<compile_context>
chip_gen: v5e
topology: v5e:2x2
jax: 0.10.0
libtpu: 0.0.40
codegen_flags: <defaults>
</compile_context>

<pallas_src>
import jax
import jax.numpy as jnp
from jax.experimental import pallas as pl
from jax.experimental.pallas import tpu as pltpu

IN_DIM = 28 * 28          # 784 (logical)
IN_PAD = 896              # 7 * 128, lane-aligned K for fc1
HID = 512
OUT_DIM = 10              # logical logits
OUT_PAD = 128             # lane-dense output slab
TILE_B = 256              # batch tile: fills MXU M (128 also fine on v5e)


def mlp_kernel(x_ref, w1_ref, b1_ref, w2_ref, b2_ref, w3_ref, b3_ref, o_ref):
    """Fused forward for one batch tile: fc1+relu, fc2+relu, fc3 (padded to 128 lanes)."""
    x = x_ref[...]                                                     # (TILE_B, IN_PAD) bf16
    # fc1: bf16 MXU, f32 accumulate; bias add + ReLU in f32 (VPU).
    h1 = jnp.dot(x, w1_ref[...], preferred_element_type=jnp.float32)
    h1 = jnp.maximum(h1 + b1_ref[...], 0.0)
    h1 = h1.astype(jnp.bfloat16)
    # fc2
    h2 = jnp.dot(h1, w2_ref[...], preferred_element_type=jnp.float32)
    h2 = jnp.maximum(h2 + b2_ref[...], 0.0)
    h2 = h2.astype(jnp.bfloat16)
    # fc3 (output columns 10..127 are zero-padded weights -> zero logits there)
    o = jnp.dot(h2, w3_ref[...], preferred_element_type=jnp.float32) + b3_ref[...]
    o_ref[...] = o.astype(o_ref.dtype)                                 # (TILE_B, OUT_PAD) f32


def mnist_net_forward(x, params):
    """x: (B, 1, 28, 28) float32 (NCHW). Returns logits (B, 10) float32."""
    w1, b1, w2, b2, w3, b3 = params
    B = x.shape[0]

    # Flatten exactly like torch's x.view(-1, 784), then pad K to 896 lanes.
    x2d = x.reshape(B, IN_DIM).astype(jnp.float32)
    x2d = jnp.pad(x2d, ((0, 0), (0, IN_PAD - IN_DIM)))

    # Pad batch up to a multiple of TILE_B (zero rows; sliced off at the end).
    B_pad = ((B + TILE_B - 1) // TILE_B) * TILE_B
    if B_pad != B:
        x2d = jnp.pad(x2d, ((0, B_pad - B), (0, 0)))
    x_bf16 = x2d.astype(jnp.bfloat16)

    # Weights: bf16 MXU operands; zero-pad w1 rows (K) and w3/b3 columns (N).
    w1p = jnp.pad(w1, ((0, IN_PAD - IN_DIM), (0, 0))).astype(jnp.bfloat16)   # (896, 512)
    w2p = w2.astype(jnp.bfloat16)                                            # (512, 512)
    w3p = jnp.pad(w3, ((0, 0), (0, OUT_PAD - OUT_DIM))).astype(jnp.bfloat16) # (512, 128)
    b1p = b1.astype(jnp.float32)                                             # (1, 512)
    b2p = b2.astype(jnp.float32)                                             # (1, 512)
    b3p = jnp.pad(b3, ((0, 0), (0, OUT_PAD - OUT_DIM))).astype(jnp.float32)  # (1, 128)

    grid = (B_pad // TILE_B,)

    flops = 2 * B_pad * (IN_PAD * HID + HID * HID + HID * OUT_PAD)
    bytes_accessed = (
        B_pad * IN_PAD * 2                                   # x (bf16)
        + (IN_PAD * HID + HID * HID + HID * OUT_PAD) * 2     # weights (bf16)
        + (2 * HID + OUT_PAD) * 4                            # biases (f32)
        + B_pad * OUT_PAD * 4                                # output (f32)
    )

    out = pl.pallas_call(
        mlp_kernel,
        out_shape=jax.ShapeDtypeStruct((B_pad, OUT_PAD), jnp.float32),
        grid_spec=pltpu.PrefetchScalarGridSpec(
            num_scalar_prefetch=0,
            grid=grid,
            in_specs=[
                pl.BlockSpec((TILE_B, IN_PAD), lambda i: (i, 0)),    # x tile
                pl.BlockSpec((IN_PAD, HID), lambda i: (0, 0)),       # w1 (resident)
                pl.BlockSpec((1, HID), lambda i: (0, 0)),            # b1
                pl.BlockSpec((HID, HID), lambda i: (0, 0)),          # w2 (resident)
                pl.BlockSpec((1, HID), lambda i: (0, 0)),            # b2
                pl.BlockSpec((HID, OUT_PAD), lambda i: (0, 0)),      # w3 (resident)
                pl.BlockSpec((1, OUT_PAD), lambda i: (0, 0)),        # b3
            ],
            out_specs=pl.BlockSpec((TILE_B, OUT_PAD), lambda i: (i, 0)),
        ),
        compiler_params=pltpu.CompilerParams(
            dimension_semantics=("parallel",),   # shards batch tiles across TCs on v7x
        ),
        cost_estimate=pl.CostEstimate(
            flops=flops, transcendentals=0, bytes_accessed=bytes_accessed),
    )(x_bf16, w1p, b1p, w2p, b2p, w3p, b3p)

    # Slice back to the logical logits.
    return out[:B, :OUT_DIM]


def init_params(key):
    """torch.nn.Linear-style init; weights stored as (in_features, out_features)."""
    k1, k2, k3, k4, k5, k6 = jax.random.split(key, 6)

    def u(k, shape, fan_in):
        lim = 1.0 / jnp.sqrt(float(fan_in))
        return jax.random.uniform(k, shape, jnp.float32, -lim, lim)

    w1 = u(k1, (IN_DIM, HID), IN_DIM)
    b1 = u(k2, (1, HID), IN_DIM)
    w2 = u(k3, (HID, HID), HID)
    b2 = u(k4, (1, HID), HID)
    w3 = u(k5, (HID, OUT_DIM), HID)
    b3 = u(k6, (1, OUT_DIM), HID)
    return (w1, b1, w2, b2, w3, b3)


def reference_forward(x, params):
    """Pure-JAX f32 reference matching the PyTorch forward."""
    w1, b1, w2, b2, w3, b3 = params
    x2d = x.reshape(x.shape[0], IN_DIM)
    h1 = jnp.maximum(x2d @ w1 + b1, 0.0)
    h2 = jnp.maximum(h1 @ w2 + b2, 0.0)
    return h2 @ w3 + b3


if __name__ == "__main__":
    key = jax.random.PRNGKey(0)
    kx, kp = jax.random.split(key)

    B = 8  # small demo batch; wrapper pads to TILE_B internally
    x = jax.random.normal(kx, (B, 1, 28, 28), dtype=jnp.float32)  # NCHW like MNIST
    params = init_params(kp)

    logits = mnist_net_forward(x, params)
    logits = jax.block_until_ready(logits)

    ref = reference_forward(x, params)
    assert logits.shape == (B, OUT_DIM)
    # bf16 MXU inputs with f32 accumulation: loosened tolerance vs f32 reference.
    assert jnp.allclose(logits, ref, atol=5e-2, rtol=5e-2), (
        float(jnp.max(jnp.abs(logits - ref))))

    print("KERNEL_OK")
</pallas_src>

<mosaic_0001>
module attributes {stable_mosaic.version = 11 : i64} {
  func.func @mlp_kernel(%arg0: i32, %arg1: memref<256x896xbf16, #tpu.memory_space<vmem>>, %arg2: memref<896x512xbf16, #tpu.memory_space<vmem>>, %arg3: memref<1x512xf32, #tpu.memory_space<vmem>>, %arg4: memref<512x512xbf16, #tpu.memory_space<vmem>>, %arg5: memref<1x512xf32, #tpu.memory_space<vmem>>, %arg6: memref<512x128xbf16, #tpu.memory_space<vmem>>, %arg7: memref<1x128xf32, #tpu.memory_space<vmem>>, %arg8: memref<256x128xf32, #tpu.memory_space<vmem>>) attributes {dimension_semantics = [#tpu.dimension_semantics<parallel>], iteration_bounds = array<i64: 1>, scalar_prefetch = 0 : i64, scratch_operands = 0 : i64, tpu.core_type = #tpu.core_type<tc>, window_params = [{transform_indices = @transform_0, window_bounds = array<i64: 256, 896>}, {pipeline_mode = #tpu.pipeline_mode<synchronous>, transform_indices = @transform_1, window_bounds = array<i64: 896, 512>}, {pipeline_mode = #tpu.pipeline_mode<synchronous>, transform_indices = @transform_2, window_bounds = array<i64: 1, 512>}, {pipeline_mode = #tpu.pipeline_mode<synchronous>, transform_indices = @transform_3, window_bounds = array<i64: 512, 512>}, {pipeline_mode = #tpu.pipeline_mode<synchronous>, transform_indices = @transform_4, window_bounds = array<i64: 1, 512>}, {pipeline_mode = #tpu.pipeline_mode<synchronous>, transform_indices = @transform_5, window_bounds = array<i64: 512, 128>}, {pipeline_mode = #tpu.pipeline_mode<synchronous>, transform_indices = @transform_6, window_bounds = array<i64: 1, 128>}, {transform_indices = @transform_7, window_bounds = array<i64: 256, 128>}]} {
    %c0 = arith.constant 0 : index
    %c0_0 = arith.constant 0 : index
    %0 = vector.load %arg1[%c0, %c0_0] : memref<256x896xbf16, #tpu.memory_space<vmem>>, vector<256x896xbf16>
    %c0_1 = arith.constant 0 : index
    %c0_2 = arith.constant 0 : index
    %1 = vector.load %arg2[%c0_1, %c0_2] : memref<896x512xbf16, #tpu.memory_space<vmem>>, vector<896x512xbf16>
    %cst = arith.constant dense<0.000000e+00> : vector<256x512xf32>
    %2 = tpu.matmul %0, %1, %cst {dimension_numbers = #tpu.dot_dimension_numbers<[1], [0], [0], [1], [0, 0, 1, 1], [], []>} : vector<256x896xbf16>, vector<896x512xbf16>, vector<256x512xf32> -> vector<256x512xf32>
    %c0_3 = arith.constant 0 : index
    %c0_4 = arith.constant 0 : index
    %3 = vector.load %arg3[%c0_3, %c0_4] : memref<1x512xf32, #tpu.memory_space<vmem>>, vector<1x512xf32>
    %4 = vector.broadcast %3 : vector<1x512xf32> to vector<256x512xf32>
    %5 = arith.addf %2, %4 : vector<256x512xf32>
    %cst_5 = arith.constant 0.000000e+00 : f32
    %6 = vector.broadcast %cst_5 : f32 to vector<256x512xf32>
    %7 = arith.maximumf %5, %6 : vector<256x512xf32>
    %8 = arith.truncf %7 : vector<256x512xf32> to vector<256x512xbf16>
    %c0_6 = arith.constant 0 : index
    %c0_7 = arith.constant 0 : index
    %9 = vector.load %arg4[%c0_6, %c0_7] : memref<512x512xbf16, #tpu.memory_space<vmem>>, vector<512x512xbf16>
    %cst_8 = arith.constant dense<0.000000e+00> : vector<256x512xf32>
    %10 = tpu.matmul %8, %9, %cst_8 {dimension_numbers = #tpu.dot_dimension_numbers<[1], [0], [0], [1], [0, 0, 1, 1], [], []>} : vector<256x512xbf16>, vector<512x512xbf16>, vector<256x512xf32> -> vector<256x512xf32>
    %c0_9 = arith.constant 0 : index
    %c0_10 = arith.constant 0 : index
    %11 = vector.load %arg5[%c0_9, %c0_10] : memref<1x512xf32, #tpu.memory_space<vmem>>, vector<1x512xf32>
    %12 = vector.broadcast %11 : vector<1x512xf32> to vector<256x512xf32>
    %13 = arith.addf %10, %12 : vector<256x512xf32>
    %cst_11 = arith.constant 0.000000e+00 : f32
    %14 = vector.broadcast %cst_11 : f32 to vector<256x512xf32>
    %15 = arith.maximumf %13, %14 : vector<256x512xf32>
    %16 = arith.truncf %15 : vector<256x512xf32> to vector<256x512xbf16>
    %c0_12 = arith.constant 0 : index
    %c0_13 = arith.constant 0 : index
    %17 = vector.load %arg6[%c0_12, %c0_13] : memref<512x128xbf16, #tpu.memory_space<vmem>>, vector<512x128xbf16>
    %cst_14 = arith.constant dense<0.000000e+00> : vector<256x128xf32>
    %18 = tpu.matmul %16, %17, %cst_14 {dimension_numbers = #tpu.dot_dimension_numbers<[1], [0], [0], [1], [0, 0, 1, 1], [], []>} : vector<256x512xbf16>, vector<512x128xbf16>, vector<256x128xf32> -> vector<256x128xf32>
    %c0_15 = arith.constant 0 : index
    %c0_16 = arith.constant 0 : index
    %19 = vector.load %arg7[%c0_15, %c0_16] : memref<1x128xf32, #tpu.memory_space<vmem>>, vector<1x128xf32>
    %20 = vector.broadcast %19 : vector<1x128xf32> to vector<256x128xf32>
    %21 = arith.addf %18, %20 : vector<256x128xf32>
    %c0_17 = arith.constant 0 : index
    %c0_18 = arith.constant 0 : index
    %22 = vector.load %arg8[%c0_17, %c0_18] : memref<256x128xf32, #tpu.memory_space<vmem>>, vector<256x128xf32>
    tpu.vector_store %arg8[%c0_17, %c0_18], %21 {strides = array<i32>} : memref<256x128xf32, #tpu.memory_space<vmem>>, vector<256x128xf32>,
    return
  }
  func.func @transform_0(%arg0: i32) -> (i32, i32) {
    %c0_i32 = arith.constant 0 : i32
    %c0_i32_0 = arith.constant 0 : i32
    return %arg0, %c0_i32 : i32, i32
  }
  func.func @transform_1(%arg0: i32) -> (i32, i32) {
    %c0_i32 = arith.constant 0 : i32
    %c0_i32_0 = arith.constant 0 : i32
    %c0_i32_1 = arith.constant 0 : i32
    return %c0_i32, %c0_i32_0 : i32, i32
  }
  func.func @transform_2(%arg0: i32) -> (i32, i32) {
    %c0_i32 = arith.constant 0 : i32
    %c0_i32_0 = arith.constant 0 : i32
    %c0_i32_1 = arith.constant 0 : i32
    return %c0_i32, %c0_i32_0 : i32, i32
  }
  func.func @transform_3(%arg0: i32) -> (i32, i32) {
    %c0_i32 = arith.constant 0 : i32
    %c0_i32_0 = arith.constant 0 : i32
    %c0_i32_1 = arith.constant 0 : i32
    return %c0_i32, %c0_i32_0 : i32, i32
  }
  func.func @transform_4(%arg0: i32) -> (i32, i32) {
    %c0_i32 = arith.constant 0 : i32
    %c0_i32_0 = arith.constant 0 : i32
    %c0_i32_1 = arith.constant 0 : i32
    return %c0_i32, %c0_i32_0 : i32, i32
  }
  func.func @transform_5(%arg0: i32) -> (i32, i32) {
    %c0_i32 = arith.constant 0 : i32
    %c0_i32_0 = arith.constant 0 : i32
    %c0_i32_1 = arith.constant 0 : i32
    return %c0_i32, %c0_i32_0 : i32, i32
  }
  func.func @transform_6(%arg0: i32) -> (i32, i32) {
    %c0_i32 = arith.constant 0 : i32
    %c0_i32_0 = arith.constant 0 : i32
    %c0_i32_1 = arith.constant 0 : i32
    return %c0_i32, %c0_i32_0 : i32, i32
  }
  func.func @transform_7(%arg0: i32) -> (i32, i32) {
    %c0_i32 = arith.constant 0 : i32
    %c0_i32_0 = arith.constant 0 : i32
    return %arg0, %c0_i32 : i32, i32
  }
}

</mosaic_0001>

<bundles_post_ra>
// kernel: tpu_custom_call.1
= control target key start
LH: loop header
LB: loop body
LE: loop exit
PB: predicated region body
PF: predicated region fallthrough
CT: control target
= control target key end

     0   :  { %12 = vsyncpa [#allocation3], 0  ;;  %s12821_s0 = inlined_call_operand.hbm [shape: bf16[256,896], index: 0, kind: input, shape index: {}]   ;;  %s12822_s1 = inlined_call_operand.hbm [shape: bf16[896,512], index: 1, kind: input, shape index: {}]   ;;  %s12823_s2 = inlined_call_operand.hbm [shape: f32[1,512], index: 2, kind: input, shape index: {}]   ;;  %s12824_s3 = inlined_call_operand.hbm [shape: bf16[512,512], index: 3, kind: input, shape index: {}]   ;;  %s12825_s4 = inlined_call_operand.hbm [shape: f32[1,512], index: 4, kind: input, shape index: {}]   ;;  %s12826_s5 = inlined_call_operand.hbm [shape: bf16[512,128], index: 5, kind: input, shape index: {}]   ;;  %s12827_s6 = inlined_call_operand.vmem [shape: f32[1,128], index: 6, kind: input, shape index: {}]   ;;  %s12828_s7 = inlined_call_operand.hbm [shape: f32[256,128], index: 7, kind: output, shape index: {}]  }
   0x1   :  { %13 = vsyncpa [#allocation6], 0 }
   0x2   :  { %14 = vsyncpa [#allocation9], 0 }
   0x3   :  { %15 = vsyncpa [#allocation12], 0  ;;  %s34_s26 = sshll.u32 %s12822_s1, 4  ;;  %s35_s26 = int_to_ptr.hbm [resolvable:$true] %s34_s26 }
   0x4   :  { %16 = vsyncpa [#allocation4], 0  ;;  %s10600_s27 = smov [#allocation5]   ;;  %s58_s8 = sshll.u32 %s12824_s3, 4  ;;  %s59_s8 = int_to_ptr.hbm [resolvable:$true] %s58_s8 }
   0x5   :  { %s36_s28 = sshll.u32 %s10600_s27, 4  ;;  %s10601_s9 = smov 256   ;;  %s37_s28 = int_to_ptr.vmem [resolvable:$true] %s36_s28 }
   0x6   :  { %s10602_s10 = smov 16   ;;  %s10603_s11 = smov [#allocation8]  }
   0x7   :  { %42 = dma.hbm_to_vmem [thread:$0]  %s35_s26, 28672, %s37_s28, [#allocation6], %s10601_s9, %s10601_s9, %s10602_s10  }
   0x8   :  { %s60_s12 = sshll.u32 %s10603_s11, 4  ;;  %s21_s15 = sshll.u32 %s12821_s0, 4  ;;  %s61_s12 = int_to_ptr.vmem [resolvable:$true] %s60_s12  ;;  %s22_s15 = int_to_ptr.hbm [resolvable:$true] %s21_s15 }
   0x9   :  { %66 = dma.hbm_to_vmem [thread:$0]  %s59_s8, 16384, %s61_s12, [#allocation9], %s10601_s9, %s10601_s9, %s10602_s10  }
   0xa   :  { %s10604_s1 = smov [#allocation2]   ;;  %s48_s3 = sshll.u32 %s12823_s2, 4  ;;  %s49_s3 = int_to_ptr.hbm [resolvable:$true] %s48_s3 }
   0xb   :  { %s23_s16 = sshll.u32 %s10604_s1, 4  ;;  %s10605_s19 = smov 448   ;;  %s24_s16 = int_to_ptr.vmem [resolvable:$true] %s23_s16 }
   0xc   :  { %s10606_s20 = smov 28   ;;  %s10607_s21 = smov [#allocation7]  }
   0xd   :  { %29 = dma.hbm_to_vmem [thread:$0]  %s22_s15, 14336, %s24_s16, [#allocation3], %s10605_s19, %s10605_s19, %s10606_s20  }
   0xe   :  { %s50_s22 = sshll.u32 %s10607_s21, 4  ;;  %s72_s0 = sshll.u32 %s12825_s4, 4  ;;  %s51_s22 = int_to_ptr.vmem [resolvable:$true] %s50_s22  ;;  %s73_s0 = int_to_ptr.hbm [resolvable:$true] %s72_s0 }
   0xf   :  { %53 = dma.hbm_to_vmem [thread:$0]  %s49_s3, 64, %s51_s22, [#allocation6]  }
  0x10   :  { %s82_s27 = sshll.u32 %s12826_s5, 4  ;;  %s10608_s28 = smov [#allocation10]   ;;  %s83_s27 = int_to_ptr.hbm [resolvable:$true] %s82_s27 }
  0x11   :  { %s74_s29 = sshll.u32 %s10608_s28, 4  ;;  %s10609_s2 = smov [#allocation11]   ;;  %s75_s29 = int_to_ptr.vmem [resolvable:$true] %s74_s29 }
  0x12   :  { %77 = dma.hbm_to_vmem [thread:$0]  %s73_s0, 64, %s75_s29, [#allocation9]  }
  0x13   :  { %s84_s30 = sshll.u32 %s10609_s2, 4  ;;  %s10610_s8 = smov 64   ;;  %s85_s30 = int_to_ptr.vmem [resolvable:$true] %s84_s30 }
  0x14   :  { %s10611_s9 = smov 4  }
  0x15   :  { %90 = dma.hbm_to_vmem [thread:$0]  %s83_s27, 4096, %s85_s30, [#allocation12], %s10610_s8, %s10610_s8, %s10611_s9  }
  0x16   :  { %10590 = dma.done.wait [#allocation3], 14336  }
  0x17   :  { %10591 = vsyncadd [#allocation3], 4294952960 }
  0x18   :  { %10592 = dma.done.wait [#allocation6], 28736  }
  0x19   :  { %10593 = vsyncadd [#allocation6], 4294938560 }
  0x1a   :  { %10594 = dma.done.wait [#allocation9], 16448  }
  0x1b   :  { %10595 = vsyncadd [#allocation9], 4294950848 }
  0x1c   :  { %10596 = dma.done.wait [#allocation12], 4096  }
  0x1d   :  { %10597 = vsyncadd [#allocation12], 4294963200  ;;  %v8485_v0 = vld [vmem:[#allocation5 + $0xe0] sm:$0xf]  ;;  %v10049_v1 = vld [vmem:[#allocation5 + $0xec] sm:$0xf0] }
  0x1e   :  { %v8613_v2 = vld [vmem:[#allocation5 + $0x1e0] sm:$0xf]  ;;  %v8486_v3 = vor.u32 %v10049_v1, %v8485_v0  ;;  %v10081_v4 = vld [vmem:[#allocation5 + $0x1ec] sm:$0xf0]  ;;  %s7907_s13 = sshll.u32 %s12828_s7, 4  ;;  %s10613_s14 = smov 128   ;;  %s7908_s13 = int_to_ptr.hbm [resolvable:$true] %s7907_s13 }
  0x1f   :  { %v8741_v5 = vld [vmem:[#allocation5 + $0x2e0] sm:$0xf]  ;;  %v10113_v6 = vld [vmem:[#allocation5 + $0x2ec] sm:$0xf0]  ;;  %v8614_v7 = vor.u32 %v10081_v4, %v8613_v2  ;;  %s10614_s15 = smov 8  }
  0x20   :  { %v8742_v8 = vor.u32 %v10113_v6, %v8741_v5  ;;  %v8869_v9 = vld [vmem:[#allocation5 + $0x3e0] sm:$0xf]  ;;  %v10145_v10 = vld [vmem:[#allocation5 + $0x3ec] sm:$0xf0]  ;;  %2175 = vmatpush.bf16.msra.mxu0 %v8486_v3 }
  0x21   :  { %v8469_v11 = vld [vmem:[#allocation5 + $0xc0] sm:$0xf]  ;;  %v8870_v12 = vor.u32 %v10145_v10, %v8869_v9  ;;  %v10045_v13 = vld [vmem:[#allocation5 + $0xcc] sm:$0xf0]  ;;  %2264 = vmatpush.bf16.msra.mxu1 %v8614_v7 }
  0x22   :  { %v8597_v14 = vld [vmem:[#allocation5 + $0x1c0] sm:$0xf]  ;;  %v10077_v15 = vld [vmem:[#allocation5 + $0x1cc] sm:$0xf0]  ;;  %2353 = vmatpush.bf16.msra.mxu2 %v8742_v8  ;;  %v8470_v16 = vor.u32 %v10045_v13, %v8469_v11 }
  0x23   :  { %v8598_v17 = vor.u32 %v10077_v15, %v8597_v14  ;;  %v8725_v18 = vld [vmem:[#allocation5 + $0x2c0] sm:$0xf]  ;;  %v10109_v19 = vld [vmem:[#allocation5 + $0x2cc] sm:$0xf0]  ;;  %2442 = vmatpush.bf16.msra.mxu3 %v8870_v12 }
  0x24   :  { %v8853_v20 = vld [vmem:[#allocation5 + $0x3c0] sm:$0xf]  ;;  %v8726_v21 = vor.u32 %v10109_v19, %v8725_v18  ;;  %v10141_v22 = vld [vmem:[#allocation5 + $0x3cc] sm:$0xf0]  ;;  %2176 = vmatpush.bf16.msra.mxu0 %v8470_v16 }
  0x25   :  { %v8453_v23 = vld [vmem:[#allocation5 + $0xa0] sm:$0xf]  ;;  %v10041_v24 = vld [vmem:[#allocation5 + $0xac] sm:$0xf0]  ;;  %v8854_v25 = vor.u32 %v10141_v22, %v8853_v20  ;;  %2265 = vmatpush.bf16.msra.mxu1 %v8598_v17 }
  0x26   :  { %v8581_v26 = vld [vmem:[#allocation5 + $0x1a0] sm:$0xf]  ;;  %v10073_v27 = vld [vmem:[#allocation5 + $0x1ac] sm:$0xf0]  ;;  %v8454_v29 = vor.u32 %v10041_v24, %v8453_v23  ;;  %2354 = vmatpush.bf16.msra.mxu2 %v8726_v21 }
  0x27   :  { %v8709_v28 = vld [vmem:[#allocation5 + $0x2a0] sm:$0xf]  ;;  %v10105_v30 = vld [vmem:[#allocation5 + $0x2ac] sm:$0xf0]  ;;  %v8582_v33 = vor.u32 %v10073_v27, %v8581_v26  ;;  %2443 = vmatpush.bf16.msra.mxu3 %v8854_v25 }
  0x28   :  { %v8837_v31 = vld [vmem:[#allocation5 + $0x3a0] sm:$0xf]  ;;  %v10137_v32 = vld [vmem:[#allocation5 + $0x3ac] sm:$0xf0]  ;;  %v8710_v34 = vor.u32 %v10105_v30, %v8709_v28  ;;  %2177 = vmatpush.bf16.msra.mxu0 %v8454_v29  ;;  %v9910_v29 = vld [vmem:[#allocation2 + $0x18] sm:$0xf0] }
  0x29   :  { %v8437_v35 = vld [vmem:[#allocation5 + $0x80] sm:$0xf]  ;;  %v10037_v36 = vld [vmem:[#allocation5 + $0x8c] sm:$0xf0]  ;;  %v8838_v38 = vor.u32 %v10137_v32, %v8837_v31  ;;  %2266 = vmatpush.bf16.msra.mxu1 %v8582_v33  ;;  %v9907_v30 = vld [vmem:[#allocation2 + $0x4] sm:$0xf] }
  0x2a   :  { %v8565_v37 = vld [vmem:[#allocation5 + $0x180] sm:$0xf]  ;;  %v10069_v39 = vld [vmem:[#allocation5 + $0x18c] sm:$0xf0]  ;;  %v8438_v44 = vor.u32 %v10037_v36, %v8437_v35  ;;  %2355 = vmatpush.bf16.msra.mxu2 %v8710_v34  ;;  %v10047_v35 = vld [vmem:[#allocation5 + $0xe4] sm:$0xf] }
  0x2b   :  { %v8693_v40 = vld [vmem:[#allocation5 + $0x280] sm:$0xf]  ;;  %v10101_v41 = vld [vmem:[#allocation5 + $0x28c] sm:$0xf0]  ;;  %v8566_v45 = vor.u32 %v10069_v39, %v8565_v37  ;;  %2444 = vmatpush.bf16.msra.mxu3 %v8838_v38  ;;  %v8487_v36 = vld [vmem:[#allocation5 + $0xf0] sm:$0xf0] }
  0x2c   :  { %v8821_v42 = vld [vmem:[#allocation5 + $0x380] sm:$0xf]  ;;  %v10133_v43 = vld [vmem:[#allocation5 + $0x38c] sm:$0xf0]  ;;  %v8694_v46 = vor.u32 %v10101_v41, %v8693_v40  ;;  %2178 = vmatpush.bf16.msra.mxu0 %v8438_v44  ;;  %v7933_v39 = vld [vmem:[#allocation2 + $0x8] sm:$0xf] }
  0x2d   :  { %v8421_v47 = vld [vmem:[#allocation5 + $0x60] sm:$0xf]  ;;  %v10033_v48 = vld [vmem:[#allocation5 + $0x6c] sm:$0xf0]  ;;  %v8822_v50 = vor.u32 %v10133_v43, %v8821_v42  ;;  %2267 = vmatpush.bf16.msra.mxu1 %v8566_v45  ;;  %v9911_v40 = vld [vmem:[#allocation2 + $0x20] sm:$0xf0] }
  0x2e   :  { %v8549_v49 = vld [vmem:[#allocation5 + $0x160] sm:$0xf]  ;;  %v10065_v51 = vld [vmem:[#allocation5 + $0x16c] sm:$0xf0]  ;;  %v8422_v56 = vor.u32 %v10033_v48, %v8421_v47  ;;  %2356 = vmatpush.bf16.msra.mxu2 %v8694_v46  ;;  %v9908_v41 = vld [vmem:[#allocation2 + $0xc] sm:$0xf]  ;;  %v8490_v48 = vor.u32 %v10047_v35, %v8487_v36 }
  0x2f   :  { %v8677_v52 = vld [vmem:[#allocation5 + $0x260] sm:$0xf]  ;;  %v10097_v53 = vld [vmem:[#allocation5 + $0x26c] sm:$0xf0]  ;;  %v8550_v57 = vor.u32 %v10065_v51, %v8549_v49  ;;  %2445 = vmatpush.bf16.msra.mxu3 %v8822_v50  ;;  %v7935_v43 = vld [vmem:[#allocation2 + $0x24] sm:$0xf0] }
  0x30   :  { %v8805_v54 = vld [vmem:[#allocation5 + $0x360] sm:$0xf]  ;;  %v10129_v55 = vld [vmem:[#allocation5 + $0x36c] sm:$0xf0]  ;;  %v8678_v58 = vor.u32 %v10097_v53, %v8677_v52  ;;  %2179 = vmatpush.bf16.msra.mxu0 %v8422_v56  ;;  %v10677_v52 = vor.u32 %v9911_v40, %v7933_v39  ;;  %v10679_v53 = vor.u32 %v9908_v41, %v7935_v43  ;;  %v8009_v40 = vld [vmem:[#allocation2 + $0xa8] sm:$0xf] }
  0x31   :  { %v8405_v59 = vld [vmem:[#allocation5 + $0x40] sm:$0xf]  ;;  %v10029_v60 = vld [vmem:[#allocation5 + $0x4c] sm:$0xf0]  ;;  %v8806_v62 = vor.u32 %v10129_v55, %v8805_v54  ;;  %2268 = vmatpush.bf16.msra.mxu1 %v8550_v57  ;;  %v9931_v41 = vld [vmem:[#allocation2 + $0xc0] sm:$0xf0] }
  0x32   :  { %v8533_v61 = vld [vmem:[#allocation5 + $0x140] sm:$0xf]  ;;  %v10061_v63 = vld [vmem:[#allocation5 + $0x14c] sm:$0xf0]  ;;  %v8406_v4 = vor.u32 %v10029_v60, %v8405_v59  ;;  %2357 = vmatpush.bf16.msra.mxu2 %v8678_v58  ;;  %13148 = vst [vmem:[#allocation21_spill] sm:$0xff] %v10677_v52 }
  0x33   :  { %v8661_v0 = vld [vmem:[#allocation5 + $0x240] sm:$0xf]  ;;  %v10093_v1 = vld [vmem:[#allocation5 + $0x24c] sm:$0xf0]  ;;  %v8534_v5 = vor.u32 %v10061_v63, %v8533_v61  ;;  %2446 = vmatpush.bf16.msra.mxu3 %v8806_v62  ;;  %13149 = vst [vmem:[#allocation22_spill] sm:$0xff] %v10679_v53 }
  0x34   :  { %v8789_v2 = vld [vmem:[#allocation5 + $0x340] sm:$0xf]  ;;  %v10125_v3 = vld [vmem:[#allocation5 + $0x34c] sm:$0xf0]  ;;  %v8662_v6 = vor.u32 %v10093_v1, %v8661_v0  ;;  %2180 = vmatpush.bf16.msra.mxu0 %v8406_v4  ;;  %v10043_v61 = vld [vmem:[#allocation5 + $0xc4] sm:$0xf] }
  0x35   :  { %v8389_v7 = vld [vmem:[#allocation5 + $0x20] sm:$0xf]  ;;  %v10025_v8 = vld [vmem:[#allocation5 + $0x2c] sm:$0xf0]  ;;  %v8790_v10 = vor.u32 %v10125_v3, %v8789_v2  ;;  %2269 = vmatpush.bf16.msra.mxu1 %v8534_v5  ;;  %v8471_v62 = vld [vmem:[#allocation5 + $0xd0] sm:$0xf0] }
  0x36   :  { %v8517_v9 = vld [vmem:[#allocation5 + $0x120] sm:$0xf]  ;;  %v10057_v11 = vld [vmem:[#allocation5 + $0x12c] sm:$0xf0]  ;;  %v8390_v17 = vor.u32 %v10025_v8, %v8389_v7  ;;  %2358 = vmatpush.bf16.msra.mxu2 %v8662_v6  ;;  %v8474_v0 = vor.u32 %v10043_v61, %v8471_v62  ;;  %v7953_v4 = vld [vmem:[#allocation2 + $0x38] sm:$0xf] }
  0x37   :  { %v8645_v12 = vld [vmem:[#allocation5 + $0x220] sm:$0xf]  ;;  %v10089_v13 = vld [vmem:[#allocation5 + $0x22c] sm:$0xf0]  ;;  %v8518_v21 = vor.u32 %v10057_v11, %v8517_v9  ;;  %2447 = vmatpush.bf16.msra.mxu3 %v8790_v10  ;;  %v9917_v5 = vld [vmem:[#allocation2 + $0x50] sm:$0xf0] }
  0x38   :  { %v8773_v14 = vld [vmem:[#allocation5 + $0x320] sm:$0xf]  ;;  %v10121_v15 = vld [vmem:[#allocation5 + $0x32c] sm:$0xf0]  ;;  %v8646_v22 = vor.u32 %v10089_v13, %v8645_v12  ;;  %2181 = vmatpush.bf16.msra.mxu0 %v8390_v17  ;;  %v9914_v6 = vld [vmem:[#allocation2 + $0x3c] sm:$0xf]  ;;  %v10685_v12 = vor.u32 %v9917_v5, %v7953_v4 }
  0x39   :  { %v8373_v16 = vld [vmem:[#allocation5] sm:$0xf]  ;;  %v10021_v18 = vld [vmem:[#allocation5 + $0xc] sm:$0xf0]  ;;  %v8774_v26 = vor.u32 %v10121_v15, %v8773_v14  ;;  %2270 = vmatpush.bf16.msra.mxu1 %v8518_v21  ;;  %v7955_v7 = vld [vmem:[#allocation2 + $0x54] sm:$0xf0] }
  0x3a   :  { %v8501_v19 = vld [vmem:[#allocation5 + $0x100] sm:$0xf]  ;;  %v10053_v20 = vld [vmem:[#allocation5 + $0x10c] sm:$0xf0]  ;;  %v8374_v33 = vor.u32 %v10021_v18, %v8373_v16  ;;  %2359 = vmatpush.bf16.msra.mxu2 %v8646_v22  ;;  %v9918_v9 = vld [vmem:[#allocation2 + $0x58] sm:$0xf0]  ;;  %v10687_v13 = vor.u32 %v9914_v6, %v7955_v7 }
  0x3b   :  { %v8629_v23 = vld [vmem:[#allocation5 + $0x200] sm:$0xf]  ;;  %v10085_v24 = vld [vmem:[#allocation5 + $0x20c] sm:$0xf0]  ;;  %v8502_v37 = vor.u32 %v10053_v20, %v8501_v19  ;;  %2448 = vmatpush.bf16.msra.mxu3 %v8774_v26  ;;  %v9915_v10 = vld [vmem:[#allocation2 + $0x44] sm:$0xf] }
  0x3c   :  { %v8757_v25 = vld [vmem:[#allocation5 + $0x300] sm:$0xf]  ;;  %v10117_v27 = vld [vmem:[#allocation5 + $0x30c] sm:$0xf0]  ;;  %v8630_v38 = vor.u32 %v10085_v24, %v8629_v23  ;;  %2182 = vmatpush.bf16.msra.mxu0 %v8374_v33  ;;  %13150 = vst [vmem:[#allocation23_spill] sm:$0xff] %v10685_v12 }
  0x3d   :  { %v7925_v28 = vld [vmem:[#allocation2] sm:$0xf]  ;;  %v10241_v32 = vld [vmem:[#allocation5 + $0x6ec] sm:$0xf0]  ;;  %v8758_v42 = vor.u32 %v10117_v27, %v8757_v25  ;;  %2271 = vmatpush.bf16.msra.mxu1 %v8502_v37  ;;  %13151 = vst [vmem:[#allocation24_spill] sm:$0xff] %v10687_v13 }
  0x3e   :  { %v9253_v31 = vld [vmem:[#allocation5 + $0x6e0] sm:$0xf]  ;;  %v10177_v46 = vld [vmem:[#allocation5 + $0x4ec] sm:$0xf0]  ;;  %v10673_v47 = vor.u32 %v9910_v29, %v7925_v28  ;;  %2360 = vmatpush.bf16.msra.mxu2 %v8630_v38  ;;  %v9924_v17 = vld [vmem:[#allocation2 + $0x88] sm:$0xf0] }
  0x3f   :  { %v7927_v34 = vld [vmem:[#allocation2 + $0x1c] sm:$0xf0]  ;;  %v9254_v44 = vor.u32 %v10241_v32, %v9253_v31  ;;  %v10209_v50 = vld [vmem:[#allocation5 + $0x5ec] sm:$0xf0]  ;;  %2449 = vmatpush.bf16.msra.mxu3 %v8758_v42  ;;  %v9921_v18 = vld [vmem:[#allocation2 + $0x74] sm:$0xf] }
  0x40   :  { %v8997_v45 = vld [vmem:[#allocation5 + $0x4e0] sm:$0xf]  ;;  %13146 = vst [vmem:[#allocation19_spill] sm:$0xff] %v10673_v47  ;;  %v10675_v51 = vor.u32 %v9907_v30, %v7927_v34  ;;  %2183 = vmatmul.bf16.vlgmr.msra.gmra.mxu0 %v10673_v47  ;;  %v10237_v57 = vld [vmem:[#allocation5 + $0x6cc] sm:$0xf0] }
  0x41   :  { %v9125_v49 = vld [vmem:[#allocation5 + $0x5e0] sm:$0xf]  ;;  %v8998_v54 = vor.u32 %v10177_v46, %v8997_v45  ;;  %2361 = vmatmul.bf16.vlgmr.msra.gmra.mxu2 %v10677_v52  ;;  %v10173_v60 = vld [vmem:[#allocation5 + $0x4cc] sm:$0xf0]  ;;  %v7989_v20 = vld [vmem:[#allocation2 + $0x78] sm:$0xf] }
  0x42   :  { %13147 = vst [vmem:[#allocation20_spill] sm:$0xff] %v10675_v51  ;;  %2709 = vmatpush.bf16.msrb.mxu2 %v9254_v44  ;;  %v9126_v55 = vor.u32 %v10209_v50, %v9125_v49  ;;  %2272 = vmatmul.bf16.vlgmr.msra.gmra.mxu1 %v10675_v51  ;;  %v9237_v56 = vld [vmem:[#allocation5 + $0x6c0] sm:$0xf]  ;;  %v10205_v2 = vld [vmem:[#allocation5 + $0x5cc] sm:$0xf0]  ;;  %v10709_v49 = vor.u32 %v9931_v41, %v8009_v40 }
  0x43   :  { %2798 = vmatpush.bf16.msrb.mxu3 %v8490_v48  ;;  %2531 = vmatpush.bf16.msrb.mxu0 %v8998_v54  ;;  %v8981_v58 = vld [vmem:[#allocation5 + $0x4c0] sm:$0xf]  ;;  %v9238_v59 = vor.u32 %v10237_v57, %v9237_v56  ;;  %v7981_v16 = vld [vmem:[#allocation2 + $0x70] sm:$0xf]  ;;  %v9925_v21 = vld [vmem:[#allocation2 + $0x90] sm:$0xf0] }
  0x44   :  { %2450 = vmatmul.bf16.vlgmr.msra.gmra.mxu3 %v10679_v53  ;;  %2620 = vmatpush.bf16.msrb.mxu1 %v9126_v55  ;;  %v8982_v63 = vor.u32 %v10173_v60, %v8981_v58  ;;  %v9109_v1 = vld [vmem:[#allocation5 + $0x5c0] sm:$0xf]  ;;  %v7983_v19 = vld [vmem:[#allocation2 + $0x8c] sm:$0xf0]  ;;  %v9922_v22 = vld [vmem:[#allocation2 + $0x7c] sm:$0xf]  ;;  %v10697_v24 = vor.u32 %v9924_v17, %v7981_v16  ;;  %v10701_v26 = vor.u32 %v9925_v21, %v7989_v20 }
  0x45   :  { %v9110_v3 = vor.u32 %v10205_v2, %v9109_v1  ;;  %v7961_v8 = vld [vmem:[#allocation2 + $0x40] sm:$0xf]  ;;  %v7991_v23 = vld [vmem:[#allocation2 + $0x94] sm:$0xf0]  ;;  %v10699_v25 = vor.u32 %v9921_v18, %v7983_v19  ;;  %v10233_v29 = vld [vmem:[#allocation5 + $0x6ac] sm:$0xf0] }
  0x46   :  { %2710 = vmatpush.bf16.msrb.mxu2 %v9238_v59  ;;  %v7963_v11 = vld [vmem:[#allocation2 + $0x5c] sm:$0xf0]  ;;  %v10689_v14 = vor.u32 %v9918_v9, %v7961_v8  ;;  %13154 = vst [vmem:[#allocation27_spill] sm:$0xff] %v10697_v24  ;;  %v10703_v27 = vor.u32 %v9922_v22, %v7991_v23  ;;  %v10169_v32 = vld [vmem:[#allocation5 + $0x4ac] sm:$0xf0] }
  0x47   :  { %2532 = vmatpush.bf16.msrb.mxu0 %v8982_v63  ;;  %2799 = vmatpush.bf16.msrb.mxu3 %v8474_v0  ;;  %v10691_v15 = vor.u32 %v9915_v10, %v7963_v11  ;;  %13155 = vst [vmem:[#allocation28_spill] sm:$0xff] %v10699_v25  ;;  %v9221_v28 = vld [vmem:[#allocation5 + $0x6a0] sm:$0xf]  ;;  %v10039_v33 = vld [vmem:[#allocation5 + $0xa4] sm:$0xf] }
  0x48   :  { %2621 = vmatpush.bf16.msrb.mxu1 %v9110_v3  ;;  %13152 = vst [vmem:[#allocation25_spill] sm:$0xff] %v10689_v14  ;;  %v8965_v30 = vld [vmem:[#allocation5 + $0x4a0] sm:$0xf]  ;;  %v9222_v31 = vor.u32 %v10233_v29, %v9221_v28  ;;  %v8455_v34 = vld [vmem:[#allocation5 + $0xb0] sm:$0xf0] }
  0x49   :  { %13153 = vst [vmem:[#allocation26_spill] sm:$0xff] %v10691_v15  ;;  %v8966_v35 = vor.u32 %v10169_v32, %v8965_v30  ;;  %v8458_v36 = vor.u32 %v10039_v33, %v8455_v34  ;;  %v9093_v37 = vld [vmem:[#allocation5 + $0x5a0] sm:$0xf]  ;;  %v10201_v38 = vld [vmem:[#allocation5 + $0x5ac] sm:$0xf0] }
  0x4a   :  { %13156 = vst [vmem:[#allocation29_spill] sm:$0xff] %v10701_v26  ;;  %2711 = vmatpush.bf16.msrb.mxu2 %v9222_v31  ;;  %v9094_v39 = vor.u32 %v10201_v38, %v9093_v37  ;;  %v9928_v42 = vld [vmem:[#allocation2 + $0xac] sm:$0xf]  ;;  %v8011_v43 = vld [vmem:[#allocation2 + $0xc4] sm:$0xf0] }
  0x4b   :  { %13157 = vst [vmem:[#allocation30_spill] sm:$0xff] %v10703_v27  ;;  %2533 = vmatpush.bf16.msrb.mxu0 %v8966_v35  ;;  %2800 = vmatpush.bf16.msrb.mxu3 %v8458_v36  ;;  %v8017_v44 = vld [vmem:[#allocation2 + $0xb0] sm:$0xf]  ;;  %v9932_v45 = vld [vmem:[#allocation2 + $0xc8] sm:$0xf0]  ;;  %v10711_v50 = vor.u32 %v9928_v42, %v8011_v43 }
  0x4c   :  { %2622 = vmatpush.bf16.msrb.mxu1 %v9094_v39  ;;  %v9929_v46 = vld [vmem:[#allocation2 + $0xb4] sm:$0xf]  ;;  %v8019_v48 = vld [vmem:[#allocation2 + $0xcc] sm:$0xf0]  ;;  %13158 = vst [vmem:[#allocation31_spill] sm:$0xff] %v10709_v49  ;;  %v10713_v54 = vor.u32 %v9932_v45, %v8017_v44 }
  0x4d   :  { %13159 = vst [vmem:[#allocation32_spill] sm:$0xff] %v10711_v50  ;;  %v10715_v55 = vor.u32 %v9929_v46, %v8019_v48  ;;  %v8037_v56 = vld [vmem:[#allocation2 + $0xe0] sm:$0xf]  ;;  %v9938_v57 = vld [vmem:[#allocation2 + $0xf8] sm:$0xf0] }
  0x4e   :  { %13160 = vst [vmem:[#allocation33_spill] sm:$0xff] %v10713_v54  ;;  %v9935_v58 = vld [vmem:[#allocation2 + $0xe4] sm:$0xf]  ;;  %v8039_v59 = vld [vmem:[#allocation2 + $0xfc] sm:$0xf0]  ;;  %v10721_v0 = vor.u32 %v9938_v57, %v8037_v56 }
  0x4f   :  { %13161 = vst [vmem:[#allocation34_spill] sm:$0xff] %v10715_v55  ;;  %v8045_v60 = vld [vmem:[#allocation2 + $0xe8] sm:$0xf]  ;;  %v9939_v61 = vld [vmem:[#allocation2 + $0x100] sm:$0xf0]  ;;  %v10723_v1 = vor.u32 %v9935_v58, %v8039_v59 }
  0x50   :  { %2188 = vmatmul.bf16.gmra.mxu0 %v10685_v12  ;;  %v9936_v62 = vld [vmem:[#allocation2 + $0xec] sm:$0xf]  ;;  %v8047_v63 = vld [vmem:[#allocation2 + $0x104] sm:$0xf0]  ;;  %13162 = vst [vmem:[#allocation35_spill] sm:$0xff] %v10721_v0  ;;  %v10725_v2 = vor.u32 %v9939_v61, %v8045_v60 }
  0x51   :  { %2366 = vmatmul.bf16.gmra.mxu2 %v10689_v14  ;;  %13163 = vst [vmem:[#allocation36_spill] sm:$0xff] %v10723_v1  ;;  %v10727_v3 = vor.u32 %v9936_v62, %v8047_v63  ;;  %v9205_v4 = vld [vmem:[#allocation5 + $0x680] sm:$0xf]  ;;  %v10229_v5 = vld [vmem:[#allocation5 + $0x68c] sm:$0xf0] }
  0x52   :  { %2277 = vmatmul.bf16.gmra.mxu1 %v10687_v13  ;;  %13164 = vst [vmem:[#allocation37_spill] sm:$0xff] %v10725_v2  ;;  %v8949_v6 = vld [vmem:[#allocation5 + $0x480] sm:$0xf]  ;;  %v9206_v7 = vor.u32 %v10229_v5, %v9205_v4  ;;  %v10165_v8 = vld [vmem:[#allocation5 + $0x48c] sm:$0xf0] }
  0x53   :  { %13165 = vst [vmem:[#allocation38_spill] sm:$0xff] %v10727_v3  ;;  %v10035_v9 = vld [vmem:[#allocation5 + $0x84] sm:$0xf]  ;;  %v8439_v10 = vld [vmem:[#allocation5 + $0x90] sm:$0xf0]  ;;  %v8950_v11 = vor.u32 %v10165_v8, %v8949_v6 }
  0x54   :  { %2455 = vmatmul.bf16.gmra.mxu3 %v10691_v15  ;;  %v8442_v16 = vor.u32 %v10035_v9, %v8439_v10  ;;  %v9077_v17 = vld [vmem:[#allocation5 + $0x580] sm:$0xf]  ;;  %v10197_v18 = vld [vmem:[#allocation5 + $0x58c] sm:$0xf0]  ;;  %2712 = vmatpush.bf16.msrb.mxu2 %v9206_v7  ;;  %v8065_v20 = vld [vmem:[#allocation2 + $0x118] sm:$0xf] }
  0x55   :  { %v9078_v19 = vor.u32 %v10197_v18, %v9077_v17  ;;  %2534 = vmatpush.bf16.msrb.mxu0 %v8950_v11  ;;  %v9945_v21 = vld [vmem:[#allocation2 + $0x130] sm:$0xf0]  ;;  %v9942_v22 = vld [vmem:[#allocation2 + $0x11c] sm:$0xf]  ;;  %v8067_v23 = vld [vmem:[#allocation2 + $0x134] sm:$0xf0] }
  0x56   :  { %2801 = vmatpush.bf16.msrb.mxu3 %v8442_v16  ;;  %v8073_v28 = vld [vmem:[#allocation2 + $0x120] sm:$0xf]  ;;  %v9946_v29 = vld [vmem:[#allocation2 + $0x138] sm:$0xf0]  ;;  %v9943_v30 = vld [vmem:[#allocation2 + $0x124] sm:$0xf]  ;;  %v10733_v32 = vor.u32 %v9945_v21, %v8065_v20  ;;  %v10735_v33 = vor.u32 %v9942_v22, %v8067_v23 }
  0x57   :  { %2623 = vmatpush.bf16.msrb.mxu1 %v9078_v19  ;;  %v8075_v31 = vld [vmem:[#allocation2 + $0x13c] sm:$0xf0]  ;;  %v10737_v34 = vor.u32 %v9946_v29, %v8073_v28  ;;  %v8093_v36 = vld [vmem:[#allocation2 + $0x150] sm:$0xf]  ;;  %v9952_v37 = vld [vmem:[#allocation2 + $0x168] sm:$0xf0] }
  0x58   :  { %13166 = vst [vmem:[#allocation39_spill] sm:$0xff] %v10733_v32  ;;  %v10739_v35 = vor.u32 %v9943_v30, %v8075_v31  ;;  %v9949_v38 = vld [vmem:[#allocation2 + $0x154] sm:$0xf]  ;;  %v8095_v39 = vld [vmem:[#allocation2 + $0x16c] sm:$0xf0]  ;;  %v10745_v44 = vor.u32 %v9952_v37, %v8093_v36 }
  0x59   :  { %13167 = vst [vmem:[#allocation40_spill] sm:$0xff] %v10735_v33  ;;  %v8101_v40 = vld [vmem:[#allocation2 + $0x158] sm:$0xf]  ;;  %v9953_v41 = vld [vmem:[#allocation2 + $0x170] sm:$0xf0]  ;;  %v10747_v45 = vor.u32 %v9949_v38, %v8095_v39 }
  0x5a   :  { %13168 = vst [vmem:[#allocation41_spill] sm:$0xff] %v10737_v34  ;;  %v9950_v42 = vld [vmem:[#allocation2 + $0x15c] sm:$0xf]  ;;  %v8103_v43 = vld [vmem:[#allocation2 + $0x174] sm:$0xf0]  ;;  %v10749_v46 = vor.u32 %v9953_v41, %v8101_v40 }
  0x5b   :  { %13169 = vst [vmem:[#allocation42_spill] sm:$0xff] %v10739_v35  ;;  %v10751_v48 = vor.u32 %v9950_v42, %v8103_v43  ;;  %v9189_v56 = vld [vmem:[#allocation5 + $0x660] sm:$0xf]  ;;  %v10225_v57 = vld [vmem:[#allocation5 + $0x66c] sm:$0xf0] }
  0x5c   :  { %13170 = vst [vmem:[#allocation43_spill] sm:$0xff] %v10745_v44  ;;  %v8933_v58 = vld [vmem:[#allocation5 + $0x460] sm:$0xf]  ;;  %v9190_v59 = vor.u32 %v10225_v57, %v9189_v56  ;;  %v10161_v60 = vld [vmem:[#allocation5 + $0x46c] sm:$0xf0] }
  0x5d   :  { %13171 = vst [vmem:[#allocation44_spill] sm:$0xff] %v10747_v45  ;;  %v10031_v61 = vld [vmem:[#allocation5 + $0x64] sm:$0xf]  ;;  %v8423_v62 = vld [vmem:[#allocation5 + $0x70] sm:$0xf0]  ;;  %v8934_v63 = vor.u32 %v10161_v60, %v8933_v58 }
  0x5e   :  { %13172 = vst [vmem:[#allocation45_spill] sm:$0xff] %v10749_v46  ;;  %v8426_v4 = vor.u32 %v10031_v61, %v8423_v62  ;;  %2713 = vmatpush.bf16.msrb.mxu2 %v9190_v59  ;;  %v9061_v5 = vld [vmem:[#allocation5 + $0x560] sm:$0xf]  ;;  %v10193_v6 = vld [vmem:[#allocation5 + $0x56c] sm:$0xf0] }
  0x5f   :  { %13173 = vst [vmem:[#allocation46_spill] sm:$0xff] %v10751_v48  ;;  %2535 = vmatpush.bf16.msrb.mxu0 %v8934_v63  ;;  %v9062_v7 = vor.u32 %v10193_v6, %v9061_v5  ;;  %v8121_v8 = vld [vmem:[#allocation2 + $0x188] sm:$0xf]  ;;  %v9959_v9 = vld [vmem:[#allocation2 + $0x1a0] sm:$0xf0] }
  0x60   :  { %2193 = vmatmul.bf16.gmra.mxu0 %v10697_v24  ;;  %2802 = vmatpush.bf16.msrb.mxu3 %v8426_v4  ;;  %v9956_v10 = vld [vmem:[#allocation2 + $0x18c] sm:$0xf]  ;;  %v8123_v11 = vld [vmem:[#allocation2 + $0x1a4] sm:$0xf0]  ;;  %v8129_v16 = vld [vmem:[#allocation2 + $0x190] sm:$0xf]  ;;  %v10757_v20 = vor.u32 %v9959_v9, %v8121_v8 }
  0x61   :  { %2371 = vmatmul.bf16.gmra.mxu2 %v10701_v26  ;;  %v9960_v17 = vld [vmem:[#allocation2 + $0x1a8] sm:$0xf0]  ;;  %2624 = vmatpush.bf16.msrb.mxu1 %v9062_v7  ;;  %v9957_v18 = vld [vmem:[#allocation2 + $0x194] sm:$0xf]  ;;  %v8131_v19 = vld [vmem:[#allocation2 + $0x1ac] sm:$0xf0]  ;;  %v10759_v21 = vor.u32 %v9956_v10, %v8123_v11 }
  0x62   :  { %2282 = vmatmul.bf16.gmra.mxu1 %v10699_v25  ;;  %13174 = vst [vmem:[#allocation47_spill] sm:$0xff] %v10757_v20  ;;  %v10761_v22 = vor.u32 %v9960_v17, %v8129_v16  ;;  %v10763_v23 = vor.u32 %v9957_v18, %v8131_v19  ;;  %v469_v28 = vld [vmem:[#allocation7] sm:$0xf]  ;;  %v9966_v31 = vld [vmem:[#allocation2 + $0x1d8] sm:$0xf0] }
  0x63   :  { %13175 = vst [vmem:[#allocation48_spill] sm:$0xff] %v10759_v21  ;;  %v10769_v29 = vperm.slane %v469_v28, 0  ;;  %v8149_v30 = vld [vmem:[#allocation2 + $0x1c0] sm:$0xf]  ;;  %v9963_v36 = vld [vmem:[#allocation2 + $0x1c4] sm:$0xf] }
  0x64   :  { %2460 = vmatmul.bf16.gmra.mxu3 %v10703_v27  ;;  %13176 = vst [vmem:[#allocation49_spill] sm:$0xff] %v10761_v22  ;;  %v8151_v37 = vld [vmem:[#allocation2 + $0x1dc] sm:$0xf0]  ;;  %v8157_v38 = vld [vmem:[#allocation2 + $0x1c8] sm:$0xf]  ;;  %v10771_v42 = vor.u32 %v9966_v31, %v8149_v30 }
  0x65   :  { %13177 = vst [vmem:[#allocation50_spill] sm:$0xff] %v10763_v23  ;;  %v9967_v39 = vld [vmem:[#allocation2 + $0x1e0] sm:$0xf0]  ;;  %v9964_v40 = vld [vmem:[#allocation2 + $0x1cc] sm:$0xf]  ;;  %v10773_v56 = vor.u32 %v9963_v36, %v8151_v37 }
  0x66   :  { %v8159_v41 = vld [vmem:[#allocation2 + $0x1e4] sm:$0xf0]  ;;  %13178 = vst [vmem:[#allocation51_spill] sm:$0xff] %v10771_v42  ;;  %v10775_v57 = vor.u32 %v9967_v39, %v8157_v38  ;;  %v9173_v62 = vld [vmem:[#allocation5 + $0x640] sm:$0xf] }
  0x67   :  { %13179 = vst [vmem:[#allocation52_spill] sm:$0xff] %v10773_v56  ;;  %v10778_v60 = vor.u32 %v9964_v40, %v8159_v41  ;;  %v10221_v63 = vld [vmem:[#allocation5 + $0x64c] sm:$0xf0]  ;;  %v8917_v4 = vld [vmem:[#allocation5 + $0x440] sm:$0xf] }
  0x68   :  { %13180 = vst [vmem:[#allocation53_spill] sm:$0xff] %v10775_v57  ;;  %v9174_v5 = vor.u32 %v10221_v63, %v9173_v62  ;;  %v10157_v6 = vld [vmem:[#allocation5 + $0x44c] sm:$0xf0]  ;;  %v10027_v7 = vld [vmem:[#allocation5 + $0x44] sm:$0xf] }
  0x69   :  { %13181 = vst [vmem:[#allocation54_spill] sm:$0xff] %v10778_v60  ;;  %v8407_v8 = vld [vmem:[#allocation5 + $0x50] sm:$0xf0]  ;;  %v8918_v10 = vor.u32 %v10157_v6, %v8917_v4  ;;  %v9045_v31 = vld [vmem:[#allocation5 + $0x540] sm:$0xf] }
  0x6a   :  { %v8410_v11 = vor.u32 %v10027_v7, %v8407_v8  ;;  %2714 = vmatpush.bf16.msrb.mxu2 %v9174_v5  ;;  %v10189_v36 = vld [vmem:[#allocation5 + $0x54c] sm:$0xf0]  ;;  %v8177_v39 = vld [vmem:[#allocation2 + $0x1f8] sm:$0xf]  ;;  %v9973_v40 = vld [vmem:[#allocation2 + $0x210] sm:$0xf0] }
  0x6b   :  { %2536 = vmatpush.bf16.msrb.mxu0 %v8918_v10  ;;  %v9046_v38 = vor.u32 %v10189_v36, %v9045_v31  ;;  %v9970_v41 = vld [vmem:[#allocation2 + $0x1fc] sm:$0xf]  ;;  %v8187_v62 = vld [vmem:[#allocation2 + $0x21c] sm:$0xf0]  ;;  %v10787_v4 = vor.u32 %v9973_v40, %v8177_v39  ;;  %v8025_v27 = vld [vmem:[#allocation2 + $0xb8] sm:$0xf] }
  0x6c   :  { %2803 = vmatpush.bf16.msrb.mxu3 %v8410_v11  ;;  %v9933_v26 = vld [vmem:[#allocation2 + $0xd0] sm:$0xf0]  ;;  %v9930_v25 = vld [vmem:[#allocation2 + $0xbc] sm:$0xf] }
  0x6d   :  { %2625 = vmatpush.bf16.msrb.mxu1 %v9046_v38  ;;  %13182 = vst [vmem:[#allocation55_spill] sm:$0xff] %v10787_v4 }
  0x70   :  { %2198 = vmatmul.bf16.gmra.mxu0 %v10709_v49 }
  0x71   :  { %2376 = vmatmul.bf16.gmra.mxu2 %v10713_v54  ;;  %v9919_v54 = vld [vmem:[#allocation2 + $0x60] sm:$0xf0] }
  0x72   :  { %2287 = vmatmul.bf16.gmra.mxu1 %v10711_v50  ;;  %v9916_v50 = vld [vmem:[#allocation2 + $0x4c] sm:$0xf] }
  0x74   :  { %2465 = vmatmul.bf16.gmra.mxu3 %v10715_v55  ;;  %v7969_v55 = vld [vmem:[#allocation2 + $0x48] sm:$0xf] }
  0x80   :  { %2203 = vmatmul.bf16.gmra.mxu0 %v10721_v0 }
  0x81   :  { %2381 = vmatmul.bf16.gmra.mxu2 %v10725_v2 }
  0x82   :  { %2292 = vmatmul.bf16.gmra.mxu1 %v10723_v1  ;;  %v8727_v1 = vld [vmem:[#allocation5 + $0x2d0] sm:$0xf0] }
  0x84   :  { %2470 = vmatmul.bf16.gmra.mxu3 %v10727_v3  ;;  %v10012_v3 = vld [vmem:[#allocation2 + $0x34c] sm:$0xf] }
  0x90   :  { %2208 = vmatmul.bf16.gmra.mxu0 %v10733_v32 }
  0x91   :  { %2386 = vmatmul.bf16.gmra.mxu2 %v10737_v34  ;;  %v8345_v34 = vld [vmem:[#allocation2 + $0x348] sm:$0xf] }
  0x92   :  { %2297 = vmatmul.bf16.gmra.mxu1 %v10735_v33  ;;  %v10015_v33 = vld [vmem:[#allocation2 + $0x360] sm:$0xf0] }
  0x94   :  { %2475 = vmatmul.bf16.gmra.mxu3 %v10739_v35 }
  0xa0   :  { %2213 = vmatmul.bf16.gmra.mxu0 %v10745_v44 }
  0xa1   :  { %2391 = vmatmul.bf16.gmra.mxu2 %v10749_v46 }
  0xa2   :  { %2302 = vmatmul.bf16.gmra.mxu1 %v10747_v45 }
  0xa4   :  { %2480 = vmatmul.bf16.gmra.mxu3 %v10751_v48  ;;  %v9998_v48 = vld [vmem:[#allocation2 + $0x2dc] sm:$0xf] }
  0xb0   :  { %2218 = vmatmul.bf16.gmra.mxu0 %v10757_v20 }
  0xb1   :  { %2396 = vmatmul.bf16.gmra.mxu2 %v10761_v22  ;;  %v8289_v22 = vld [vmem:[#allocation2 + $0x2d8] sm:$0xf] }
  0xb2   :  { %2307 = vmatmul.bf16.gmra.mxu1 %v10759_v21  ;;  %v10001_v21 = vld [vmem:[#allocation2 + $0x2f0] sm:$0xf0] }
  0xb4   :  { %2485 = vmatmul.bf16.gmra.mxu3 %v10763_v23 }
  0xbd   :  { %v2184_v43 = vpop.f32.mrf.mxu0 }
  0xbe   :  { %v2185_v58 = vadd.f32 %v2184_v43, %v10769_v29  ;;  %v8179_v43 = vld [vmem:[#allocation2 + $0x214] sm:$0xf0] }
  0xbf   :  { %v2273_v59 = vpop.f32.mrf.mxu1  ;;  %v10789_v8 = vor.u32 %v9970_v41, %v8179_v43  ;;  %v8205_v41 = vld [vmem:[#allocation2 + $0x230] sm:$0xf]  ;;  %v9980_v43 = vld [vmem:[#allocation2 + $0x248] sm:$0xf0] }
  0xc0   :  { %v2274_v61 = vadd.f32 %v2273_v59, %v2185_v58  ;;  %2223 = vmatmul.bf16.gmra.mxu0 %v10771_v42  ;;  %v8185_v58 = vld [vmem:[#allocation2 + $0x200] sm:$0xf]  ;;  %v9974_v59 = vld [vmem:[#allocation2 + $0x218] sm:$0xf0] }
  0xc1   :  { %2401 = vmatmul.bf16.gmra.mxu2 %v10775_v57  ;;  %13183 = vst [vmem:[#allocation56_spill] sm:$0xff] %v10789_v8 }
  0xc2   :  { %2312 = vmatmul.bf16.gmra.mxu1 %v10773_v56 }
  0xc4   :  { %2490 = vmatmul.bf16.gmra.mxu3 %v10778_v60  ;;  %v2362_v9 = vpop.f32.mrf.mxu2  ;;  %v9984_v60 = vld [vmem:[#allocation2 + $0x26c] sm:$0xf] }
  0xc5   :  { %v2363_v16 = vadd.f32 %v2362_v9, %v2274_v61  ;;  %v2186_v18 = vpop.f32.mrf.mxu0  ;;  %v9971_v61 = vld [vmem:[#allocation2 + $0x204] sm:$0xf]  ;;  %v10791_v9 = vor.u32 %v9974_v59, %v8185_v58  ;;  %v9977_v58 = vld [vmem:[#allocation2 + $0x234] sm:$0xf]  ;;  %v8207_v59 = vld [vmem:[#allocation2 + $0x24c] sm:$0xf0] }
  0xc6   :  { %v2187_v19 = vadd.f32 %v2186_v18, %v10769_v29 }
  0xc7   :  { %v2451_v17 = vpop.f32.mrf.mxu3  ;;  %v2275_v28 = vpop.f32.mrf.mxu1  ;;  %13184 = vst [vmem:[#allocation57_spill] sm:$0xff] %v10791_v9 }
  0xc8   :  { %v10785_v30 = vadd.f32 %v2451_v17, %v2363_v16  ;;  %v2276_v37 = vadd.f32 %v2275_v28, %v2187_v19  ;;  %v10794_v16 = vor.u32 %v9971_v61, %v8187_v62  ;;  %v8213_v61 = vld [vmem:[#allocation2 + $0x238] sm:$0xf]  ;;  %v9981_v62 = vld [vmem:[#allocation2 + $0x250] sm:$0xf0] }
  0xca   :  { %13185 = vst [vmem:[#allocation58_spill] sm:$0xff] %v10794_v16 }
  0xcc   :  { %v2364_v63 = vpop.f32.mrf.mxu2 }
  0xcd   :  { %v2365_v5 = vadd.f32 %v2364_v63, %v2276_v37  ;;  %v2189_v7 = vpop.f32.mrf.mxu0  ;;  %v9978_v63 = vld [vmem:[#allocation2 + $0x23c] sm:$0xf] }
  0xce   :  { %v2190_v10 = vadd.f32 %v2189_v7, %v10769_v29  ;;  %v10805_v7 = vor.u32 %v9980_v43, %v8205_v41  ;;  %v10217_v41 = vld [vmem:[#allocation5 + $0x62c] sm:$0xf0]  ;;  %v8901_v43 = vld [vmem:[#allocation5 + $0x420] sm:$0xf] }
  0xcf   :  { %v2453_v6 = vpop.f32.mrf.mxu3  ;;  %v2278_v11 = vpop.f32.mrf.mxu1 }
  0xd0   :  { %v10796_v17 = vadd.f32 %v2453_v6, %v2365_v5  ;;  %v2279_v18 = vadd.f32 %v2278_v11, %v2190_v10  ;;  %2228 = vmatmul.bf16.gmra.mxu0 %v10787_v4  ;;  %v8215_v5 = vld [vmem:[#allocation2 + $0x254] sm:$0xf0]  ;;  %13186 = vst [vmem:[#allocation59_spill] sm:$0xff] %v10805_v7 }
  0xd1   :  { %2406 = vmatmul.bf16.gmra.mxu2 %v10791_v9  ;;  %v8233_v9 = vld [vmem:[#allocation2 + $0x268] sm:$0xf] }
  0xd2   :  { %2317 = vmatmul.bf16.gmra.mxu1 %v10789_v8  ;;  %v9987_v8 = vld [vmem:[#allocation2 + $0x280] sm:$0xf0] }
  0xd4   :  { %2495 = vmatmul.bf16.gmra.mxu3 %v10794_v16  ;;  %v2367_v19 = vpop.f32.mrf.mxu2 }
  0xd5   :  { %v2368_v28 = vadd.f32 %v2367_v19, %v2279_v18  ;;  %v2191_v36 = vpop.f32.mrf.mxu0  ;;  %v10807_v19 = vor.u32 %v9977_v58, %v8207_v59  ;;  %v10153_v59 = vld [vmem:[#allocation5 + $0x42c] sm:$0xf0] }
  0xd6   :  { %v2192_v37 = vadd.f32 %v2191_v36, %v10769_v29  ;;  %v10809_v36 = vor.u32 %v9981_v62, %v8213_v61  ;;  %v10023_v61 = vld [vmem:[#allocation5 + $0x24] sm:$0xf]  ;;  %v8391_v62 = vld [vmem:[#allocation5 + $0x30] sm:$0xf0] }
  0xd7   :  { %v2456_v31 = vpop.f32.mrf.mxu3  ;;  %v2280_v38 = vpop.f32.mrf.mxu1  ;;  %13187 = vst [vmem:[#allocation60_spill] sm:$0xff] %v10807_v19 }
  0xd8   :  { %v10803_v39 = vadd.f32 %v2456_v31, %v2368_v28  ;;  %v2281_v40 = vadd.f32 %v2280_v38, %v2192_v37  ;;  %13188 = vst [vmem:[#allocation61_spill] sm:$0xff] %v10809_v36  ;;  %v10812_v37 = vor.u32 %v9978_v63, %v8215_v5  ;;  %v8902_v5 = vor.u32 %v10153_v59, %v8901_v43  ;;  %v8235_v43 = vld [vmem:[#allocation2 + $0x284] sm:$0xf0]  ;;  %v8241_v59 = vld [vmem:[#allocation2 + $0x270] sm:$0xf] }
  0xda   :  { %13189 = vst [vmem:[#allocation62_spill] sm:$0xff] %v10812_v37  ;;  %2537 = vmatpush.bf16.msrb.mxu0 %v8902_v5 }
  0xdc   :  { %v2369_v6 = vpop.f32.mrf.mxu2 }
  0xdd   :  { %v2370_v10 = vadd.f32 %v2369_v6, %v2281_v40  ;;  %v2194_v18 = vpop.f32.mrf.mxu0  ;;  %v9157_v40 = vld [vmem:[#allocation5 + $0x620] sm:$0xf]  ;;  %v8394_v6 = vor.u32 %v10023_v61, %v8391_v62  ;;  %v9985_v61 = vld [vmem:[#allocation2 + $0x274] sm:$0xf] }
  0xde   :  { %v2195_v28 = vadd.f32 %v2194_v18, %v10769_v29  ;;  %v9158_v58 = vor.u32 %v10217_v41, %v9157_v40 }
  0xdf   :  { %v2458_v11 = vpop.f32.mrf.mxu3  ;;  %v2283_v31 = vpop.f32.mrf.mxu1  ;;  %2804 = vmatpush.bf16.msrb.mxu3 %v8394_v6 }
  0xe0   :  { %v10814_v38 = vadd.f32 %v2458_v11, %v2370_v10  ;;  %v2284_v16 = vadd.f32 %v2283_v31, %v2195_v28  ;;  %2233 = vmatmul.bf16.gmra.mxu0 %v10805_v7  ;;  %2715 = vmatpush.bf16.msrb.mxu2 %v9158_v58  ;;  %v8243_v58 = vld [vmem:[#allocation2 + $0x28c] sm:$0xf0] }
  0xe1   :  { %2411 = vmatmul.bf16.gmra.mxu2 %v10809_v36  ;;  %v9029_v36 = vld [vmem:[#allocation5 + $0x520] sm:$0xf] }
  0xe2   :  { %2322 = vmatmul.bf16.gmra.mxu1 %v10807_v19  ;;  %v10185_v19 = vld [vmem:[#allocation5 + $0x52c] sm:$0xf0] }
  0xe3   :  { %v9030_v41 = vor.u32 %v10185_v19, %v9029_v36 }
  0xe4   :  { %2500 = vmatmul.bf16.gmra.mxu3 %v10812_v37  ;;  %v2372_v63 = vpop.f32.mrf.mxu2 }
  0xe5   :  { %v2373_v10 = vadd.f32 %v2372_v63, %v2284_v16  ;;  %v2196_v18 = vpop.f32.mrf.mxu0  ;;  %v9988_v16 = vld [vmem:[#allocation2 + $0x288] sm:$0xf0]  ;;  %2626 = vmatpush.bf16.msrb.mxu1 %v9030_v41  ;;  %v10823_v63 = vor.u32 %v9987_v8, %v8233_v9 }
  0xe6   :  { %v2197_v28 = vadd.f32 %v2196_v18, %v10769_v29  ;;  %v10827_v18 = vor.u32 %v9988_v16, %v8241_v59 }
  0xe7   :  { %v2461_v11 = vpop.f32.mrf.mxu3  ;;  %v2285_v31 = vpop.f32.mrf.mxu1  ;;  %13190 = vst [vmem:[#allocation63_spill] sm:$0xff] %v10823_v63 }
  0xe8   :  { %v10821_v37 = vadd.f32 %v2461_v11, %v2373_v10  ;;  %v2286_v40 = vadd.f32 %v2285_v31, %v2197_v28  ;;  %v10825_v11 = vor.u32 %v9984_v60, %v8235_v43  ;;  %13192 = vst [vmem:[#allocation65_spill] sm:$0xff] %v10827_v18  ;;  %v10830_v28 = vor.u32 %v9985_v61, %v8243_v58  ;;  %v8261_v58 = vld [vmem:[#allocation2 + $0x2a0] sm:$0xf] }
  0xea   :  { %13191 = vst [vmem:[#allocation64_spill] sm:$0xff] %v10825_v11 }
  0xeb   :  { %13193 = vst [vmem:[#allocation66_spill] sm:$0xff] %v10830_v28 }
  0xec   :  { %v2374_v62 = vpop.f32.mrf.mxu2 }
  0xed   :  { %v2375_v5 = vadd.f32 %v2374_v62, %v2286_v40  ;;  %v2199_v10 = vpop.f32.mrf.mxu0  ;;  %v9994_v62 = vld [vmem:[#allocation2 + $0x2b8] sm:$0xf0] }
  0xee   :  { %v2200_v19 = vadd.f32 %v2199_v10, %v10769_v29  ;;  %v8269_v10 = vld [vmem:[#allocation2 + $0x2a8] sm:$0xf] }
  0xef   :  { %v2463_v6 = vpop.f32.mrf.mxu3  ;;  %v2288_v36 = vpop.f32.mrf.mxu1 }
  0xf0   :  { %v10832_v31 = vadd.f32 %v2463_v6, %v2375_v5  ;;  %v2289_v41 = vadd.f32 %v2288_v36, %v2200_v19  ;;  %2238 = vmatmul.bf16.gmra.mxu0 %v10823_v63  ;;  %v9991_v5 = vld [vmem:[#allocation2 + $0x2a4] sm:$0xf]  ;;  %v8263_v6 = vld [vmem:[#allocation2 + $0x2bc] sm:$0xf0]  ;;  %v9992_v36 = vld [vmem:[#allocation2 + $0x2ac] sm:$0xf] }
  0xf1   :  { %2416 = vmatmul.bf16.gmra.mxu2 %v10827_v18  ;;  %v9995_v19 = vld [vmem:[#allocation2 + $0x2c0] sm:$0xf0]  ;;  %v8271_v18 = vld [vmem:[#allocation2 + $0x2c4] sm:$0xf0]  ;;  %v10843_v56 = vor.u32 %v9991_v5, %v8263_v6  ;;  %v10149_v5 = vld [vmem:[#allocation5 + $0x40c] sm:$0xf0] }
  0xf2   :  { %2327 = vmatmul.bf16.gmra.mxu1 %v10825_v11  ;;  %v8375_v6 = vld [vmem:[#allocation5 + $0x10] sm:$0xf0] }
  0xf3   :  { %13195 = vst [vmem:[#allocation68_spill] sm:$0xff] %v10843_v56 }
  0xf4   :  { %2505 = vmatmul.bf16.gmra.mxu3 %v10830_v28  ;;  %v2377_v60 = vpop.f32.mrf.mxu2  ;;  %v10841_v28 = vor.u32 %v9994_v62, %v8261_v58  ;;  %v8885_v58 = vld [vmem:[#allocation5 + $0x400] sm:$0xf] }
  0xf5   :  { %v2378_v8 = vadd.f32 %v2377_v60, %v2289_v41  ;;  %v2201_v40 = vpop.f32.mrf.mxu0 }
  0xf6   :  { %v2202_v43 = vadd.f32 %v2201_v40, %v10769_v29  ;;  %13194 = vst [vmem:[#allocation67_spill] sm:$0xff] %v10841_v28  ;;  %v10845_v40 = vor.u32 %v9995_v19, %v8269_v10  ;;  %v8886_v10 = vor.u32 %v10149_v5, %v8885_v58  ;;  %v8291_v58 = vld [vmem:[#allocation2 + $0x2f4] sm:$0xf0]  ;;  %v8297_v5 = vld [vmem:[#allocation2 + $0x2e0] sm:$0xf] }
  0xf7   :  { %v2466_v9 = vpop.f32.mrf.mxu3  ;;  %v2290_v59 = vpop.f32.mrf.mxu1 }
  0xf8   :  { %v10839_v16 = vadd.f32 %v2466_v9, %v2378_v8  ;;  %v2291_v61 = vadd.f32 %v2290_v59, %v2202_v43  ;;  %13196 = vst [vmem:[#allocation69_spill] sm:$0xff] %v10845_v40  ;;  %v10848_v43 = vor.u32 %v9992_v36, %v8271_v18  ;;  %2538 = vmatpush.bf16.msrb.mxu0 %v8886_v10 }
  0xfa   :  { %13197 = vst [vmem:[#allocation70_spill] sm:$0xff] %v10848_v43 }
  0xfc   :  { %v2379_v11 = vpop.f32.mrf.mxu2 }
  0xfd   :  { %v2380_v41 = vadd.f32 %v2379_v11, %v2291_v61  ;;  %v2204_v57 = vpop.f32.mrf.mxu0  ;;  %v9141_v11 = vld [vmem:[#allocation5 + $0x600] sm:$0xf]  ;;  %v10213_v61 = vld [vmem:[#allocation5 + $0x60c] sm:$0xf0] }
  0xfe   :  { %v2205_v8 = vadd.f32 %v2204_v57, %v10769_v29  ;;  %v9142_v62 = vor.u32 %v10213_v61, %v9141_v11  ;;  %v10019_v57 = vld [vmem:[#allocation5 + $0x4] sm:$0xf] }
  0xff   :  { %v2468_v60 = vpop.f32.mrf.mxu3  ;;  %v2293_v9 = vpop.f32.mrf.mxu1  ;;  %v8378_v19 = vor.u32 %v10019_v57, %v8375_v6  ;;  %v9999_v57 = vld [vmem:[#allocation2 + $0x2e4] sm:$0xf] }
 0x100   :  { %v10850_v59 = vadd.f32 %v2468_v60, %v2380_v41  ;;  %v2294_v23 = vadd.f32 %v2293_v9, %v2205_v8  ;;  %2243 = vmatmul.bf16.gmra.mxu0 %v10841_v28  ;;  %2716 = vmatpush.bf16.msrb.mxu2 %v9142_v62  ;;  %v8299_v62 = vld [vmem:[#allocation2 + $0x2fc] sm:$0xf0] }
 0x101   :  { %2421 = vmatmul.bf16.gmra.mxu2 %v10845_v40  ;;  %2805 = vmatpush.bf16.msrb.mxu3 %v8378_v19  ;;  %v9013_v40 = vld [vmem:[#allocation5 + $0x500] sm:$0xf] }
 0x102   :  { %2332 = vmatmul.bf16.gmra.mxu1 %v10843_v56  ;;  %v10181_v56 = vld [vmem:[#allocation5 + $0x50c] sm:$0xf0] }
 0x103   :  { %v9014_v61 = vor.u32 %v10181_v56, %v9013_v40 }
 0x104   :  { %2510 = vmatmul.bf16.gmra.mxu3 %v10848_v43  ;;  %v2382_v18 = vpop.f32.mrf.mxu2 }
 0x105   :  { %v2383_v36 = vadd.f32 %v2382_v18, %v2294_v23  ;;  %v2206_v60 = vpop.f32.mrf.mxu0  ;;  %v10002_v23 = vld [vmem:[#allocation2 + $0x2f8] sm:$0xf0]  ;;  %2627 = vmatpush.bf16.msrb.mxu1 %v9014_v61  ;;  %v10859_v18 = vor.u32 %v10001_v21, %v8289_v22 }
 0x106   :  { %v2207_v8 = vadd.f32 %v2206_v60, %v10769_v29  ;;  %v10863_v60 = vor.u32 %v10002_v23, %v8297_v5 }
 0x107   :  { %v2471_v41 = vpop.f32.mrf.mxu3  ;;  %v2295_v9 = vpop.f32.mrf.mxu1  ;;  %13198 = vst [vmem:[#allocation71_spill] sm:$0xff] %v10859_v18 }
 0x108   :  { %v10857_v43 = vadd.f32 %v2471_v41, %v2383_v36  ;;  %v2296_v11 = vadd.f32 %v2295_v9, %v2207_v8  ;;  %v10861_v41 = vor.u32 %v9998_v48, %v8291_v58  ;;  %13200 = vst [vmem:[#allocation73_spill] sm:$0xff] %v10863_v60  ;;  %v10866_v8 = vor.u32 %v9999_v57, %v8299_v62  ;;  %v8317_v62 = vld [vmem:[#allocation2 + $0x310] sm:$0xf] }
 0x10a   :  { %13199 = vst [vmem:[#allocation72_spill] sm:$0xff] %v10861_v41 }
 0x10b   :  { %13201 = vst [vmem:[#allocation74_spill] sm:$0xff] %v10866_v8 }
 0x10c   :  { %v2384_v6 = vpop.f32.mrf.mxu2 }
 0x10d   :  { %v2385_v10 = vadd.f32 %v2384_v6, %v2296_v11  ;;  %v2209_v36 = vpop.f32.mrf.mxu0  ;;  %v10008_v6 = vld [vmem:[#allocation2 + $0x328] sm:$0xf0] }
 0x10e   :  { %v2210_v56 = vadd.f32 %v2209_v36, %v10769_v29  ;;  %v8325_v36 = vld [vmem:[#allocation2 + $0x318] sm:$0xf] }
 0x10f   :  { %v2473_v19 = vpop.f32.mrf.mxu3  ;;  %v2298_v40 = vpop.f32.mrf.mxu1 }
 0x110   :  { %v10868_v9 = vadd.f32 %v2473_v19, %v2385_v10  ;;  %v2299_v61 = vadd.f32 %v2298_v40, %v2210_v56  ;;  %2248 = vmatmul.bf16.gmra.mxu0 %v10859_v18  ;;  %v10005_v10 = vld [vmem:[#allocation2 + $0x314] sm:$0xf]  ;;  %v8319_v19 = vld [vmem:[#allocation2 + $0x32c] sm:$0xf0]  ;;  %v10006_v40 = vld [vmem:[#allocation2 + $0x31c] sm:$0xf] }
 0x111   :  { %2426 = vmatmul.bf16.gmra.mxu2 %v10863_v60  ;;  %v10009_v56 = vld [vmem:[#allocation2 + $0x330] sm:$0xf0]  ;;  %v8327_v60 = vld [vmem:[#allocation2 + $0x334] sm:$0xf0]  ;;  %v10879_v45 = vor.u32 %v10005_v10, %v8319_v19 }
 0x112   :  { %2337 = vmatmul.bf16.gmra.mxu1 %v10861_v41  ;;  %v8615_v10 = vld [vmem:[#allocation5 + $0x1f0] sm:$0xf0] }
 0x113   :  { %13203 = vst [vmem:[#allocation76_spill] sm:$0xff] %v10879_v45  ;;  %v8999_v19 = vld [vmem:[#allocation5 + $0x4f0] sm:$0xf0] }
 0x114   :  { %2515 = vmatmul.bf16.gmra.mxu3 %v10866_v8  ;;  %v2387_v48 = vpop.f32.mrf.mxu2  ;;  %v10877_v8 = vor.u32 %v10008_v6, %v8317_v62  ;;  %v10079_v62 = vld [vmem:[#allocation5 + $0x1e4] sm:$0xf] }
 0x115   :  { %v2388_v21 = vadd.f32 %v2387_v48, %v2299_v61  ;;  %v2211_v11 = vpop.f32.mrf.mxu0 }
 0x116   :  { %v2212_v58 = vadd.f32 %v2211_v11, %v10769_v29  ;;  %13202 = vst [vmem:[#allocation75_spill] sm:$0xff] %v10877_v8  ;;  %v10881_v11 = vor.u32 %v10009_v56, %v8325_v36  ;;  %v8618_v36 = vor.u32 %v10079_v62, %v8615_v10  ;;  %v8347_v62 = vld [vmem:[#allocation2 + $0x364] sm:$0xf0]  ;;  %v8353_v10 = vld [vmem:[#allocation2 + $0x350] sm:$0xf] }
 0x117   :  { %v2476_v22 = vpop.f32.mrf.mxu3  ;;  %v2300_v5 = vpop.f32.mrf.mxu1 }
 0x118   :  { %v10875_v23 = vadd.f32 %v2476_v22, %v2388_v21  ;;  %v2301_v57 = vadd.f32 %v2300_v5, %v2212_v58  ;;  %13204 = vst [vmem:[#allocation77_spill] sm:$0xff] %v10881_v11  ;;  %v10884_v58 = vor.u32 %v10006_v40, %v8327_v60  ;;  %2887 = vmatpush.bf16.msra.mxu0 %v8618_v36 }
 0x11a   :  { %13205 = vst [vmem:[#allocation78_spill] sm:$0xff] %v10884_v58 }
 0x11c   :  { %v2389_v41 = vpop.f32.mrf.mxu2 }
 0x11d   :  { %v2390_v61 = vadd.f32 %v2389_v41, %v2301_v57  ;;  %v2214_v46 = vpop.f32.mrf.mxu0  ;;  %v10143_v41 = vld [vmem:[#allocation5 + $0x3e4] sm:$0xf]  ;;  %v8871_v57 = vld [vmem:[#allocation5 + $0x3f0] sm:$0xf0] }
 0x11e   :  { %v2215_v21 = vadd.f32 %v2214_v46, %v10769_v29  ;;  %v8874_v6 = vor.u32 %v10143_v41, %v8871_v57  ;;  %v10175_v46 = vld [vmem:[#allocation5 + $0x4e4] sm:$0xf] }
 0x11f   :  { %v2478_v48 = vpop.f32.mrf.mxu3  ;;  %v2303_v22 = vpop.f32.mrf.mxu1  ;;  %v9002_v56 = vor.u32 %v10175_v46, %v8999_v19  ;;  %v10013_v46 = vld [vmem:[#allocation2 + $0x354] sm:$0xf] }
 0x120   :  { %v10886_v5 = vadd.f32 %v2478_v48, %v2390_v61  ;;  %v2304_v35 = vadd.f32 %v2303_v22, %v2215_v21  ;;  %2253 = vmatmul.bf16.gmra.mxu0 %v10877_v8  ;;  %3065 = vmatpush.bf16.msra.mxu2 %v8874_v6  ;;  %v8355_v6 = vld [vmem:[#allocation2 + $0x36c] sm:$0xf0] }
 0x121   :  { %2431 = vmatmul.bf16.gmra.mxu2 %v10881_v11  ;;  %3154 = vmatpush.bf16.msra.mxu3 %v9002_v56  ;;  %v10111_v11 = vld [vmem:[#allocation5 + $0x2e4] sm:$0xf] }
 0x122   :  { %2342 = vmatmul.bf16.gmra.mxu1 %v10879_v45  ;;  %v8743_v45 = vld [vmem:[#allocation5 + $0x2f0] sm:$0xf0] }
 0x123   :  { %v8746_v57 = vor.u32 %v10111_v11, %v8743_v45 }
 0x124   :  { %2520 = vmatmul.bf16.gmra.mxu3 %v10884_v58  ;;  %v2392_v60 = vpop.f32.mrf.mxu2 }
 0x125   :  { %v2393_v40 = vadd.f32 %v2392_v60, %v2304_v35  ;;  %v2216_v48 = vpop.f32.mrf.mxu0  ;;  %v10016_v35 = vld [vmem:[#allocation2 + $0x368] sm:$0xf0]  ;;  %2976 = vmatpush.bf16.msra.mxu1 %v8746_v57  ;;  %v10895_v60 = vor.u32 %v10015_v33, %v8345_v34 }
 0x126   :  { %v2217_v21 = vadd.f32 %v2216_v48, %v10769_v29  ;;  %v10899_v48 = vor.u32 %v10016_v35, %v8353_v10 }
 0x127   :  { %v2481_v61 = vpop.f32.mrf.mxu3  ;;  %v2305_v22 = vpop.f32.mrf.mxu1  ;;  %13206 = vst [vmem:[#allocation79_spill] sm:$0xff] %v10895_v60 }
 0x128   :  { %v10893_v58 = vadd.f32 %v2481_v61, %v2393_v40  ;;  %v2306_v41 = vadd.f32 %v2305_v22, %v2217_v21  ;;  %v10897_v61 = vor.u32 %v10012_v3, %v8347_v62  ;;  %13208 = vst [vmem:[#allocation81_spill] sm:$0xff] %v10899_v48  ;;  %v10902_v21 = vor.u32 %v10013_v46, %v8355_v6  ;;  %v7941_v6 = vld [vmem:[#allocation2 + $0x10] sm:$0xf] }
 0x12a   :  { %13207 = vst [vmem:[#allocation80_spill] sm:$0xff] %v10897_v61 }
 0x12b   :  { %13209 = vst [vmem:[#allocation82_spill] sm:$0xff] %v10902_v21 }
 0x12c   :  { %v2394_v19 = vpop.f32.mrf.mxu2 }
 0x12d   :  { %v2395_v36 = vadd.f32 %v2394_v19, %v2306_v41  ;;  %v2219_v40 = vpop.f32.mrf.mxu0  ;;  %v9912_v19 = vld [vmem:[#allocation2 + $0x28] sm:$0xf0] }
 0x12e   :  { %v2220_v45 = vadd.f32 %v2219_v40, %v10769_v29  ;;  %v7949_v40 = vld [vmem:[#allocation2 + $0x18] sm:$0xf] }
 0x12f   :  { %v2483_v56 = vpop.f32.mrf.mxu3  ;;  %v2308_v11 = vpop.f32.mrf.mxu1 }
 0x130   :  { %v10904_v22 = vadd.f32 %v2483_v56, %v2395_v36  ;;  %v2309_v57 = vadd.f32 %v2308_v11, %v2220_v45  ;;  %2258 = vmatmul.bf16.gmra.mxu0 %v10895_v60  ;;  %v9909_v36 = vld [vmem:[#allocation2 + $0x14] sm:$0xf]  ;;  %v7943_v56 = vld [vmem:[#allocation2 + $0x2c] sm:$0xf0] }
 0x131   :  { %2436 = vmatmul.bf16.gmra.mxu2 %v10899_v48  ;;  %v9913_v45 = vld [vmem:[#allocation2 + $0x30] sm:$0xf0]  ;;  %v10913_v48 = vor.u32 %v9912_v19, %v7941_v6  ;;  %v10075_v6 = vld [vmem:[#allocation5 + $0x1c4] sm:$0xf] }
 0x132   :  { %2347 = vmatmul.bf16.gmra.mxu1 %v10897_v61  ;;  %v10917_v2 = vor.u32 %v9913_v45, %v7949_v40  ;;  %v8983_v40 = vld [vmem:[#allocation5 + $0x4d0] sm:$0xf0] }
 0x133   :  { %13210 = vst [vmem:[#allocation83_spill] sm:$0xff] %v10913_v48 }
 0x134   :  { %2525 = vmatmul.bf16.gmra.mxu3 %v10902_v21  ;;  %v2397_v3 = vpop.f32.mrf.mxu2  ;;  %13212 = vst [vmem:[#allocation85_spill] sm:$0xff] %v10917_v2 }
 0x135   :  { %v2398_v33 = vadd.f32 %v2397_v3, %v2309_v57  ;;  %v2221_v41 = vpop.f32.mrf.mxu0  ;;  %v10915_v3 = vor.u32 %v9909_v36, %v7943_v56  ;;  %v8599_v36 = vld [vmem:[#allocation5 + $0x1d0] sm:$0xf0]  ;;  %v10171_v56 = vld [vmem:[#allocation5 + $0x4c4] sm:$0xf] }
 0x136   :  { %v2222_v62 = vadd.f32 %v2221_v41, %v10769_v29 }
 0x137   :  { %v2486_v34 = vpop.f32.mrf.mxu3  ;;  %v2310_v10 = vpop.f32.mrf.mxu1  ;;  %13211 = vst [vmem:[#allocation84_spill] sm:$0xff] %v10915_v3 }
 0x138   :  { %v10911_v35 = vadd.f32 %v2486_v34, %v2398_v33  ;;  %v2311_v46 = vadd.f32 %v2310_v10, %v2222_v62  ;;  %v10139_v10 = vld [vmem:[#allocation5 + $0x3c4] sm:$0xf] }
 0x13c   :  { %v2399_v11 = vpop.f32.mrf.mxu2 }
 0x13d   :  { %v2400_v21 = vadd.f32 %v2399_v11, %v2311_v46  ;;  %v2224_v57 = vpop.f32.mrf.mxu0  ;;  %v8855_v46 = vld [vmem:[#allocation5 + $0x3d0] sm:$0xf0]  ;;  %v8602_v11 = vor.u32 %v10075_v6, %v8599_v36  ;;  %v7971_v6 = vld [vmem:[#allocation2 + $0x64] sm:$0xf0]  ;;  %v7977_v36 = vld [vmem:[#allocation2 + $0x50] sm:$0xf] }
 0x13e   :  { %v2225_v33 = vadd.f32 %v2224_v57, %v10769_v29  ;;  %v8858_v19 = vor.u32 %v10139_v10, %v8855_v46 }
 0x13f   :  { %v2488_v61 = vpop.f32.mrf.mxu3  ;;  %v2313_v34 = vpop.f32.mrf.mxu1  ;;  %2888 = vmatpush.bf16.msra.mxu0 %v8602_v11 }
 0x140   :  { %v10920_v41 = vadd.f32 %v2488_v61, %v2400_v21  ;;  %v2314_v62 = vadd.f32 %v2313_v34, %v2225_v33  ;;  %2539 = vmatmul.bf16.vlgmr.msrb.gmra.mxu0 %v10913_v48  ;;  %v8986_v61 = vor.u32 %v10171_v56, %v8983_v40  ;;  %3066 = vmatpush.bf16.msra.mxu2 %v8858_v19 }
 0x141   :  { %2717 = vmatmul.bf16.vlgmr.msrb.gmra.mxu2 %v10917_v2  ;;  %v10107_v2 = vld [vmem:[#allocation5 + $0x2c4] sm:$0xf]  ;;  %v10929_v19 = vor.u32 %v9919_v54, %v7969_v55 }
 0x142   :  { %2628 = vmatmul.bf16.vlgmr.msrb.gmra.mxu1 %v10915_v3  ;;  %3155 = vmatpush.bf16.msra.mxu3 %v8986_v61  ;;  %v8730_v46 = vor.u32 %v10107_v2, %v8727_v1  ;;  %v10931_v61 = vor.u32 %v9916_v50, %v7971_v6 }
 0x143   :  { %13213 = vst [vmem:[#allocation86_spill] sm:$0xff] %v10929_v19 }
 0x144   :  { %2806 = vmatmul.bf16.vlgmr.msrb.gmra.mxu3 %v10673_v47  ;;  %v2402_v45 = vpop.f32.mrf.mxu2  ;;  %2977 = vmatpush.bf16.msra.mxu1 %v8730_v46  ;;  %13214 = vst [vmem:[#allocation87_spill] sm:$0xff] %v10931_v61 }
 0x145   :  { %v2403_v21 = vadd.f32 %v2402_v45, %v2314_v62  ;;  %v2226_v33 = vpop.f32.mrf.mxu0  ;;  %v9920_v62 = vld [vmem:[#allocation2 + $0x68] sm:$0xf0] }
 0x146   :  { %v2227_v34 = vadd.f32 %v2226_v33, %v10769_v29 }
 0x147   :  { %v2491_v57 = vpop.f32.mrf.mxu3  ;;  %v2315_v3 = vpop.f32.mrf.mxu1 }
 0x148   :  { %v10927_v47 = vadd.f32 %v2491_v57, %v2403_v21  ;;  %v2316_v10 = vadd.f32 %v2315_v3, %v2227_v34  ;;  %v10933_v21 = vor.u32 %v9920_v62, %v7977_v36  ;;  %v7997_v36 = vld [vmem:[#allocation2 + $0x80] sm:$0xf]  ;;  %v9926_v62 = vld [vmem:[#allocation2 + $0x98] sm:$0xf0] }
 0x14a   :  { %13215 = vst [vmem:[#allocation88_spill] sm:$0xff] %v10933_v21 }
 0x14c   :  { %v2404_v56 = vpop.f32.mrf.mxu2 }
 0x14d   :  { %v2405_v40 = vadd.f32 %v2404_v56, %v2316_v10  ;;  %v2229_v11 = vpop.f32.mrf.mxu0  ;;  %v9923_v56 = vld [vmem:[#allocation2 + $0x84] sm:$0xf] }
 0x14e   :  { %v2230_v3 = vadd.f32 %v2229_v11, %v10769_v29  ;;  %v9927_v11 = vld [vmem:[#allocation2 + $0xa0] sm:$0xf0] }
 0x14f   :  { %v2493_v45 = vpop.f32.mrf.mxu3  ;;  %v2318_v1 = vpop.f32.mrf.mxu1 }
 0x150   :  { %v10936_v2 = vadd.f32 %v2493_v45, %v2405_v40  ;;  %v2319_v57 = vadd.f32 %v2318_v1, %v2230_v3  ;;  %2544 = vmatmul.bf16.gmra.mxu0 %v10929_v19  ;;  %v7999_v40 = vld [vmem:[#allocation2 + $0x9c] sm:$0xf0]  ;;  %v8005_v45 = vld [vmem:[#allocation2 + $0x88] sm:$0xf]  ;;  %v10945_v1 = vor.u32 %v9926_v62, %v7997_v36  ;;  %v10071_v36 = vld [vmem:[#allocation5 + $0x1a4] sm:$0xf] }
 0x151   :  { %2722 = vmatmul.bf16.gmra.mxu2 %v10933_v21 }
 0x152   :  { %2633 = vmatmul.bf16.gmra.mxu1 %v10931_v61  ;;  %13216 = vst [vmem:[#allocation89_spill] sm:$0xff] %v10945_v1  ;;  %v10949_v61 = vor.u32 %v9927_v11, %v8005_v45  ;;  %v8967_v45 = vld [vmem:[#allocation5 + $0x4b0] sm:$0xf0] }
 0x154   :  { %2811 = vmatmul.bf16.gmra.mxu3 %v10685_v12  ;;  %v2407_v54 = vpop.f32.mrf.mxu2  ;;  %13218 = vst [vmem:[#allocation91_spill] sm:$0xff] %v10949_v61 }
 0x155   :  { %v2408_v55 = vadd.f32 %v2407_v54, %v2319_v57  ;;  %v2231_v33 = vpop.f32.mrf.mxu0  ;;  %v10947_v54 = vor.u32 %v9923_v56, %v7999_v40  ;;  %v8583_v56 = vld [vmem:[#allocation5 + $0x1b0] sm:$0xf0]  ;;  %v10167_v40 = vld [vmem:[#allocation5 + $0x4a4] sm:$0xf] }
 0x156   :  { %v2232_v34 = vadd.f32 %v2231_v33, %v10769_v29 }
 0x157   :  { %v2496_v50 = vpop.f32.mrf.mxu3  ;;  %v2320_v10 = vpop.f32.mrf.mxu1  ;;  %13217 = vst [vmem:[#allocation90_spill] sm:$0xff] %v10947_v54 }
 0x158   :  { %v10943_v46 = vadd.f32 %v2496_v50, %v2408_v55  ;;  %v2321_v6 = vadd.f32 %v2320_v10, %v2232_v34  ;;  %v10135_v10 = vld [vmem:[#allocation5 + $0x3a4] sm:$0xf] }
 0x15c   :  { %v2409_v3 = vpop.f32.mrf.mxu2 }
 0x15d   :  { %v2410_v12 = vadd.f32 %v2409_v3, %v2321_v6  ;;  %v2234_v57 = vpop.f32.mrf.mxu0  ;;  %v8839_v6 = vld [vmem:[#allocation5 + $0x3b0] sm:$0xf0]  ;;  %v8586_v3 = vor.u32 %v10071_v36, %v8583_v56  ;;  %v8027_v36 = vld [vmem:[#allocation2 + $0xd4] sm:$0xf0]  ;;  %v8033_v56 = vld [vmem:[#allocation2 + $0xc0] sm:$0xf] }
 0x15e   :  { %v2235_v55 = vadd.f32 %v2234_v57, %v10769_v29  ;;  %v8842_v62 = vor.u32 %v10135_v10, %v8839_v6 }
 0x15f   :  { %v2498_v21 = vpop.f32.mrf.mxu3  ;;  %v2323_v50 = vpop.f32.mrf.mxu1  ;;  %2889 = vmatpush.bf16.msra.mxu0 %v8586_v3 }
 0x160   :  { %v10952_v33 = vadd.f32 %v2498_v21, %v2410_v12  ;;  %v2324_v34 = vadd.f32 %v2323_v50, %v2235_v55  ;;  %2549 = vmatmul.bf16.gmra.mxu0 %v10945_v1  ;;  %v8970_v12 = vor.u32 %v10167_v40, %v8967_v45  ;;  %3067 = vmatpush.bf16.msra.mxu2 %v8842_v62  ;;  %v8711_v1 = vld [vmem:[#allocation5 + $0x2b0] sm:$0xf0] }
 0x161   :  { %2727 = vmatmul.bf16.gmra.mxu2 %v10949_v61  ;;  %v10103_v61 = vld [vmem:[#allocation5 + $0x2a4] sm:$0xf]  ;;  %v10961_v62 = vor.u32 %v9933_v26, %v8025_v27 }
 0x162   :  { %2638 = vmatmul.bf16.gmra.mxu1 %v10947_v54  ;;  %3156 = vmatpush.bf16.msra.mxu3 %v8970_v12  ;;  %v8714_v6 = vor.u32 %v10103_v61, %v8711_v1  ;;  %v10963_v12 = vor.u32 %v9930_v25, %v8027_v36 }
 0x163   :  { %13219 = vst [vmem:[#allocation92_spill] sm:$0xff] %v10961_v62 }
 0x164   :  { %2816 = vmatmul.bf16.gmra.mxu3 %v10697_v24  ;;  %v2412_v11 = vpop.f32.mrf.mxu2  ;;  %2978 = vmatpush.bf16.msra.mxu1 %v8714_v6  ;;  %13220 = vst [vmem:[#allocation93_spill] sm:$0xff] %v10963_v12 }
 0x165   :  { %v2413_v21 = vadd.f32 %v2412_v11, %v2324_v34  ;;  %v2236_v55 = vpop.f32.mrf.mxu0  ;;  %v9934_v34 = vld [vmem:[#allocation2 + $0xd8] sm:$0xf0] }
 0x166   :  { %v2237_v50 = vadd.f32 %v2236_v55, %v10769_v29 }
 0x167   :  { %v2501_v57 = vpop.f32.mrf.mxu3  ;;  %v2325_v54 = vpop.f32.mrf.mxu1 }
 0x168   :  { %v10959_v24 = vadd.f32 %v2501_v57, %v2413_v21  ;;  %v2326_v10 = vadd.f32 %v2325_v54, %v2237_v50  ;;  %v10965_v21 = vor.u32 %v9934_v34, %v8033_v56  ;;  %v8053_v56 = vld [vmem:[#allocation2 + $0xf0] sm:$0xf]  ;;  %v9940_v34 = vld [vmem:[#allocation2 + $0x108] sm:$0xf0] }
 0x16a   :  { %13221 = vst [vmem:[#allocation94_spill] sm:$0xff] %v10965_v21 }
 0x16c   :  { %v2414_v40 = vpop.f32.mrf.mxu2 }
 0x16d   :  { %v2415_v45 = vadd.f32 %v2414_v40, %v2326_v10  ;;  %v2239_v3 = vpop.f32.mrf.mxu0  ;;  %v9937_v40 = vld [vmem:[#allocation2 + $0xf4] sm:$0xf] }
 0x16e   :  { %v2240_v54 = vadd.f32 %v2239_v3, %v10769_v29  ;;  %v9941_v3 = vld [vmem:[#allocation2 + $0x110] sm:$0xf0] }
 0x16f   :  { %v2503_v11 = vpop.f32.mrf.mxu3  ;;  %v2328_v61 = vpop.f32.mrf.mxu1 }
 0x170   :  { %v10968_v1 = vadd.f32 %v2503_v11, %v2415_v45  ;;  %v2329_v57 = vadd.f32 %v2328_v61, %v2240_v54  ;;  %2554 = vmatmul.bf16.gmra.mxu0 %v10961_v62  ;;  %v8055_v45 = vld [vmem:[#allocation2 + $0x10c] sm:$0xf0]  ;;  %v8061_v11 = vld [vmem:[#allocation2 + $0xf8] sm:$0xf]  ;;  %v10977_v61 = vor.u32 %v9940_v34, %v8053_v56  ;;  %v10067_v56 = vld [vmem:[#allocation5 + $0x184] sm:$0xf] }
 0x171   :  { %2732 = vmatmul.bf16.gmra.mxu2 %v10965_v21  ;;  %v9947_v62 = vld [vmem:[#allocation2 + $0x140] sm:$0xf0] }
 0x172   :  { %2643 = vmatmul.bf16.gmra.mxu1 %v10963_v12  ;;  %13223 = vst [vmem:[#allocation96_spill] sm:$0xff] %v10977_v61  ;;  %v10981_v12 = vor.u32 %v9941_v3, %v8061_v11  ;;  %v8951_v11 = vld [vmem:[#allocation5 + $0x490] sm:$0xf0] }
 0x174   :  { %2821 = vmatmul.bf16.gmra.mxu3 %v10709_v49  ;;  %v2417_v26 = vpop.f32.mrf.mxu2  ;;  %13225 = vst [vmem:[#allocation98_spill] sm:$0xff] %v10981_v12 }
 0x175   :  { %v2418_v27 = vadd.f32 %v2417_v26, %v2329_v57  ;;  %v2241_v55 = vpop.f32.mrf.mxu0  ;;  %v10979_v26 = vor.u32 %v9937_v40, %v8055_v45  ;;  %v8567_v40 = vld [vmem:[#allocation5 + $0x190] sm:$0xf0]  ;;  %v10163_v45 = vld [vmem:[#allocation5 + $0x484] sm:$0xf] }
 0x176   :  { %v2242_v50 = vadd.f32 %v2241_v55, %v10769_v29 }
 0x177   :  { %v2506_v25 = vpop.f32.mrf.mxu3  ;;  %v2330_v10 = vpop.f32.mrf.mxu1  ;;  %13224 = vst [vmem:[#allocation97_spill] sm:$0xff] %v10979_v26 }
 0x178   :  { %v10975_v6 = vadd.f32 %v2506_v25, %v2418_v27  ;;  %v2331_v36 = vadd.f32 %v2330_v10, %v2242_v50  ;;  %v10131_v10 = vld [vmem:[#allocation5 + $0x384] sm:$0xf] }
 0x17a   :  { %13222 = vst [vmem:[#allocation95_spill] sm:$0xff] %v10975_v6  ;;  %v9944_v6 = vld [vmem:[#allocation2 + $0x12c] sm:$0xf] }
 0x17c   :  { %v2419_v54 = vpop.f32.mrf.mxu2 }
 0x17d   :  { %v2420_v49 = vadd.f32 %v2419_v54, %v2331_v36  ;;  %v2244_v57 = vpop.f32.mrf.mxu0  ;;  %v8823_v36 = vld [vmem:[#allocation5 + $0x390] sm:$0xf0]  ;;  %v8570_v54 = vor.u32 %v10067_v56, %v8567_v40  ;;  %v8083_v56 = vld [vmem:[#allocation2 + $0x144] sm:$0xf0]  ;;  %v8089_v40 = vld [vmem:[#allocation2 + $0x130] sm:$0xf] }
 0x17e   :  { %v2245_v27 = vadd.f32 %v2244_v57, %v10769_v29  ;;  %v8826_v34 = vor.u32 %v10131_v10, %v8823_v36 }
 0x17f   :  { %v2508_v21 = vpop.f32.mrf.mxu3  ;;  %v2333_v25 = vpop.f32.mrf.mxu1  ;;  %2890 = vmatpush.bf16.msra.mxu0 %v8570_v54 }
 0x180   :  { %v10984_v55 = vadd.f32 %v2508_v21, %v2420_v49  ;;  %v2334_v50 = vadd.f32 %v2333_v25, %v2245_v27  ;;  %2559 = vmatmul.bf16.gmra.mxu0 %v10977_v61  ;;  %v8954_v49 = vor.u32 %v10163_v45, %v8951_v11  ;;  %3068 = vmatpush.bf16.msra.mxu2 %v8826_v34  ;;  %v8695_v61 = vld [vmem:[#allocation5 + $0x290] sm:$0xf0] }
 0x181   :  { %2737 = vmatmul.bf16.gmra.mxu2 %v10981_v12  ;;  %v10099_v12 = vld [vmem:[#allocation5 + $0x284] sm:$0xf] }
 0x182   :  { %13226 = vst [vmem:[#allocation99_spill] sm:$0xff] %v10984_v55  ;;  %2648 = vmatmul.bf16.gmra.mxu1 %v10979_v26  ;;  %3157 = vmatpush.bf16.msra.mxu3 %v8954_v49  ;;  %v8698_v36 = vor.u32 %v10099_v12, %v8695_v61  ;;  %v8081_v55 = vld [vmem:[#allocation2 + $0x128] sm:$0xf]  ;;  %v10995_v49 = vor.u32 %v9944_v6, %v8083_v56 }
 0x183   :  { %v10993_v34 = vor.u32 %v9947_v62, %v8081_v55 }
 0x184   :  { %2826 = vmatmul.bf16.gmra.mxu3 %v10721_v0  ;;  %v2422_v3 = vpop.f32.mrf.mxu2  ;;  %2979 = vmatpush.bf16.msra.mxu1 %v8698_v36  ;;  %13228 = vst [vmem:[#allocation101_spill] sm:$0xff] %v10995_v49 }
 0x185   :  { %v2423_v21 = vadd.f32 %v2422_v3, %v2334_v50  ;;  %v2246_v27 = vpop.f32.mrf.mxu0  ;;  %v9948_v50 = vld [vmem:[#allocation2 + $0x148] sm:$0xf0]  ;;  %13227 = vst [vmem:[#allocation100_spill] sm:$0xff] %v10993_v34 }
 0x186   :  { %v2247_v25 = vadd.f32 %v2246_v27, %v10769_v29 }
 0x187   :  { %v2511_v57 = vpop.f32.mrf.mxu3  ;;  %v2335_v26 = vpop.f32.mrf.mxu1 }
 0x188   :  { %v10991_v0 = vadd.f32 %v2511_v57, %v2423_v21  ;;  %v2336_v10 = vadd.f32 %v2335_v26, %v2247_v25  ;;  %v10997_v21 = vor.u32 %v9948_v50, %v8089_v40  ;;  %v8109_v40 = vld [vmem:[#allocation2 + $0x160] sm:$0xf]  ;;  %v9954_v50 = vld [vmem:[#allocation2 + $0x178] sm:$0xf0] }
 0x18a   :  { %13229 = vst [vmem:[#allocation102_spill] sm:$0xff] %v10997_v21 }
 0x18c   :  { %v2424_v45 = vpop.f32.mrf.mxu2 }
 0x18d   :  { %v2425_v11 = vadd.f32 %v2424_v45, %v2336_v10  ;;  %v2249_v54 = vpop.f32.mrf.mxu0  ;;  %v9951_v45 = vld [vmem:[#allocation2 + $0x164] sm:$0xf] }
 0x18e   :  { %v2250_v26 = vadd.f32 %v2249_v54, %v10769_v29  ;;  %v9955_v54 = vld [vmem:[#allocation2 + $0x180] sm:$0xf0] }
 0x18f   :  { %v2513_v3 = vpop.f32.mrf.mxu3  ;;  %v2338_v12 = vpop.f32.mrf.mxu1 }
 0x190   :  { %v11000_v61 = vadd.f32 %v2513_v3, %v2425_v11  ;;  %v2339_v57 = vadd.f32 %v2338_v12, %v2250_v26  ;;  %2564 = vmatmul.bf16.gmra.mxu0 %v10993_v34  ;;  %v8111_v11 = vld [vmem:[#allocation2 + $0x17c] sm:$0xf0]  ;;  %v8117_v3 = vld [vmem:[#allocation2 + $0x168] sm:$0xf]  ;;  %v11009_v12 = vor.u32 %v9954_v50, %v8109_v40  ;;  %v10063_v40 = vld [vmem:[#allocation5 + $0x164] sm:$0xf] }
 0x191   :  { %2742 = vmatmul.bf16.gmra.mxu2 %v10997_v21  ;;  %v9961_v34 = vld [vmem:[#allocation2 + $0x1b0] sm:$0xf0] }
 0x192   :  { %2653 = vmatmul.bf16.gmra.mxu1 %v10995_v49  ;;  %13231 = vst [vmem:[#allocation104_spill] sm:$0xff] %v11009_v12  ;;  %v11013_v49 = vor.u32 %v9955_v54, %v8117_v3  ;;  %v8935_v3 = vld [vmem:[#allocation5 + $0x470] sm:$0xf0] }
 0x194   :  { %2831 = vmatmul.bf16.gmra.mxu3 %v10733_v32  ;;  %v2427_v62 = vpop.f32.mrf.mxu2  ;;  %13233 = vst [vmem:[#allocation106_spill] sm:$0xff] %v11013_v49 }
 0x195   :  { %v2428_v55 = vadd.f32 %v2427_v62, %v2339_v57  ;;  %v2251_v27 = vpop.f32.mrf.mxu0  ;;  %v11011_v62 = vor.u32 %v9951_v45, %v8111_v11  ;;  %v8551_v45 = vld [vmem:[#allocation5 + $0x170] sm:$0xf0]  ;;  %v10159_v11 = vld [vmem:[#allocation5 + $0x464] sm:$0xf] }
 0x196   :  { %v2252_v25 = vadd.f32 %v2251_v27, %v10769_v29 }
 0x197   :  { %v2516_v6 = vpop.f32.mrf.mxu3  ;;  %v2340_v10 = vpop.f32.mrf.mxu1  ;;  %13232 = vst [vmem:[#allocation105_spill] sm:$0xff] %v11011_v62 }
 0x198   :  { %v11007_v36 = vadd.f32 %v2516_v6, %v2428_v55  ;;  %v2341_v56 = vadd.f32 %v2340_v10, %v2252_v25  ;;  %v10127_v10 = vld [vmem:[#allocation5 + $0x364] sm:$0xf] }
 0x19a   :  { %13230 = vst [vmem:[#allocation103_spill] sm:$0xff] %v11007_v36  ;;  %v9958_v36 = vld [vmem:[#allocation2 + $0x19c] sm:$0xf] }
 0x19c   :  { %v2429_v26 = vpop.f32.mrf.mxu2 }
 0x19d   :  { %v2430_v32 = vadd.f32 %v2429_v26, %v2341_v56  ;;  %v2254_v57 = vpop.f32.mrf.mxu0  ;;  %v8807_v56 = vld [vmem:[#allocation5 + $0x370] sm:$0xf0]  ;;  %v8554_v26 = vor.u32 %v10063_v40, %v8551_v45  ;;  %v8139_v40 = vld [vmem:[#allocation2 + $0x1b4] sm:$0xf0]  ;;  %v8145_v45 = vld [vmem:[#allocation2 + $0x1a0] sm:$0xf] }
 0x19e   :  { %v2255_v55 = vadd.f32 %v2254_v57, %v10769_v29  ;;  %v8810_v50 = vor.u32 %v10127_v10, %v8807_v56 }
 0x19f   :  { %v2518_v21 = vpop.f32.mrf.mxu3  ;;  %v2343_v6 = vpop.f32.mrf.mxu1  ;;  %2891 = vmatpush.bf16.msra.mxu0 %v8554_v26 }
 0x1a0   :  { %v11016_v27 = vadd.f32 %v2518_v21, %v2430_v32  ;;  %v2344_v25 = vadd.f32 %v2343_v6, %v2255_v55  ;;  %2569 = vmatmul.bf16.gmra.mxu0 %v11009_v12  ;;  %v8938_v32 = vor.u32 %v10159_v11, %v8935_v3  ;;  %3069 = vmatpush.bf16.msra.mxu2 %v8810_v50  ;;  %v8679_v12 = vld [vmem:[#allocation5 + $0x270] sm:$0xf0] }
 0x1a1   :  { %2747 = vmatmul.bf16.gmra.mxu2 %v11013_v49  ;;  %v10095_v49 = vld [vmem:[#allocation5 + $0x264] sm:$0xf] }
 0x1a2   :  { %13234 = vst [vmem:[#allocation107_spill] sm:$0xff] %v11016_v27  ;;  %2658 = vmatmul.bf16.gmra.mxu1 %v11011_v62  ;;  %3158 = vmatpush.bf16.msra.mxu3 %v8938_v32  ;;  %v8682_v56 = vor.u32 %v10095_v49, %v8679_v12  ;;  %v8137_v27 = vld [vmem:[#allocation2 + $0x198] sm:$0xf]  ;;  %v11027_v32 = vor.u32 %v9958_v36, %v8139_v40 }
 0x1a3   :  { %v11025_v50 = vor.u32 %v9961_v34, %v8137_v27 }
 0x1a4   :  { %2836 = vmatmul.bf16.gmra.mxu3 %v10745_v44  ;;  %v2432_v54 = vpop.f32.mrf.mxu2  ;;  %2980 = vmatpush.bf16.msra.mxu1 %v8682_v56  ;;  %13236 = vst [vmem:[#allocation109_spill] sm:$0xff] %v11027_v32 }
 0x1a5   :  { %v2433_v21 = vadd.f32 %v2432_v54, %v2344_v25  ;;  %v2256_v55 = vpop.f32.mrf.mxu0  ;;  %v9962_v25 = vld [vmem:[#allocation2 + $0x1b8] sm:$0xf0]  ;;  %13235 = vst [vmem:[#allocation108_spill] sm:$0xff] %v11025_v50 }
 0x1a6   :  { %v2257_v6 = vadd.f32 %v2256_v55, %v10769_v29 }
 0x1a7   :  { %v2521_v57 = vpop.f32.mrf.mxu3  ;;  %v2345_v62 = vpop.f32.mrf.mxu1 }
 0x1a8   :  { %v11023_v44 = vadd.f32 %v2521_v57, %v2433_v21  ;;  %v2346_v10 = vadd.f32 %v2345_v62, %v2257_v6  ;;  %v11029_v21 = vor.u32 %v9962_v25, %v8145_v45  ;;  %v8165_v45 = vld [vmem:[#allocation2 + $0x1d0] sm:$0xf]  ;;  %v9968_v25 = vld [vmem:[#allocation2 + $0x1e8] sm:$0xf0] }
 0x1aa   :  { %13237 = vst [vmem:[#allocation110_spill] sm:$0xff] %v11029_v21 }
 0x1ac   :  { %v2434_v11 = vpop.f32.mrf.mxu2 }
 0x1ad   :  { %v2435_v3 = vadd.f32 %v2434_v11, %v2346_v10  ;;  %v2259_v26 = vpop.f32.mrf.mxu0  ;;  %v9965_v11 = vld [vmem:[#allocation2 + $0x1d4] sm:$0xf] }
 0x1ae   :  { %v2260_v62 = vadd.f32 %v2259_v26, %v10769_v29  ;;  %v9969_v26 = vld [vmem:[#allocation2 + $0x1f0] sm:$0xf0] }
 0x1af   :  { %v2523_v54 = vpop.f32.mrf.mxu3  ;;  %v2348_v49 = vpop.f32.mrf.mxu1 }
 0x1b0   :  { %v11032_v12 = vadd.f32 %v2523_v54, %v2435_v3  ;;  %v2349_v57 = vadd.f32 %v2348_v49, %v2260_v62  ;;  %2574 = vmatmul.bf16.gmra.mxu0 %v11025_v50  ;;  %v8167_v3 = vld [vmem:[#allocation2 + $0x1ec] sm:$0xf0]  ;;  %v8173_v54 = vld [vmem:[#allocation2 + $0x1d8] sm:$0xf]  ;;  %v11041_v49 = vor.u32 %v9968_v25, %v8165_v45  ;;  %v8535_v25 = vld [vmem:[#allocation5 + $0x150] sm:$0xf0] }
 0x1b1   :  { %2752 = vmatmul.bf16.gmra.mxu2 %v11029_v21 }
 0x1b2   :  { %2663 = vmatmul.bf16.gmra.mxu1 %v11027_v32  ;;  %13238 = vst [vmem:[#allocation111_spill] sm:$0xff] %v11041_v49  ;;  %v11045_v32 = vor.u32 %v9969_v26, %v8173_v54 }
 0x1b4   :  { %2841 = vmatmul.bf16.gmra.mxu3 %v10757_v20  ;;  %v2437_v34 = vpop.f32.mrf.mxu2  ;;  %13240 = vst [vmem:[#allocation113_spill] sm:$0xff] %v11045_v32 }
 0x1b5   :  { %v2438_v27 = vadd.f32 %v2437_v34, %v2349_v57  ;;  %v2261_v55 = vpop.f32.mrf.mxu0  ;;  %v11043_v34 = vor.u32 %v9965_v11, %v8167_v3  ;;  %v10155_v11 = vld [vmem:[#allocation5 + $0x444] sm:$0xf]  ;;  %v8919_v3 = vld [vmem:[#allocation5 + $0x450] sm:$0xf0] }
 0x1b6   :  { %v2262_v6 = vadd.f32 %v2261_v55, %v10769_v29 }
 0x1b7   :  { %v2526_v36 = vpop.f32.mrf.mxu3  ;;  %v2350_v10 = vpop.f32.mrf.mxu1  ;;  %13239 = vst [vmem:[#allocation112_spill] sm:$0xff] %v11043_v34 }
 0x1b8   :  { %v11039_v56 = vadd.f32 %v2526_v36, %v2438_v27  ;;  %v2351_v40 = vadd.f32 %v2350_v10, %v2262_v6  ;;  %v10123_v6 = vld [vmem:[#allocation5 + $0x344] sm:$0xf]  ;;  %v8791_v10 = vld [vmem:[#allocation5 + $0x350] sm:$0xf0] }
 0x1b9   :  { %v8794_v45 = vor.u32 %v10123_v6, %v8791_v10  ;;  %v8193_v10 = vld [vmem:[#allocation2 + $0x208] sm:$0xf] }
 0x1bb   :  { %3070 = vmatpush.bf16.msra.mxu2 %v8794_v45 }
 0x1bc   :  { %v2439_v62 = vpop.f32.mrf.mxu2 }
 0x1bd   :  { %v2440_v20 = vadd.f32 %v2439_v62, %v2351_v40  ;;  %v2540_v57 = vpop.f32.mrf.mxu0  ;;  %v10059_v40 = vld [vmem:[#allocation5 + $0x144] sm:$0xf] }
 0x1be   :  { %v2541_v29 = vadd.f32 %v2540_v57, %v10785_v30  ;;  %v8538_v54 = vor.u32 %v10059_v40, %v8535_v25  ;;  %v8201_v40 = vld [vmem:[#allocation2 + $0x210] sm:$0xf]  ;;  %v9976_v25 = vld [vmem:[#allocation2 + $0x228] sm:$0xf0] }
 0x1bf   :  { %v2528_v21 = vpop.f32.mrf.mxu3  ;;  %v2629_v27 = vpop.f32.mrf.mxu1 }
 0x1c0   :  { %v11048_v36 = vadd.f32 %v2528_v21, %v2440_v20  ;;  %v2630_v55 = vadd.f32 %v2629_v27, %v2541_v29  ;;  %2579 = vmatmul.bf16.gmra.mxu0 %v11041_v49  ;;  %v8922_v20 = vor.u32 %v10155_v11, %v8919_v3  ;;  %v10091_v27 = vld [vmem:[#allocation5 + $0x244] sm:$0xf]  ;;  %v9972_v49 = vld [vmem:[#allocation2 + $0x20c] sm:$0xf] }
 0x1c1   :  { %2757 = vmatmul.bf16.gmra.mxu2 %v11045_v32  ;;  %2892 = vmatpush.bf16.msra.mxu0 %v8538_v54  ;;  %v11063_v54 = vor.u32 %v9976_v25, %v8201_v40  ;;  %v9982_v40 = vld [vmem:[#allocation2 + $0x258] sm:$0xf0]  ;;  %v9979_v25 = vld [vmem:[#allocation2 + $0x244] sm:$0xf] }
 0x1c2   :  { %13241 = vst [vmem:[#allocation114_spill] sm:$0xff] %v11048_v36  ;;  %2668 = vmatmul.bf16.gmra.mxu1 %v11043_v34  ;;  %3159 = vmatpush.bf16.msra.mxu3 %v8922_v20  ;;  %v9975_v34 = vld [vmem:[#allocation2 + $0x220] sm:$0xf0]  ;;  %v8195_v36 = vld [vmem:[#allocation2 + $0x224] sm:$0xf0] }
 0x1c3   :  { %v11057_v11 = vor.u32 %v9975_v34, %v8193_v10  ;;  %13244 = vst [vmem:[#allocation117_spill] sm:$0xff] %v11063_v54  ;;  %v8221_v10 = vld [vmem:[#allocation2 + $0x240] sm:$0xf] }
 0x1c4   :  { %2846 = vmatmul.bf16.gmra.mxu3 %v10771_v42  ;;  %v2718_v30 = vpop.f32.mrf.mxu2  ;;  %v8663_v42 = vld [vmem:[#allocation5 + $0x250] sm:$0xf0] }
 0x1c5   :  { %v2719_v21 = vadd.f32 %v2718_v30, %v2630_v55  ;;  %v2542_v62 = vpop.f32.mrf.mxu0  ;;  %v8666_v6 = vor.u32 %v10091_v27, %v8663_v42  ;;  %13242 = vst [vmem:[#allocation115_spill] sm:$0xff] %v11057_v11  ;;  %v11061_v30 = vor.u32 %v9972_v49, %v8195_v36 }
 0x1c6   :  { %v2543_v57 = vadd.f32 %v2542_v62, %v10796_v17 }
 0x1c7   :  { %v11054_v26 = vpop.f32.mrf.mxu3  ;;  %v2631_v29 = vpop.f32.mrf.mxu1  ;;  %2981 = vmatpush.bf16.msra.mxu1 %v8666_v6  ;;  %13243 = vst [vmem:[#allocation116_spill] sm:$0xff] %v11061_v30  ;;  %v4667_v62 = vmax.f32 %v2719_v21, 0.0 }
 0x1c8   :  { %v2632_v32 = vadd.f32 %v2631_v29, %v2543_v57 }
 0x1cc   :  { %v2720_v55 = vpop.f32.mrf.mxu2 }
 0x1cd   :  { %v2721_v45 = vadd.f32 %v2720_v55, %v2632_v32  ;;  %v2545_v17 = vpop.f32.mrf.mxu0  ;;  %v8223_v55 = vld [vmem:[#allocation2 + $0x25c] sm:$0xf0] }
 0x1ce   :  { %v2546_v42 = vadd.f32 %v2545_v17, %v10803_v39  ;;  %v9983_v17 = vld [vmem:[#allocation2 + $0x260] sm:$0xf0] }
 0x1cf   :  { %v11059_v3 = vpop.f32.mrf.mxu3  ;;  %v2634_v20 = vpop.f32.mrf.mxu1  ;;  %v4671_v57 = vmax.f32 %v2721_v45, 0.0  ;;  %v8229_v45 = vld [vmem:[#allocation2 + $0x248] sm:$0xf] }
 0x1d0   :  { %v2635_v29 = vadd.f32 %v2634_v20, %v2546_v42  ;;  %2584 = vmatmul.bf16.gmra.mxu0 %v11057_v11  ;;  %v11075_v20 = vor.u32 %v9982_v40, %v8221_v10  ;;  %v8775_v10 = vld [vmem:[#allocation5 + $0x330] sm:$0xf0]  ;;  %v10055_v40 = vld [vmem:[#allocation5 + $0x124] sm:$0xf] }
 0x1d1   :  { %v11067_v27 = vpack.c.bf16 %v4671_v57, %v4667_v62  ;;  %2762 = vmatmul.bf16.gmra.mxu2 %v11063_v54 }
 0x1d2   :  { %2673 = vmatmul.bf16.gmra.mxu1 %v11061_v30  ;;  %13246 = vst [vmem:[#allocation119_spill] sm:$0xff] %v11075_v20  ;;  %v8251_v30 = vld [vmem:[#allocation2 + $0x294] sm:$0xf0] }
 0x1d3   :  { %13245 = vst [vmem:[#allocation118_spill] sm:$0xff] %v11067_v27  ;;  %v11081_v27 = vor.u32 %v9983_v17, %v8229_v45  ;;  %v8903_v45 = vld [vmem:[#allocation5 + $0x430] sm:$0xf0] }
 0x1d4   :  { %2851 = vmatmul.bf16.gmra.mxu3 %v10787_v4  ;;  %v2723_v32 = vpop.f32.mrf.mxu2 }
 0x1d5   :  { %v2724_v49 = vadd.f32 %v2723_v32, %v2635_v29  ;;  %v2547_v36 = vpop.f32.mrf.mxu0  ;;  %v11079_v32 = vor.u32 %v9979_v25, %v8223_v55  ;;  %13248 = vst [vmem:[#allocation121_spill] sm:$0xff] %v11081_v27  ;;  %v8519_v55 = vld [vmem:[#allocation5 + $0x130] sm:$0xf0] }
 0x1d6   :  { %v2548_v39 = vadd.f32 %v2547_v36, %v10814_v38  ;;  %v8522_v17 = vor.u32 %v10055_v40, %v8519_v55  ;;  %v8257_v40 = vld [vmem:[#allocation2 + $0x280] sm:$0xf]  ;;  %v9990_v55 = vld [vmem:[#allocation2 + $0x298] sm:$0xf0] }
 0x1d7   :  { %v11072_v34 = vpop.f32.mrf.mxu3  ;;  %v2636_v21 = vpop.f32.mrf.mxu1  ;;  %13247 = vst [vmem:[#allocation120_spill] sm:$0xff] %v11079_v32 }
 0x1d8   :  { %v2637_v6 = vadd.f32 %v2636_v21, %v2548_v39  ;;  %v4675_v39 = vmax.f32 %v2724_v49, 0.0  ;;  %2893 = vmatpush.bf16.msra.mxu0 %v8522_v17  ;;  %v11099_v17 = vor.u32 %v9990_v55, %v8257_v40  ;;  %v9996_v40 = vld [vmem:[#allocation2 + $0x2c8] sm:$0xf0]  ;;  %v9993_v55 = vld [vmem:[#allocation2 + $0x2b4] sm:$0xf] }
 0x1da   :  { %13252 = vst [vmem:[#allocation125_spill] sm:$0xff] %v11099_v17 }
 0x1dc   :  { %v2725_v42 = vpop.f32.mrf.mxu2 }
 0x1dd   :  { %v2726_v62 = vadd.f32 %v2725_v42, %v2637_v6  ;;  %v2550_v29 = vpop.f32.mrf.mxu0  ;;  %v10119_v6 = vld [vmem:[#allocation5 + $0x324] sm:$0xf] }
 0x1de   :  { %v2551_v38 = vadd.f32 %v2550_v29, %v10821_v37  ;;  %v8778_v25 = vor.u32 %v10119_v6, %v8775_v10  ;;  %v10151_v37 = vld [vmem:[#allocation5 + $0x424] sm:$0xf]  ;;  %v8249_v10 = vld [vmem:[#allocation2 + $0x278] sm:$0xf] }
 0x1df   :  { %v11077_v57 = vpop.f32.mrf.mxu3  ;;  %v2639_v36 = vpop.f32.mrf.mxu1  ;;  %v4679_v21 = vmax.f32 %v2726_v62, 0.0  ;;  %v8906_v42 = vor.u32 %v10151_v37, %v8903_v45 }
 0x1e0   :  { %v2640_v4 = vadd.f32 %v2639_v36, %v2551_v38  ;;  %2589 = vmatmul.bf16.gmra.mxu0 %v11075_v20  ;;  %3071 = vmatpush.bf16.msra.mxu2 %v8778_v25 }
 0x1e1   :  { %v11085_v54 = vpack.c.bf16 %v4679_v21, %v4675_v39  ;;  %2767 = vmatmul.bf16.gmra.mxu2 %v11081_v27  ;;  %3160 = vmatpush.bf16.msra.mxu3 %v8906_v42  ;;  %v10087_v21 = vld [vmem:[#allocation5 + $0x224] sm:$0xf]  ;;  %v9989_v27 = vld [vmem:[#allocation2 + $0x290] sm:$0xf0] }
 0x1e2   :  { %2678 = vmatmul.bf16.gmra.mxu1 %v11079_v32  ;;  %v9986_v32 = vld [vmem:[#allocation2 + $0x27c] sm:$0xf]  ;;  %v11093_v37 = vor.u32 %v9989_v27, %v8249_v10  ;;  %v8277_v10 = vld [vmem:[#allocation2 + $0x2b0] sm:$0xf] }
 0x1e3   :  { %13249 = vst [vmem:[#allocation122_spill] sm:$0xff] %v11085_v54  ;;  %v8647_v54 = vld [vmem:[#allocation5 + $0x230] sm:$0xf0] }
 0x1e4   :  { %2856 = vmatmul.bf16.gmra.mxu3 %v10805_v7  ;;  %v2728_v49 = vpop.f32.mrf.mxu2  ;;  %v8650_v6 = vor.u32 %v10087_v21, %v8647_v54  ;;  %13250 = vst [vmem:[#allocation123_spill] sm:$0xff] %v11093_v37 }
 0x1e5   :  { %v2729_v62 = vadd.f32 %v2728_v49, %v2640_v4  ;;  %v2552_v38 = vpop.f32.mrf.mxu0  ;;  %v11097_v49 = vor.u32 %v9986_v32, %v8251_v30 }
 0x1e6   :  { %v2553_v36 = vadd.f32 %v2552_v38, %v10832_v31  ;;  %2982 = vmatpush.bf16.msra.mxu1 %v8650_v6 }
 0x1e7   :  { %v11090_v29 = vpop.f32.mrf.mxu3  ;;  %v2641_v39 = vpop.f32.mrf.mxu1  ;;  %13251 = vst [vmem:[#allocation124_spill] sm:$0xff] %v11097_v49  ;;  %v4683_v38 = vmax.f32 %v2729_v62, 0.0 }
 0x1e8   :  { %v2642_v7 = vadd.f32 %v2641_v39, %v2553_v36 }
 0x1ec   :  { %v2730_v4 = vpop.f32.mrf.mxu2 }
 0x1ed   :  { %v2731_v25 = vadd.f32 %v2730_v4, %v2642_v7  ;;  %v2555_v31 = vpop.f32.mrf.mxu0  ;;  %v8279_v4 = vld [vmem:[#allocation2 + $0x2cc] sm:$0xf0] }
 0x1ee   :  { %v2556_v54 = vadd.f32 %v2555_v31, %v10839_v16  ;;  %v9997_v31 = vld [vmem:[#allocation2 + $0x2d0] sm:$0xf0] }
 0x1ef   :  { %v11095_v45 = vpop.f32.mrf.mxu3  ;;  %v2644_v42 = vpop.f32.mrf.mxu1  ;;  %v4687_v36 = vmax.f32 %v2731_v25, 0.0  ;;  %v8285_v25 = vld [vmem:[#allocation2 + $0x2b8] sm:$0xf] }
 0x1f0   :  { %v2645_v39 = vadd.f32 %v2644_v42, %v2556_v54  ;;  %2594 = vmatmul.bf16.gmra.mxu0 %v11093_v37  ;;  %v11111_v42 = vor.u32 %v9996_v40, %v8277_v10  ;;  %v8759_v10 = vld [vmem:[#allocation5 + $0x310] sm:$0xf0]  ;;  %v10051_v40 = vld [vmem:[#allocation5 + $0x104] sm:$0xf] }
 0x1f1   :  { %v11103_v21 = vpack.c.bf16 %v4687_v36, %v4683_v38  ;;  %2772 = vmatmul.bf16.gmra.mxu2 %v11099_v17 }
 0x1f2   :  { %2683 = vmatmul.bf16.gmra.mxu1 %v11097_v49  ;;  %13254 = vst [vmem:[#allocation127_spill] sm:$0xff] %v11111_v42  ;;  %v8307_v49 = vld [vmem:[#allocation2 + $0x304] sm:$0xf0] }
 0x1f3   :  { %13253 = vst [vmem:[#allocation126_spill] sm:$0xff] %v11103_v21  ;;  %v11117_v21 = vor.u32 %v9997_v31, %v8285_v25  ;;  %v8887_v25 = vld [vmem:[#allocation5 + $0x410] sm:$0xf0] }
 0x1f4   :  { %2861 = vmatmul.bf16.gmra.mxu3 %v10823_v63  ;;  %v2733_v7 = vpop.f32.mrf.mxu2 }
 0x1f5   :  { %v2734_v30 = vadd.f32 %v2733_v7, %v2645_v39  ;;  %v2557_v32 = vpop.f32.mrf.mxu0  ;;  %v11115_v7 = vor.u32 %v9993_v55, %v8279_v4  ;;  %13256 = vst [vmem:[#allocation129_spill] sm:$0xff] %v11117_v21  ;;  %v8503_v4 = vld [vmem:[#allocation5 + $0x110] sm:$0xf0] }
 0x1f6   :  { %v2558_v16 = vadd.f32 %v2557_v32, %v10850_v59  ;;  %v8506_v31 = vor.u32 %v10051_v40, %v8503_v4  ;;  %v8313_v40 = vld [vmem:[#allocation2 + $0x2f0] sm:$0xf]  ;;  %v10004_v4 = vld [vmem:[#allocation2 + $0x308] sm:$0xf0] }
 0x1f7   :  { %v11108_v27 = vpop.f32.mrf.mxu3  ;;  %v2646_v62 = vpop.f32.mrf.mxu1  ;;  %13255 = vst [vmem:[#allocation128_spill] sm:$0xff] %v11115_v7 }
 0x1f8   :  { %v2647_v6 = vadd.f32 %v2646_v62, %v2558_v16  ;;  %v4691_v16 = vmax.f32 %v2734_v30, 0.0  ;;  %2894 = vmatpush.bf16.msra.mxu0 %v8506_v31  ;;  %v11135_v31 = vor.u32 %v10004_v4, %v8313_v40  ;;  %v10010_v40 = vld [vmem:[#allocation2 + $0x338] sm:$0xf0]  ;;  %v10007_v4 = vld [vmem:[#allocation2 + $0x324] sm:$0xf] }
 0x1fa   :  { %13260 = vst [vmem:[#allocation133_spill] sm:$0xff] %v11135_v31 }
 0x1fc   :  { %v2735_v54 = vpop.f32.mrf.mxu2 }
 0x1fd   :  { %v2736_v38 = vadd.f32 %v2735_v54, %v2647_v6  ;;  %v2560_v39 = vpop.f32.mrf.mxu0  ;;  %v10115_v6 = vld [vmem:[#allocation5 + $0x304] sm:$0xf] }
 0x1fe   :  { %v2561_v59 = vadd.f32 %v2560_v39, %v10857_v43  ;;  %v8762_v55 = vor.u32 %v10115_v6, %v8759_v10  ;;  %v10147_v43 = vld [vmem:[#allocation5 + $0x404] sm:$0xf]  ;;  %v8305_v10 = vld [vmem:[#allocation2 + $0x2e8] sm:$0xf] }
 0x1ff   :  { %v11113_v36 = vpop.f32.mrf.mxu3  ;;  %v2649_v32 = vpop.f32.mrf.mxu1  ;;  %v4695_v62 = vmax.f32 %v2736_v38, 0.0  ;;  %v8890_v54 = vor.u32 %v10147_v43, %v8887_v25 }
 0x200   :  { %v2650_v63 = vadd.f32 %v2649_v32, %v2561_v59  ;;  %2599 = vmatmul.bf16.gmra.mxu0 %v11111_v42  ;;  %3072 = vmatpush.bf16.msra.mxu2 %v8762_v55 }
 0x201   :  { %v11121_v17 = vpack.c.bf16 %v4695_v62, %v4691_v16  ;;  %2777 = vmatmul.bf16.gmra.mxu2 %v11117_v21  ;;  %3161 = vmatpush.bf16.msra.mxu3 %v8890_v54  ;;  %v10083_v62 = vld [vmem:[#allocation5 + $0x204] sm:$0xf] }
 0x202   :  { %2688 = vmatmul.bf16.gmra.mxu1 %v11115_v7  ;;  %v10003_v21 = vld [vmem:[#allocation2 + $0x300] sm:$0xf0]  ;;  %v10000_v7 = vld [vmem:[#allocation2 + $0x2ec] sm:$0xf] }
 0x203   :  { %13257 = vst [vmem:[#allocation130_spill] sm:$0xff] %v11121_v17  ;;  %v8631_v17 = vld [vmem:[#allocation5 + $0x210] sm:$0xf0]  ;;  %v11129_v43 = vor.u32 %v10003_v21, %v8305_v10  ;;  %v8333_v10 = vld [vmem:[#allocation2 + $0x320] sm:$0xf] }
 0x204   :  { %2866 = vmatmul.bf16.gmra.mxu3 %v10841_v28  ;;  %v2738_v30 = vpop.f32.mrf.mxu2  ;;  %v8634_v6 = vor.u32 %v10083_v62, %v8631_v17 }
 0x205   :  { %v2739_v38 = vadd.f32 %v2738_v30, %v2650_v63  ;;  %v2562_v59 = vpop.f32.mrf.mxu0  ;;  %13258 = vst [vmem:[#allocation131_spill] sm:$0xff] %v11129_v43  ;;  %v11133_v30 = vor.u32 %v10000_v7, %v8307_v49 }
 0x206   :  { %v2563_v32 = vadd.f32 %v2562_v59, %v10868_v9  ;;  %2983 = vmatpush.bf16.msra.mxu1 %v8634_v6 }
 0x207   :  { %v11126_v39 = vpop.f32.mrf.mxu3  ;;  %v2651_v16 = vpop.f32.mrf.mxu1  ;;  %13259 = vst [vmem:[#allocation132_spill] sm:$0xff] %v11133_v30  ;;  %v4699_v59 = vmax.f32 %v2739_v38, 0.0 }
 0x208   :  { %v2652_v28 = vadd.f32 %v2651_v16, %v2563_v32 }
 0x20c   :  { %v2740_v63 = vpop.f32.mrf.mxu2 }
 0x20d   :  { %v2741_v55 = vadd.f32 %v2740_v63, %v2652_v28  ;;  %v2565_v9 = vpop.f32.mrf.mxu0  ;;  %v8335_v63 = vld [vmem:[#allocation2 + $0x33c] sm:$0xf0] }
 0x20e   :  { %v2566_v17 = vadd.f32 %v2565_v9, %v10875_v23  ;;  %v10011_v9 = vld [vmem:[#allocation2 + $0x340] sm:$0xf0] }
 0x20f   :  { %v11131_v25 = vpop.f32.mrf.mxu3  ;;  %v2654_v54 = vpop.f32.mrf.mxu1  ;;  %v4703_v32 = vmax.f32 %v2741_v55, 0.0  ;;  %v8341_v55 = vld [vmem:[#allocation2 + $0x328] sm:$0xf] }
 0x210   :  { %v2655_v16 = vadd.f32 %v2654_v54, %v2566_v17  ;;  %2604 = vmatmul.bf16.gmra.mxu0 %v11129_v43  ;;  %v11147_v54 = vor.u32 %v10010_v40, %v8333_v10  ;;  %v10050_v10 = vld [vmem:[#allocation5 + $0xf4] sm:$0xf0]  ;;  %v10207_v40 = vld [vmem:[#allocation5 + $0x5e4] sm:$0xf] }
 0x211   :  { %v11139_v62 = vpack.c.bf16 %v4703_v32, %v4699_v59  ;;  %2782 = vmatmul.bf16.gmra.mxu2 %v11135_v31 }
 0x212   :  { %2693 = vmatmul.bf16.gmra.mxu1 %v11133_v30  ;;  %13262 = vst [vmem:[#allocation135_spill] sm:$0xff] %v11147_v54  ;;  %v8363_v30 = vld [vmem:[#allocation2 + $0x374] sm:$0xf0] }
 0x213   :  { %13261 = vst [vmem:[#allocation134_spill] sm:$0xff] %v11139_v62  ;;  %v11153_v62 = vor.u32 %v10011_v9, %v8341_v55  ;;  %v10082_v55 = vld [vmem:[#allocation5 + $0x1f4] sm:$0xf0] }
 0x214   :  { %2871 = vmatmul.bf16.gmra.mxu3 %v10859_v18  ;;  %v2743_v28 = vpop.f32.mrf.mxu2 }
 0x215   :  { %v2744_v49 = vadd.f32 %v2743_v28, %v2655_v16  ;;  %v2567_v7 = vpop.f32.mrf.mxu0  ;;  %v11151_v28 = vor.u32 %v10007_v4, %v8335_v63  ;;  %13264 = vst [vmem:[#allocation137_spill] sm:$0xff] %v11153_v62  ;;  %v9127_v63 = vld [vmem:[#allocation5 + $0x5f0] sm:$0xf0] }
 0x216   :  { %v2568_v23 = vadd.f32 %v2567_v7, %v10886_v5  ;;  %v9130_v9 = vor.u32 %v10207_v40, %v9127_v63  ;;  %v8369_v40 = vld [vmem:[#allocation2 + $0x360] sm:$0xf]  ;;  %v10018_v63 = vld [vmem:[#allocation2 + $0x378] sm:$0xf0] }
 0x217   :  { %v11144_v21 = vpop.f32.mrf.mxu3  ;;  %v2656_v38 = vpop.f32.mrf.mxu1  ;;  %13263 = vst [vmem:[#allocation136_spill] sm:$0xff] %v11151_v28 }
 0x218   :  { %v2657_v6 = vadd.f32 %v2656_v38, %v2568_v23  ;;  %v4707_v23 = vmax.f32 %v2744_v49, 0.0  ;;  %3243 = vmatpush.bf16.msrb.mxu0 %v9130_v9  ;;  %v11171_v9 = vor.u32 %v10018_v63, %v8369_v40 }
 0x21a   :  { %13268 = vst [vmem:[#allocation141_spill] sm:$0xff] %v11171_v9 }
 0x21c   :  { %v2745_v17 = vpop.f32.mrf.mxu2 }
 0x21d   :  { %v2746_v59 = vadd.f32 %v2745_v17, %v2657_v6  ;;  %v2570_v16 = vpop.f32.mrf.mxu0  ;;  %v8493_v6 = vld [vmem:[#allocation5 + $0xe8] sm:$0xf] }
 0x21e   :  { %v2571_v5 = vadd.f32 %v2570_v16, %v10893_v58  ;;  %v8494_v4 = vor.u32 %v10050_v10, %v8493_v6  ;;  %v8621_v58 = vld [vmem:[#allocation5 + $0x1e8] sm:$0xf]  ;;  %v8361_v10 = vld [vmem:[#allocation2 + $0x358] sm:$0xf] }
 0x21f   :  { %v11149_v32 = vpop.f32.mrf.mxu3  ;;  %v2659_v7 = vpop.f32.mrf.mxu1  ;;  %v4711_v38 = vmax.f32 %v2746_v59, 0.0  ;;  %v8622_v17 = vor.u32 %v10082_v55, %v8621_v58 }
 0x220   :  { %v2660_v18 = vadd.f32 %v2659_v7, %v2571_v5  ;;  %2609 = vmatmul.bf16.gmra.mxu0 %v11147_v54  ;;  %3421 = vmatpush.bf16.msrb.mxu2 %v8494_v4 }
 0x221   :  { %v11157_v31 = vpack.c.bf16 %v4711_v38, %v4707_v23  ;;  %2787 = vmatmul.bf16.gmra.mxu2 %v11153_v62  ;;  %3510 = vmatpush.bf16.msrb.mxu3 %v8622_v17  ;;  %v10239_v38 = vld [vmem:[#allocation5 + $0x6e4] sm:$0xf]  ;;  %v10017_v62 = vld [vmem:[#allocation2 + $0x370] sm:$0xf0] }
 0x222   :  { %2698 = vmatmul.bf16.gmra.mxu1 %v11151_v28  ;;  %v10014_v28 = vld [vmem:[#allocation2 + $0x35c] sm:$0xf]  ;;  %v11165_v58 = vor.u32 %v10017_v62, %v8361_v10 }
 0x223   :  { %13265 = vst [vmem:[#allocation138_spill] sm:$0xff] %v11157_v31  ;;  %v9255_v31 = vld [vmem:[#allocation5 + $0x6f0] sm:$0xf0] }
 0x224   :  { %2876 = vmatmul.bf16.gmra.mxu3 %v10877_v8  ;;  %v2748_v49 = vpop.f32.mrf.mxu2  ;;  %v9258_v6 = vor.u32 %v10239_v38, %v9255_v31  ;;  %13266 = vst [vmem:[#allocation139_spill] sm:$0xff] %v11165_v58 }
 0x225   :  { %v2749_v59 = vadd.f32 %v2748_v49, %v2660_v18  ;;  %v2572_v5 = vpop.f32.mrf.mxu0  ;;  %v11169_v49 = vor.u32 %v10014_v28, %v8363_v30 }
 0x226   :  { %v2573_v7 = vadd.f32 %v2572_v5, %v10904_v22  ;;  %3332 = vmatpush.bf16.msrb.mxu1 %v9258_v6 }
 0x227   :  { %v11162_v16 = vpop.f32.mrf.mxu3  ;;  %v2661_v23 = vpop.f32.mrf.mxu1  ;;  %13267 = vst [vmem:[#allocation140_spill] sm:$0xff] %v11169_v49  ;;  %v4715_v5 = vmax.f32 %v2749_v59, 0.0 }
 0x228   :  { %v2662_v8 = vadd.f32 %v2661_v23, %v2573_v7 }
 0x22c   :  { %v2750_v18 = vpop.f32.mrf.mxu2 }
 0x22d   :  { %v2751_v4 = vadd.f32 %v2750_v18, %v2662_v8  ;;  %v2575_v22 = vpop.f32.mrf.mxu0 }
 0x22e   :  { %v2576_v31 = vadd.f32 %v2575_v22, %v10911_v35 }
 0x22f   :  { %v11167_v55 = vpop.f32.mrf.mxu3  ;;  %v2664_v17 = vpop.f32.mrf.mxu1  ;;  %v4719_v7 = vmax.f32 %v2751_v4, 0.0 }
 0x230   :  { %v2665_v23 = vadd.f32 %v2664_v17, %v2576_v31  ;;  %2614 = vmatmul.bf16.gmra.mxu0 %v11165_v58 }
 0x231   :  { %v11175_v38 = vpack.c.bf16 %v4719_v7, %v4715_v5  ;;  %2792 = vmatmul.bf16.gmra.mxu2 %v11171_v9  ;;  %v9063_v9 = vld [vmem:[#allocation5 + $0x570] sm:$0xf0] }
 0x232   :  { %2703 = vmatmul.bf16.gmra.mxu1 %v11169_v49 }
 0x233   :  { %13269 = vst [vmem:[#allocation142_spill] sm:$0xff] %v11175_v38 }
 0x234   :  { %2881 = vmatmul.bf16.gmra.mxu3 %v10895_v60  ;;  %v2753_v8 = vpop.f32.mrf.mxu2 }
 0x235   :  { %v2754_v30 = vadd.f32 %v2753_v8, %v2665_v23  ;;  %v2577_v28 = vpop.f32.mrf.mxu0  ;;  %v10046_v23 = vld [vmem:[#allocation5 + $0xd4] sm:$0xf0]  ;;  %v10203_v8 = vld [vmem:[#allocation5 + $0x5c4] sm:$0xf] }
 0x236   :  { %v2578_v35 = vadd.f32 %v2577_v28, %v10920_v41  ;;  %v8477_v41 = vld [vmem:[#allocation5 + $0xc8] sm:$0xf] }
 0x237   :  { %v11180_v62 = vpop.f32.mrf.mxu3  ;;  %v2666_v59 = vpop.f32.mrf.mxu1  ;;  %v4723_v31 = vmax.f32 %v2754_v30, 0.0  ;;  %v8478_v28 = vor.u32 %v10046_v23, %v8477_v41 }
 0x238   :  { %v2667_v6 = vadd.f32 %v2666_v59, %v2578_v35  ;;  %v9111_v35 = vld [vmem:[#allocation5 + $0x5d0] sm:$0xf0]  ;;  %v10078_v59 = vld [vmem:[#allocation5 + $0x1d4] sm:$0xf0] }
 0x239   :  { %3422 = vmatpush.bf16.msrb.mxu2 %v8478_v28 }
 0x23c   :  { %v2755_v10 = vpop.f32.mrf.mxu2 }
 0x23d   :  { %v2756_v40 = vadd.f32 %v2755_v10, %v2667_v6  ;;  %v2580_v18 = vpop.f32.mrf.mxu0  ;;  %v9114_v6 = vor.u32 %v10203_v8, %v9111_v35 }
 0x23e   :  { %v2581_v4 = vadd.f32 %v2580_v18, %v10927_v47  ;;  %v8605_v47 = vld [vmem:[#allocation5 + $0x1c8] sm:$0xf] }
 0x23f   :  { %v11183_v63 = vpop.f32.mrf.mxu3  ;;  %v2669_v22 = vpop.f32.mrf.mxu1  ;;  %v4727_v17 = vmax.f32 %v2756_v40, 0.0  ;;  %v8606_v10 = vor.u32 %v10078_v59, %v8605_v47  ;;  %3244 = vmatpush.bf16.msrb.mxu0 %v9114_v6 }
 0x240   :  { %v2670_v5 = vadd.f32 %v2669_v22, %v2581_v4  ;;  %2895 = vmatmul.bf16.vlgmr.msra.gmra.mxu0 %v10675_v51 }
 0x241   :  { %v11187_v7 = vpack.c.bf16 %v4727_v17, %v4723_v31  ;;  %3073 = vmatmul.bf16.vlgmr.msra.gmra.mxu2 %v10679_v53  ;;  %3511 = vmatpush.bf16.msrb.mxu3 %v8606_v10  ;;  %v10235_v17 = vld [vmem:[#allocation5 + $0x6c4] sm:$0xf] }
 0x242   :  { %2984 = vmatmul.bf16.vlgmr.msra.gmra.mxu1 %v10677_v52 }
 0x243   :  { %13270 = vst [vmem:[#allocation143_spill] sm:$0xff] %v11187_v7  ;;  %v9239_v7 = vld [vmem:[#allocation5 + $0x6d0] sm:$0xf0] }
 0x244   :  { %3162 = vmatmul.bf16.vlgmr.msra.gmra.mxu3 %v10913_v48  ;;  %v2758_v30 = vpop.f32.mrf.mxu2  ;;  %v9242_v41 = vor.u32 %v10235_v17, %v9239_v7 }
 0x245   :  { %v2759_v40 = vadd.f32 %v2758_v30, %v2670_v5  ;;  %v2582_v4 = vpop.f32.mrf.mxu0 }
 0x246   :  { %v2583_v22 = vadd.f32 %v2582_v4, %v10936_v2  ;;  %3333 = vmatpush.bf16.msrb.mxu1 %v9242_v41 }
 0x247   :  { %v11192_v18 = vpop.f32.mrf.mxu3  ;;  %v2671_v31 = vpop.f32.mrf.mxu1  ;;  %v4731_v47 = vmax.f32 %v2759_v40, 0.0 }
 0x248   :  { %v2672_v38 = vadd.f32 %v2671_v31, %v2583_v22 }
 0x24c   :  { %v2760_v23 = vpop.f32.mrf.mxu2 }
 0x24d   :  { %v2761_v48 = vadd.f32 %v2760_v23, %v2672_v38  ;;  %v2585_v8 = vpop.f32.mrf.mxu0 }
 0x24e   :  { %v2586_v5 = vadd.f32 %v2585_v8, %v10943_v46 }
 0x24f   :  { %v11195_v53 = vpop.f32.mrf.mxu3  ;;  %v2674_v35 = vpop.f32.mrf.mxu1  ;;  %v4735_v28 = vmax.f32 %v2761_v48, 0.0 }
 0x250   :  { %v2675_v59 = vadd.f32 %v2674_v35, %v2586_v5  ;;  %2900 = vmatmul.bf16.gmra.mxu0 %v10687_v13  ;;  %v13272_v35 = vld [vmem:[#allocation28_spill] sm:$0xff] }
 0x251   :  { %v11199_v2 = vpack.c.bf16 %v4735_v28, %v4731_v47  ;;  %3078 = vmatmul.bf16.gmra.mxu2 %v10691_v15  ;;  %v13274_v28 = vld [vmem:[#allocation29_spill] sm:$0xff]  ;;  %v9079_v15 = vld [vmem:[#allocation5 + $0x590] sm:$0xf0] }
 0x252   :  { %2989 = vmatmul.bf16.gmra.mxu1 %v10689_v14 }
 0x253   :  { %13271 = vst [vmem:[#allocation144_spill] sm:$0xff] %v11199_v2  ;;  %v10231_v2 = vld [vmem:[#allocation5 + $0x6a4] sm:$0xf] }
 0x254   :  { %3167 = vmatmul.bf16.gmra.mxu3 %v10929_v19  ;;  %v2763_v38 = vpop.f32.mrf.mxu2 }
 0x255   :  { %v2764_v7 = vadd.f32 %v2763_v38, %v2675_v59  ;;  %v2587_v6 = vpop.f32.mrf.mxu0  ;;  %v13276_v59 = vld [vmem:[#allocation89_spill] sm:$0xff]  ;;  %v8461_v38 = vld [vmem:[#allocation5 + $0xa8] sm:$0xf] }
 0x256   :  { %v2588_v46 = vadd.f32 %v2587_v6, %v10952_v33  ;;  %v13275_v33 = vld [vmem:[#allocation30_spill] sm:$0xff]  ;;  %v10042_v6 = vld [vmem:[#allocation5 + $0xb4] sm:$0xf0] }
 0x257   :  { %v11204_v30 = vpop.f32.mrf.mxu3  ;;  %v2676_v10 = vpop.f32.mrf.mxu1  ;;  %v4739_v23 = vmax.f32 %v2764_v7, 0.0 }
 0x258   :  { %v2677_v48 = vadd.f32 %v2676_v10, %v2588_v46  ;;  %v10199_v46 = vld [vmem:[#allocation5 + $0x5a4] sm:$0xf]  ;;  %v8462_v10 = vor.u32 %v10042_v6, %v8461_v38 }
 0x25a   :  { %3423 = vmatpush.bf16.msrb.mxu2 %v8462_v10 }
 0x25c   :  { %v2765_v40 = vpop.f32.mrf.mxu2 }
 0x25d   :  { %v2766_v4 = vadd.f32 %v2765_v40, %v2677_v48  ;;  %v2590_v31 = vpop.f32.mrf.mxu0  ;;  %v9095_v48 = vld [vmem:[#allocation5 + $0x5b0] sm:$0xf0]  ;;  %v10074_v40 = vld [vmem:[#allocation5 + $0x1b4] sm:$0xf0] }
 0x25e   :  { %v2591_v17 = vadd.f32 %v2590_v31, %v10959_v24  ;;  %v8589_v24 = vld [vmem:[#allocation5 + $0x1a8] sm:$0xf] }
 0x25f   :  { %v11207_v22 = vpop.f32.mrf.mxu3  ;;  %v2679_v41 = vpop.f32.mrf.mxu1  ;;  %v4743_v8 = vmax.f32 %v2766_v4, 0.0  ;;  %v9098_v4 = vor.u32 %v10199_v46, %v9095_v48  ;;  %v8590_v31 = vor.u32 %v10074_v40, %v8589_v24 }
 0x260   :  { %v2680_v5 = vadd.f32 %v2679_v41, %v2591_v17  ;;  %2905 = vmatmul.bf16.gmra.mxu0 %v13272_v35 }
 0x261   :  { %v11211_v47 = vpack.c.bf16 %v4743_v8, %v4739_v23  ;;  %3083 = vmatmul.bf16.gmra.mxu2 %v13275_v33  ;;  %3245 = vmatpush.bf16.msrb.mxu0 %v9098_v4 }
 0x262   :  { %2994 = vmatmul.bf16.gmra.mxu1 %v13274_v28  ;;  %3512 = vmatpush.bf16.msrb.mxu3 %v8590_v31  ;;  %v13280_v31 = vld [vmem:[#allocation33_spill] sm:$0xff] }
 0x263   :  { %13273 = vst [vmem:[#allocation145_spill] sm:$0xff] %v11211_v47 }
 0x264   :  { %3172 = vmatmul.bf16.gmra.mxu3 %v13276_v59  ;;  %v2768_v7 = vpop.f32.mrf.mxu2  ;;  %v9223_v59 = vld [vmem:[#allocation5 + $0x6b0] sm:$0xf0] }
 0x265   :  { %v2769_v17 = vadd.f32 %v2768_v7, %v2680_v5  ;;  %v2592_v23 = vpop.f32.mrf.mxu0  ;;  %v9226_v38 = vor.u32 %v10231_v2, %v9223_v59  ;;  %v13277_v5 = vld [vmem:[#allocation95_spill] sm:$0xff]  ;;  %v13282_v2 = vld [vmem:[#allocation92_spill] sm:$0xff] }
 0x266   :  { %v2593_v8 = vadd.f32 %v2592_v23, %v10968_v1  ;;  %v13278_v1 = vld [vmem:[#allocation32_spill] sm:$0xff] }
 0x267   :  { %v11216_v41 = vpop.f32.mrf.mxu3  ;;  %v2681_v47 = vpop.f32.mrf.mxu1  ;;  %3334 = vmatpush.bf16.msrb.mxu1 %v9226_v38  ;;  %v4747_v40 = vmax.f32 %v2769_v17, 0.0  ;;  %v13283_v38 = vld [vmem:[#allocation99_spill] sm:$0xff] }
 0x268   :  { %v2682_v33 = vadd.f32 %v2681_v47, %v2593_v8  ;;  %v13281_v47 = vld [vmem:[#allocation34_spill] sm:$0xff] }
 0x26c   :  { %v2770_v6 = vpop.f32.mrf.mxu2 }
 0x26d   :  { %v2771_v28 = vadd.f32 %v2770_v6, %v2682_v33  ;;  %v2595_v46 = vpop.f32.mrf.mxu0 }
 0x26e   :  { %v2596_v48 = vadd.f32 %v2595_v46, %v13277_v5 }
 0x26f   :  { %v11219_v19 = vpop.f32.mrf.mxu3  ;;  %v2684_v24 = vpop.f32.mrf.mxu1  ;;  %v4751_v10 = vmax.f32 %v2771_v28, 0.0 }
 0x270   :  { %v2685_v7 = vadd.f32 %v2684_v24, %v2596_v48  ;;  %2910 = vmatmul.bf16.gmra.mxu0 %v13278_v1 }
 0x271   :  { %v11223_v4 = vpack.c.bf16 %v4751_v10, %v4747_v40  ;;  %3088 = vmatmul.bf16.gmra.mxu2 %v13281_v47 }
 0x272   :  { %2999 = vmatmul.bf16.gmra.mxu1 %v13280_v31  ;;  %v13284_v31 = vld [vmem:[#allocation36_spill] sm:$0xff] }
 0x273   :  { %13279 = vst [vmem:[#allocation95_spill] sm:$0xff] %v11223_v4 }
 0x274   :  { %3177 = vmatmul.bf16.gmra.mxu3 %v13282_v2  ;;  %v2773_v33 = vpop.f32.mrf.mxu2 }
 0x275   :  { %v2774_v59 = vadd.f32 %v2773_v33, %v2685_v7  ;;  %v2597_v8 = vpop.f32.mrf.mxu0  ;;  %v13286_v33 = vld [vmem:[#allocation37_spill] sm:$0xff] }
 0x276   :  { %v2598_v6 = vadd.f32 %v2597_v8, %v13283_v38  ;;  %v13287_v8 = vld [vmem:[#allocation38_spill] sm:$0xff]  ;;  %v13288_v38 = vld [vmem:[#allocation96_spill] sm:$0xff] }
 0x277   :  { %v11228_v23 = vpop.f32.mrf.mxu3  ;;  %v2686_v17 = vpop.f32.mrf.mxu1  ;;  %v4755_v4 = vmax.f32 %v2774_v59, 0.0 }
 0x278   :  { %v2687_v28 = vadd.f32 %v2686_v17, %v2598_v6  ;;  %v8445_v6 = vld [vmem:[#allocation5 + $0x88] sm:$0xf]  ;;  %v10038_v17 = vld [vmem:[#allocation5 + $0x94] sm:$0xf0] }
 0x27c   :  { %v2775_v46 = vpop.f32.mrf.mxu2 }
 0x27d   :  { %v2776_v5 = vadd.f32 %v2775_v46, %v2687_v28  ;;  %v2600_v24 = vpop.f32.mrf.mxu0  ;;  %v10195_v28 = vld [vmem:[#allocation5 + $0x584] sm:$0xf]  ;;  %v8446_v46 = vor.u32 %v10038_v17, %v8445_v6 }
 0x27e   :  { %v2601_v40 = vadd.f32 %v2600_v24, %v10991_v0  ;;  %v8573_v0 = vld [vmem:[#allocation5 + $0x188] sm:$0xf]  ;;  %v10070_v24 = vld [vmem:[#allocation5 + $0x194] sm:$0xf0] }
 0x27f   :  { %v11231_v48 = vpop.f32.mrf.mxu3  ;;  %v2689_v10 = vpop.f32.mrf.mxu1  ;;  %v4759_v47 = vmax.f32 %v2776_v5, 0.0  ;;  %v9082_v5 = vor.u32 %v10195_v28, %v9079_v15  ;;  %3424 = vmatpush.bf16.msrb.mxu2 %v8446_v46 }
 0x280   :  { %v2690_v2 = vadd.f32 %v2689_v10, %v2601_v40  ;;  %2915 = vmatmul.bf16.gmra.mxu0 %v13284_v31  ;;  %v8574_v40 = vor.u32 %v10070_v24, %v8573_v0 }
 0x281   :  { %v11235_v7 = vpack.c.bf16 %v4759_v47, %v4755_v4  ;;  %3093 = vmatmul.bf16.gmra.mxu2 %v13287_v8  ;;  %3246 = vmatpush.bf16.msrb.mxu0 %v9082_v5  ;;  %v9207_v8 = vld [vmem:[#allocation5 + $0x690] sm:$0xf0] }
 0x282   :  { %3004 = vmatmul.bf16.gmra.mxu1 %v13286_v33  ;;  %3513 = vmatpush.bf16.msrb.mxu3 %v8574_v40  ;;  %v13292_v40 = vld [vmem:[#allocation41_spill] sm:$0xff] }
 0x283   :  { %13285 = vst [vmem:[#allocation99_spill] sm:$0xff] %v11235_v7 }
 0x284   :  { %3182 = vmatmul.bf16.gmra.mxu3 %v13288_v38  ;;  %v2778_v59 = vpop.f32.mrf.mxu2  ;;  %v10227_v38 = vld [vmem:[#allocation5 + $0x684] sm:$0xf] }
 0x285   :  { %v2779_v10 = vadd.f32 %v2778_v59, %v2690_v2  ;;  %v2602_v4 = vpop.f32.mrf.mxu0  ;;  %v9210_v6 = vor.u32 %v10227_v38, %v9207_v8  ;;  %v13289_v2 = vld [vmem:[#allocation103_spill] sm:$0xff]  ;;  %v13294_v8 = vld [vmem:[#allocation100_spill] sm:$0xff] }
 0x286   :  { %v2603_v47 = vadd.f32 %v2602_v4, %v11000_v61  ;;  %v13290_v61 = vld [vmem:[#allocation40_spill] sm:$0xff] }
 0x287   :  { %v11240_v14 = vpop.f32.mrf.mxu3  ;;  %v2691_v7 = vpop.f32.mrf.mxu1  ;;  %3335 = vmatpush.bf16.msrb.mxu1 %v9210_v6  ;;  %v4763_v24 = vmax.f32 %v2779_v10, 0.0  ;;  %v13295_v6 = vld [vmem:[#allocation107_spill] sm:$0xff] }
 0x288   :  { %v2692_v33 = vadd.f32 %v2691_v7, %v2603_v47  ;;  %v13293_v7 = vld [vmem:[#allocation42_spill] sm:$0xff] }
 0x28c   :  { %v2780_v17 = vpop.f32.mrf.mxu2 }
 0x28d   :  { %v2781_v52 = vadd.f32 %v2780_v17, %v2692_v33  ;;  %v2605_v15 = vpop.f32.mrf.mxu0 }
 0x28e   :  { %v2606_v28 = vadd.f32 %v2605_v15, %v13289_v2 }
 0x28f   :  { %v11243_v60 = vpop.f32.mrf.mxu3  ;;  %v2694_v0 = vpop.f32.mrf.mxu1  ;;  %v4767_v46 = vmax.f32 %v2781_v52, 0.0 }
 0x290   :  { %v2695_v59 = vadd.f32 %v2694_v0, %v2606_v28  ;;  %2920 = vmatmul.bf16.gmra.mxu0 %v13290_v61 }
 0x291   :  { %v11247_v5 = vpack.c.bf16 %v4767_v46, %v4763_v24  ;;  %3098 = vmatmul.bf16.gmra.mxu2 %v13293_v7 }
 0x292   :  { %3009 = vmatmul.bf16.gmra.mxu1 %v13292_v40  ;;  %v13297_v40 = vld [vmem:[#allocation44_spill] sm:$0xff] }
 0x293   :  { %13291 = vst [vmem:[#allocation103_spill] sm:$0xff] %v11247_v5 }
 0x294   :  { %3187 = vmatmul.bf16.gmra.mxu3 %v13294_v8  ;;  %v2783_v33 = vpop.f32.mrf.mxu2 }
 0x295   :  { %v2784_v38 = vadd.f32 %v2783_v33, %v2695_v59  ;;  %v2607_v47 = vpop.f32.mrf.mxu0  ;;  %v13299_v33 = vld [vmem:[#allocation45_spill] sm:$0xff] }
 0x296   :  { %v2608_v17 = vadd.f32 %v2607_v47, %v13295_v6  ;;  %v13300_v47 = vld [vmem:[#allocation46_spill] sm:$0xff]  ;;  %v13301_v6 = vld [vmem:[#allocation104_spill] sm:$0xff] }
 0x297   :  { %v11252_v4 = vpop.f32.mrf.mxu3  ;;  %v2696_v10 = vpop.f32.mrf.mxu1  ;;  %v4771_v5 = vmax.f32 %v2784_v38, 0.0 }
 0x298   :  { %v2697_v52 = vadd.f32 %v2696_v10, %v2608_v17  ;;  %v8429_v17 = vld [vmem:[#allocation5 + $0x68] sm:$0xf]  ;;  %v10034_v10 = vld [vmem:[#allocation5 + $0x74] sm:$0xf0] }
 0x29c   :  { %v2785_v15 = vpop.f32.mrf.mxu2 }
 0x29d   :  { %v2786_v2 = vadd.f32 %v2785_v15, %v2697_v52  ;;  %v2610_v0 = vpop.f32.mrf.mxu0  ;;  %v10191_v52 = vld [vmem:[#allocation5 + $0x564] sm:$0xf]  ;;  %v8430_v15 = vor.u32 %v10034_v10, %v8429_v17 }
 0x29e   :  { %v2611_v24 = vadd.f32 %v2610_v0, %v11023_v44  ;;  %v8557_v44 = vld [vmem:[#allocation5 + $0x168] sm:$0xf]  ;;  %v10066_v0 = vld [vmem:[#allocation5 + $0x174] sm:$0xf0] }
 0x29f   :  { %v11255_v28 = vpop.f32.mrf.mxu3  ;;  %v2699_v46 = vpop.f32.mrf.mxu1  ;;  %v4775_v7 = vmax.f32 %v2786_v2, 0.0  ;;  %v9066_v2 = vor.u32 %v10191_v52, %v9063_v9  ;;  %3425 = vmatpush.bf16.msrb.mxu2 %v8430_v15 }
 0x2a0   :  { %13296 = vst [vmem:[#allocation107_spill] sm:$0xff] %v11255_v28  ;;  %v2700_v8 = vadd.f32 %v2699_v46, %v2611_v24  ;;  %2925 = vmatmul.bf16.gmra.mxu0 %v13297_v40  ;;  %v8558_v24 = vor.u32 %v10066_v0, %v8557_v44 }
 0x2a1   :  { %v11259_v59 = vpack.c.bf16 %v4775_v7, %v4771_v5  ;;  %3103 = vmatmul.bf16.gmra.mxu2 %v13300_v47  ;;  %3247 = vmatpush.bf16.msrb.mxu0 %v9066_v2  ;;  %v9191_v47 = vld [vmem:[#allocation5 + $0x670] sm:$0xf0]  ;;  %v13304_v2 = vld [vmem:[#allocation49_spill] sm:$0xff] }
 0x2a2   :  { %3014 = vmatmul.bf16.gmra.mxu1 %v13299_v33  ;;  %3514 = vmatpush.bf16.msrb.mxu3 %v8558_v24 }
 0x2a3   :  { %13298 = vst [vmem:[#allocation146_spill] sm:$0xff] %v11259_v59 }
 0x2a4   :  { %3192 = vmatmul.bf16.gmra.mxu3 %v13301_v6  ;;  %v2788_v38 = vpop.f32.mrf.mxu2  ;;  %v10223_v6 = vld [vmem:[#allocation5 + $0x664] sm:$0xf] }
 0x2a5   :  { %v2789_v46 = vadd.f32 %v2788_v38, %v2700_v8  ;;  %v2612_v5 = vpop.f32.mrf.mxu0  ;;  %v9194_v17 = vor.u32 %v10223_v6, %v9191_v47 }
 0x2a6   :  { %v2613_v7 = vadd.f32 %v2612_v5, %v11032_v12  ;;  %v13302_v12 = vld [vmem:[#allocation48_spill] sm:$0xff] }
 0x2a7   :  { %v11264_v49 = vpop.f32.mrf.mxu3  ;;  %v2701_v59 = vpop.f32.mrf.mxu1  ;;  %3336 = vmatpush.bf16.msrb.mxu1 %v9194_v17  ;;  %v4779_v44 = vmax.f32 %v2789_v46, 0.0 }
 0x2a8   :  { %v2702_v33 = vadd.f32 %v2701_v59, %v2613_v7  ;;  %v13305_v59 = vld [vmem:[#allocation50_spill] sm:$0xff] }
 0x2ac   :  { %v2790_v10 = vpop.f32.mrf.mxu2 }
 0x2ad   :  { %v2791_v40 = vadd.f32 %v2790_v10, %v2702_v33  ;;  %v2615_v9 = vpop.f32.mrf.mxu0 }
 0x2ae   :  { %v2616_v8 = vadd.f32 %v2615_v9, %v11039_v56  ;;  %v13306_v56 = vld [vmem:[#allocation114_spill] sm:$0xff] }
 0x2af   :  { %v11267_v28 = vpop.f32.mrf.mxu3  ;;  %v2704_v52 = vpop.f32.mrf.mxu1  ;;  %v4783_v15 = vmax.f32 %v2791_v40, 0.0  ;;  %v11279_v40 = vld [vmem:[#allocation7] sm:$0xf] }
 0x2b0   :  { %v2705_v0 = vadd.f32 %v2704_v52, %v2616_v8  ;;  %2930 = vmatmul.bf16.gmra.mxu0 %v13302_v12  ;;  %13307 = vst [vmem:[#allocation114_spill] sm:$0xff] %v11279_v40  ;;  %v11282_v7 = vperm.slane %v11279_v40, 1  ;;  %v9047_v40 = vld [vmem:[#allocation5 + $0x550] sm:$0xf0] }
 0x2b1   :  { %v11271_v38 = vpack.c.bf16 %v4783_v15, %v4779_v44  ;;  %3108 = vmatmul.bf16.gmra.mxu2 %v13305_v59  ;;  %v13311_v59 = vld [vmem:[#allocation53_spill] sm:$0xff] }
 0x2b2   :  { %3019 = vmatmul.bf16.gmra.mxu1 %v13304_v2  ;;  %v2808_v10 = vadd.f32 %v11054_v26, %v11282_v7  ;;  %v8413_v26 = vld [vmem:[#allocation5 + $0x48] sm:$0xf] }
 0x2b3   :  { %13303 = vst [vmem:[#allocation147_spill] sm:$0xff] %v11271_v38 }
 0x2b4   :  { %3197 = vmatmul.bf16.gmra.mxu3 %v11025_v50  ;;  %v2793_v33 = vpop.f32.mrf.mxu2 }
 0x2b5   :  { %v2794_v47 = vadd.f32 %v2793_v33, %v2705_v0  ;;  %v2617_v24 = vpop.f32.mrf.mxu0 }
 0x2b6   :  { %v2618_v5 = vadd.f32 %v2617_v24, %v13306_v56  ;;  %v13309_v56 = vld [vmem:[#allocation52_spill] sm:$0xff] }
 0x2b7   :  { %v11276_v6 = vpop.f32.mrf.mxu3  ;;  %v2706_v46 = vpop.f32.mrf.mxu1  ;;  %v4787_v33 = vmax.f32 %v2794_v47, 0.0  ;;  %v2810_v47 = vadd.f32 %v11059_v3, %v11282_v7  ;;  %v2813_v3 = vadd.f32 %v11072_v34, %v11282_v7  ;;  %v2815_v34 = vadd.f32 %v11077_v57, %v11282_v7 }
 0x2b8   :  { %v2707_v17 = vadd.f32 %v2706_v46, %v2618_v5  ;;  %v13312_v5 = vld [vmem:[#allocation54_spill] sm:$0xff]  ;;  %v13313_v46 = vld [vmem:[#allocation111_spill] sm:$0xff] }
 0x2bc   :  { %v2795_v9 = vpop.f32.mrf.mxu2 }
 0x2bd   :  { %v2796_v8 = vadd.f32 %v2795_v9, %v2707_v17  ;;  %v2896_v44 = vpop.f32.mrf.mxu0  ;;  %v10030_v17 = vld [vmem:[#allocation5 + $0x54] sm:$0xf0]  ;;  %v10187_v9 = vld [vmem:[#allocation5 + $0x544] sm:$0xf] }
 0x2be   :  { %v2897_v15 = vadd.f32 %v2896_v44, %v2808_v10  ;;  %v8414_v2 = vor.u32 %v10030_v17, %v8413_v26  ;;  %v8541_v10 = vld [vmem:[#allocation5 + $0x148] sm:$0xf]  ;;  %v10062_v44 = vld [vmem:[#allocation5 + $0x154] sm:$0xf0]  ;;  %v10219_v26 = vld [vmem:[#allocation5 + $0x644] sm:$0xf] }
 0x2bf   :  { %v11286_v52 = vpop.f32.mrf.mxu3  ;;  %v2985_v0 = vpop.f32.mrf.mxu1  ;;  %v4791_v38 = vmax.f32 %v2796_v8, 0.0  ;;  %v9175_v17 = vld [vmem:[#allocation5 + $0x650] sm:$0xf0] }
 0x2c0   :  { %13308 = vst [vmem:[#allocation148_spill] sm:$0xff] %v11286_v52  ;;  %v2986_v24 = vadd.f32 %v2985_v0, %v2897_v15  ;;  %2935 = vmatmul.bf16.gmra.mxu0 %v13309_v56  ;;  %v9050_v15 = vor.u32 %v10187_v9, %v9047_v40  ;;  %3426 = vmatpush.bf16.msrb.mxu2 %v8414_v2 }
 0x2c1   :  { %v11289_v50 = vpack.c.bf16 %v4791_v38, %v4787_v33  ;;  %3113 = vmatmul.bf16.gmra.mxu2 %v13312_v5  ;;  %v8542_v38 = vor.u32 %v10062_v44, %v8541_v10  ;;  %v9178_v52 = vor.u32 %v10219_v26, %v9175_v17 }
 0x2c2   :  { %3024 = vmatmul.bf16.gmra.mxu1 %v13311_v59  ;;  %3248 = vmatpush.bf16.msrb.mxu0 %v9050_v15  ;;  %v13315_v15 = vld [vmem:[#allocation57_spill] sm:$0xff] }
 0x2c3   :  { %13310 = vst [vmem:[#allocation149_spill] sm:$0xff] %v11289_v50  ;;  %3515 = vmatpush.bf16.msrb.mxu3 %v8542_v38  ;;  %3337 = vmatpush.bf16.msrb.mxu1 %v9178_v52  ;;  %v13316_v38 = vld [vmem:[#allocation58_spill] sm:$0xff] }
 0x2c4   :  { %3202 = vmatmul.bf16.gmra.mxu3 %v13313_v46  ;;  %v3074_v8 = vpop.f32.mrf.mxu2 }
 0x2c5   :  { %v3075_v0 = vadd.f32 %v3074_v8, %v2986_v24  ;;  %v2898_v50 = vpop.f32.mrf.mxu0  ;;  %v13314_v8 = vld [vmem:[#allocation56_spill] sm:$0xff] }
 0x2c6   :  { %v2899_v5 = vadd.f32 %v2898_v50, %v2810_v47 }
 0x2c7   :  { %v3163_v33 = vpop.f32.mrf.mxu3  ;;  %v2987_v59 = vpop.f32.mrf.mxu1 }
 0x2c8   :  { %v11296_v46 = vadd.f32 %v3163_v33, %v3075_v0  ;;  %v2988_v56 = vadd.f32 %v2987_v59, %v2899_v5 }
 0x2cc   :  { %v3076_v40 = vpop.f32.mrf.mxu2 }
 0x2cd   :  { %v3077_v9 = vadd.f32 %v3076_v40, %v2988_v56  ;;  %v2901_v10 = vpop.f32.mrf.mxu0 }
 0x2ce   :  { %v2902_v44 = vadd.f32 %v2901_v10, %v2813_v3  ;;  %v2818_v3 = vadd.f32 %v11090_v29, %v11282_v7  ;;  %v10183_v29 = vld [vmem:[#allocation5 + $0x524] sm:$0xf] }
 0x2cf   :  { %v3165_v24 = vpop.f32.mrf.mxu3  ;;  %v2990_v2 = vpop.f32.mrf.mxu1 }
 0x2d0   :  { %v11300_v50 = vadd.f32 %v3165_v24, %v3077_v9  ;;  %v2991_v47 = vadd.f32 %v2990_v2, %v2902_v44  ;;  %2940 = vmatmul.bf16.gmra.mxu0 %v13314_v8 }
 0x2d1   :  { %3118 = vmatmul.bf16.gmra.mxu2 %v13316_v38 }
 0x2d2   :  { %3029 = vmatmul.bf16.gmra.mxu1 %v13315_v15 }
 0x2d4   :  { %3207 = vmatmul.bf16.gmra.mxu3 %v11057_v11  ;;  %v3079_v59 = vpop.f32.mrf.mxu2 }
 0x2d5   :  { %v3080_v52 = vadd.f32 %v3079_v59, %v2991_v47  ;;  %v2903_v5 = vpop.f32.mrf.mxu0  ;;  %v13317_v47 = vld [vmem:[#allocation60_spill] sm:$0xff]  ;;  %v13318_v59 = vld [vmem:[#allocation61_spill] sm:$0xff] }
 0x2d6   :  { %v2904_v0 = vadd.f32 %v2903_v5, %v2815_v34  ;;  %v13319_v34 = vld [vmem:[#allocation62_spill] sm:$0xff] }
 0x2d7   :  { %v3168_v56 = vpop.f32.mrf.mxu3  ;;  %v2992_v33 = vpop.f32.mrf.mxu1 }
 0x2d8   :  { %v11308_v26 = vadd.f32 %v3168_v56, %v3080_v52  ;;  %v2993_v17 = vadd.f32 %v2992_v33, %v2904_v0  ;;  %v8397_v52 = vld [vmem:[#allocation5 + $0x28] sm:$0xf]  ;;  %v10026_v56 = vld [vmem:[#allocation5 + $0x34] sm:$0xf0]  ;;  %v9031_v0 = vld [vmem:[#allocation5 + $0x530] sm:$0xf0] }
 0x2d9   :  { %v8398_v5 = vor.u32 %v10026_v56, %v8397_v52  ;;  %v8525_v33 = vld [vmem:[#allocation5 + $0x128] sm:$0xf]  ;;  %v10215_v52 = vld [vmem:[#allocation5 + $0x624] sm:$0xf]  ;;  %v9159_v56 = vld [vmem:[#allocation5 + $0x630] sm:$0xf0] }
 0x2da   :  { %v9162_v15 = vor.u32 %v10215_v52, %v9159_v56 }
 0x2db   :  { %3427 = vmatpush.bf16.msrb.mxu2 %v8398_v5 }
 0x2dc   :  { %v3081_v40 = vpop.f32.mrf.mxu2  ;;  %3338 = vmatpush.bf16.msrb.mxu1 %v9162_v15 }
 0x2dd   :  { %v3082_v9 = vadd.f32 %v3081_v40, %v2993_v17  ;;  %v2906_v10 = vpop.f32.mrf.mxu0  ;;  %v10058_v17 = vld [vmem:[#allocation5 + $0x134] sm:$0xf0] }
 0x2de   :  { %v2907_v44 = vadd.f32 %v2906_v10, %v2818_v3  ;;  %v2820_v3 = vadd.f32 %v11095_v45, %v11282_v7  ;;  %v2823_v45 = vadd.f32 %v11108_v27, %v11282_v7  ;;  %v2825_v27 = vadd.f32 %v11113_v36, %v11282_v7 }
 0x2df   :  { %v3170_v24 = vpop.f32.mrf.mxu3  ;;  %v2995_v2 = vpop.f32.mrf.mxu1 }
 0x2e0   :  { %v11312_v11 = vadd.f32 %v3170_v24, %v3082_v9  ;;  %v2996_v57 = vadd.f32 %v2995_v2, %v2907_v44  ;;  %2945 = vmatmul.bf16.gmra.mxu0 %v13317_v47  ;;  %v9034_v9 = vor.u32 %v10183_v29, %v9031_v0  ;;  %v8526_v24 = vor.u32 %v10058_v17, %v8525_v33 }
 0x2e1   :  { %3123 = vmatmul.bf16.gmra.mxu2 %v13319_v34 }
 0x2e2   :  { %3034 = vmatmul.bf16.gmra.mxu1 %v13318_v59  ;;  %3249 = vmatpush.bf16.msrb.mxu0 %v9034_v9  ;;  %v13320_v9 = vld [vmem:[#allocation64_spill] sm:$0xff] }
 0x2e3   :  { %3516 = vmatpush.bf16.msrb.mxu3 %v8526_v24  ;;  %v13321_v24 = vld [vmem:[#allocation65_spill] sm:$0xff] }
 0x2e4   :  { %3212 = vmatmul.bf16.gmra.mxu3 %v11075_v20  ;;  %v3084_v40 = vpop.f32.mrf.mxu2 }
 0x2e5   :  { %v3085_v10 = vadd.f32 %v3084_v40, %v2996_v57  ;;  %v2908_v2 = vpop.f32.mrf.mxu0 }
 0x2e6   :  { %v2909_v34 = vadd.f32 %v2908_v2, %v2820_v3 }
 0x2e7   :  { %v3173_v44 = vpop.f32.mrf.mxu3  ;;  %v2997_v59 = vpop.f32.mrf.mxu1 }
 0x2e8   :  { %v11320_v20 = vadd.f32 %v3173_v44, %v3085_v10  ;;  %v2998_v38 = vadd.f32 %v2997_v59, %v2909_v34  ;;  %v13322_v10 = vld [vmem:[#allocation66_spill] sm:$0xff] }
 0x2ec   :  { %v3086_v29 = vpop.f32.mrf.mxu2 }
 0x2ed   :  { %v3087_v0 = vadd.f32 %v3086_v29, %v2998_v38  ;;  %v2911_v33 = vpop.f32.mrf.mxu0 }
 0x2ee   :  { %v2912_v17 = vadd.f32 %v2911_v33, %v2823_v45  ;;  %v2828_v45 = vadd.f32 %v11126_v39, %v11282_v7  ;;  %v10179_v39 = vld [vmem:[#allocation5 + $0x504] sm:$0xf] }
 0x2ef   :  { %v3175_v57 = vpop.f32.mrf.mxu3  ;;  %v3000_v5 = vpop.f32.mrf.mxu1 }
 0x2f0   :  { %v11324_v3 = vadd.f32 %v3175_v57, %v3087_v0  ;;  %v3001_v40 = vadd.f32 %v3000_v5, %v2912_v17  ;;  %2950 = vmatmul.bf16.gmra.mxu0 %v13320_v9 }
 0x2f1   :  { %3128 = vmatmul.bf16.gmra.mxu2 %v13322_v10 }
 0x2f2   :  { %3039 = vmatmul.bf16.gmra.mxu1 %v13321_v24 }
 0x2f4   :  { %3217 = vmatmul.bf16.gmra.mxu3 %v11093_v37  ;;  %v3089_v15 = vpop.f32.mrf.mxu2 }
 0x2f5   :  { %v3090_v38 = vadd.f32 %v3089_v15, %v3001_v40  ;;  %v2913_v34 = vpop.f32.mrf.mxu0  ;;  %v13323_v40 = vld [vmem:[#allocation68_spill] sm:$0xff]  ;;  %v13324_v15 = vld [vmem:[#allocation69_spill] sm:$0xff] }
 0x2f6   :  { %v2914_v44 = vadd.f32 %v2913_v34, %v2825_v27  ;;  %v13325_v27 = vld [vmem:[#allocation70_spill] sm:$0xff] }
 0x2f7   :  { %v3178_v59 = vpop.f32.mrf.mxu3  ;;  %v3002_v2 = vpop.f32.mrf.mxu1 }
 0x2f8   :  { %v11332_v52 = vadd.f32 %v3178_v59, %v3090_v38  ;;  %v3003_v56 = vadd.f32 %v3002_v2, %v2914_v44  ;;  %v8381_v38 = vld [vmem:[#allocation5 + $0x8] sm:$0xf]  ;;  %v10022_v59 = vld [vmem:[#allocation5 + $0x14] sm:$0xf0]  ;;  %v9015_v44 = vld [vmem:[#allocation5 + $0x510] sm:$0xf0] }
 0x2f9   :  { %v8382_v34 = vor.u32 %v10022_v59, %v8381_v38  ;;  %v8509_v2 = vld [vmem:[#allocation5 + $0x108] sm:$0xf]  ;;  %v10211_v38 = vld [vmem:[#allocation5 + $0x604] sm:$0xf]  ;;  %v9143_v59 = vld [vmem:[#allocation5 + $0x610] sm:$0xf0] }
 0x2fa   :  { %v9146_v24 = vor.u32 %v10211_v38, %v9143_v59 }
 0x2fb   :  { %3428 = vmatpush.bf16.msrb.mxu2 %v8382_v34 }
 0x2fc   :  { %v3091_v29 = vpop.f32.mrf.mxu2  ;;  %3339 = vmatpush.bf16.msrb.mxu1 %v9146_v24 }
 0x2fd   :  { %v3092_v0 = vadd.f32 %v3091_v29, %v3003_v56  ;;  %v2916_v33 = vpop.f32.mrf.mxu0  ;;  %v10054_v56 = vld [vmem:[#allocation5 + $0x114] sm:$0xf0] }
 0x2fe   :  { %v2917_v17 = vadd.f32 %v2916_v33, %v2828_v45  ;;  %v2830_v45 = vadd.f32 %v11131_v25, %v11282_v7  ;;  %v2833_v25 = vadd.f32 %v11144_v21, %v11282_v7  ;;  %v2835_v21 = vadd.f32 %v11149_v32, %v11282_v7 }
 0x2ff   :  { %v3180_v57 = vpop.f32.mrf.mxu3  ;;  %v3005_v5 = vpop.f32.mrf.mxu1 }
 0x300   :  { %v11336_v37 = vadd.f32 %v3180_v57, %v3092_v0  ;;  %v3006_v36 = vadd.f32 %v3005_v5, %v2917_v17  ;;  %2955 = vmatmul.bf16.gmra.mxu0 %v13323_v40  ;;  %v9018_v0 = vor.u32 %v10179_v39, %v9015_v44  ;;  %v8510_v57 = vor.u32 %v10054_v56, %v8509_v2 }
 0x301   :  { %3133 = vmatmul.bf16.gmra.mxu2 %v13325_v27 }
 0x302   :  { %3044 = vmatmul.bf16.gmra.mxu1 %v13324_v15  ;;  %3250 = vmatpush.bf16.msrb.mxu0 %v9018_v0  ;;  %v13326_v0 = vld [vmem:[#allocation72_spill] sm:$0xff] }
 0x303   :  { %3517 = vmatpush.bf16.msrb.mxu3 %v8510_v57  ;;  %v13327_v57 = vld [vmem:[#allocation73_spill] sm:$0xff] }
 0x304   :  { %3222 = vmatmul.bf16.gmra.mxu3 %v11111_v42  ;;  %v3094_v29 = vpop.f32.mrf.mxu2 }
 0x305   :  { %v3095_v33 = vadd.f32 %v3094_v29, %v3006_v36  ;;  %v2918_v5 = vpop.f32.mrf.mxu0 }
 0x306   :  { %v2919_v27 = vadd.f32 %v2918_v5, %v2830_v45 }
 0x307   :  { %v3183_v17 = vpop.f32.mrf.mxu3  ;;  %v3007_v15 = vpop.f32.mrf.mxu1 }
 0x308   :  { %v11344_v42 = vadd.f32 %v3183_v17, %v3095_v33  ;;  %v3008_v10 = vadd.f32 %v3007_v15, %v2919_v27  ;;  %v13328_v33 = vld [vmem:[#allocation74_spill] sm:$0xff] }
 0x30c   :  { %v3096_v39 = vpop.f32.mrf.mxu2 }
 0x30d   :  { %v3097_v44 = vadd.f32 %v3096_v39, %v3008_v10  ;;  %v2921_v2 = vpop.f32.mrf.mxu0 }
 0x30e   :  { %v2922_v56 = vadd.f32 %v2921_v2, %v2833_v25  ;;  %v2838_v25 = vadd.f32 %v11162_v16, %v11282_v7  ;;  %v8749_v16 = vld [vmem:[#allocation5 + $0x2e8] sm:$0xf] }
 0x30f   :  { %v3185_v36 = vpop.f32.mrf.mxu3  ;;  %v3010_v34 = vpop.f32.mrf.mxu1 }
 0x310   :  { %v11348_v45 = vadd.f32 %v3185_v36, %v3097_v44  ;;  %v3011_v29 = vadd.f32 %v3010_v34, %v2922_v56  ;;  %2960 = vmatmul.bf16.gmra.mxu0 %v13326_v0 }
 0x311   :  { %3138 = vmatmul.bf16.gmra.mxu2 %v13328_v33 }
 0x312   :  { %3049 = vmatmul.bf16.gmra.mxu1 %v13327_v57 }
 0x314   :  { %3227 = vmatmul.bf16.gmra.mxu3 %v11129_v43  ;;  %v3099_v24 = vpop.f32.mrf.mxu2 }
 0x315   :  { %v3100_v10 = vadd.f32 %v3099_v24, %v3011_v29  ;;  %v2923_v27 = vpop.f32.mrf.mxu0  ;;  %v13329_v29 = vld [vmem:[#allocation76_spill] sm:$0xff]  ;;  %v13330_v24 = vld [vmem:[#allocation77_spill] sm:$0xff] }
 0x316   :  { %v2924_v17 = vadd.f32 %v2923_v27, %v2835_v21  ;;  %v13331_v21 = vld [vmem:[#allocation78_spill] sm:$0xff] }
 0x317   :  { %v3188_v15 = vpop.f32.mrf.mxu3  ;;  %v3012_v5 = vpop.f32.mrf.mxu1 }
 0x318   :  { %v11356_v38 = vadd.f32 %v3188_v15, %v3100_v10  ;;  %v3013_v59 = vadd.f32 %v3012_v5, %v2924_v17  ;;  %v9005_v10 = vld [vmem:[#allocation5 + $0x4e8] sm:$0xf]  ;;  %v10178_v15 = vld [vmem:[#allocation5 + $0x4f4] sm:$0xf0] }
 0x319   :  { %v9006_v27 = vor.u32 %v10178_v15, %v9005_v10  ;;  %v10114_v17 = vld [vmem:[#allocation5 + $0x2f4] sm:$0xf0]  ;;  %v9133_v5 = vld [vmem:[#allocation5 + $0x5e8] sm:$0xf] }
 0x31a   :  { %v8877_v10 = vld [vmem:[#allocation5 + $0x3e8] sm:$0xf]  ;;  %v10146_v15 = vld [vmem:[#allocation5 + $0x3f4] sm:$0xf0] }
 0x31b   :  { %3777 = vmatpush.bf16.msra.mxu2 %v9006_v27  ;;  %v8878_v57 = vor.u32 %v10146_v15, %v8877_v10 }
 0x31c   :  { %v3101_v39 = vpop.f32.mrf.mxu2 }
 0x31d   :  { %v3102_v44 = vadd.f32 %v3101_v39, %v3013_v59  ;;  %v2926_v2 = vpop.f32.mrf.mxu0  ;;  %v10210_v59 = vld [vmem:[#allocation5 + $0x5f4] sm:$0xf0]  ;;  %3688 = vmatpush.bf16.msra.mxu1 %v8878_v57 }
 0x31e   :  { %v2927_v56 = vadd.f32 %v2926_v2, %v2838_v25  ;;  %v2840_v25 = vadd.f32 %v11167_v55, %v11282_v7  ;;  %v2843_v55 = vadd.f32 %v11180_v62, %v11282_v7  ;;  %v2845_v62 = vadd.f32 %v11183_v63, %v11282_v7 }
 0x31f   :  { %v3190_v36 = vpop.f32.mrf.mxu3  ;;  %v3015_v34 = vpop.f32.mrf.mxu1 }
 0x320   :  { %v11360_v43 = vadd.f32 %v3190_v36, %v3102_v44  ;;  %v3016_v32 = vadd.f32 %v3015_v34, %v2927_v56  ;;  %2965 = vmatmul.bf16.gmra.mxu0 %v13329_v29  ;;  %v8750_v44 = vor.u32 %v10114_v17, %v8749_v16  ;;  %v9134_v36 = vor.u32 %v10210_v59, %v9133_v5 }
 0x321   :  { %3143 = vmatmul.bf16.gmra.mxu2 %v13331_v21 }
 0x322   :  { %3054 = vmatmul.bf16.gmra.mxu1 %v13330_v24  ;;  %3599 = vmatpush.bf16.msra.mxu0 %v8750_v44  ;;  %v13332_v44 = vld [vmem:[#allocation80_spill] sm:$0xff] }
 0x323   :  { %3866 = vmatpush.bf16.msra.mxu3 %v9134_v36  ;;  %v13333_v36 = vld [vmem:[#allocation81_spill] sm:$0xff] }
 0x324   :  { %3232 = vmatmul.bf16.gmra.mxu3 %v11147_v54  ;;  %v3104_v39 = vpop.f32.mrf.mxu2 }
 0x325   :  { %v3105_v2 = vadd.f32 %v3104_v39, %v3016_v32  ;;  %v2928_v34 = vpop.f32.mrf.mxu0 }
 0x326   :  { %v2929_v21 = vadd.f32 %v2928_v34, %v2840_v25 }
 0x327   :  { %v3193_v56 = vpop.f32.mrf.mxu3  ;;  %v3017_v24 = vpop.f32.mrf.mxu1 }
 0x328   :  { %v11368_v54 = vadd.f32 %v3193_v56, %v3105_v2  ;;  %v3018_v33 = vadd.f32 %v3017_v24, %v2929_v21  ;;  %v13334_v2 = vld [vmem:[#allocation82_spill] sm:$0xff] }
 0x32c   :  { %v3106_v16 = vpop.f32.mrf.mxu2 }
 0x32d   :  { %v3107_v17 = vadd.f32 %v3106_v16, %v3018_v33  ;;  %v2931_v5 = vpop.f32.mrf.mxu0 }
 0x32e   :  { %v2932_v59 = vadd.f32 %v2931_v5, %v2843_v55  ;;  %v2848_v55 = vadd.f32 %v11192_v18, %v11282_v7  ;;  %v8733_v18 = vld [vmem:[#allocation5 + $0x2c8] sm:$0xf] }
 0x32f   :  { %v3195_v32 = vpop.f32.mrf.mxu3  ;;  %v3020_v27 = vpop.f32.mrf.mxu1 }
 0x330   :  { %v11372_v25 = vadd.f32 %v3195_v32, %v3107_v17  ;;  %v3021_v39 = vadd.f32 %v3020_v27, %v2932_v59  ;;  %2970 = vmatmul.bf16.gmra.mxu0 %v13332_v44 }
 0x331   :  { %3148 = vmatmul.bf16.gmra.mxu2 %v13334_v2 }
 0x332   :  { %3059 = vmatmul.bf16.gmra.mxu1 %v13333_v36 }
 0x334   :  { %3237 = vmatmul.bf16.gmra.mxu3 %v11165_v58  ;;  %v3109_v57 = vpop.f32.mrf.mxu2 }
 0x335   :  { %v3110_v33 = vadd.f32 %v3109_v57, %v3021_v39  ;;  %v2933_v21 = vpop.f32.mrf.mxu0  ;;  %v13335_v39 = vld [vmem:[#allocation84_spill] sm:$0xff]  ;;  %v13336_v57 = vld [vmem:[#allocation85_spill] sm:$0xff] }
 0x336   :  { %v2934_v56 = vadd.f32 %v2933_v21, %v2845_v62  ;;  %v13337_v62 = vld [vmem:[#allocation19_spill] sm:$0xff] }
 0x337   :  { %v3198_v24 = vpop.f32.mrf.mxu3  ;;  %v3022_v34 = vpop.f32.mrf.mxu1 }
 0x338   :  { %v11380_v10 = vadd.f32 %v3198_v24, %v3110_v33  ;;  %v3023_v15 = vadd.f32 %v3022_v34, %v2934_v56  ;;  %v8989_v33 = vld [vmem:[#allocation5 + $0x4c8] sm:$0xf]  ;;  %v10174_v24 = vld [vmem:[#allocation5 + $0x4d4] sm:$0xf0] }
 0x339   :  { %v8990_v21 = vor.u32 %v10174_v24, %v8989_v33  ;;  %v10110_v56 = vld [vmem:[#allocation5 + $0x2d4] sm:$0xf0]  ;;  %v9117_v34 = vld [vmem:[#allocation5 + $0x5c8] sm:$0xf] }
 0x33a   :  { %v8861_v33 = vld [vmem:[#allocation5 + $0x3c8] sm:$0xf]  ;;  %v10142_v24 = vld [vmem:[#allocation5 + $0x3d4] sm:$0xf0] }
 0x33b   :  { %3778 = vmatpush.bf16.msra.mxu2 %v8990_v21  ;;  %v8862_v36 = vor.u32 %v10142_v24, %v8861_v33 }
 0x33c   :  { %v3111_v16 = vpop.f32.mrf.mxu2 }
 0x33d   :  { %v3112_v17 = vadd.f32 %v3111_v16, %v3023_v15  ;;  %v2936_v5 = vpop.f32.mrf.mxu0  ;;  %v10206_v15 = vld [vmem:[#allocation5 + $0x5d4] sm:$0xf0]  ;;  %3689 = vmatpush.bf16.msra.mxu1 %v8862_v36 }
 0x33e   :  { %v2937_v59 = vadd.f32 %v2936_v5, %v2848_v55  ;;  %v2850_v55 = vadd.f32 %v11195_v53, %v11282_v7  ;;  %v2853_v53 = vadd.f32 %v11204_v30, %v11282_v7  ;;  %v2855_v30 = vadd.f32 %v11207_v22, %v11282_v7 }
 0x33f   :  { %v3200_v32 = vpop.f32.mrf.mxu3  ;;  %v3025_v27 = vpop.f32.mrf.mxu1 }
 0x340   :  { %v11384_v58 = vadd.f32 %v3200_v32, %v3112_v17  ;;  %v3026_v63 = vadd.f32 %v3025_v27, %v2937_v59  ;;  %3251 = vmatmul.bf16.vlgmr.msrb.gmra.mxu0 %v13335_v39  ;;  %v8734_v17 = vor.u32 %v10110_v56, %v8733_v18  ;;  %v9118_v32 = vor.u32 %v10206_v15, %v9117_v34 }
 0x341   :  { %3429 = vmatmul.bf16.vlgmr.msrb.gmra.mxu2 %v13337_v62 }
 0x342   :  { %3340 = vmatmul.bf16.vlgmr.msrb.gmra.mxu1 %v13336_v57  ;;  %3600 = vmatpush.bf16.msra.mxu0 %v8734_v17  ;;  %v13338_v17 = vld [vmem:[#allocation87_spill] sm:$0xff] }
 0x343   :  { %3867 = vmatpush.bf16.msra.mxu3 %v9118_v32  ;;  %v13339_v32 = vld [vmem:[#allocation88_spill] sm:$0xff] }
 0x344   :  { %3518 = vmatmul.bf16.vlgmr.msrb.gmra.mxu3 %v10675_v51  ;;  %v3114_v16 = vpop.f32.mrf.mxu2 }
 0x345   :  { %v3115_v5 = vadd.f32 %v3114_v16, %v3026_v63  ;;  %v2938_v27 = vpop.f32.mrf.mxu0 }
 0x346   :  { %v2939_v62 = vadd.f32 %v2938_v27, %v2850_v55 }
 0x347   :  { %v3203_v59 = vpop.f32.mrf.mxu3  ;;  %v3027_v57 = vpop.f32.mrf.mxu1 }
 0x348   :  { %v11392_v51 = vadd.f32 %v3203_v59, %v3115_v5  ;;  %v3028_v2 = vadd.f32 %v3027_v57, %v2939_v62  ;;  %v13340_v5 = vld [vmem:[#allocation23_spill] sm:$0xff] }
 0x34c   :  { %v3116_v18 = vpop.f32.mrf.mxu2 }
 0x34d   :  { %v3117_v56 = vadd.f32 %v3116_v18, %v3028_v2  ;;  %v2941_v34 = vpop.f32.mrf.mxu0 }
 0x34e   :  { %v2942_v15 = vadd.f32 %v2941_v34, %v2853_v53  ;;  %v2858_v53 = vadd.f32 %v11216_v41, %v11282_v7  ;;  %v8717_v41 = vld [vmem:[#allocation5 + $0x2a8] sm:$0xf] }
 0x34f   :  { %v3205_v63 = vpop.f32.mrf.mxu3  ;;  %v3030_v21 = vpop.f32.mrf.mxu1 }
 0x350   :  { %v11396_v55 = vadd.f32 %v3205_v63, %v3117_v56  ;;  %v3031_v16 = vadd.f32 %v3030_v21, %v2942_v15  ;;  %3256 = vmatmul.bf16.gmra.mxu0 %v13338_v17 }
 0x351   :  { %3434 = vmatmul.bf16.gmra.mxu2 %v13340_v5 }
 0x352   :  { %3345 = vmatmul.bf16.gmra.mxu1 %v13339_v32 }
 0x354   :  { %3523 = vmatmul.bf16.gmra.mxu3 %v10687_v13  ;;  %v3119_v36 = vpop.f32.mrf.mxu2 }
 0x355   :  { %v3120_v2 = vadd.f32 %v3119_v36, %v3031_v16  ;;  %v2943_v62 = vpop.f32.mrf.mxu0  ;;  %v13341_v16 = vld [vmem:[#allocation90_spill] sm:$0xff]  ;;  %v13342_v36 = vld [vmem:[#allocation91_spill] sm:$0xff] }
 0x356   :  { %v2944_v59 = vadd.f32 %v2943_v62, %v2855_v30  ;;  %v13343_v30 = vld [vmem:[#allocation27_spill] sm:$0xff] }
 0x357   :  { %v3208_v57 = vpop.f32.mrf.mxu3  ;;  %v3032_v27 = vpop.f32.mrf.mxu1 }
 0x358   :  { %v11404_v33 = vadd.f32 %v3208_v57, %v3120_v2  ;;  %v3033_v24 = vadd.f32 %v3032_v27, %v2944_v59  ;;  %v8973_v2 = vld [vmem:[#allocation5 + $0x4a8] sm:$0xf]  ;;  %v10170_v57 = vld [vmem:[#allocation5 + $0x4b4] sm:$0xf0] }
 0x359   :  { %v8974_v62 = vor.u32 %v10170_v57, %v8973_v2  ;;  %v10106_v59 = vld [vmem:[#allocation5 + $0x2b4] sm:$0xf0]  ;;  %v9101_v27 = vld [vmem:[#allocation5 + $0x5a8] sm:$0xf] }
 0x35a   :  { %v8845_v2 = vld [vmem:[#allocation5 + $0x3a8] sm:$0xf]  ;;  %v10138_v57 = vld [vmem:[#allocation5 + $0x3b4] sm:$0xf0] }
 0x35b   :  { %3779 = vmatpush.bf16.msra.mxu2 %v8974_v62  ;;  %v8846_v32 = vor.u32 %v10138_v57, %v8845_v2 }
 0x35c   :  { %v3121_v18 = vpop.f32.mrf.mxu2 }
 0x35d   :  { %v3122_v56 = vadd.f32 %v3121_v18, %v3033_v24  ;;  %v2946_v34 = vpop.f32.mrf.mxu0  ;;  %v10202_v24 = vld [vmem:[#allocation5 + $0x5b4] sm:$0xf0]  ;;  %3690 = vmatpush.bf16.msra.mxu1 %v8846_v32 }
 0x35e   :  { %v2947_v15 = vadd.f32 %v2946_v34, %v2858_v53  ;;  %v2860_v53 = vadd.f32 %v11219_v19, %v11282_v7  ;;  %v2863_v19 = vadd.f32 %v11228_v23, %v11282_v7  ;;  %v2865_v23 = vadd.f32 %v11231_v48, %v11282_v7 }
 0x35f   :  { %v3210_v63 = vpop.f32.mrf.mxu3  ;;  %v3035_v21 = vpop.f32.mrf.mxu1 }
 0x360   :  { %v11408_v13 = vadd.f32 %v3210_v63, %v3122_v56  ;;  %v3036_v22 = vadd.f32 %v3035_v21, %v2947_v15  ;;  %3261 = vmatmul.bf16.gmra.mxu0 %v13341_v16  ;;  %v8718_v56 = vor.u32 %v10106_v59, %v8717_v41  ;;  %v9102_v63 = vor.u32 %v10202_v24, %v9101_v27 }
 0x361   :  { %3439 = vmatmul.bf16.gmra.mxu2 %v13343_v30 }
 0x362   :  { %3350 = vmatmul.bf16.gmra.mxu1 %v13342_v36  ;;  %3601 = vmatpush.bf16.msra.mxu0 %v8718_v56  ;;  %v13344_v56 = vld [vmem:[#allocation93_spill] sm:$0xff] }
 0x363   :  { %3868 = vmatpush.bf16.msra.mxu3 %v9102_v63  ;;  %v13345_v63 = vld [vmem:[#allocation94_spill] sm:$0xff] }
 0x364   :  { %3528 = vmatmul.bf16.gmra.mxu3 %v13272_v35  ;;  %v3124_v18 = vpop.f32.mrf.mxu2 }
 0x365   :  { %v3125_v34 = vadd.f32 %v3124_v18, %v3036_v22  ;;  %v2948_v21 = vpop.f32.mrf.mxu0 }
 0x366   :  { %v2949_v30 = vadd.f32 %v2948_v21, %v2860_v53 }
 0x367   :  { %v3213_v15 = vpop.f32.mrf.mxu3  ;;  %v3037_v36 = vpop.f32.mrf.mxu1 }
 0x368   :  { %v11416_v35 = vadd.f32 %v3213_v15, %v3125_v34  ;;  %v3038_v5 = vadd.f32 %v3037_v36, %v2949_v30  ;;  %v13346_v34 = vld [vmem:[#allocation31_spill] sm:$0xff] }
 0x36c   :  { %v3126_v41 = vpop.f32.mrf.mxu2 }
 0x36d   :  { %v3127_v59 = vadd.f32 %v3126_v41, %v3038_v5  ;;  %v2951_v27 = vpop.f32.mrf.mxu0 }
 0x36e   :  { %v2952_v24 = vadd.f32 %v2951_v27, %v2863_v19  ;;  %v2868_v19 = vadd.f32 %v11240_v14, %v11282_v7  ;;  %v8701_v14 = vld [vmem:[#allocation5 + $0x288] sm:$0xf] }
 0x36f   :  { %v3215_v22 = vpop.f32.mrf.mxu3  ;;  %v3040_v62 = vpop.f32.mrf.mxu1 }
 0x370   :  { %v11420_v53 = vadd.f32 %v3215_v22, %v3127_v59  ;;  %v3041_v18 = vadd.f32 %v3040_v62, %v2952_v24  ;;  %3266 = vmatmul.bf16.gmra.mxu0 %v13344_v56 }
 0x371   :  { %3444 = vmatmul.bf16.gmra.mxu2 %v13346_v34 }
 0x372   :  { %3355 = vmatmul.bf16.gmra.mxu1 %v13345_v63 }
 0x374   :  { %3533 = vmatmul.bf16.gmra.mxu3 %v13278_v1  ;;  %v3129_v32 = vpop.f32.mrf.mxu2 }
 0x375   :  { %v3130_v5 = vadd.f32 %v3129_v32, %v3041_v18  ;;  %v2953_v30 = vpop.f32.mrf.mxu0  ;;  %v13347_v18 = vld [vmem:[#allocation97_spill] sm:$0xff]  ;;  %v13348_v32 = vld [vmem:[#allocation98_spill] sm:$0xff] }
 0x376   :  { %v2954_v15 = vadd.f32 %v2953_v30, %v2865_v23  ;;  %v13349_v23 = vld [vmem:[#allocation35_spill] sm:$0xff] }
 0x377   :  { %v3218_v36 = vpop.f32.mrf.mxu3  ;;  %v3042_v21 = vpop.f32.mrf.mxu1 }
 0x378   :  { %v11428_v2 = vadd.f32 %v3218_v36, %v3130_v5  ;;  %v3043_v57 = vadd.f32 %v3042_v21, %v2954_v15  ;;  %v8957_v5 = vld [vmem:[#allocation5 + $0x488] sm:$0xf]  ;;  %v10166_v36 = vld [vmem:[#allocation5 + $0x494] sm:$0xf0] }
 0x379   :  { %v8958_v30 = vor.u32 %v10166_v36, %v8957_v5  ;;  %v10102_v15 = vld [vmem:[#allocation5 + $0x294] sm:$0xf0]  ;;  %v9085_v21 = vld [vmem:[#allocation5 + $0x588] sm:$0xf] }
 0x37a   :  { %v8829_v5 = vld [vmem:[#allocation5 + $0x388] sm:$0xf]  ;;  %v10134_v36 = vld [vmem:[#allocation5 + $0x394] sm:$0xf0] }
 0x37b   :  { %3780 = vmatpush.bf16.msra.mxu2 %v8958_v30  ;;  %v8830_v63 = vor.u32 %v10134_v36, %v8829_v5 }
 0x37c   :  { %v3131_v41 = vpop.f32.mrf.mxu2 }
 0x37d   :  { %v3132_v59 = vadd.f32 %v3131_v41, %v3043_v57  ;;  %v2956_v27 = vpop.f32.mrf.mxu0  ;;  %v10198_v57 = vld [vmem:[#allocation5 + $0x594] sm:$0xf0]  ;;  %3691 = vmatpush.bf16.msra.mxu1 %v8830_v63  ;;  %v13353_v63 = vld [vmem:[#allocation107_spill] sm:$0xff] }
 0x37e   :  { %v2957_v24 = vadd.f32 %v2956_v27, %v2868_v19  ;;  %v2870_v19 = vadd.f32 %v11243_v60, %v11282_v7  ;;  %v2873_v60 = vadd.f32 %v11252_v4, %v11282_v7  ;;  %v2875_v4 = vadd.f32 %v13353_v63, %v11282_v7 }
 0x37f   :  { %v3220_v22 = vpop.f32.mrf.mxu3  ;;  %v3045_v62 = vpop.f32.mrf.mxu1 }
 0x380   :  { %v11432_v1 = vadd.f32 %v3220_v22, %v3132_v59  ;;  %v3046_v48 = vadd.f32 %v3045_v62, %v2957_v24  ;;  %3271 = vmatmul.bf16.gmra.mxu0 %v13347_v18  ;;  %v8702_v59 = vor.u32 %v10102_v15, %v8701_v14  ;;  %v9086_v22 = vor.u32 %v10198_v57, %v9085_v21 }
 0x381   :  { %3449 = vmatmul.bf16.gmra.mxu2 %v13349_v23 }
 0x382   :  { %3360 = vmatmul.bf16.gmra.mxu1 %v13348_v32  ;;  %3602 = vmatpush.bf16.msra.mxu0 %v8702_v59  ;;  %v13350_v59 = vld [vmem:[#allocation101_spill] sm:$0xff] }
 0x383   :  { %3869 = vmatpush.bf16.msra.mxu3 %v9086_v22  ;;  %v13351_v22 = vld [vmem:[#allocation102_spill] sm:$0xff] }
 0x384   :  { %3538 = vmatmul.bf16.gmra.mxu3 %v13284_v31  ;;  %v3134_v41 = vpop.f32.mrf.mxu2 }
 0x385   :  { %v3135_v27 = vadd.f32 %v3134_v41, %v3046_v48  ;;  %v2958_v62 = vpop.f32.mrf.mxu0 }
 0x386   :  { %v2959_v23 = vadd.f32 %v2958_v62, %v2870_v19 }
 0x387   :  { %v3223_v24 = vpop.f32.mrf.mxu3  ;;  %v3047_v32 = vpop.f32.mrf.mxu1 }
 0x388   :  { %v11440_v31 = vadd.f32 %v3223_v24, %v3135_v27  ;;  %v3048_v34 = vadd.f32 %v3047_v32, %v2959_v23  ;;  %v13352_v27 = vld [vmem:[#allocation39_spill] sm:$0xff] }
 0x38c   :  { %v3136_v14 = vpop.f32.mrf.mxu2 }
 0x38d   :  { %v3137_v15 = vadd.f32 %v3136_v14, %v3048_v34  ;;  %v2961_v21 = vpop.f32.mrf.mxu0  ;;  %v2878_v14 = vadd.f32 %v11264_v49, %v11282_v7  ;;  %v8685_v49 = vld [vmem:[#allocation5 + $0x268] sm:$0xf] }
 0x38e   :  { %v2962_v57 = vadd.f32 %v2961_v21, %v2873_v60 }
 0x38f   :  { %v3225_v48 = vpop.f32.mrf.mxu3  ;;  %v3050_v30 = vpop.f32.mrf.mxu1 }
 0x390   :  { %v11444_v19 = vadd.f32 %v3225_v48, %v3137_v15  ;;  %v3051_v41 = vadd.f32 %v3050_v30, %v2962_v57  ;;  %3276 = vmatmul.bf16.gmra.mxu0 %v13350_v59 }
 0x391   :  { %3454 = vmatmul.bf16.gmra.mxu2 %v13352_v27 }
 0x392   :  { %3365 = vmatmul.bf16.gmra.mxu1 %v13351_v22 }
 0x394   :  { %3543 = vmatmul.bf16.gmra.mxu3 %v13290_v61  ;;  %v3139_v32 = vpop.f32.mrf.mxu2 }
 0x395   :  { %v3140_v34 = vadd.f32 %v3139_v32, %v3051_v41  ;;  %v2963_v24 = vpop.f32.mrf.mxu0  ;;  %v13355_v41 = vld [vmem:[#allocation105_spill] sm:$0xff]  ;;  %v13356_v32 = vld [vmem:[#allocation106_spill] sm:$0xff] }
 0x396   :  { %v2964_v62 = vadd.f32 %v2963_v24, %v2875_v4  ;;  %v13357_v4 = vld [vmem:[#allocation43_spill] sm:$0xff]  ;;  %v10162_v24 = vld [vmem:[#allocation5 + $0x474] sm:$0xf0] }
 0x397   :  { %v3228_v23 = vpop.f32.mrf.mxu3  ;;  %v3052_v5 = vpop.f32.mrf.mxu1 }
 0x398   :  { %v11452_v36 = vadd.f32 %v3228_v23, %v3140_v34  ;;  %v3053_v60 = vadd.f32 %v3052_v5, %v2964_v62  ;;  %v13358_v34 = vld [vmem:[#allocation44_spill] sm:$0xff]  ;;  %v8941_v23 = vld [vmem:[#allocation5 + $0x468] sm:$0xf]  ;;  %v10098_v5 = vld [vmem:[#allocation5 + $0x274] sm:$0xf0] }
 0x399   :  { %v8942_v62 = vor.u32 %v10162_v24, %v8941_v23  ;;  %v8813_v23 = vld [vmem:[#allocation5 + $0x368] sm:$0xf]  ;;  %v10130_v24 = vld [vmem:[#allocation5 + $0x374] sm:$0xf0] }
 0x39b   :  { %3781 = vmatpush.bf16.msra.mxu2 %v8942_v62 }
 0x39c   :  { %v3141_v15 = vpop.f32.mrf.mxu2 }
 0x39d   :  { %v3142_v48 = vadd.f32 %v3141_v15, %v3053_v60  ;;  %v2966_v57 = vpop.f32.mrf.mxu0  ;;  %v9069_v60 = vld [vmem:[#allocation5 + $0x568] sm:$0xf]  ;;  %v10194_v15 = vld [vmem:[#allocation5 + $0x574] sm:$0xf0] }
 0x39e   :  { %v2967_v30 = vadd.f32 %v2966_v57, %v2878_v14  ;;  %v2880_v14 = vadd.f32 %v11267_v28, %v11282_v7  ;;  %v2883_v28 = vadd.f32 %v11276_v6, %v11282_v7 }
 0x39f   :  { %v3230_v21 = vpop.f32.mrf.mxu3  ;;  %v3055_v61 = vpop.f32.mrf.mxu1 }
 0x3a0   :  { %v11456_v27 = vadd.f32 %v3230_v21, %v3142_v48  ;;  %v3056_v63 = vadd.f32 %v3055_v61, %v2967_v30  ;;  %3281 = vmatmul.bf16.gmra.mxu0 %v13355_v41  ;;  %v8686_v61 = vor.u32 %v10098_v5, %v8685_v49  ;;  %v9070_v21 = vor.u32 %v10194_v15, %v9069_v60 }
 0x3a1   :  { %3459 = vmatmul.bf16.gmra.mxu2 %v13357_v4 }
 0x3a2   :  { %13354 = vst [vmem:[#allocation107_spill] sm:$0xff] %v11456_v27  ;;  %3370 = vmatmul.bf16.gmra.mxu1 %v13356_v32  ;;  %3603 = vmatpush.bf16.msra.mxu0 %v8686_v61  ;;  %v8814_v27 = vor.u32 %v10130_v24, %v8813_v23  ;;  %v13360_v61 = vld [vmem:[#allocation110_spill] sm:$0xff] }
 0x3a3   :  { %3870 = vmatpush.bf16.msra.mxu3 %v9070_v21  ;;  %v13361_v21 = vld [vmem:[#allocation47_spill] sm:$0xff] }
 0x3a4   :  { %3548 = vmatmul.bf16.gmra.mxu3 %v13358_v34  ;;  %v3144_v48 = vpop.f32.mrf.mxu2  ;;  %3692 = vmatpush.bf16.msra.mxu1 %v8814_v27 }
 0x3a5   :  { %v3145_v57 = vadd.f32 %v3144_v48, %v3056_v63  ;;  %v2968_v32 = vpop.f32.mrf.mxu0  ;;  %v13359_v48 = vld [vmem:[#allocation109_spill] sm:$0xff] }
 0x3a6   :  { %v2969_v4 = vadd.f32 %v2968_v32, %v2880_v14 }
 0x3a7   :  { %v3233_v30 = vpop.f32.mrf.mxu3  ;;  %v3057_v22 = vpop.f32.mrf.mxu1 }
 0x3a8   :  { %v11464_v34 = vadd.f32 %v3233_v30, %v3145_v57  ;;  %v3058_v41 = vadd.f32 %v3057_v22, %v2969_v4  ;;  %v13362_v22 = vld [vmem:[#allocation148_spill] sm:$0xff] }
 0x3a9   :  { %v2885_v6 = vadd.f32 %v13362_v22, %v11282_v7  ;;  %v13364_v7 = vld [vmem:[#allocation112_spill] sm:$0xff]  ;;  %v13366_v22 = vld [vmem:[#allocation51_spill] sm:$0xff] }
 0x3ac   :  { %v3146_v49 = vpop.f32.mrf.mxu2 }
 0x3ad   :  { %v3147_v5 = vadd.f32 %v3146_v49, %v3058_v41  ;;  %v2971_v60 = vpop.f32.mrf.mxu0 }
 0x3ae   :  { %v2972_v15 = vadd.f32 %v2971_v60, %v2883_v28 }
 0x3af   :  { %v3235_v63 = vpop.f32.mrf.mxu3  ;;  %v3060_v62 = vpop.f32.mrf.mxu1 }
 0x3b0   :  { %v11468_v32 = vadd.f32 %v3235_v63, %v3147_v5  ;;  %v3061_v14 = vadd.f32 %v3060_v62, %v2972_v15  ;;  %3286 = vmatmul.bf16.gmra.mxu0 %v13359_v48 }
 0x3b1   :  { %3464 = vmatmul.bf16.gmra.mxu2 %v13361_v21 }
 0x3b2   :  { %3375 = vmatmul.bf16.gmra.mxu1 %v13360_v61 }
 0x3b4   :  { %3553 = vmatmul.bf16.gmra.mxu3 %v13302_v12  ;;  %v3149_v27 = vpop.f32.mrf.mxu2 }
 0x3b5   :  { %v3150_v41 = vadd.f32 %v3149_v27, %v3061_v14  ;;  %v2973_v57 = vpop.f32.mrf.mxu0  ;;  %v13365_v14 = vld [vmem:[#allocation113_spill] sm:$0xff] }
 0x3b6   :  { %v2974_v30 = vadd.f32 %v2973_v57, %v2885_v6  ;;  %v13367_v6 = vld [vmem:[#allocation114_spill] sm:$0xff]  ;;  %v10158_v57 = vld [vmem:[#allocation5 + $0x454] sm:$0xf0] }
 0x3b7   :  { %v3238_v4 = vpop.f32.mrf.mxu3  ;;  %v3062_v23 = vpop.f32.mrf.mxu1  ;;  %v11485_v27 = vperm.slane %v13367_v6, 2 }
 0x3b8   :  { %v11476_v24 = vadd.f32 %v3238_v4, %v3150_v41  ;;  %v3063_v28 = vadd.f32 %v3062_v23, %v2974_v30  ;;  %v13368_v41 = vld [vmem:[#allocation52_spill] sm:$0xff]  ;;  %v8925_v4 = vld [vmem:[#allocation5 + $0x448] sm:$0xf] }
 0x3b9   :  { %v8926_v30 = vor.u32 %v10158_v57, %v8925_v4  ;;  %v8669_v23 = vld [vmem:[#allocation5 + $0x248] sm:$0xf]  ;;  %v10126_v57 = vld [vmem:[#allocation5 + $0x354] sm:$0xf0] }
 0x3ba   :  { %v8797_v4 = vld [vmem:[#allocation5 + $0x348] sm:$0xf] }
 0x3bb   :  { %3782 = vmatpush.bf16.msra.mxu2 %v8926_v30 }
 0x3bc   :  { %v3151_v49 = vpop.f32.mrf.mxu2 }
 0x3bd   :  { %v3152_v5 = vadd.f32 %v3151_v49, %v3063_v28  ;;  %v3252_v60 = vpop.f32.mrf.mxu0  ;;  %v9053_v28 = vld [vmem:[#allocation5 + $0x548] sm:$0xf] }
 0x3be   :  { %v3253_v15 = vadd.f32 %v3252_v60, %v11296_v46  ;;  %v10094_v46 = vld [vmem:[#allocation5 + $0x254] sm:$0xf0] }
 0x3bf   :  { %v3240_v63 = vpop.f32.mrf.mxu3  ;;  %v3341_v62 = vpop.f32.mrf.mxu1 }
 0x3c0   :  { %v11479_v12 = vadd.f32 %v3240_v63, %v3152_v5  ;;  %v3342_v21 = vadd.f32 %v3341_v62, %v3253_v15  ;;  %3291 = vmatmul.bf16.gmra.mxu0 %v13364_v7  ;;  %v8670_v5 = vor.u32 %v10094_v46, %v8669_v23  ;;  %v10190_v63 = vld [vmem:[#allocation5 + $0x554] sm:$0xf0]  ;;  %v8798_v7 = vor.u32 %v10126_v57, %v8797_v4 }
 0x3c1   :  { %3469 = vmatmul.bf16.gmra.mxu2 %v13366_v22  ;;  %v9054_v22 = vor.u32 %v10190_v63, %v9053_v28 }
 0x3c2   :  { %13363 = vst [vmem:[#allocation148_spill] sm:$0xff] %v11479_v12  ;;  %3380 = vmatmul.bf16.gmra.mxu1 %v13365_v14  ;;  %3604 = vmatpush.bf16.msra.mxu0 %v8670_v5  ;;  %v4668_v12 = vmax.f32 %v3342_v21, 0.0  ;;  %v13372_v21 = vld [vmem:[#allocation55_spill] sm:$0xff] }
 0x3c3   :  { %3871 = vmatpush.bf16.msra.mxu3 %v9054_v22  ;;  %3693 = vmatpush.bf16.msra.mxu1 %v8798_v7 }
 0x3c4   :  { %3558 = vmatmul.bf16.gmra.mxu3 %v13368_v41  ;;  %v3430_v49 = vpop.f32.mrf.mxu2 }
 0x3c5   :  { %v3431_v60 = vadd.f32 %v3430_v49, %v11485_v27  ;;  %v3254_v62 = vpop.f32.mrf.mxu0 }
 0x3c6   :  { %v3255_v6 = vadd.f32 %v3254_v62, %v11300_v50 }
 0x3c7   :  { %v3519_v15 = vpop.f32.mrf.mxu3  ;;  %v3343_v14 = vpop.f32.mrf.mxu1 }
 0x3c8   :  { %v11490_v41 = vadd.f32 %v3519_v15, %v3431_v60  ;;  %v3344_v61 = vadd.f32 %v3343_v14, %v3255_v6  ;;  %v13370_v15 = vld [vmem:[#allocation116_spill] sm:$0xff]  ;;  %v13371_v14 = vld [vmem:[#allocation117_spill] sm:$0xff] }
 0x3ca   :  { %v4672_v23 = vmax.f32 %v3344_v61, 0.0 }
 0x3cc   :  { %v11492_v46 = vpack.c.bf16 %v4672_v23, %v4668_v12  ;;  %v3432_v49 = vpop.f32.mrf.mxu2 }
 0x3cd   :  { %v3433_v30 = vadd.f32 %v3432_v49, %v11485_v27  ;;  %v3257_v63 = vpop.f32.mrf.mxu0 }
 0x3ce   :  { %13369 = vst [vmem:[#allocation114_spill] sm:$0xff] %v11492_v46  ;;  %v3258_v50 = vadd.f32 %v3257_v63, %v11308_v26 }
 0x3cf   :  { %v3521_v28 = vpop.f32.mrf.mxu3  ;;  %v3346_v5 = vpop.f32.mrf.mxu1 }
 0x3d0   :  { %v11496_v60 = vadd.f32 %v3521_v28, %v3433_v30  ;;  %v3347_v22 = vadd.f32 %v3346_v5, %v3258_v50  ;;  %3296 = vmatmul.bf16.gmra.mxu0 %v13370_v15 }
 0x3d1   :  { %3474 = vmatmul.bf16.gmra.mxu2 %v13372_v21 }
 0x3d2   :  { %3385 = vmatmul.bf16.gmra.mxu1 %v13371_v14  ;;  %v4676_v23 = vmax.f32 %v3347_v22, 0.0  ;;  %v8909_v22 = vld [vmem:[#allocation5 + $0x428] sm:$0xf] }
 0x3d4   :  { %3563 = vmatmul.bf16.gmra.mxu3 %v13314_v8  ;;  %v3435_v12 = vpop.f32.mrf.mxu2 }
 0x3d5   :  { %v3436_v61 = vadd.f32 %v3435_v12, %v11485_v27  ;;  %v3259_v62 = vpop.f32.mrf.mxu0 }
 0x3d6   :  { %v3260_v6 = vadd.f32 %v3259_v62, %v11312_v11  ;;  %v13374_v11 = vld [vmem:[#allocation120_spill] sm:$0xff]  ;;  %v10154_v62 = vld [vmem:[#allocation5 + $0x434] sm:$0xf0] }
 0x3d7   :  { %v3524_v7 = vpop.f32.mrf.mxu3  ;;  %v3348_v26 = vpop.f32.mrf.mxu1 }
 0x3d8   :  { %v11504_v4 = vadd.f32 %v3524_v7, %v3436_v61  ;;  %v3349_v57 = vadd.f32 %v3348_v26, %v3260_v6  ;;  %v13375_v61 = vld [vmem:[#allocation121_spill] sm:$0xff]  ;;  %v13376_v7 = vld [vmem:[#allocation59_spill] sm:$0xff]  ;;  %v8910_v6 = vor.u32 %v10154_v62, %v8909_v22 }
 0x3d9   :  { %v8653_v26 = vld [vmem:[#allocation5 + $0x228] sm:$0xf]  ;;  %v10122_v62 = vld [vmem:[#allocation5 + $0x334] sm:$0xf0] }
 0x3da   :  { %v4680_v49 = vmax.f32 %v3349_v57, 0.0  ;;  %v10090_v57 = vld [vmem:[#allocation5 + $0x234] sm:$0xf0]  ;;  %3783 = vmatpush.bf16.msra.mxu2 %v8910_v6  ;;  %v8781_v22 = vld [vmem:[#allocation5 + $0x328] sm:$0xf] }
 0x3dc   :  { %v11506_v30 = vpack.c.bf16 %v4680_v49, %v4676_v23  ;;  %v3437_v28 = vpop.f32.mrf.mxu2  ;;  %v9037_v23 = vld [vmem:[#allocation5 + $0x528] sm:$0xf] }
 0x3dd   :  { %v3438_v63 = vadd.f32 %v3437_v28, %v11485_v27  ;;  %v3262_v5 = vpop.f32.mrf.mxu0  ;;  %v10186_v28 = vld [vmem:[#allocation5 + $0x534] sm:$0xf0] }
 0x3de   :  { %13373 = vst [vmem:[#allocation150_spill] sm:$0xff] %v11506_v30  ;;  %v3263_v46 = vadd.f32 %v3262_v5, %v11320_v20  ;;  %v8654_v20 = vor.u32 %v10090_v57, %v8653_v26  ;;  %v9038_v5 = vor.u32 %v10186_v28, %v9037_v23 }
 0x3df   :  { %v3526_v50 = vpop.f32.mrf.mxu3  ;;  %v3351_v12 = vpop.f32.mrf.mxu1 }
 0x3e0   :  { %v11510_v8 = vadd.f32 %v3526_v50, %v3438_v63  ;;  %v3352_v21 = vadd.f32 %v3351_v12, %v3263_v46  ;;  %3301 = vmatmul.bf16.gmra.mxu0 %v13374_v11  ;;  %3872 = vmatpush.bf16.msra.mxu3 %v9038_v5 }
 0x3e1   :  { %3479 = vmatmul.bf16.gmra.mxu2 %v13376_v7  ;;  %3605 = vmatpush.bf16.msra.mxu0 %v8654_v20 }
 0x3e2   :  { %3390 = vmatmul.bf16.gmra.mxu1 %v13375_v61  ;;  %v8782_v61 = vor.u32 %v10122_v62, %v8781_v22  ;;  %v4684_v14 = vmax.f32 %v3352_v21, 0.0  ;;  %v13380_v21 = vld [vmem:[#allocation63_spill] sm:$0xff] }
 0x3e4   :  { %3568 = vmatmul.bf16.gmra.mxu3 %v13317_v47  ;;  %v3440_v49 = vpop.f32.mrf.mxu2  ;;  %3694 = vmatpush.bf16.msra.mxu1 %v8782_v61 }
 0x3e5   :  { %v3441_v63 = vadd.f32 %v3440_v49, %v11485_v27  ;;  %v3264_v50 = vpop.f32.mrf.mxu0 }
 0x3e6   :  { %v3265_v12 = vadd.f32 %v3264_v50, %v11324_v3  ;;  %v13378_v50 = vld [vmem:[#allocation124_spill] sm:$0xff] }
 0x3e7   :  { %v3529_v46 = vpop.f32.mrf.mxu3  ;;  %v3353_v30 = vpop.f32.mrf.mxu1 }
 0x3e8   :  { %v11518_v47 = vadd.f32 %v3529_v46, %v3441_v63  ;;  %v3354_v7 = vadd.f32 %v3353_v30, %v3265_v12  ;;  %v13379_v30 = vld [vmem:[#allocation125_spill] sm:$0xff] }
 0x3ea   :  { %v4688_v26 = vmax.f32 %v3354_v7, 0.0 }
 0x3ec   :  { %v11520_v57 = vpack.c.bf16 %v4688_v26, %v4684_v14  ;;  %v3442_v49 = vpop.f32.mrf.mxu2 }
 0x3ed   :  { %v3443_v6 = vadd.f32 %v3442_v49, %v11485_v27  ;;  %v3267_v28 = vpop.f32.mrf.mxu0 }
 0x3ee   :  { %13377 = vst [vmem:[#allocation151_spill] sm:$0xff] %v11520_v57  ;;  %v3268_v3 = vadd.f32 %v3267_v28, %v11332_v52 }
 0x3ef   :  { %v3531_v23 = vpop.f32.mrf.mxu3  ;;  %v3356_v20 = vpop.f32.mrf.mxu1 }
 0x3f0   :  { %v11524_v63 = vadd.f32 %v3531_v23, %v3443_v6  ;;  %v3357_v46 = vadd.f32 %v3356_v20, %v3268_v3  ;;  %3306 = vmatmul.bf16.gmra.mxu0 %v13378_v50 }
 0x3f1   :  { %3484 = vmatmul.bf16.gmra.mxu2 %v13380_v21 }
 0x3f2   :  { %3395 = vmatmul.bf16.gmra.mxu1 %v13379_v30  ;;  %v4692_v26 = vmax.f32 %v3357_v46, 0.0  ;;  %v8893_v46 = vld [vmem:[#allocation5 + $0x408] sm:$0xf] }
 0x3f4   :  { %3573 = vmatmul.bf16.gmra.mxu3 %v13320_v9  ;;  %v3445_v14 = vpop.f32.mrf.mxu2 }
 0x3f5   :  { %v3446_v61 = vadd.f32 %v3445_v14, %v11485_v27  ;;  %v3269_v5 = vpop.f32.mrf.mxu0 }
 0x3f6   :  { %v3270_v12 = vadd.f32 %v3269_v5, %v11336_v37  ;;  %v13382_v37 = vld [vmem:[#allocation128_spill] sm:$0xff]  ;;  %v10150_v5 = vld [vmem:[#allocation5 + $0x414] sm:$0xf0] }
 0x3f7   :  { %v3534_v7 = vpop.f32.mrf.mxu3  ;;  %v3358_v52 = vpop.f32.mrf.mxu1 }
 0x3f8   :  { %v11532_v22 = vadd.f32 %v3534_v7, %v3446_v61  ;;  %v3359_v62 = vadd.f32 %v3358_v52, %v3270_v12  ;;  %v13383_v61 = vld [vmem:[#allocation129_spill] sm:$0xff]  ;;  %v13384_v7 = vld [vmem:[#allocation67_spill] sm:$0xff]  ;;  %v8894_v12 = vor.u32 %v10150_v5, %v8893_v46 }
 0x3f9   :  { %v8637_v52 = vld [vmem:[#allocation5 + $0x208] sm:$0xf]  ;;  %v10118_v5 = vld [vmem:[#allocation5 + $0x314] sm:$0xf0] }
 0x3fa   :  { %v4696_v49 = vmax.f32 %v3359_v62, 0.0  ;;  %v10086_v62 = vld [vmem:[#allocation5 + $0x214] sm:$0xf0]  ;;  %3784 = vmatpush.bf16.msra.mxu2 %v8894_v12  ;;  %v8765_v46 = vld [vmem:[#allocation5 + $0x308] sm:$0xf] }
 0x3fc   :  { %v11534_v6 = vpack.c.bf16 %v4696_v49, %v4692_v26  ;;  %v3447_v23 = vpop.f32.mrf.mxu2  ;;  %v9021_v26 = vld [vmem:[#allocation5 + $0x508] sm:$0xf] }
 0x3fd   :  { %v3448_v28 = vadd.f32 %v3447_v23, %v11485_v27  ;;  %v3272_v20 = vpop.f32.mrf.mxu0  ;;  %v10182_v23 = vld [vmem:[#allocation5 + $0x514] sm:$0xf0] }
 0x3fe   :  { %13381 = vst [vmem:[#allocation152_spill] sm:$0xff] %v11534_v6  ;;  %v3273_v57 = vadd.f32 %v3272_v20, %v11344_v42  ;;  %v8638_v42 = vor.u32 %v10086_v62, %v8637_v52  ;;  %v9022_v20 = vor.u32 %v10182_v23, %v9021_v26 }
 0x3ff   :  { %v3536_v3 = vpop.f32.mrf.mxu3  ;;  %v3361_v14 = vpop.f32.mrf.mxu1 }
 0x400   :  { %v11538_v9 = vadd.f32 %v3536_v3, %v3448_v28  ;;  %v3362_v21 = vadd.f32 %v3361_v14, %v3273_v57  ;;  %3311 = vmatmul.bf16.gmra.mxu0 %v13382_v37  ;;  %3873 = vmatpush.bf16.msra.mxu3 %v9022_v20 }
 0x401   :  { %3489 = vmatmul.bf16.gmra.mxu2 %v13384_v7  ;;  %3606 = vmatpush.bf16.msra.mxu0 %v8638_v42 }
 0x402   :  { %3400 = vmatmul.bf16.gmra.mxu1 %v13383_v61  ;;  %v8766_v61 = vor.u32 %v10118_v5, %v8765_v46  ;;  %v4700_v30 = vmax.f32 %v3362_v21, 0.0  ;;  %v13388_v21 = vld [vmem:[#allocation71_spill] sm:$0xff] }
 0x404   :  { %3578 = vmatmul.bf16.gmra.mxu3 %v13323_v40  ;;  %v3450_v49 = vpop.f32.mrf.mxu2  ;;  %3695 = vmatpush.bf16.msra.mxu1 %v8766_v61 }
 0x405   :  { %v3451_v28 = vadd.f32 %v3450_v49, %v11485_v27  ;;  %v3274_v3 = vpop.f32.mrf.mxu0 }
 0x406   :  { %v3275_v14 = vadd.f32 %v3274_v3, %v11348_v45  ;;  %v13386_v3 = vld [vmem:[#allocation132_spill] sm:$0xff] }
 0x407   :  { %v3539_v57 = vpop.f32.mrf.mxu3  ;;  %v3363_v6 = vpop.f32.mrf.mxu1 }
 0x408   :  { %v11546_v40 = vadd.f32 %v3539_v57, %v3451_v28  ;;  %v3364_v7 = vadd.f32 %v3363_v6, %v3275_v14  ;;  %v13387_v6 = vld [vmem:[#allocation133_spill] sm:$0xff] }
 0x40a   :  { %v4704_v52 = vmax.f32 %v3364_v7, 0.0 }
 0x40c   :  { %v11548_v62 = vpack.c.bf16 %v4704_v52, %v4700_v30  ;;  %v3452_v49 = vpop.f32.mrf.mxu2 }
 0x40d   :  { %v3453_v12 = vadd.f32 %v3452_v49, %v11485_v27  ;;  %v3277_v23 = vpop.f32.mrf.mxu0 }
 0x40e   :  { %13385 = vst [vmem:[#allocation153_spill] sm:$0xff] %v11548_v62  ;;  %v3278_v45 = vadd.f32 %v3277_v23, %v11356_v38 }
 0x40f   :  { %v3541_v26 = vpop.f32.mrf.mxu3  ;;  %v3366_v42 = vpop.f32.mrf.mxu1 }
 0x410   :  { %v11552_v28 = vadd.f32 %v3541_v26, %v3453_v12  ;;  %v3367_v57 = vadd.f32 %v3366_v42, %v3278_v45  ;;  %3316 = vmatmul.bf16.gmra.mxu0 %v13386_v3 }
 0x411   :  { %3494 = vmatmul.bf16.gmra.mxu2 %v13388_v21 }
 0x412   :  { %3405 = vmatmul.bf16.gmra.mxu1 %v13387_v6  ;;  %v4708_v52 = vmax.f32 %v3367_v57, 0.0  ;;  %v10080_v57 = vld [vmem:[#allocation5 + $0x1ec] sm:$0xf] }
 0x414   :  { %3583 = vmatmul.bf16.gmra.mxu3 %v13326_v0  ;;  %v3455_v30 = vpop.f32.mrf.mxu2 }
 0x415   :  { %v3456_v61 = vadd.f32 %v3455_v30, %v11485_v27  ;;  %v3279_v20 = vpop.f32.mrf.mxu0 }
 0x416   :  { %v3280_v14 = vadd.f32 %v3279_v20, %v11360_v43  ;;  %v13390_v43 = vld [vmem:[#allocation136_spill] sm:$0xff]  ;;  %v8623_v20 = vld [vmem:[#allocation5 + $0x1f8] sm:$0xf0] }
 0x417   :  { %v3544_v7 = vpop.f32.mrf.mxu3  ;;  %v3368_v38 = vpop.f32.mrf.mxu1 }
 0x418   :  { %v11560_v46 = vadd.f32 %v3544_v7, %v3456_v61  ;;  %v3369_v5 = vadd.f32 %v3368_v38, %v3280_v14  ;;  %v13391_v61 = vld [vmem:[#allocation137_spill] sm:$0xff]  ;;  %v13392_v7 = vld [vmem:[#allocation75_spill] sm:$0xff]  ;;  %v8626_v14 = vor.u32 %v10080_v57, %v8623_v20 }
 0x419   :  { %v9261_v38 = vld [vmem:[#allocation5 + $0x6e8] sm:$0xf]  ;;  %v10048_v57 = vld [vmem:[#allocation5 + $0xec] sm:$0xf]  ;;  %v8495_v20 = vld [vmem:[#allocation5 + $0xf8] sm:$0xf0] }
 0x41a   :  { %v4712_v49 = vmax.f32 %v3369_v5, 0.0  ;;  %v10242_v5 = vld [vmem:[#allocation5 + $0x6f4] sm:$0xf0]  ;;  %4133 = vmatpush.bf16.msrb.mxu2 %v8626_v14 }
 0x41c   :  { %v11562_v12 = vpack.c.bf16 %v4712_v49, %v4708_v52  ;;  %v3457_v26 = vpop.f32.mrf.mxu2  ;;  %v10112_v52 = vld [vmem:[#allocation5 + $0x2ec] sm:$0xf] }
 0x41d   :  { %v3458_v23 = vadd.f32 %v3457_v26, %v11485_v27  ;;  %v3282_v42 = vpop.f32.mrf.mxu0  ;;  %v8751_v26 = vld [vmem:[#allocation5 + $0x2f8] sm:$0xf0] }
 0x41e   :  { %13389 = vst [vmem:[#allocation154_spill] sm:$0xff] %v11562_v12  ;;  %v3283_v62 = vadd.f32 %v3282_v42, %v11368_v54  ;;  %v9262_v54 = vor.u32 %v10242_v5, %v9261_v38  ;;  %v8754_v42 = vor.u32 %v10112_v52, %v8751_v26 }
 0x41f   :  { %v3546_v45 = vpop.f32.mrf.mxu3  ;;  %v3371_v30 = vpop.f32.mrf.mxu1 }
 0x420   :  { %v11566_v0 = vadd.f32 %v3546_v45, %v3458_v23  ;;  %v3372_v21 = vadd.f32 %v3371_v30, %v3283_v62  ;;  %3321 = vmatmul.bf16.gmra.mxu0 %v13390_v43  ;;  %4222 = vmatpush.bf16.msrb.mxu3 %v8754_v42 }
 0x421   :  { %3499 = vmatmul.bf16.gmra.mxu2 %v13392_v7  ;;  %3955 = vmatpush.bf16.msrb.mxu0 %v9262_v54 }
 0x422   :  { %3410 = vmatmul.bf16.gmra.mxu1 %v13391_v61  ;;  %v8498_v61 = vor.u32 %v10048_v57, %v8495_v20  ;;  %v4716_v6 = vmax.f32 %v3372_v21, 0.0  ;;  %v13396_v21 = vld [vmem:[#allocation79_spill] sm:$0xff] }
 0x424   :  { %3588 = vmatmul.bf16.gmra.mxu3 %v13329_v29  ;;  %v3460_v49 = vpop.f32.mrf.mxu2  ;;  %4044 = vmatpush.bf16.msrb.mxu1 %v8498_v61 }
 0x425   :  { %v3461_v23 = vadd.f32 %v3460_v49, %v11485_v27  ;;  %v3284_v45 = vpop.f32.mrf.mxu0 }
 0x426   :  { %v3285_v30 = vadd.f32 %v3284_v45, %v11372_v25  ;;  %v13394_v45 = vld [vmem:[#allocation140_spill] sm:$0xff] }
 0x427   :  { %v3549_v62 = vpop.f32.mrf.mxu3  ;;  %v3373_v12 = vpop.f32.mrf.mxu1 }
 0x428   :  { %v11574_v29 = vadd.f32 %v3549_v62, %v3461_v23  ;;  %v3374_v7 = vadd.f32 %v3373_v12, %v3285_v30  ;;  %v13395_v12 = vld [vmem:[#allocation141_spill] sm:$0xff] }
 0x42a   :  { %v4720_v38 = vmax.f32 %v3374_v7, 0.0 }
 0x42c   :  { %v11576_v5 = vpack.c.bf16 %v4720_v38, %v4716_v6  ;;  %v3462_v49 = vpop.f32.mrf.mxu2 }
 0x42d   :  { %v3463_v14 = vadd.f32 %v3462_v49, %v11485_v27  ;;  %v3287_v26 = vpop.f32.mrf.mxu0 }
 0x42e   :  { %13393 = vst [vmem:[#allocation155_spill] sm:$0xff] %v11576_v5  ;;  %v3288_v25 = vadd.f32 %v3287_v26, %v11380_v10 }
 0x42f   :  { %v3551_v52 = vpop.f32.mrf.mxu3  ;;  %v3376_v54 = vpop.f32.mrf.mxu1 }
 0x430   :  { %v11580_v23 = vadd.f32 %v3551_v52, %v3463_v14  ;;  %v3377_v62 = vadd.f32 %v3376_v54, %v3288_v25  ;;  %3326 = vmatmul.bf16.gmra.mxu0 %v13394_v45 }
 0x431   :  { %3504 = vmatmul.bf16.gmra.mxu2 %v13396_v21 }
 0x432   :  { %3415 = vmatmul.bf16.gmra.mxu1 %v13395_v12  ;;  %v4724_v38 = vmax.f32 %v3377_v62, 0.0  ;;  %v10076_v62 = vld [vmem:[#allocation5 + $0x1cc] sm:$0xf] }
 0x434   :  { %3593 = vmatmul.bf16.gmra.mxu3 %v13332_v44  ;;  %v3465_v6 = vpop.f32.mrf.mxu2 }
 0x435   :  { %v3466_v61 = vadd.f32 %v3465_v6, %v11485_v27  ;;  %v3289_v42 = vpop.f32.mrf.mxu0 }
 0x436   :  { %v3290_v30 = vadd.f32 %v3289_v42, %v11384_v58  ;;  %v13398_v58 = vld [vmem:[#allocation21_spill] sm:$0xff] }
 0x437   :  { %v3554_v7 = vpop.f32.mrf.mxu3  ;;  %v3378_v10 = vpop.f32.mrf.mxu1  ;;  %v8607_v42 = vld [vmem:[#allocation5 + $0x1d8] sm:$0xf0] }
 0x438   :  { %v11588_v57 = vadd.f32 %v3554_v7, %v3466_v61  ;;  %v3379_v20 = vadd.f32 %v3378_v10, %v3290_v30  ;;  %v13399_v61 = vld [vmem:[#allocation22_spill] sm:$0xff]  ;;  %v13400_v7 = vld [vmem:[#allocation83_spill] sm:$0xff]  ;;  %v8610_v30 = vor.u32 %v10076_v62, %v8607_v42  ;;  %v8479_v42 = vld [vmem:[#allocation5 + $0xd8] sm:$0xf0] }
 0x439   :  { %v9245_v10 = vld [vmem:[#allocation5 + $0x6c8] sm:$0xf]  ;;  %v10044_v62 = vld [vmem:[#allocation5 + $0xcc] sm:$0xf] }
 0x43a   :  { %v4728_v49 = vmax.f32 %v3379_v20, 0.0  ;;  %v10238_v20 = vld [vmem:[#allocation5 + $0x6d4] sm:$0xf0]  ;;  %4134 = vmatpush.bf16.msrb.mxu2 %v8610_v30 }
 0x43c   :  { %v11590_v14 = vpack.c.bf16 %v4728_v49, %v4724_v38  ;;  %v3467_v52 = vpop.f32.mrf.mxu2  ;;  %v10108_v38 = vld [vmem:[#allocation5 + $0x2cc] sm:$0xf] }
 0x43d   :  { %v3468_v26 = vadd.f32 %v3467_v52, %v11485_v27  ;;  %v3292_v54 = vpop.f32.mrf.mxu0  ;;  %v8735_v52 = vld [vmem:[#allocation5 + $0x2d8] sm:$0xf0] }
 0x43e   :  { %13397 = vst [vmem:[#allocation156_spill] sm:$0xff] %v11590_v14  ;;  %v3293_v5 = vadd.f32 %v3292_v54, %v11392_v51  ;;  %v9246_v51 = vor.u32 %v10238_v20, %v9245_v10  ;;  %v8738_v54 = vor.u32 %v10108_v38, %v8735_v52 }
 0x43f   :  { %v3556_v25 = vpop.f32.mrf.mxu3  ;;  %v3381_v6 = vpop.f32.mrf.mxu1 }
 0x440   :  { %v11594_v44 = vadd.f32 %v3556_v25, %v3468_v26  ;;  %v3382_v21 = vadd.f32 %v3381_v6, %v3293_v5  ;;  %3607 = vmatmul.bf16.vlgmr.msra.gmra.mxu0 %v13398_v58  ;;  %4223 = vmatpush.bf16.msrb.mxu3 %v8738_v54 }
 0x441   :  { %3785 = vmatmul.bf16.vlgmr.msra.gmra.mxu2 %v13400_v7  ;;  %3956 = vmatpush.bf16.msrb.mxu0 %v9246_v51 }
 0x442   :  { %3696 = vmatmul.bf16.vlgmr.msra.gmra.mxu1 %v13399_v61  ;;  %v8482_v61 = vor.u32 %v10044_v62, %v8479_v42  ;;  %v4732_v12 = vmax.f32 %v3382_v21, 0.0  ;;  %v13404_v21 = vld [vmem:[#allocation86_spill] sm:$0xff] }
 0x444   :  { %3874 = vmatmul.bf16.vlgmr.msra.gmra.mxu3 %v13335_v39  ;;  %v3470_v49 = vpop.f32.mrf.mxu2  ;;  %4045 = vmatpush.bf16.msrb.mxu1 %v8482_v61 }
 0x445   :  { %v3471_v26 = vadd.f32 %v3470_v49, %v11485_v27  ;;  %v3294_v25 = vpop.f32.mrf.mxu0 }
 0x446   :  { %v3295_v6 = vadd.f32 %v3294_v25, %v11396_v55  ;;  %v13402_v25 = vld [vmem:[#allocation25_spill] sm:$0xff] }
 0x447   :  { %v3559_v5 = vpop.f32.mrf.mxu3  ;;  %v3383_v14 = vpop.f32.mrf.mxu1 }
 0x448   :  { %v11602_v39 = vadd.f32 %v3559_v5, %v3471_v26  ;;  %v3384_v7 = vadd.f32 %v3383_v14, %v3295_v6  ;;  %v13403_v14 = vld [vmem:[#allocation26_spill] sm:$0xff] }
 0x44a   :  { %v4736_v10 = vmax.f32 %v3384_v7, 0.0 }
 0x44c   :  { %v11604_v20 = vpack.c.bf16 %v4736_v10, %v4732_v12  ;;  %v3472_v49 = vpop.f32.mrf.mxu2 }
 0x44d   :  { %v3473_v30 = vadd.f32 %v3472_v49, %v11485_v27  ;;  %v3297_v52 = vpop.f32.mrf.mxu0 }
 0x44e   :  { %13401 = vst [vmem:[#allocation21_spill] sm:$0xff] %v11604_v20  ;;  %v3298_v55 = vadd.f32 %v3297_v52, %v11404_v33 }
 0x44f   :  { %v3561_v38 = vpop.f32.mrf.mxu3  ;;  %v3386_v51 = vpop.f32.mrf.mxu1 }
 0x450   :  { %v11608_v26 = vadd.f32 %v3561_v38, %v3473_v30  ;;  %v3387_v5 = vadd.f32 %v3386_v51, %v3298_v55  ;;  %3612 = vmatmul.bf16.gmra.mxu0 %v13402_v25 }
 0x451   :  { %3790 = vmatmul.bf16.gmra.mxu2 %v13404_v21 }
 0x452   :  { %3701 = vmatmul.bf16.gmra.mxu1 %v13403_v14  ;;  %v4740_v10 = vmax.f32 %v3387_v5, 0.0  ;;  %v10072_v5 = vld [vmem:[#allocation5 + $0x1ac] sm:$0xf] }
 0x454   :  { %3879 = vmatmul.bf16.gmra.mxu3 %v13338_v17  ;;  %v3475_v12 = vpop.f32.mrf.mxu2 }
 0x455   :  { %v3476_v61 = vadd.f32 %v3475_v12, %v11485_v27  ;;  %v3299_v54 = vpop.f32.mrf.mxu0 }
 0x456   :  { %v3300_v6 = vadd.f32 %v3299_v54, %v11408_v13  ;;  %v13406_v13 = vld [vmem:[#allocation29_spill] sm:$0xff] }
 0x457   :  { %v3564_v7 = vpop.f32.mrf.mxu3  ;;  %v3388_v33 = vpop.f32.mrf.mxu1  ;;  %v8591_v54 = vld [vmem:[#allocation5 + $0x1b8] sm:$0xf0] }
 0x458   :  { %v11616_v62 = vadd.f32 %v3564_v7, %v3476_v61  ;;  %v3389_v42 = vadd.f32 %v3388_v33, %v3300_v6  ;;  %v13407_v61 = vld [vmem:[#allocation30_spill] sm:$0xff]  ;;  %v13408_v7 = vld [vmem:[#allocation89_spill] sm:$0xff]  ;;  %v8594_v6 = vor.u32 %v10072_v5, %v8591_v54  ;;  %v9229_v33 = vld [vmem:[#allocation5 + $0x6a8] sm:$0xf] }
 0x459   :  { %v10040_v5 = vld [vmem:[#allocation5 + $0xac] sm:$0xf]  ;;  %v8463_v54 = vld [vmem:[#allocation5 + $0xb8] sm:$0xf0] }
 0x45a   :  { %v4744_v49 = vmax.f32 %v3389_v42, 0.0  ;;  %v10234_v42 = vld [vmem:[#allocation5 + $0x6b4] sm:$0xf0]  ;;  %4135 = vmatpush.bf16.msrb.mxu2 %v8594_v6 }
 0x45c   :  { %v11618_v30 = vpack.c.bf16 %v4744_v49, %v4740_v10  ;;  %v3477_v38 = vpop.f32.mrf.mxu2  ;;  %v10104_v10 = vld [vmem:[#allocation5 + $0x2ac] sm:$0xf] }
 0x45d   :  { %v3478_v52 = vadd.f32 %v3477_v38, %v11485_v27  ;;  %v3302_v51 = vpop.f32.mrf.mxu0  ;;  %v8719_v38 = vld [vmem:[#allocation5 + $0x2b8] sm:$0xf0] }
 0x45e   :  { %13405 = vst [vmem:[#allocation25_spill] sm:$0xff] %v11618_v30  ;;  %v3303_v20 = vadd.f32 %v3302_v51, %v11416_v35  ;;  %v9230_v35 = vor.u32 %v10234_v42, %v9229_v33  ;;  %v8722_v51 = vor.u32 %v10104_v10, %v8719_v38 }
 0x45f   :  { %v3566_v55 = vpop.f32.mrf.mxu3  ;;  %v3391_v12 = vpop.f32.mrf.mxu1 }
 0x460   :  { %v11622_v17 = vadd.f32 %v3566_v55, %v3478_v52  ;;  %v3392_v21 = vadd.f32 %v3391_v12, %v3303_v20  ;;  %3617 = vmatmul.bf16.gmra.mxu0 %v13406_v13  ;;  %4224 = vmatpush.bf16.msrb.mxu3 %v8722_v51 }
 0x461   :  { %3795 = vmatmul.bf16.gmra.mxu2 %v13408_v7  ;;  %3957 = vmatpush.bf16.msrb.mxu0 %v9230_v35 }
 0x462   :  { %3706 = vmatmul.bf16.gmra.mxu1 %v13407_v61  ;;  %v8466_v61 = vor.u32 %v10040_v5, %v8463_v54  ;;  %v4748_v14 = vmax.f32 %v3392_v21, 0.0  ;;  %v13412_v21 = vld [vmem:[#allocation92_spill] sm:$0xff] }
 0x464   :  { %3884 = vmatmul.bf16.gmra.mxu3 %v13341_v16  ;;  %v3480_v49 = vpop.f32.mrf.mxu2  ;;  %4046 = vmatpush.bf16.msrb.mxu1 %v8466_v61 }
 0x465   :  { %v3481_v52 = vadd.f32 %v3480_v49, %v11485_v27  ;;  %v3304_v55 = vpop.f32.mrf.mxu0 }
 0x466   :  { %v3305_v12 = vadd.f32 %v3304_v55, %v11420_v53  ;;  %v13410_v55 = vld [vmem:[#allocation33_spill] sm:$0xff] }
 0x467   :  { %v3569_v20 = vpop.f32.mrf.mxu3  ;;  %v3393_v30 = vpop.f32.mrf.mxu1 }
 0x468   :  { %v11630_v16 = vadd.f32 %v3569_v20, %v3481_v52  ;;  %v3394_v7 = vadd.f32 %v3393_v30, %v3305_v12  ;;  %v13411_v30 = vld [vmem:[#allocation34_spill] sm:$0xff] }
 0x46a   :  { %v4752_v33 = vmax.f32 %v3394_v7, 0.0 }
 0x46c   :  { %v11632_v42 = vpack.c.bf16 %v4752_v33, %v4748_v14  ;;  %v3482_v49 = vpop.f32.mrf.mxu2 }
 0x46d   :  { %v3483_v6 = vadd.f32 %v3482_v49, %v11485_v27  ;;  %v3307_v38 = vpop.f32.mrf.mxu0 }
 0x46e   :  { %13409 = vst [vmem:[#allocation29_spill] sm:$0xff] %v11632_v42  ;;  %v3308_v53 = vadd.f32 %v3307_v38, %v11428_v2 }
 0x46f   :  { %v3571_v10 = vpop.f32.mrf.mxu3  ;;  %v3396_v35 = vpop.f32.mrf.mxu1 }
 0x470   :  { %v11636_v52 = vadd.f32 %v3571_v10, %v3483_v6  ;;  %v3397_v20 = vadd.f32 %v3396_v35, %v3308_v53  ;;  %3622 = vmatmul.bf16.gmra.mxu0 %v13410_v55 }
 0x471   :  { %3800 = vmatmul.bf16.gmra.mxu2 %v13412_v21 }
 0x472   :  { %3711 = vmatmul.bf16.gmra.mxu1 %v13411_v30  ;;  %v4756_v33 = vmax.f32 %v3397_v20, 0.0  ;;  %v10068_v20 = vld [vmem:[#allocation5 + $0x18c] sm:$0xf] }
 0x474   :  { %3889 = vmatmul.bf16.gmra.mxu3 %v13344_v56  ;;  %v3485_v14 = vpop.f32.mrf.mxu2 }
 0x475   :  { %v3486_v61 = vadd.f32 %v3485_v14, %v11485_v27  ;;  %v3309_v51 = vpop.f32.mrf.mxu0 }
 0x476   :  { %v3310_v12 = vadd.f32 %v3309_v51, %v11432_v1  ;;  %v13414_v1 = vld [vmem:[#allocation37_spill] sm:$0xff] }
 0x477   :  { %v3574_v7 = vpop.f32.mrf.mxu3  ;;  %v3398_v2 = vpop.f32.mrf.mxu1  ;;  %v8575_v51 = vld [vmem:[#allocation5 + $0x198] sm:$0xf0] }
 0x478   :  { %v11644_v5 = vadd.f32 %v3574_v7, %v3486_v61  ;;  %v3399_v54 = vadd.f32 %v3398_v2, %v3310_v12  ;;  %v13415_v61 = vld [vmem:[#allocation38_spill] sm:$0xff]  ;;  %v13416_v7 = vld [vmem:[#allocation96_spill] sm:$0xff]  ;;  %v8578_v12 = vor.u32 %v10068_v20, %v8575_v51  ;;  %v9213_v2 = vld [vmem:[#allocation5 + $0x688] sm:$0xf] }
 0x479   :  { %v10036_v20 = vld [vmem:[#allocation5 + $0x8c] sm:$0xf]  ;;  %v8447_v51 = vld [vmem:[#allocation5 + $0x98] sm:$0xf0] }
 0x47a   :  { %v4760_v49 = vmax.f32 %v3399_v54, 0.0  ;;  %v10230_v54 = vld [vmem:[#allocation5 + $0x694] sm:$0xf0]  ;;  %4136 = vmatpush.bf16.msrb.mxu2 %v8578_v12 }
 0x47c   :  { %v11646_v6 = vpack.c.bf16 %v4760_v49, %v4756_v33  ;;  %v3487_v10 = vpop.f32.mrf.mxu2  ;;  %v10100_v33 = vld [vmem:[#allocation5 + $0x28c] sm:$0xf] }
 0x47d   :  { %v3488_v38 = vadd.f32 %v3487_v10, %v11485_v27  ;;  %v3312_v35 = vpop.f32.mrf.mxu0  ;;  %v8703_v10 = vld [vmem:[#allocation5 + $0x298] sm:$0xf0] }
 0x47e   :  { %13413 = vst [vmem:[#allocation33_spill] sm:$0xff] %v11646_v6  ;;  %v3313_v42 = vadd.f32 %v3312_v35, %v11440_v31  ;;  %v9214_v31 = vor.u32 %v10230_v54, %v9213_v2  ;;  %v8706_v35 = vor.u32 %v10100_v33, %v8703_v10 }
 0x47f   :  { %v3576_v53 = vpop.f32.mrf.mxu3  ;;  %v3401_v14 = vpop.f32.mrf.mxu1 }
 0x480   :  { %v11650_v56 = vadd.f32 %v3576_v53, %v3488_v38  ;;  %v3402_v21 = vadd.f32 %v3401_v14, %v3313_v42  ;;  %3627 = vmatmul.bf16.gmra.mxu0 %v13414_v1  ;;  %4225 = vmatpush.bf16.msrb.mxu3 %v8706_v35 }
 0x481   :  { %3805 = vmatmul.bf16.gmra.mxu2 %v13416_v7  ;;  %3958 = vmatpush.bf16.msrb.mxu0 %v9214_v31 }
 0x482   :  { %3716 = vmatmul.bf16.gmra.mxu1 %v13415_v61  ;;  %v8450_v61 = vor.u32 %v10036_v20, %v8447_v51  ;;  %v4764_v30 = vmax.f32 %v3402_v21, 0.0  ;;  %v13420_v21 = vld [vmem:[#allocation100_spill] sm:$0xff] }
 0x484   :  { %3894 = vmatmul.bf16.gmra.mxu3 %v13347_v18  ;;  %v3490_v49 = vpop.f32.mrf.mxu2  ;;  %4047 = vmatpush.bf16.msrb.mxu1 %v8450_v61 }
 0x485   :  { %v3491_v38 = vadd.f32 %v3490_v49, %v11485_v27  ;;  %v3314_v53 = vpop.f32.mrf.mxu0 }
 0x486   :  { %v3315_v14 = vadd.f32 %v3314_v53, %v11444_v19  ;;  %v13418_v53 = vld [vmem:[#allocation41_spill] sm:$0xff] }
 0x487   :  { %v3579_v42 = vpop.f32.mrf.mxu3  ;;  %v3403_v6 = vpop.f32.mrf.mxu1 }
 0x488   :  { %v11658_v18 = vadd.f32 %v3579_v42, %v3491_v38  ;;  %v3404_v7 = vadd.f32 %v3403_v6, %v3315_v14  ;;  %v13419_v6 = vld [vmem:[#allocation42_spill] sm:$0xff]  ;;  %v13421_v14 = vld [vmem:[#allocation107_spill] sm:$0xff] }
 0x48a   :  { %v4768_v2 = vmax.f32 %v3404_v7, 0.0 }
 0x48c   :  { %v11660_v54 = vpack.c.bf16 %v4768_v2, %v4764_v30  ;;  %v3492_v49 = vpop.f32.mrf.mxu2 }
 0x48d   :  { %v3493_v12 = vadd.f32 %v3492_v49, %v11485_v27  ;;  %v3317_v10 = vpop.f32.mrf.mxu0 }
 0x48e   :  { %13417 = vst [vmem:[#allocation37_spill] sm:$0xff] %v11660_v54  ;;  %v3318_v19 = vadd.f32 %v3317_v10, %v11452_v36 }
 0x48f   :  { %v3581_v33 = vpop.f32.mrf.mxu3  ;;  %v3406_v31 = vpop.f32.mrf.mxu1 }
 0x490   :  { %v11664_v38 = vadd.f32 %v3581_v33, %v3493_v12  ;;  %v3407_v42 = vadd.f32 %v3406_v31, %v3318_v19  ;;  %3632 = vmatmul.bf16.gmra.mxu0 %v13418_v53 }
 0x491   :  { %3810 = vmatmul.bf16.gmra.mxu2 %v13420_v21 }
 0x492   :  { %3721 = vmatmul.bf16.gmra.mxu1 %v13419_v6  ;;  %v4772_v49 = vmax.f32 %v3407_v42, 0.0  ;;  %v13427_v42 = vld [vmem:[#allocation105_spill] sm:$0xff] }
 0x494   :  { %3899 = vmatmul.bf16.gmra.mxu3 %v13350_v59  ;;  %v3495_v30 = vpop.f32.mrf.mxu2 }
 0x495   :  { %v3496_v61 = vadd.f32 %v3495_v30, %v11485_v27  ;;  %v3319_v35 = vpop.f32.mrf.mxu0 }
 0x496   :  { %v3320_v20 = vadd.f32 %v3319_v35, %v13421_v14  ;;  %v13424_v35 = vld [vmem:[#allocation45_spill] sm:$0xff]  ;;  %v10064_v14 = vld [vmem:[#allocation5 + $0x16c] sm:$0xf] }
 0x497   :  { %v3584_v7 = vpop.f32.mrf.mxu3  ;;  %v3408_v36 = vpop.f32.mrf.mxu1 }
 0x498   :  { %v11672_v51 = vadd.f32 %v3584_v7, %v3496_v61  ;;  %v3409_v2 = vadd.f32 %v3408_v36, %v3320_v20  ;;  %v13425_v61 = vld [vmem:[#allocation46_spill] sm:$0xff]  ;;  %v13426_v7 = vld [vmem:[#allocation104_spill] sm:$0xff]  ;;  %v8559_v20 = vld [vmem:[#allocation5 + $0x178] sm:$0xf0] }
 0x499   :  { %v8562_v36 = vor.u32 %v10064_v14, %v8559_v20  ;;  %v10032_v14 = vld [vmem:[#allocation5 + $0x6c] sm:$0xf]  ;;  %v8431_v20 = vld [vmem:[#allocation5 + $0x78] sm:$0xf0] }
 0x49a   :  { %v4776_v12 = vmax.f32 %v3409_v2, 0.0  ;;  %v9197_v2 = vld [vmem:[#allocation5 + $0x668] sm:$0xf] }
 0x49b   :  { %4137 = vmatpush.bf16.msrb.mxu2 %v8562_v36 }
 0x49c   :  { %v11674_v33 = vpack.c.bf16 %v4776_v12, %v4772_v49  ;;  %v3497_v10 = vpop.f32.mrf.mxu2  ;;  %v10226_v49 = vld [vmem:[#allocation5 + $0x674] sm:$0xf0]  ;;  %v10096_v12 = vld [vmem:[#allocation5 + $0x26c] sm:$0xf] }
 0x49d   :  { %v3498_v19 = vadd.f32 %v3497_v10, %v11485_v27  ;;  %v3322_v54 = vpop.f32.mrf.mxu0 }
 0x49e   :  { %13422 = vst [vmem:[#allocation41_spill] sm:$0xff] %v11674_v33  ;;  %v3323_v59 = vadd.f32 %v3322_v54, %v11464_v34  ;;  %v9198_v34 = vor.u32 %v10226_v49, %v9197_v2  ;;  %v8687_v54 = vld [vmem:[#allocation5 + $0x278] sm:$0xf0] }
 0x49f   :  { %v3586_v31 = vpop.f32.mrf.mxu3  ;;  %v3411_v30 = vpop.f32.mrf.mxu1 }
 0x4a0   :  { %v11678_v21 = vadd.f32 %v3586_v31, %v3498_v19  ;;  %v3412_v6 = vadd.f32 %v3411_v30, %v3323_v59  ;;  %3637 = vmatmul.bf16.gmra.mxu0 %v13424_v35  ;;  %v8690_v30 = vor.u32 %v10096_v12, %v8687_v54  ;;  %v8434_v35 = vor.u32 %v10032_v14, %v8431_v20 }
 0x4a1   :  { %3815 = vmatmul.bf16.gmra.mxu2 %v13426_v7  ;;  %3959 = vmatpush.bf16.msrb.mxu0 %v9198_v34 }
 0x4a2   :  { %13423 = vst [vmem:[#allocation107_spill] sm:$0xff] %v11678_v21  ;;  %3726 = vmatmul.bf16.gmra.mxu1 %v13425_v61  ;;  %4226 = vmatpush.bf16.msrb.mxu3 %v8690_v30  ;;  %v4780_v21 = vmax.f32 %v3412_v6, 0.0  ;;  %v13431_v6 = vld [vmem:[#allocation108_spill] sm:$0xff] }
 0x4a3   :  { %4048 = vmatpush.bf16.msrb.mxu1 %v8434_v35  ;;  %v13432_v30 = vld [vmem:[#allocation148_spill] sm:$0xff] }
 0x4a4   :  { %3904 = vmatmul.bf16.gmra.mxu3 %v13427_v42  ;;  %v3500_v10 = vpop.f32.mrf.mxu2 }
 0x4a5   :  { %v3501_v19 = vadd.f32 %v3500_v10, %v11485_v27  ;;  %v3324_v31 = vpop.f32.mrf.mxu0 }
 0x4a6   :  { %v3325_v33 = vadd.f32 %v3324_v31, %v11468_v32  ;;  %v13429_v31 = vld [vmem:[#allocation49_spill] sm:$0xff] }
 0x4a7   :  { %v3589_v59 = vpop.f32.mrf.mxu3  ;;  %v3413_v7 = vpop.f32.mrf.mxu1 }
 0x4a8   :  { %v11686_v42 = vadd.f32 %v3589_v59, %v3501_v19  ;;  %v3414_v61 = vadd.f32 %v3413_v7, %v3325_v33  ;;  %v13430_v33 = vld [vmem:[#allocation50_spill] sm:$0xff] }
 0x4aa   :  { %v4784_v2 = vmax.f32 %v3414_v61, 0.0 }
 0x4ac   :  { %v11688_v49 = vpack.c.bf16 %v4784_v2, %v4780_v21  ;;  %v3502_v10 = vpop.f32.mrf.mxu2 }
 0x4ad   :  { %v3503_v36 = vadd.f32 %v3502_v10, %v11485_v27  ;;  %v3327_v54 = vpop.f32.mrf.mxu0 }
 0x4ae   :  { %13428 = vst [vmem:[#allocation157_spill] sm:$0xff] %v11688_v49  ;;  %v3328_v32 = vadd.f32 %v3327_v54, %v11476_v24 }
 0x4af   :  { %v3591_v12 = vpop.f32.mrf.mxu3  ;;  %v3416_v34 = vpop.f32.mrf.mxu1 }
 0x4b0   :  { %v11692_v19 = vadd.f32 %v3591_v12, %v3503_v36  ;;  %v3417_v59 = vadd.f32 %v3416_v34, %v3328_v32  ;;  %3642 = vmatmul.bf16.gmra.mxu0 %v13429_v31 }
 0x4b1   :  { %3820 = vmatmul.bf16.gmra.mxu2 %v13431_v6 }
 0x4b2   :  { %3731 = vmatmul.bf16.gmra.mxu1 %v13430_v33  ;;  %v4788_v10 = vmax.f32 %v3417_v59, 0.0  ;;  %v13438_v59 = vld [vmem:[#allocation112_spill] sm:$0xff] }
 0x4b4   :  { %3909 = vmatmul.bf16.gmra.mxu3 %v13359_v48  ;;  %v3505_v21 = vpop.f32.mrf.mxu2 }
 0x4b5   :  { %v3506_v35 = vadd.f32 %v3505_v21, %v11485_v27  ;;  %v3329_v7 = vpop.f32.mrf.mxu0 }
 0x4b6   :  { %v3330_v14 = vadd.f32 %v3329_v7, %v13432_v30  ;;  %v13435_v7 = vld [vmem:[#allocation53_spill] sm:$0xff]  ;;  %v10060_v30 = vld [vmem:[#allocation5 + $0x14c] sm:$0xf] }
 0x4b7   :  { %v3594_v61 = vpop.f32.mrf.mxu3  ;;  %v3418_v24 = vpop.f32.mrf.mxu1 }
 0x4b8   :  { %v11700_v20 = vadd.f32 %v3594_v61, %v3506_v35  ;;  %v3419_v2 = vadd.f32 %v3418_v24, %v3330_v14  ;;  %v13436_v35 = vld [vmem:[#allocation54_spill] sm:$0xff]  ;;  %v13437_v61 = vld [vmem:[#allocation111_spill] sm:$0xff]  ;;  %v8543_v14 = vld [vmem:[#allocation5 + $0x158] sm:$0xf0] }
 0x4b9   :  { %v9181_v24 = vld [vmem:[#allocation5 + $0x648] sm:$0xf] }
 0x4ba   :  { %v4792_v36 = vmax.f32 %v3419_v2, 0.0  ;;  %v10222_v2 = vld [vmem:[#allocation5 + $0x654] sm:$0xf0] }
 0x4bc   :  { %v11702_v12 = vpack.c.bf16 %v4792_v36, %v4788_v10  ;;  %v3507_v54 = vpop.f32.mrf.mxu2  ;;  %v10092_v10 = vld [vmem:[#allocation5 + $0x24c] sm:$0xf]  ;;  %v8671_v36 = vld [vmem:[#allocation5 + $0x258] sm:$0xf0] }
 0x4bd   :  { %v3508_v32 = vadd.f32 %v3507_v54, %v11485_v27  ;;  %v3608_v49 = vpop.f32.mrf.mxu0  ;;  %v8546_v27 = vor.u32 %v10060_v30, %v8543_v14  ;;  %v8674_v54 = vor.u32 %v10092_v10, %v8671_v36  ;;  %v13439_v36 = vld [vmem:[#allocation57_spill] sm:$0xff] }
 0x4be   :  { %13433 = vst [vmem:[#allocation49_spill] sm:$0xff] %v11702_v12  ;;  %v3609_v48 = vadd.f32 %v3608_v49, %v11490_v41  ;;  %v9182_v49 = vor.u32 %v10222_v2, %v9181_v24 }
 0x4bf   :  { %v3596_v34 = vpop.f32.mrf.mxu3  ;;  %v3697_v21 = vpop.f32.mrf.mxu1  ;;  %4138 = vmatpush.bf16.msrb.mxu2 %v8546_v27  ;;  %4227 = vmatpush.bf16.msrb.mxu3 %v8674_v54 }
 0x4c0   :  { %v11706_v6 = vadd.f32 %v3596_v34, %v3508_v32  ;;  %v3698_v33 = vadd.f32 %v3697_v21, %v3609_v48  ;;  %3647 = vmatmul.bf16.gmra.mxu0 %v13435_v7 }
 0x4c1   :  { %3825 = vmatmul.bf16.gmra.mxu2 %v13437_v61  ;;  %3960 = vmatpush.bf16.msrb.mxu0 %v9182_v49  ;;  %v10028_v61 = vld [vmem:[#allocation5 + $0x4c] sm:$0xf] }
 0x4c2   :  { %13434 = vst [vmem:[#allocation148_spill] sm:$0xff] %v11706_v6  ;;  %3736 = vmatmul.bf16.gmra.mxu1 %v13436_v35  ;;  %v8415_v35 = vld [vmem:[#allocation5 + $0x58] sm:$0xf0]  ;;  %v13441_v49 = vld [vmem:[#allocation115_spill] sm:$0xff] }
 0x4c3   :  { %v8418_v14 = vor.u32 %v10028_v61, %v8415_v35 }
 0x4c4   :  { %3914 = vmatmul.bf16.gmra.mxu3 %v13438_v59  ;;  %v3786_v41 = vpop.f32.mrf.mxu2 }
 0x4c5   :  { %v3787_v32 = vadd.f32 %v3786_v41, %v3698_v33  ;;  %v3610_v34 = vpop.f32.mrf.mxu0  ;;  %4049 = vmatpush.bf16.msrb.mxu1 %v8418_v14  ;;  %v13440_v41 = vld [vmem:[#allocation58_spill] sm:$0xff] }
 0x4c6   :  { %v3611_v21 = vadd.f32 %v3610_v34, %v11496_v60 }
 0x4c7   :  { %v3875_v48 = vpop.f32.mrf.mxu3  ;;  %v3699_v12 = vpop.f32.mrf.mxu1 }
 0x4c8   :  { %v11713_v59 = vadd.f32 %v3875_v48, %v3787_v32  ;;  %v3700_v30 = vadd.f32 %v3699_v12, %v3611_v21 }
 0x4cc   :  { %v3788_v7 = vpop.f32.mrf.mxu2 }
 0x4cd   :  { %v3789_v6 = vadd.f32 %v3788_v7, %v3700_v30  ;;  %v3613_v2 = vpop.f32.mrf.mxu0 }
 0x4ce   :  { %v3614_v33 = vadd.f32 %v3613_v2, %v11504_v4 }
 0x4cf   :  { %v3877_v24 = vpop.f32.mrf.mxu3  ;;  %v3702_v10 = vpop.f32.mrf.mxu1 }
 0x4d0   :  { %v11716_v27 = vadd.f32 %v3877_v24, %v3789_v6  ;;  %v3703_v60 = vadd.f32 %v3702_v10, %v3614_v33  ;;  %3652 = vmatmul.bf16.gmra.mxu0 %v13439_v36  ;;  %v13442_v10 = vld [vmem:[#allocation61_spill] sm:$0xff] }
 0x4d1   :  { %3830 = vmatmul.bf16.gmra.mxu2 %v13441_v49 }
 0x4d2   :  { %3741 = vmatmul.bf16.gmra.mxu1 %v13440_v41 }
 0x4d4   :  { %3919 = vmatmul.bf16.gmra.mxu3 %v13370_v15  ;;  %v3791_v12 = vpop.f32.mrf.mxu2  ;;  %v8399_v15 = vld [vmem:[#allocation5 + $0x38] sm:$0xf0] }
 0x4d5   :  { %v3792_v35 = vadd.f32 %v3791_v12, %v3703_v60  ;;  %v3615_v7 = vpop.f32.mrf.mxu0  ;;  %v13443_v60 = vld [vmem:[#allocation62_spill] sm:$0xff]  ;;  %v13444_v12 = vld [vmem:[#allocation119_spill] sm:$0xff] }
 0x4d6   :  { %v3616_v54 = vadd.f32 %v3615_v7, %v11510_v8  ;;  %v10056_v8 = vld [vmem:[#allocation5 + $0x12c] sm:$0xf] }
 0x4d7   :  { %v3880_v61 = vpop.f32.mrf.mxu3  ;;  %v3704_v32 = vpop.f32.mrf.mxu1 }
 0x4d8   :  { %v11723_v4 = vadd.f32 %v3880_v61, %v3792_v35  ;;  %v3705_v6 = vadd.f32 %v3704_v32, %v3616_v54  ;;  %v8527_v35 = vld [vmem:[#allocation5 + $0x138] sm:$0xf0]  ;;  %v9165_v61 = vld [vmem:[#allocation5 + $0x628] sm:$0xf]  ;;  %v10218_v54 = vld [vmem:[#allocation5 + $0x634] sm:$0xf0] }
 0x4d9   :  { %v8530_v7 = vor.u32 %v10056_v8, %v8527_v35  ;;  %v10088_v32 = vld [vmem:[#allocation5 + $0x22c] sm:$0xf] }
 0x4db   :  { %4139 = vmatpush.bf16.msrb.mxu2 %v8530_v7 }
 0x4dc   :  { %v3793_v48 = vpop.f32.mrf.mxu2 }
 0x4dd   :  { %v3794_v34 = vadd.f32 %v3793_v48, %v3705_v6  ;;  %v3618_v30 = vpop.f32.mrf.mxu0  ;;  %v8655_v6 = vld [vmem:[#allocation5 + $0x238] sm:$0xf0]  ;;  %v9166_v48 = vor.u32 %v10218_v54, %v9165_v61 }
 0x4de   :  { %v3619_v14 = vadd.f32 %v3618_v30, %v11518_v47 }
 0x4df   :  { %v3882_v21 = vpop.f32.mrf.mxu3  ;;  %v3707_v24 = vpop.f32.mrf.mxu1  ;;  %3961 = vmatpush.bf16.msrb.mxu0 %v9166_v48  ;;  %v13447_v48 = vld [vmem:[#allocation123_spill] sm:$0xff] }
 0x4e0   :  { %v11726_v2 = vadd.f32 %v3882_v21, %v3794_v34  ;;  %v3708_v33 = vadd.f32 %v3707_v24, %v3619_v14  ;;  %3657 = vmatmul.bf16.gmra.mxu0 %v13442_v10  ;;  %v8658_v34 = vor.u32 %v10088_v32, %v8655_v6  ;;  %v13445_v6 = vld [vmem:[#allocation65_spill] sm:$0xff] }
 0x4e1   :  { %3835 = vmatmul.bf16.gmra.mxu2 %v13444_v12  ;;  %v10024_v12 = vld [vmem:[#allocation5 + $0x2c] sm:$0xf] }
 0x4e2   :  { %3746 = vmatmul.bf16.gmra.mxu1 %v13443_v60  ;;  %4228 = vmatpush.bf16.msrb.mxu3 %v8658_v34  ;;  %v8402_v35 = vor.u32 %v10024_v12, %v8399_v15 }
 0x4e4   :  { %3924 = vmatmul.bf16.gmra.mxu3 %v13374_v11  ;;  %v3796_v47 = vpop.f32.mrf.mxu2  ;;  %4050 = vmatpush.bf16.msrb.mxu1 %v8402_v35 }
 0x4e5   :  { %v3797_v21 = vadd.f32 %v3796_v47, %v3708_v33  ;;  %v3620_v14 = vpop.f32.mrf.mxu0  ;;  %v13446_v47 = vld [vmem:[#allocation66_spill] sm:$0xff] }
 0x4e6   :  { %v3621_v24 = vadd.f32 %v3620_v14, %v11524_v63 }
 0x4e7   :  { %v3885_v30 = vpop.f32.mrf.mxu3  ;;  %v3709_v60 = vpop.f32.mrf.mxu1 }
 0x4e8   :  { %v11733_v11 = vadd.f32 %v3885_v30, %v3797_v21  ;;  %v3710_v8 = vadd.f32 %v3709_v60, %v3621_v24 }
 0x4ec   :  { %v3798_v49 = vpop.f32.mrf.mxu2 }
 0x4ed   :  { %v3799_v41 = vadd.f32 %v3798_v49, %v3710_v8  ;;  %v3623_v54 = vpop.f32.mrf.mxu0 }
 0x4ee   :  { %v3624_v33 = vadd.f32 %v3623_v54, %v11532_v22 }
 0x4ef   :  { %v3887_v61 = vpop.f32.mrf.mxu3  ;;  %v3712_v32 = vpop.f32.mrf.mxu1 }
 0x4f0   :  { %v11736_v7 = vadd.f32 %v3887_v61, %v3799_v41  ;;  %v3713_v63 = vadd.f32 %v3712_v32, %v3624_v33  ;;  %3662 = vmatmul.bf16.gmra.mxu0 %v13445_v6  ;;  %v13448_v32 = vld [vmem:[#allocation69_spill] sm:$0xff] }
 0x4f1   :  { %3840 = vmatmul.bf16.gmra.mxu2 %v13447_v48 }
 0x4f2   :  { %3751 = vmatmul.bf16.gmra.mxu1 %v13446_v47 }
 0x4f4   :  { %3929 = vmatmul.bf16.gmra.mxu3 %v13378_v50  ;;  %v3801_v15 = vpop.f32.mrf.mxu2  ;;  %v8383_v50 = vld [vmem:[#allocation5 + $0x18] sm:$0xf0] }
 0x4f5   :  { %v3802_v60 = vadd.f32 %v3801_v15, %v3713_v63  ;;  %v3625_v49 = vpop.f32.mrf.mxu0  ;;  %v13449_v63 = vld [vmem:[#allocation70_spill] sm:$0xff]  ;;  %v13450_v15 = vld [vmem:[#allocation127_spill] sm:$0xff] }
 0x4f6   :  { %v3626_v34 = vadd.f32 %v3625_v49, %v11538_v9  ;;  %v10052_v9 = vld [vmem:[#allocation5 + $0x10c] sm:$0xf] }
 0x4f7   :  { %v3890_v12 = vpop.f32.mrf.mxu3  ;;  %v3714_v21 = vpop.f32.mrf.mxu1 }
 0x4f8   :  { %v11743_v22 = vadd.f32 %v3890_v12, %v3802_v60  ;;  %v3715_v41 = vadd.f32 %v3714_v21, %v3626_v34  ;;  %v8511_v60 = vld [vmem:[#allocation5 + $0x118] sm:$0xf0]  ;;  %v9149_v12 = vld [vmem:[#allocation5 + $0x608] sm:$0xf]  ;;  %v10214_v34 = vld [vmem:[#allocation5 + $0x614] sm:$0xf0] }
 0x4f9   :  { %v8514_v49 = vor.u32 %v10052_v9, %v8511_v60  ;;  %v10084_v21 = vld [vmem:[#allocation5 + $0x20c] sm:$0xf] }
 0x4fb   :  { %4140 = vmatpush.bf16.msrb.mxu2 %v8514_v49 }
 0x4fc   :  { %v3803_v30 = vpop.f32.mrf.mxu2 }
 0x4fd   :  { %v3804_v14 = vadd.f32 %v3803_v30, %v3715_v41  ;;  %v3628_v8 = vpop.f32.mrf.mxu0  ;;  %v8639_v41 = vld [vmem:[#allocation5 + $0x218] sm:$0xf0]  ;;  %v9150_v30 = vor.u32 %v10214_v34, %v9149_v12 }
 0x4fe   :  { %v3629_v35 = vadd.f32 %v3628_v8, %v11546_v40 }
 0x4ff   :  { %v3892_v24 = vpop.f32.mrf.mxu3  ;;  %v3717_v61 = vpop.f32.mrf.mxu1  ;;  %3962 = vmatpush.bf16.msrb.mxu0 %v9150_v30  ;;  %v13453_v30 = vld [vmem:[#allocation131_spill] sm:$0xff] }
 0x500   :  { %v11746_v54 = vadd.f32 %v3892_v24, %v3804_v14  ;;  %v3718_v33 = vadd.f32 %v3717_v61, %v3629_v35  ;;  %3667 = vmatmul.bf16.gmra.mxu0 %v13448_v32  ;;  %v8642_v14 = vor.u32 %v10084_v21, %v8639_v41  ;;  %v13451_v41 = vld [vmem:[#allocation73_spill] sm:$0xff] }
 0x501   :  { %3845 = vmatmul.bf16.gmra.mxu2 %v13450_v15  ;;  %v10020_v15 = vld [vmem:[#allocation5 + $0xc] sm:$0xf] }
 0x502   :  { %3756 = vmatmul.bf16.gmra.mxu1 %v13449_v63  ;;  %4229 = vmatpush.bf16.msrb.mxu3 %v8642_v14  ;;  %v8386_v60 = vor.u32 %v10020_v15, %v8383_v50 }
 0x504   :  { %3934 = vmatmul.bf16.gmra.mxu3 %v13382_v37  ;;  %v3806_v40 = vpop.f32.mrf.mxu2  ;;  %4051 = vmatpush.bf16.msrb.mxu1 %v8386_v60 }
 0x505   :  { %v3807_v24 = vadd.f32 %v3806_v40, %v3718_v33  ;;  %v3630_v35 = vpop.f32.mrf.mxu0  ;;  %v13452_v40 = vld [vmem:[#allocation74_spill] sm:$0xff] }
 0x506   :  { %v3631_v61 = vadd.f32 %v3630_v35, %v11552_v28 }
 0x507   :  { %v3895_v8 = vpop.f32.mrf.mxu3  ;;  %v3719_v63 = vpop.f32.mrf.mxu1 }
 0x508   :  { %v11753_v37 = vadd.f32 %v3895_v8, %v3807_v24  ;;  %v3720_v9 = vadd.f32 %v3719_v63, %v3631_v61 }
 0x50c   :  { %v3808_v48 = vpop.f32.mrf.mxu2 }
 0x50d   :  { %v3809_v47 = vadd.f32 %v3808_v48, %v3720_v9  ;;  %v3633_v34 = vpop.f32.mrf.mxu0 }
 0x50e   :  { %v3634_v33 = vadd.f32 %v3633_v34, %v11560_v46 }
 0x50f   :  { %v3897_v12 = vpop.f32.mrf.mxu3  ;;  %v3722_v21 = vpop.f32.mrf.mxu1 }
 0x510   :  { %v11756_v49 = vadd.f32 %v3897_v12, %v3809_v47  ;;  %v3723_v28 = vadd.f32 %v3722_v21, %v3634_v33  ;;  %3672 = vmatmul.bf16.gmra.mxu0 %v13451_v41  ;;  %v13454_v21 = vld [vmem:[#allocation77_spill] sm:$0xff] }
 0x511   :  { %3850 = vmatmul.bf16.gmra.mxu2 %v13453_v30 }
 0x512   :  { %3761 = vmatmul.bf16.gmra.mxu1 %v13452_v40 }
 0x514   :  { %3939 = vmatmul.bf16.gmra.mxu3 %v13386_v3  ;;  %v3811_v50 = vpop.f32.mrf.mxu2  ;;  %v9007_v3 = vld [vmem:[#allocation5 + $0x4f8] sm:$0xf0] }
 0x515   :  { %v3812_v63 = vadd.f32 %v3811_v50, %v3723_v28  ;;  %v3635_v48 = vpop.f32.mrf.mxu0  ;;  %v13455_v28 = vld [vmem:[#allocation78_spill] sm:$0xff]  ;;  %v13456_v50 = vld [vmem:[#allocation135_spill] sm:$0xff] }
 0x516   :  { %v3636_v14 = vadd.f32 %v3635_v48, %v11566_v0  ;;  %v10208_v0 = vld [vmem:[#allocation5 + $0x5ec] sm:$0xf] }
 0x517   :  { %v3900_v15 = vpop.f32.mrf.mxu3  ;;  %v3724_v24 = vpop.f32.mrf.mxu1 }
 0x518   :  { %v11763_v46 = vadd.f32 %v3900_v15, %v3812_v63  ;;  %v3725_v47 = vadd.f32 %v3724_v24, %v3636_v14  ;;  %v9135_v63 = vld [vmem:[#allocation5 + $0x5f8] sm:$0xf0]  ;;  %v10144_v15 = vld [vmem:[#allocation5 + $0x3ec] sm:$0xf] }
 0x519   :  { %v9138_v48 = vor.u32 %v10208_v0, %v9135_v63  ;;  %v8879_v14 = vld [vmem:[#allocation5 + $0x3f8] sm:$0xf0]  ;;  %v10240_v24 = vld [vmem:[#allocation5 + $0x6ec] sm:$0xf] }
 0x51b   :  { %4489 = vmatpush.bf16.msra.mxu2 %v9138_v48 }
 0x51c   :  { %v3813_v8 = vpop.f32.mrf.mxu2 }
 0x51d   :  { %v3814_v35 = vadd.f32 %v3813_v8, %v3725_v47  ;;  %v3638_v9 = vpop.f32.mrf.mxu0  ;;  %v9263_v47 = vld [vmem:[#allocation5 + $0x6f8] sm:$0xf0]  ;;  %v8882_v8 = vor.u32 %v10144_v15, %v8879_v14 }
 0x51e   :  { %v3639_v60 = vadd.f32 %v3638_v9, %v11574_v29 }
 0x51f   :  { %v3902_v61 = vpop.f32.mrf.mxu3  ;;  %v3727_v12 = vpop.f32.mrf.mxu1  ;;  %4311 = vmatpush.bf16.msra.mxu0 %v8882_v8  ;;  %v13459_v8 = vld [vmem:[#allocation139_spill] sm:$0xff] }
 0x520   :  { %v11766_v34 = vadd.f32 %v3902_v61, %v3814_v35  ;;  %v3728_v33 = vadd.f32 %v3727_v12, %v3639_v60  ;;  %3677 = vmatmul.bf16.gmra.mxu0 %v13454_v21  ;;  %v9266_v35 = vor.u32 %v10240_v24, %v9263_v47  ;;  %v13457_v47 = vld [vmem:[#allocation81_spill] sm:$0xff] }
 0x521   :  { %3855 = vmatmul.bf16.gmra.mxu2 %v13456_v50  ;;  %v10176_v50 = vld [vmem:[#allocation5 + $0x4ec] sm:$0xf] }
 0x522   :  { %3766 = vmatmul.bf16.gmra.mxu1 %v13455_v28  ;;  %4578 = vmatpush.bf16.msra.mxu3 %v9266_v35  ;;  %v9010_v63 = vor.u32 %v10176_v50, %v9007_v3 }
 0x524   :  { %3944 = vmatmul.bf16.gmra.mxu3 %v13390_v43  ;;  %v3816_v29 = vpop.f32.mrf.mxu2  ;;  %4400 = vmatpush.bf16.msra.mxu1 %v9010_v63 }
 0x525   :  { %v3817_v61 = vadd.f32 %v3816_v29, %v3728_v33  ;;  %v3640_v60 = vpop.f32.mrf.mxu0  ;;  %v13458_v29 = vld [vmem:[#allocation82_spill] sm:$0xff] }
 0x526   :  { %v3641_v12 = vadd.f32 %v3640_v60, %v11580_v23 }
 0x527   :  { %v3905_v9 = vpop.f32.mrf.mxu3  ;;  %v3729_v28 = vpop.f32.mrf.mxu1 }
 0x528   :  { %v11773_v43 = vadd.f32 %v3905_v9, %v3817_v61  ;;  %v3730_v0 = vadd.f32 %v3729_v28, %v3641_v12 }
 0x52c   :  { %v3818_v30 = vpop.f32.mrf.mxu2 }
 0x52d   :  { %v3819_v40 = vadd.f32 %v3818_v30, %v3730_v0  ;;  %v3643_v14 = vpop.f32.mrf.mxu0 }
 0x52e   :  { %v3644_v33 = vadd.f32 %v3643_v14, %v11588_v57 }
 0x52f   :  { %v3907_v15 = vpop.f32.mrf.mxu3  ;;  %v3732_v24 = vpop.f32.mrf.mxu1 }
 0x530   :  { %v11776_v48 = vadd.f32 %v3907_v15, %v3819_v40  ;;  %v3733_v23 = vadd.f32 %v3732_v24, %v3644_v33  ;;  %3682 = vmatmul.bf16.gmra.mxu0 %v13457_v47  ;;  %v13460_v24 = vld [vmem:[#allocation85_spill] sm:$0xff] }
 0x531   :  { %3860 = vmatmul.bf16.gmra.mxu2 %v13459_v8 }
 0x532   :  { %3771 = vmatmul.bf16.gmra.mxu1 %v13458_v29 }
 0x534   :  { %3949 = vmatmul.bf16.gmra.mxu3 %v13394_v45  ;;  %v3821_v3 = vpop.f32.mrf.mxu2  ;;  %v8991_v45 = vld [vmem:[#allocation5 + $0x4d8] sm:$0xf0] }
 0x535   :  { %v3822_v28 = vadd.f32 %v3821_v3, %v3733_v23  ;;  %v3645_v30 = vpop.f32.mrf.mxu0  ;;  %v13461_v23 = vld [vmem:[#allocation19_spill] sm:$0xff]  ;;  %v13462_v3 = vld [vmem:[#allocation20_spill] sm:$0xff] }
 0x536   :  { %v3646_v35 = vadd.f32 %v3645_v30, %v11594_v44  ;;  %v10204_v44 = vld [vmem:[#allocation5 + $0x5cc] sm:$0xf] }
 0x537   :  { %v3910_v50 = vpop.f32.mrf.mxu3  ;;  %v3734_v61 = vpop.f32.mrf.mxu1 }
 0x538   :  { %v11783_v57 = vadd.f32 %v3910_v50, %v3822_v28  ;;  %v3735_v40 = vadd.f32 %v3734_v61, %v3646_v35  ;;  %v9119_v28 = vld [vmem:[#allocation5 + $0x5d8] sm:$0xf0]  ;;  %v10140_v50 = vld [vmem:[#allocation5 + $0x3cc] sm:$0xf] }
 0x539   :  { %v9122_v30 = vor.u32 %v10204_v44, %v9119_v28  ;;  %v8863_v35 = vld [vmem:[#allocation5 + $0x3d8] sm:$0xf0]  ;;  %v10236_v61 = vld [vmem:[#allocation5 + $0x6cc] sm:$0xf] }
 0x53b   :  { %4490 = vmatpush.bf16.msra.mxu2 %v9122_v30 }
 0x53c   :  { %v3823_v9 = vpop.f32.mrf.mxu2 }
 0x53d   :  { %v3824_v60 = vadd.f32 %v3823_v9, %v3735_v40  ;;  %v3648_v0 = vpop.f32.mrf.mxu0  ;;  %v9247_v40 = vld [vmem:[#allocation5 + $0x6d8] sm:$0xf0]  ;;  %v8866_v9 = vor.u32 %v10140_v50, %v8863_v35 }
 0x53e   :  { %v3649_v63 = vadd.f32 %v3648_v0, %v11602_v39 }
 0x53f   :  { %v3912_v12 = vpop.f32.mrf.mxu3  ;;  %v3737_v15 = vpop.f32.mrf.mxu1  ;;  %4312 = vmatpush.bf16.msra.mxu0 %v8866_v9  ;;  %v13465_v9 = vld [vmem:[#allocation24_spill] sm:$0xff] }
 0x540   :  { %v11786_v14 = vadd.f32 %v3912_v12, %v3824_v60  ;;  %v3738_v33 = vadd.f32 %v3737_v15, %v3649_v63  ;;  %3963 = vmatmul.bf16.vlgmr.msrb.gmra.mxu0 %v13460_v24  ;;  %v9250_v60 = vor.u32 %v10236_v61, %v9247_v40  ;;  %v13463_v40 = vld [vmem:[#allocation88_spill] sm:$0xff] }
 0x541   :  { %4141 = vmatmul.bf16.vlgmr.msrb.gmra.mxu2 %v13462_v3  ;;  %v10172_v3 = vld [vmem:[#allocation5 + $0x4cc] sm:$0xf] }
 0x542   :  { %4052 = vmatmul.bf16.vlgmr.msrb.gmra.mxu1 %v13461_v23  ;;  %4579 = vmatpush.bf16.msra.mxu3 %v9250_v60  ;;  %v8994_v28 = vor.u32 %v10172_v3, %v8991_v45 }
 0x544   :  { %4230 = vmatmul.bf16.vlgmr.msrb.gmra.mxu3 %v13398_v58  ;;  %v3826_v39 = vpop.f32.mrf.mxu2  ;;  %4401 = vmatpush.bf16.msra.mxu1 %v8994_v28 }
 0x545   :  { %v3827_v12 = vadd.f32 %v3826_v39, %v3738_v33  ;;  %v3650_v63 = vpop.f32.mrf.mxu0  ;;  %v13464_v39 = vld [vmem:[#allocation23_spill] sm:$0xff] }
 0x546   :  { %v3651_v15 = vadd.f32 %v3650_v63, %v11608_v26 }
 0x547   :  { %v3915_v0 = vpop.f32.mrf.mxu3  ;;  %v3739_v23 = vpop.f32.mrf.mxu1 }
 0x548   :  { %v11793_v58 = vadd.f32 %v3915_v0, %v3827_v12  ;;  %v3740_v44 = vadd.f32 %v3739_v23, %v3651_v15 }
 0x54c   :  { %v3828_v8 = vpop.f32.mrf.mxu2 }
 0x54d   :  { %v3829_v29 = vadd.f32 %v3828_v8, %v3740_v44  ;;  %v3653_v35 = vpop.f32.mrf.mxu0 }
 0x54e   :  { %v3654_v33 = vadd.f32 %v3653_v35, %v11616_v62 }
 0x54f   :  { %v3917_v50 = vpop.f32.mrf.mxu3  ;;  %v3742_v61 = vpop.f32.mrf.mxu1 }
 0x550   :  { %v11796_v30 = vadd.f32 %v3917_v50, %v3829_v29  ;;  %v3743_v26 = vadd.f32 %v3742_v61, %v3654_v33  ;;  %3968 = vmatmul.bf16.gmra.mxu0 %v13463_v40  ;;  %v13466_v33 = vld [vmem:[#allocation91_spill] sm:$0xff] }
 0x551   :  { %4146 = vmatmul.bf16.gmra.mxu2 %v13465_v9  ;;  %v13467_v61 = vld [vmem:[#allocation27_spill] sm:$0xff] }
 0x552   :  { %4057 = vmatmul.bf16.gmra.mxu1 %v13464_v39  ;;  %v9103_v39 = vld [vmem:[#allocation5 + $0x5b8] sm:$0xf0]  ;;  %v10136_v9 = vld [vmem:[#allocation5 + $0x3ac] sm:$0xf] }
 0x554   :  { %4235 = vmatmul.bf16.gmra.mxu3 %v13402_v25  ;;  %v3831_v45 = vpop.f32.mrf.mxu2 }
 0x555   :  { %v3832_v60 = vadd.f32 %v3831_v45, %v3743_v26  ;;  %v3655_v8 = vpop.f32.mrf.mxu0  ;;  %v13468_v26 = vld [vmem:[#allocation28_spill] sm:$0xff] }
 0x556   :  { %v3656_v0 = vadd.f32 %v3655_v8, %v11622_v17  ;;  %v10200_v17 = vld [vmem:[#allocation5 + $0x5ac] sm:$0xf]  ;;  %v9231_v8 = vld [vmem:[#allocation5 + $0x6b8] sm:$0xf0] }
 0x557   :  { %v3920_v12 = vpop.f32.mrf.mxu3  ;;  %v3744_v63 = vpop.f32.mrf.mxu1  ;;  %v9106_v45 = vor.u32 %v10200_v17, %v9103_v39 }
 0x558   :  { %v11803_v62 = vadd.f32 %v3920_v12, %v3832_v60  ;;  %v3745_v29 = vadd.f32 %v3744_v63, %v3656_v0  ;;  %v8847_v60 = vld [vmem:[#allocation5 + $0x3b8] sm:$0xf0]  ;;  %v10232_v12 = vld [vmem:[#allocation5 + $0x6ac] sm:$0xf] }
 0x559   :  { %v8850_v0 = vor.u32 %v10136_v9, %v8847_v60  ;;  %v9234_v63 = vor.u32 %v10232_v12, %v9231_v8  ;;  %4491 = vmatpush.bf16.msra.mxu2 %v9106_v45  ;;  %v13469_v8 = vld [vmem:[#allocation94_spill] sm:$0xff] }
 0x55b   :  { %4313 = vmatpush.bf16.msra.mxu0 %v8850_v0  ;;  %4580 = vmatpush.bf16.msra.mxu3 %v9234_v63  ;;  %v13471_v0 = vld [vmem:[#allocation32_spill] sm:$0xff] }
 0x55c   :  { %v3833_v15 = vpop.f32.mrf.mxu2 }
 0x55d   :  { %v3834_v23 = vadd.f32 %v3833_v15, %v3745_v29  ;;  %v3658_v44 = vpop.f32.mrf.mxu0 }
 0x55e   :  { %v3659_v28 = vadd.f32 %v3658_v44, %v11630_v16 }
 0x55f   :  { %v3922_v3 = vpop.f32.mrf.mxu3  ;;  %v3747_v50 = vpop.f32.mrf.mxu1 }
 0x560   :  { %v11806_v35 = vadd.f32 %v3922_v3, %v3834_v23  ;;  %v3748_v25 = vadd.f32 %v3747_v50, %v3659_v28  ;;  %3973 = vmatmul.bf16.gmra.mxu0 %v13466_v33  ;;  %v10168_v28 = vld [vmem:[#allocation5 + $0x4ac] sm:$0xf]  ;;  %v8975_v50 = vld [vmem:[#allocation5 + $0x4b8] sm:$0xf0] }
 0x561   :  { %4151 = vmatmul.bf16.gmra.mxu2 %v13468_v26  ;;  %v8978_v26 = vor.u32 %v10168_v28, %v8975_v50 }
 0x562   :  { %4062 = vmatmul.bf16.gmra.mxu1 %v13467_v61 }
 0x563   :  { %4402 = vmatpush.bf16.msra.mxu1 %v8978_v26 }
 0x564   :  { %4240 = vmatmul.bf16.gmra.mxu3 %v13406_v13  ;;  %v3836_v16 = vpop.f32.mrf.mxu2 }
 0x565   :  { %v3837_v29 = vadd.f32 %v3836_v16, %v3748_v25  ;;  %v3660_v23 = vpop.f32.mrf.mxu0  ;;  %v13470_v16 = vld [vmem:[#allocation31_spill] sm:$0xff] }
 0x566   :  { %v3661_v3 = vadd.f32 %v3660_v23, %v11636_v52 }
 0x567   :  { %v3925_v15 = vpop.f32.mrf.mxu3  ;;  %v3749_v44 = vpop.f32.mrf.mxu1 }
 0x568   :  { %v11813_v13 = vadd.f32 %v3925_v15, %v3837_v29  ;;  %v3750_v61 = vadd.f32 %v3749_v44, %v3661_v3 }
 0x56c   :  { %v3838_v17 = vpop.f32.mrf.mxu2 }
 0x56d   :  { %v3839_v39 = vadd.f32 %v3838_v17, %v3750_v61  ;;  %v3663_v60 = vpop.f32.mrf.mxu0 }
 0x56e   :  { %v3664_v25 = vadd.f32 %v3663_v60, %v11644_v5 }
 0x56f   :  { %v3927_v9 = vpop.f32.mrf.mxu3  ;;  %v3752_v12 = vpop.f32.mrf.mxu1 }
 0x570   :  { %v11816_v45 = vadd.f32 %v3927_v9, %v3839_v39  ;;  %v3753_v52 = vadd.f32 %v3752_v12, %v3664_v25  ;;  %3978 = vmatmul.bf16.gmra.mxu0 %v13469_v8  ;;  %v13472_v25 = vld [vmem:[#allocation98_spill] sm:$0xff]  ;;  %v13473_v12 = vld [vmem:[#allocation35_spill] sm:$0xff] }
 0x571   :  { %4156 = vmatmul.bf16.gmra.mxu2 %v13471_v0  ;;  %v10132_v0 = vld [vmem:[#allocation5 + $0x38c] sm:$0xf] }
 0x572   :  { %4067 = vmatmul.bf16.gmra.mxu1 %v13470_v16  ;;  %v9087_v16 = vld [vmem:[#allocation5 + $0x598] sm:$0xf0] }
 0x574   :  { %4245 = vmatmul.bf16.gmra.mxu3 %v13410_v55  ;;  %v3841_v63 = vpop.f32.mrf.mxu2 }
 0x575   :  { %v3842_v29 = vadd.f32 %v3841_v63, %v3753_v52  ;;  %v3665_v23 = vpop.f32.mrf.mxu0  ;;  %v13474_v52 = vld [vmem:[#allocation36_spill] sm:$0xff] }
 0x576   :  { %v3666_v3 = vadd.f32 %v3665_v23, %v11650_v56  ;;  %v10196_v56 = vld [vmem:[#allocation5 + $0x58c] sm:$0xf]  ;;  %v9215_v23 = vld [vmem:[#allocation5 + $0x698] sm:$0xf0] }
 0x577   :  { %v3930_v15 = vpop.f32.mrf.mxu3  ;;  %v3754_v44 = vpop.f32.mrf.mxu1  ;;  %v9090_v63 = vor.u32 %v10196_v56, %v9087_v16 }
 0x578   :  { %v11823_v5 = vadd.f32 %v3930_v15, %v3842_v29  ;;  %v3755_v28 = vadd.f32 %v3754_v44, %v3666_v3  ;;  %v8831_v29 = vld [vmem:[#allocation5 + $0x398] sm:$0xf0]  ;;  %v10228_v15 = vld [vmem:[#allocation5 + $0x68c] sm:$0xf] }
 0x579   :  { %v8834_v3 = vor.u32 %v10132_v0, %v8831_v29  ;;  %v9218_v44 = vor.u32 %v10228_v15, %v9215_v23  ;;  %4492 = vmatpush.bf16.msra.mxu2 %v9090_v63  ;;  %v13475_v23 = vld [vmem:[#allocation102_spill] sm:$0xff] }
 0x57b   :  { %4314 = vmatpush.bf16.msra.mxu0 %v8834_v3  ;;  %4581 = vmatpush.bf16.msra.mxu3 %v9218_v44  ;;  %v13477_v3 = vld [vmem:[#allocation40_spill] sm:$0xff] }
 0x57c   :  { %v3843_v50 = vpop.f32.mrf.mxu2 }
 0x57d   :  { %v3844_v61 = vadd.f32 %v3843_v50, %v3755_v28  ;;  %v3668_v17 = vpop.f32.mrf.mxu0 }
 0x57e   :  { %v3669_v39 = vadd.f32 %v3668_v17, %v11658_v18 }
 0x57f   :  { %v3932_v26 = vpop.f32.mrf.mxu3  ;;  %v3757_v9 = vpop.f32.mrf.mxu1 }
 0x580   :  { %v11826_v60 = vadd.f32 %v3932_v26, %v3844_v61  ;;  %v3758_v55 = vadd.f32 %v3757_v9, %v3669_v39  ;;  %3983 = vmatmul.bf16.gmra.mxu0 %v13472_v25  ;;  %v10164_v39 = vld [vmem:[#allocation5 + $0x48c] sm:$0xf]  ;;  %v8959_v9 = vld [vmem:[#allocation5 + $0x498] sm:$0xf0] }
 0x581   :  { %4161 = vmatmul.bf16.gmra.mxu2 %v13474_v52  ;;  %v8962_v52 = vor.u32 %v10164_v39, %v8959_v9 }
 0x582   :  { %4072 = vmatmul.bf16.gmra.mxu1 %v13473_v12 }
 0x583   :  { %4403 = vmatpush.bf16.msra.mxu1 %v8962_v52 }
 0x584   :  { %4250 = vmatmul.bf16.gmra.mxu3 %v13414_v1  ;;  %v3846_v18 = vpop.f32.mrf.mxu2 }
 0x585   :  { %v3847_v28 = vadd.f32 %v3846_v18, %v3758_v55  ;;  %v3670_v61 = vpop.f32.mrf.mxu0  ;;  %v13476_v18 = vld [vmem:[#allocation39_spill] sm:$0xff] }
 0x586   :  { %v3671_v26 = vadd.f32 %v3670_v61, %v11664_v38 }
 0x587   :  { %v3935_v50 = vpop.f32.mrf.mxu3  ;;  %v3759_v17 = vpop.f32.mrf.mxu1 }
 0x588   :  { %v11833_v1 = vadd.f32 %v3935_v50, %v3847_v28  ;;  %v3760_v12 = vadd.f32 %v3759_v17, %v3671_v26  ;;  %v13478_v26 = vld [vmem:[#allocation107_spill] sm:$0xff] }
 0x58c   :  { %v3848_v56 = vpop.f32.mrf.mxu2 }
 0x58d   :  { %v3849_v16 = vadd.f32 %v3848_v56, %v3760_v12  ;;  %v3673_v29 = vpop.f32.mrf.mxu0 }
 0x58e   :  { %v3674_v55 = vadd.f32 %v3673_v29, %v11672_v51 }
 0x58f   :  { %v3937_v0 = vpop.f32.mrf.mxu3  ;;  %v3762_v15 = vpop.f32.mrf.mxu1 }
 0x590   :  { %v11836_v63 = vadd.f32 %v3937_v0, %v3849_v16  ;;  %v3763_v38 = vadd.f32 %v3762_v15, %v3674_v55  ;;  %3988 = vmatmul.bf16.gmra.mxu0 %v13475_v23  ;;  %v13480_v15 = vld [vmem:[#allocation106_spill] sm:$0xff] }
 0x591   :  { %4166 = vmatmul.bf16.gmra.mxu2 %v13477_v3  ;;  %v13483_v3 = vld [vmem:[#allocation45_spill] sm:$0xff] }
 0x592   :  { %4077 = vmatmul.bf16.gmra.mxu1 %v13476_v18  ;;  %v13482_v18 = vld [vmem:[#allocation44_spill] sm:$0xff] }
 0x594   :  { %4255 = vmatmul.bf16.gmra.mxu3 %v13418_v53  ;;  %v3851_v44 = vpop.f32.mrf.mxu2 }
 0x595   :  { %v3852_v28 = vadd.f32 %v3851_v44, %v3763_v38  ;;  %v3675_v61 = vpop.f32.mrf.mxu0  ;;  %v13481_v38 = vld [vmem:[#allocation43_spill] sm:$0xff] }
 0x596   :  { %v3676_v17 = vadd.f32 %v3675_v61, %v13478_v26  ;;  %v10192_v44 = vld [vmem:[#allocation5 + $0x56c] sm:$0xf]  ;;  %v8815_v26 = vld [vmem:[#allocation5 + $0x378] sm:$0xf0] }
 0x597   :  { %v3940_v50 = vpop.f32.mrf.mxu3  ;;  %v3764_v39 = vpop.f32.mrf.mxu1 }
 0x598   :  { %v11843_v51 = vadd.f32 %v3940_v50, %v3852_v28  ;;  %v3765_v9 = vadd.f32 %v3764_v39, %v3676_v17  ;;  %v9071_v28 = vld [vmem:[#allocation5 + $0x578] sm:$0xf0]  ;;  %v10128_v50 = vld [vmem:[#allocation5 + $0x36c] sm:$0xf] }
 0x599   :  { %v9074_v61 = vor.u32 %v10192_v44, %v9071_v28  ;;  %v10224_v17 = vld [vmem:[#allocation5 + $0x66c] sm:$0xf]  ;;  %v9199_v39 = vld [vmem:[#allocation5 + $0x678] sm:$0xf0] }
 0x59b   :  { %4493 = vmatpush.bf16.msra.mxu2 %v9074_v61 }
 0x59c   :  { %v3853_v12 = vpop.f32.mrf.mxu2 }
 0x59d   :  { %v3854_v52 = vadd.f32 %v3853_v12, %v3765_v9  ;;  %v3678_v16 = vpop.f32.mrf.mxu0  ;;  %v8818_v9 = vor.u32 %v10128_v50, %v8815_v26  ;;  %v9202_v12 = vor.u32 %v10224_v17, %v9199_v39  ;;  %v13484_v39 = vld [vmem:[#allocation110_spill] sm:$0xff] }
 0x59e   :  { %v3679_v0 = vadd.f32 %v3678_v16, %v11686_v42 }
 0x59f   :  { %v3942_v56 = vpop.f32.mrf.mxu3  ;;  %v3767_v29 = vpop.f32.mrf.mxu1  ;;  %4315 = vmatpush.bf16.msra.mxu0 %v8818_v9  ;;  %4582 = vmatpush.bf16.msra.mxu3 %v9202_v12  ;;  %v13486_v9 = vld [vmem:[#allocation48_spill] sm:$0xff] }
 0x5a0   :  { %v11846_v55 = vadd.f32 %v3942_v56, %v3854_v52  ;;  %v3768_v53 = vadd.f32 %v3767_v29, %v3679_v0  ;;  %3993 = vmatmul.bf16.gmra.mxu0 %v13480_v15 }
 0x5a1   :  { %4171 = vmatmul.bf16.gmra.mxu2 %v13482_v18  ;;  %v10160_v18 = vld [vmem:[#allocation5 + $0x46c] sm:$0xf] }
 0x5a2   :  { %13479 = vst [vmem:[#allocation57_spill] sm:$0xff] %v11846_v55  ;;  %4082 = vmatmul.bf16.gmra.mxu1 %v13481_v38 }
 0x5a4   :  { %4260 = vmatmul.bf16.gmra.mxu3 %v13483_v3  ;;  %v3856_v42 = vpop.f32.mrf.mxu2  ;;  %v8943_v3 = vld [vmem:[#allocation5 + $0x478] sm:$0xf0] }
 0x5a5   :  { %v3857_v52 = vadd.f32 %v3856_v42, %v3768_v53  ;;  %v3680_v16 = vpop.f32.mrf.mxu0  ;;  %v8946_v28 = vor.u32 %v10160_v18, %v8943_v3  ;;  %v13485_v42 = vld [vmem:[#allocation47_spill] sm:$0xff] }
 0x5a6   :  { %v3681_v0 = vadd.f32 %v3680_v16, %v11692_v19  ;;  %v13487_v16 = vld [vmem:[#allocation148_spill] sm:$0xff] }
 0x5a7   :  { %v3945_v56 = vpop.f32.mrf.mxu3  ;;  %v3769_v29 = vpop.f32.mrf.mxu1  ;;  %4404 = vmatpush.bf16.msra.mxu1 %v8946_v28 }
 0x5a8   :  { %v11853_v38 = vadd.f32 %v3945_v56, %v3857_v52  ;;  %v3770_v44 = vadd.f32 %v3769_v29, %v3681_v0 }
 0x5ac   :  { %v3858_v15 = vpop.f32.mrf.mxu2 }
 0x5ad   :  { %v3859_v55 = vadd.f32 %v3858_v15, %v3770_v44  ;;  %v3683_v26 = vpop.f32.mrf.mxu0 }
 0x5ae   :  { %v3684_v53 = vadd.f32 %v3683_v26, %v11700_v20 }
 0x5af   :  { %v3947_v50 = vpop.f32.mrf.mxu3  ;;  %v3772_v17 = vpop.f32.mrf.mxu1 }
 0x5b0   :  { %v11856_v61 = vadd.f32 %v3947_v50, %v3859_v55  ;;  %v3773_v19 = vadd.f32 %v3772_v17, %v3684_v53  ;;  %3998 = vmatmul.bf16.gmra.mxu0 %v13484_v39  ;;  %v10420_v50 = vld [vmem:[#allocation7] sm:$0xf] }
 0x5b1   :  { %4176 = vmatmul.bf16.gmra.mxu2 %v13486_v9  ;;  %v11865_v26 = vperm.slane %v10420_v50, 3  ;;  %v13491_v9 = vld [vmem:[#allocation51_spill] sm:$0xff] }
 0x5b2   :  { %4087 = vmatmul.bf16.gmra.mxu1 %v13485_v42 }
 0x5b4   :  { %4265 = vmatmul.bf16.gmra.mxu3 %v13429_v31  ;;  %v3861_v12 = vpop.f32.mrf.mxu2 }
 0x5b5   :  { %v3862_v52 = vadd.f32 %v3861_v12, %v3773_v19  ;;  %v3685_v15 = vpop.f32.mrf.mxu0  ;;  %v13490_v19 = vld [vmem:[#allocation113_spill] sm:$0xff]  ;;  %v13492_v12 = vld [vmem:[#allocation52_spill] sm:$0xff] }
 0x5b6   :  { %v3686_v0 = vadd.f32 %v3685_v15, %v13487_v16  ;;  %v9055_v15 = vld [vmem:[#allocation5 + $0x558] sm:$0xf0]  ;;  %v10124_v16 = vld [vmem:[#allocation5 + $0x34c] sm:$0xf] }
 0x5b7   :  { %v3950_v56 = vpop.f32.mrf.mxu3  ;;  %v3774_v29 = vpop.f32.mrf.mxu1 }
 0x5b8   :  { %v11863_v20 = vadd.f32 %v3950_v56, %v3862_v52  ;;  %v3775_v55 = vadd.f32 %v3774_v29, %v3686_v0  ;;  %v13493_v52 = vld [vmem:[#allocation53_spill] sm:$0xff]  ;;  %v10188_v56 = vld [vmem:[#allocation5 + $0x54c] sm:$0xf] }
 0x5b9   :  { %v9058_v0 = vor.u32 %v10188_v56, %v9055_v15  ;;  %v8799_v29 = vld [vmem:[#allocation5 + $0x358] sm:$0xf0] }
 0x5ba   :  { %13488 = vst [vmem:[#allocation61_spill] sm:$0xff] %v11863_v20 }
 0x5bb   :  { %4494 = vmatpush.bf16.msra.mxu2 %v9058_v0 }
 0x5bc   :  { %v3863_v18 = vpop.f32.mrf.mxu2 }
 0x5bd   :  { %v3864_v3 = vadd.f32 %v3863_v18, %v3775_v55  ;;  %v3964_v28 = vpop.f32.mrf.mxu0  ;;  %v10220_v55 = vld [vmem:[#allocation5 + $0x64c] sm:$0xf] }
 0x5be   :  { %v3965_v53 = vadd.f32 %v3964_v28, %v11713_v59  ;;  %v9183_v59 = vld [vmem:[#allocation5 + $0x658] sm:$0xf0] }
 0x5bf   :  { %v3952_v44 = vpop.f32.mrf.mxu3  ;;  %v4053_v31 = vpop.f32.mrf.mxu1 }
 0x5c0   :  { %v11868_v17 = vadd.f32 %v3952_v44, %v3864_v3  ;;  %4003 = vmatmul.bf16.gmra.mxu0 %v13490_v19  ;;  %v4054_v42 = vadd.f32 %v4053_v31, %v11865_v26  ;;  %v8802_v3 = vor.u32 %v10124_v16, %v8799_v29  ;;  %v9186_v44 = vor.u32 %v10220_v55, %v9183_v59 }
 0x5c1   :  { %4181 = vmatmul.bf16.gmra.mxu2 %v13492_v12  ;;  %v4669_v56 = vmax.f32 %v3965_v53, 0.0 }
 0x5c2   :  { %13489 = vst [vmem:[#allocation65_spill] sm:$0xff] %v11868_v17  ;;  %4092 = vmatmul.bf16.gmra.mxu1 %v13491_v9  ;;  %4316 = vmatpush.bf16.msra.mxu0 %v8802_v3  ;;  %v8927_v17 = vld [vmem:[#allocation5 + $0x458] sm:$0xf0]  ;;  %v13496_v3 = vld [vmem:[#allocation55_spill] sm:$0xff] }
 0x5c3   :  { %4583 = vmatpush.bf16.msra.mxu3 %v9186_v44 }
 0x5c4   :  { %4270 = vmatmul.bf16.gmra.mxu3 %v13493_v52  ;;  %v4142_v18 = vpop.f32.mrf.mxu2  ;;  %v10156_v52 = vld [vmem:[#allocation5 + $0x44c] sm:$0xf] }
 0x5c5   :  { %v4143_v28 = vadd.f32 %v4142_v18, %v4054_v42  ;;  %v3966_v19 = vpop.f32.mrf.mxu0  ;;  %v8930_v39 = vor.u32 %v10156_v52, %v8927_v17  ;;  %v13495_v18 = vld [vmem:[#allocation117_spill] sm:$0xff]  ;;  %v13497_v17 = vld [vmem:[#allocation56_spill] sm:$0xff] }
 0x5c6   :  { %v3967_v31 = vadd.f32 %v3966_v19, %v11716_v27 }
 0x5c7   :  { %v4231_v50 = vpop.f32.mrf.mxu3  ;;  %v4055_v9 = vpop.f32.mrf.mxu1  ;;  %4405 = vmatpush.bf16.msra.mxu1 %v8930_v39 }
 0x5c8   :  { %v11876_v12 = vadd.f32 %v4231_v50, %v4143_v28  ;;  %v4673_v15 = vmax.f32 %v3967_v31, 0.0  ;;  %v4056_v42 = vadd.f32 %v4055_v9, %v11865_v26 }
 0x5ca   :  { %v11878_v20 = vpack.c.bf16 %v4673_v15, %v4669_v56 }
 0x5cc   :  { %13494 = vst [vmem:[#allocation69_spill] sm:$0xff] %v11878_v20  ;;  %v4144_v16 = vpop.f32.mrf.mxu2 }
 0x5cd   :  { %v4145_v29 = vadd.f32 %v4144_v16, %v4056_v42  ;;  %v3969_v55 = vpop.f32.mrf.mxu0 }
 0x5ce   :  { %v3970_v27 = vadd.f32 %v3969_v55, %v11723_v4 }
 0x5cf   :  { %v4233_v0 = vpop.f32.mrf.mxu3  ;;  %v4058_v19 = vpop.f32.mrf.mxu1 }
 0x5d0   :  { %v11882_v59 = vadd.f32 %v4233_v0, %v4145_v29  ;;  %4008 = vmatmul.bf16.gmra.mxu0 %v13495_v18  ;;  %v4059_v53 = vadd.f32 %v4058_v19, %v11865_v26  ;;  %v4677_v52 = vmax.f32 %v3970_v27, 0.0  ;;  %v13501_v27 = vld [vmem:[#allocation60_spill] sm:$0xff] }
 0x5d1   :  { %4186 = vmatmul.bf16.gmra.mxu2 %v13497_v17  ;;  %v13500_v17 = vld [vmem:[#allocation59_spill] sm:$0xff] }
 0x5d2   :  { %4097 = vmatmul.bf16.gmra.mxu1 %v13496_v3  ;;  %v13499_v3 = vld [vmem:[#allocation121_spill] sm:$0xff] }
 0x5d4   :  { %4275 = vmatmul.bf16.gmra.mxu3 %v13439_v36  ;;  %v4147_v39 = vpop.f32.mrf.mxu2 }
 0x5d5   :  { %v4148_v44 = vadd.f32 %v4147_v39, %v4059_v53  ;;  %v3971_v50 = vpop.f32.mrf.mxu0  ;;  %v10184_v39 = vld [vmem:[#allocation5 + $0x52c] sm:$0xf] }
 0x5d6   :  { %v3972_v31 = vadd.f32 %v3971_v50, %v11726_v2 }
 0x5d7   :  { %v4236_v28 = vpop.f32.mrf.mxu3  ;;  %v4060_v4 = vpop.f32.mrf.mxu1 }
 0x5d8   :  { %v11890_v9 = vadd.f32 %v4236_v28, %v4148_v44  ;;  %v4681_v56 = vmax.f32 %v3972_v31, 0.0  ;;  %v4061_v42 = vadd.f32 %v4060_v4, %v11865_v26  ;;  %v9039_v44 = vld [vmem:[#allocation5 + $0x538] sm:$0xf0]  ;;  %v10120_v28 = vld [vmem:[#allocation5 + $0x32c] sm:$0xf] }
 0x5d9   :  { %v9042_v50 = vor.u32 %v10184_v39, %v9039_v44  ;;  %v8783_v31 = vld [vmem:[#allocation5 + $0x338] sm:$0xf0]  ;;  %v10216_v4 = vld [vmem:[#allocation5 + $0x62c] sm:$0xf] }
 0x5da   :  { %v11892_v15 = vpack.c.bf16 %v4681_v56, %v4677_v52  ;;  %v8786_v56 = vor.u32 %v10120_v28, %v8783_v31 }
 0x5db   :  { %4495 = vmatpush.bf16.msra.mxu2 %v9042_v50 }
 0x5dc   :  { %13498 = vst [vmem:[#allocation73_spill] sm:$0xff] %v11892_v15  ;;  %v4149_v16 = vpop.f32.mrf.mxu2  ;;  %4317 = vmatpush.bf16.msra.mxu0 %v8786_v56  ;;  %v13503_v56 = vld [vmem:[#allocation125_spill] sm:$0xff] }
 0x5dd   :  { %v4150_v29 = vadd.f32 %v4149_v16, %v4061_v42  ;;  %v3974_v55 = vpop.f32.mrf.mxu0 }
 0x5de   :  { %v3975_v36 = vadd.f32 %v3974_v55, %v11733_v11  ;;  %v9167_v11 = vld [vmem:[#allocation5 + $0x638] sm:$0xf0] }
 0x5df   :  { %v4238_v0 = vpop.f32.mrf.mxu3  ;;  %v4063_v19 = vpop.f32.mrf.mxu1  ;;  %v9170_v42 = vor.u32 %v10216_v4, %v9167_v11 }
 0x5e0   :  { %v11896_v53 = vadd.f32 %v4238_v0, %v4150_v29  ;;  %4013 = vmatmul.bf16.gmra.mxu0 %v13499_v3  ;;  %v4064_v2 = vadd.f32 %v4063_v19, %v11865_v26  ;;  %v4685_v39 = vmax.f32 %v3975_v36, 0.0 }
 0x5e1   :  { %4191 = vmatmul.bf16.gmra.mxu2 %v13501_v27  ;;  %4584 = vmatpush.bf16.msra.mxu3 %v9170_v42  ;;  %v8911_v27 = vld [vmem:[#allocation5 + $0x438] sm:$0xf0]  ;;  %v13504_v42 = vld [vmem:[#allocation63_spill] sm:$0xff] }
 0x5e2   :  { %4102 = vmatmul.bf16.gmra.mxu1 %v13500_v17  ;;  %v10152_v17 = vld [vmem:[#allocation5 + $0x42c] sm:$0xf] }
 0x5e3   :  { %v8914_v15 = vor.u32 %v10152_v17, %v8911_v27 }
 0x5e4   :  { %4280 = vmatmul.bf16.gmra.mxu3 %v13442_v10  ;;  %v4152_v52 = vpop.f32.mrf.mxu2 }
 0x5e5   :  { %v4153_v16 = vadd.f32 %v4152_v52, %v4064_v2  ;;  %v3976_v0 = vpop.f32.mrf.mxu0  ;;  %4406 = vmatpush.bf16.msra.mxu1 %v8914_v15 }
 0x5e6   :  { %v3977_v55 = vadd.f32 %v3976_v0, %v11736_v7 }
 0x5e7   :  { %v4241_v29 = vpop.f32.mrf.mxu3  ;;  %v4065_v19 = vpop.f32.mrf.mxu1 }
 0x5e8   :  { %v11904_v10 = vadd.f32 %v4241_v29, %v4153_v16  ;;  %v4689_v44 = vmax.f32 %v3977_v55, 0.0  ;;  %v4066_v2 = vadd.f32 %v4065_v19, %v11865_v26  ;;  %v13505_v16 = vld [vmem:[#allocation64_spill] sm:$0xff] }
 0x5ea   :  { %v11906_v20 = vpack.c.bf16 %v4689_v44, %v4685_v39 }
 0x5ec   :  { %13502 = vst [vmem:[#allocation77_spill] sm:$0xff] %v11906_v20  ;;  %v4154_v28 = vpop.f32.mrf.mxu2 }
 0x5ed   :  { %v4155_v31 = vadd.f32 %v4154_v28, %v4066_v2  ;;  %v3979_v4 = vpop.f32.mrf.mxu0 }
 0x5ee   :  { %v3980_v7 = vadd.f32 %v3979_v4, %v11743_v22 }
 0x5ef   :  { %v4243_v50 = vpop.f32.mrf.mxu3  ;;  %v4068_v11 = vpop.f32.mrf.mxu1 }
 0x5f0   :  { %v11910_v52 = vadd.f32 %v4243_v50, %v4155_v31  ;;  %4018 = vmatmul.bf16.gmra.mxu0 %v13503_v56  ;;  %v4069_v36 = vadd.f32 %v4068_v11, %v11865_v26  ;;  %v4693_v27 = vmax.f32 %v3980_v7, 0.0  ;;  %v13509_v7 = vld [vmem:[#allocation68_spill] sm:$0xff] }
 0x5f1   :  { %4196 = vmatmul.bf16.gmra.mxu2 %v13505_v16  ;;  %v13508_v16 = vld [vmem:[#allocation67_spill] sm:$0xff] }
 0x5f2   :  { %4107 = vmatmul.bf16.gmra.mxu1 %v13504_v42  ;;  %v13507_v42 = vld [vmem:[#allocation129_spill] sm:$0xff] }
 0x5f4   :  { %4285 = vmatmul.bf16.gmra.mxu3 %v13445_v6  ;;  %v4157_v15 = vpop.f32.mrf.mxu2 }
 0x5f5   :  { %v4158_v29 = vadd.f32 %v4157_v15, %v4069_v36  ;;  %v3981_v55 = vpop.f32.mrf.mxu0  ;;  %v10180_v15 = vld [vmem:[#allocation5 + $0x50c] sm:$0xf] }
 0x5f6   :  { %v3982_v19 = vadd.f32 %v3981_v55, %v11746_v54 }
 0x5f7   :  { %v4246_v0 = vpop.f32.mrf.mxu3  ;;  %v4070_v22 = vpop.f32.mrf.mxu1 }
 0x5f8   :  { %v11918_v17 = vadd.f32 %v4246_v0, %v4158_v29  ;;  %v4697_v39 = vmax.f32 %v3982_v19, 0.0  ;;  %v4071_v2 = vadd.f32 %v4070_v22, %v11865_v26  ;;  %v9023_v29 = vld [vmem:[#allocation5 + $0x518] sm:$0xf0]  ;;  %v10116_v0 = vld [vmem:[#allocation5 + $0x30c] sm:$0xf] }
 0x5f9   :  { %v9026_v55 = vor.u32 %v10180_v15, %v9023_v29  ;;  %v8767_v19 = vld [vmem:[#allocation5 + $0x318] sm:$0xf0]  ;;  %v10212_v22 = vld [vmem:[#allocation5 + $0x60c] sm:$0xf] }
 0x5fa   :  { %v11920_v44 = vpack.c.bf16 %v4697_v39, %v4693_v27  ;;  %v8770_v39 = vor.u32 %v10116_v0, %v8767_v19 }
 0x5fb   :  { %4496 = vmatpush.bf16.msra.mxu2 %v9026_v55 }
 0x5fc   :  { %13506 = vst [vmem:[#allocation81_spill] sm:$0xff] %v11920_v44  ;;  %v4159_v28 = vpop.f32.mrf.mxu2  ;;  %4318 = vmatpush.bf16.msra.mxu0 %v8770_v39  ;;  %v13511_v39 = vld [vmem:[#allocation133_spill] sm:$0xff] }
 0x5fd   :  { %v4160_v31 = vadd.f32 %v4159_v28, %v4071_v2  ;;  %v3984_v4 = vpop.f32.mrf.mxu0 }
 0x5fe   :  { %v3985_v6 = vadd.f32 %v3984_v4, %v11753_v37  ;;  %v9151_v37 = vld [vmem:[#allocation5 + $0x618] sm:$0xf0] }
 0x5ff   :  { %v4248_v50 = vpop.f32.mrf.mxu3  ;;  %v4073_v11 = vpop.f32.mrf.mxu1  ;;  %v9154_v2 = vor.u32 %v10212_v22, %v9151_v37 }
 0x600   :  { %v11924_v36 = vadd.f32 %v4248_v50, %v4160_v31  ;;  %4023 = vmatmul.bf16.gmra.mxu0 %v13507_v42  ;;  %v4074_v54 = vadd.f32 %v4073_v11, %v11865_v26  ;;  %v4701_v15 = vmax.f32 %v3985_v6, 0.0 }
 0x601   :  { %4201 = vmatmul.bf16.gmra.mxu2 %v13509_v7  ;;  %4585 = vmatpush.bf16.msra.mxu3 %v9154_v2  ;;  %v8895_v7 = vld [vmem:[#allocation5 + $0x418] sm:$0xf0]  ;;  %v13512_v2 = vld [vmem:[#allocation71_spill] sm:$0xff] }
 0x602   :  { %4112 = vmatmul.bf16.gmra.mxu1 %v13508_v16  ;;  %v10148_v16 = vld [vmem:[#allocation5 + $0x40c] sm:$0xf] }
 0x603   :  { %v8898_v44 = vor.u32 %v10148_v16, %v8895_v7 }
 0x604   :  { %4290 = vmatmul.bf16.gmra.mxu3 %v13448_v32  ;;  %v4162_v27 = vpop.f32.mrf.mxu2 }
 0x605   :  { %v4163_v28 = vadd.f32 %v4162_v27, %v4074_v54  ;;  %v3986_v50 = vpop.f32.mrf.mxu0  ;;  %4407 = vmatpush.bf16.msra.mxu1 %v8898_v44 }
 0x606   :  { %v3987_v4 = vadd.f32 %v3986_v50, %v11756_v49 }
 0x607   :  { %v4251_v31 = vpop.f32.mrf.mxu3  ;;  %v4075_v11 = vpop.f32.mrf.mxu1 }
 0x608   :  { %v11932_v32 = vadd.f32 %v4251_v31, %v4163_v28  ;;  %v4705_v29 = vmax.f32 %v3987_v4, 0.0  ;;  %v4076_v54 = vadd.f32 %v4075_v11, %v11865_v26  ;;  %v13513_v28 = vld [vmem:[#allocation72_spill] sm:$0xff] }
 0x60a   :  { %v11934_v20 = vpack.c.bf16 %v4705_v29, %v4701_v15 }
 0x60c   :  { %13510 = vst [vmem:[#allocation85_spill] sm:$0xff] %v11934_v20  ;;  %v4164_v0 = vpop.f32.mrf.mxu2 }
 0x60d   :  { %v4165_v19 = vadd.f32 %v4164_v0, %v4076_v54  ;;  %v3989_v22 = vpop.f32.mrf.mxu0 }
 0x60e   :  { %v3990_v49 = vadd.f32 %v3989_v22, %v11763_v46 }
 0x60f   :  { %v4253_v55 = vpop.f32.mrf.mxu3  ;;  %v4078_v37 = vpop.f32.mrf.mxu1 }
 0x610   :  { %v11938_v27 = vadd.f32 %v4253_v55, %v4165_v19  ;;  %4028 = vmatmul.bf16.gmra.mxu0 %v13511_v39  ;;  %v4079_v6 = vadd.f32 %v4078_v37, %v11865_v26  ;;  %v4709_v7 = vmax.f32 %v3990_v49, 0.0  ;;  %v13517_v49 = vld [vmem:[#allocation76_spill] sm:$0xff] }
 0x611   :  { %4206 = vmatmul.bf16.gmra.mxu2 %v13513_v28  ;;  %v13516_v28 = vld [vmem:[#allocation75_spill] sm:$0xff] }
 0x612   :  { %4117 = vmatmul.bf16.gmra.mxu1 %v13512_v2  ;;  %v13515_v2 = vld [vmem:[#allocation137_spill] sm:$0xff] }
 0x614   :  { %4295 = vmatmul.bf16.gmra.mxu3 %v13451_v41  ;;  %v4167_v44 = vpop.f32.mrf.mxu2 }
 0x615   :  { %v4168_v31 = vadd.f32 %v4167_v44, %v4079_v6  ;;  %v3991_v4 = vpop.f32.mrf.mxu0  ;;  %v9637_v44 = vld [vmem:[#allocation8 + $0x2e0] sm:$0xf] }
 0x616   :  { %v3992_v11 = vadd.f32 %v3991_v4, %v11766_v34 }
 0x617   :  { %v4256_v50 = vpop.f32.mrf.mxu3  ;;  %v4080_v46 = vpop.f32.mrf.mxu1 }
 0x618   :  { %v11946_v16 = vadd.f32 %v4256_v50, %v4168_v31  ;;  %v4713_v15 = vmax.f32 %v3992_v11, 0.0  ;;  %v4081_v54 = vadd.f32 %v4080_v46, %v11865_v26  ;;  %v10337_v31 = vld [vmem:[#allocation8 + $0x2ec] sm:$0xf0]  ;;  %v9381_v50 = vld [vmem:[#allocation8 + $0xe0] sm:$0xf] }
 0x619   :  { %v9638_v4 = vor.u32 %v10337_v31, %v9637_v44  ;;  %v10273_v11 = vld [vmem:[#allocation8 + $0xec] sm:$0xf0]  ;;  %v9765_v46 = vld [vmem:[#allocation8 + $0x3e0] sm:$0xf] }
 0x61a   :  { %v11948_v29 = vpack.c.bf16 %v4713_v15, %v4709_v7  ;;  %v9382_v15 = vor.u32 %v10273_v11, %v9381_v50 }
 0x61b   :  { %5815 = vmatpush.bf16.msrb.mxu2 %v9638_v4 }
 0x61c   :  { %13514 = vst [vmem:[#allocation19_spill] sm:$0xff] %v11948_v29  ;;  %v4169_v0 = vpop.f32.mrf.mxu2  ;;  %5637 = vmatpush.bf16.msrb.mxu0 %v9382_v15  ;;  %v13518_v15 = vld [vmem:[#allocation141_spill] sm:$0xff] }
 0x61d   :  { %v4170_v19 = vadd.f32 %v4169_v0, %v4081_v54  ;;  %v3994_v22 = vpop.f32.mrf.mxu0 }
 0x61e   :  { %v3995_v41 = vadd.f32 %v3994_v22, %v11773_v43  ;;  %v10369_v43 = vld [vmem:[#allocation8 + $0x3ec] sm:$0xf0] }
 0x61f   :  { %v4258_v55 = vpop.f32.mrf.mxu3  ;;  %v4083_v37 = vpop.f32.mrf.mxu1  ;;  %v9766_v54 = vor.u32 %v10369_v43, %v9765_v46 }
 0x620   :  { %v11952_v6 = vadd.f32 %v4258_v55, %v4170_v19  ;;  %4033 = vmatmul.bf16.gmra.mxu0 %v13515_v2  ;;  %v4084_v34 = vadd.f32 %v4083_v37, %v11865_v26  ;;  %v4717_v44 = vmax.f32 %v3995_v41, 0.0 }
 0x621   :  { %4211 = vmatmul.bf16.gmra.mxu2 %v13517_v49  ;;  %5904 = vmatpush.bf16.msrb.mxu3 %v9766_v54  ;;  %v10305_v49 = vld [vmem:[#allocation8 + $0x1ec] sm:$0xf0]  ;;  %v13519_v54 = vld [vmem:[#allocation79_spill] sm:$0xff] }
 0x622   :  { %4122 = vmatmul.bf16.gmra.mxu1 %v13516_v28  ;;  %v9509_v28 = vld [vmem:[#allocation8 + $0x1e0] sm:$0xf] }
 0x623   :  { %v9510_v29 = vor.u32 %v10305_v49, %v9509_v28 }
 0x624   :  { %4300 = vmatmul.bf16.gmra.mxu3 %v13454_v21  ;;  %v4172_v7 = vpop.f32.mrf.mxu2 }
 0x625   :  { %v4173_v0 = vadd.f32 %v4172_v7, %v4084_v34  ;;  %v3996_v55 = vpop.f32.mrf.mxu0  ;;  %5726 = vmatpush.bf16.msrb.mxu1 %v9510_v29 }
 0x626   :  { %v3997_v22 = vadd.f32 %v3996_v55, %v11776_v48 }
 0x627   :  { %v4261_v19 = vpop.f32.mrf.mxu3  ;;  %v4085_v37 = vpop.f32.mrf.mxu1 }
 0x628   :  { %v11960_v21 = vadd.f32 %v4261_v19, %v4173_v0  ;;  %v4721_v31 = vmax.f32 %v3997_v22, 0.0  ;;  %v4086_v34 = vadd.f32 %v4085_v37, %v11865_v26  ;;  %v13520_v0 = vld [vmem:[#allocation80_spill] sm:$0xff] }
 0x62a   :  { %v11962_v20 = vpack.c.bf16 %v4721_v31, %v4717_v44 }
 0x62c   :  { %v4174_v50 = vpop.f32.mrf.mxu2 }
 0x62d   :  { %v4175_v11 = vadd.f32 %v4174_v50, %v4086_v34  ;;  %v3999_v46 = vpop.f32.mrf.mxu0 }
 0x62e   :  { %v4000_v48 = vadd.f32 %v3999_v46, %v11783_v57 }
 0x62f   :  { %v4263_v4 = vpop.f32.mrf.mxu3  ;;  %v4088_v43 = vpop.f32.mrf.mxu1 }
 0x630   :  { %v11966_v7 = vadd.f32 %v4263_v4, %v4175_v11  ;;  %4038 = vmatmul.bf16.gmra.mxu0 %v13518_v15  ;;  %v4089_v41 = vadd.f32 %v4088_v43, %v11865_v26  ;;  %v4725_v49 = vmax.f32 %v4000_v48, 0.0  ;;  %v13524_v48 = vld [vmem:[#allocation84_spill] sm:$0xff] }
 0x631   :  { %4216 = vmatmul.bf16.gmra.mxu2 %v13520_v0  ;;  %v13523_v0 = vld [vmem:[#allocation83_spill] sm:$0xff] }
 0x632   :  { %4127 = vmatmul.bf16.gmra.mxu1 %v13519_v54  ;;  %v13522_v54 = vld [vmem:[#allocation22_spill] sm:$0xff] }
 0x634   :  { %4305 = vmatmul.bf16.gmra.mxu3 %v13457_v47  ;;  %v4177_v29 = vpop.f32.mrf.mxu2 }
 0x635   :  { %v4178_v19 = vadd.f32 %v4177_v29, %v4089_v41  ;;  %v4001_v22 = vpop.f32.mrf.mxu0  ;;  %v9621_v29 = vld [vmem:[#allocation8 + $0x2c0] sm:$0xf] }
 0x636   :  { %v4002_v37 = vadd.f32 %v4001_v22, %v11786_v14 }
 0x637   :  { %v4266_v55 = vpop.f32.mrf.mxu3  ;;  %v4090_v57 = vpop.f32.mrf.mxu1 }
 0x638   :  { %v11974_v28 = vadd.f32 %v4266_v55, %v4178_v19  ;;  %v4729_v44 = vmax.f32 %v4002_v37, 0.0  ;;  %v4091_v34 = vadd.f32 %v4090_v57, %v11865_v26  ;;  %v10333_v19 = vld [vmem:[#allocation8 + $0x2cc] sm:$0xf0]  ;;  %v9365_v55 = vld [vmem:[#allocation8 + $0xc0] sm:$0xf] }
 0x639   :  { %v9622_v22 = vor.u32 %v10333_v19, %v9621_v29  ;;  %v10269_v37 = vld [vmem:[#allocation8 + $0xcc] sm:$0xf0]  ;;  %v9749_v57 = vld [vmem:[#allocation8 + $0x3c0] sm:$0xf] }
 0x63a   :  { %v11976_v31 = vpack.c.bf16 %v4729_v44, %v4725_v49  ;;  %v9366_v44 = vor.u32 %v10269_v37, %v9365_v55 }
 0x63b   :  { %5816 = vmatpush.bf16.msrb.mxu2 %v9622_v22 }
 0x63c   :  { %13521 = vst [vmem:[#allocation20_spill] sm:$0xff] %v11976_v31  ;;  %v4179_v50 = vpop.f32.mrf.mxu2  ;;  %5638 = vmatpush.bf16.msrb.mxu0 %v9366_v44  ;;  %v13526_v44 = vld [vmem:[#allocation26_spill] sm:$0xff] }
 0x63d   :  { %v4180_v11 = vadd.f32 %v4179_v50, %v4091_v34  ;;  %v4004_v46 = vpop.f32.mrf.mxu0 }
 0x63e   :  { %v4005_v47 = vadd.f32 %v4004_v46, %v11793_v58  ;;  %v10365_v58 = vld [vmem:[#allocation8 + $0x3cc] sm:$0xf0] }
 0x63f   :  { %v4268_v4 = vpop.f32.mrf.mxu3  ;;  %v4093_v43 = vpop.f32.mrf.mxu1  ;;  %v9750_v34 = vor.u32 %v10365_v58, %v9749_v57 }
 0x640   :  { %v11980_v41 = vadd.f32 %v4268_v4, %v4180_v11  ;;  %4319 = vmatmul.bf16.vlgmr.msra.gmra.mxu0 %v13522_v54  ;;  %v4094_v14 = vadd.f32 %v4093_v43, %v11865_v26  ;;  %v9493_v54 = vld [vmem:[#allocation8 + $0x1c0] sm:$0xf] }
 0x641   :  { %4497 = vmatmul.bf16.vlgmr.msra.gmra.mxu2 %v13524_v48  ;;  %5905 = vmatpush.bf16.msrb.mxu3 %v9750_v34  ;;  %v4733_v48 = vmax.f32 %v4005_v47, 0.0  ;;  %v13527_v34 = vld [vmem:[#allocation86_spill] sm:$0xff] }
 0x642   :  { %4408 = vmatmul.bf16.vlgmr.msra.gmra.mxu1 %v13523_v0  ;;  %v10301_v0 = vld [vmem:[#allocation8 + $0x1cc] sm:$0xf0] }
 0x643   :  { %v9494_v19 = vor.u32 %v10301_v0, %v9493_v54 }
 0x644   :  { %4586 = vmatmul.bf16.vlgmr.msra.gmra.mxu3 %v13460_v24  ;;  %v4182_v49 = vpop.f32.mrf.mxu2 }
 0x645   :  { %v4183_v50 = vadd.f32 %v4182_v49, %v4094_v14  ;;  %v4006_v4 = vpop.f32.mrf.mxu0  ;;  %5727 = vmatpush.bf16.msrb.mxu1 %v9494_v19 }
 0x646   :  { %v4007_v46 = vadd.f32 %v4006_v4, %v11796_v30 }
 0x647   :  { %v4271_v11 = vpop.f32.mrf.mxu3  ;;  %v4095_v43 = vpop.f32.mrf.mxu1 }
 0x648   :  { %v11988_v24 = vadd.f32 %v4271_v11, %v4183_v50  ;;  %v4737_v29 = vmax.f32 %v4007_v46, 0.0  ;;  %v4096_v14 = vadd.f32 %v4095_v43, %v11865_v26  ;;  %v13528_v50 = vld [vmem:[#allocation87_spill] sm:$0xff] }
 0x64a   :  { %v11990_v31 = vpack.c.bf16 %v4737_v29, %v4733_v48 }
 0x64c   :  { %13525 = vst [vmem:[#allocation88_spill] sm:$0xff] %v11990_v31  ;;  %v4184_v55 = vpop.f32.mrf.mxu2 }
 0x64d   :  { %v4185_v37 = vadd.f32 %v4184_v55, %v4096_v14  ;;  %v4009_v57 = vpop.f32.mrf.mxu0 }
 0x64e   :  { %v4010_v30 = vadd.f32 %v4009_v57, %v11803_v62 }
 0x64f   :  { %v4273_v22 = vpop.f32.mrf.mxu3  ;;  %v4098_v58 = vpop.f32.mrf.mxu1 }
 0x650   :  { %v11994_v49 = vadd.f32 %v4273_v22, %v4185_v37  ;;  %4324 = vmatmul.bf16.gmra.mxu0 %v13526_v44  ;;  %v4099_v47 = vadd.f32 %v4098_v58, %v11865_v26  ;;  %v4741_v48 = vmax.f32 %v4010_v30, 0.0  ;;  %v13531_v30 = vld [vmem:[#allocation90_spill] sm:$0xff] }
 0x651   :  { %4502 = vmatmul.bf16.gmra.mxu2 %v13528_v50  ;;  %v9605_v50 = vld [vmem:[#allocation8 + $0x2a0] sm:$0xf] }
 0x652   :  { %4413 = vmatmul.bf16.gmra.mxu1 %v13527_v34  ;;  %v13530_v34 = vld [vmem:[#allocation89_spill] sm:$0xff] }
 0x654   :  { %4591 = vmatmul.bf16.gmra.mxu3 %v13463_v40  ;;  %v4187_v11 = vpop.f32.mrf.mxu2 }
 0x655   :  { %v4188_v4 = vadd.f32 %v4187_v11, %v4099_v47  ;;  %v4011_v43 = vpop.f32.mrf.mxu0  ;;  %v13529_v47 = vld [vmem:[#allocation30_spill] sm:$0xff]  ;;  %v10329_v11 = vld [vmem:[#allocation8 + $0x2ac] sm:$0xf0] }
 0x656   :  { %v4012_v54 = vadd.f32 %v4011_v43, %v11806_v35  ;;  %v10265_v43 = vld [vmem:[#allocation8 + $0xac] sm:$0xf0] }
 0x657   :  { %v4276_v46 = vpop.f32.mrf.mxu3  ;;  %v4100_v62 = vpop.f32.mrf.mxu1 }
 0x658   :  { %v12002_v0 = vadd.f32 %v4276_v46, %v4188_v4  ;;  %v4745_v29 = vmax.f32 %v4012_v54, 0.0  ;;  %v4101_v14 = vadd.f32 %v4100_v62, %v11865_v26  ;;  %v9349_v4 = vld [vmem:[#allocation8 + $0xa0] sm:$0xf]  ;;  %v9606_v46 = vor.u32 %v10329_v11, %v9605_v50 }
 0x659   :  { %v9733_v54 = vld [vmem:[#allocation8 + $0x3a0] sm:$0xf] }
 0x65a   :  { %v12004_v19 = vpack.c.bf16 %v4745_v29, %v4741_v48  ;;  %v9350_v48 = vor.u32 %v10265_v43, %v9349_v4  ;;  %5817 = vmatpush.bf16.msrb.mxu2 %v9606_v46 }
 0x65c   :  { %v4189_v55 = vpop.f32.mrf.mxu2  ;;  %5639 = vmatpush.bf16.msrb.mxu0 %v9350_v48  ;;  %v13533_v48 = vld [vmem:[#allocation34_spill] sm:$0xff] }
 0x65d   :  { %v4190_v37 = vadd.f32 %v4189_v55, %v4101_v14  ;;  %v4014_v57 = vpop.f32.mrf.mxu0 }
 0x65e   :  { %v4015_v40 = vadd.f32 %v4014_v57, %v11813_v13  ;;  %v10361_v13 = vld [vmem:[#allocation8 + $0x3ac] sm:$0xf0] }
 0x65f   :  { %v4278_v22 = vpop.f32.mrf.mxu3  ;;  %v4103_v58 = vpop.f32.mrf.mxu1  ;;  %v9734_v29 = vor.u32 %v10361_v13, %v9733_v54 }
 0x660   :  { %v12008_v44 = vadd.f32 %v4278_v22, %v4190_v37  ;;  %4329 = vmatmul.bf16.gmra.mxu0 %v13529_v47  ;;  %v4104_v35 = vadd.f32 %v4103_v58, %v11865_v26  ;;  %v9477_v58 = vld [vmem:[#allocation8 + $0x1a0] sm:$0xf]  ;;  %v10297_v47 = vld [vmem:[#allocation8 + $0x1ac] sm:$0xf0] }
 0x661   :  { %4507 = vmatmul.bf16.gmra.mxu2 %v13531_v30  ;;  %5906 = vmatpush.bf16.msrb.mxu3 %v9734_v29  ;;  %v9478_v50 = vor.u32 %v10297_v47, %v9477_v58  ;;  %v13534_v29 = vld [vmem:[#allocation92_spill] sm:$0xff] }
 0x662   :  { %4418 = vmatmul.bf16.gmra.mxu1 %v13530_v34  ;;  %v4749_v34 = vmax.f32 %v4015_v40, 0.0 }
 0x663   :  { %5728 = vmatpush.bf16.msrb.mxu1 %v9478_v50 }
 0x664   :  { %4596 = vmatmul.bf16.gmra.mxu3 %v13466_v33  ;;  %v4192_v62 = vpop.f32.mrf.mxu2 }
 0x665   :  { %v4193_v14 = vadd.f32 %v4192_v62, %v4104_v35  ;;  %v4016_v37 = vpop.f32.mrf.mxu0 }
 0x666   :  { %v4017_v22 = vadd.f32 %v4016_v37, %v11816_v45 }
 0x667   :  { %v4281_v55 = vpop.f32.mrf.mxu3  ;;  %v4105_v57 = vpop.f32.mrf.mxu1 }
 0x668   :  { %v12016_v33 = vadd.f32 %v4281_v55, %v4193_v14  ;;  %v4753_v30 = vmax.f32 %v4017_v22, 0.0  ;;  %v4106_v35 = vadd.f32 %v4105_v57, %v11865_v26  ;;  %v13535_v14 = vld [vmem:[#allocation93_spill] sm:$0xff] }
 0x66a   :  { %v12018_v11 = vpack.c.bf16 %v4753_v30, %v4749_v34 }
 0x66c   :  { %13532 = vst [vmem:[#allocation23_spill] sm:$0xff] %v12018_v11  ;;  %v4194_v4 = vpop.f32.mrf.mxu2 }
 0x66d   :  { %v4195_v43 = vadd.f32 %v4194_v4, %v4106_v35  ;;  %v4019_v54 = vpop.f32.mrf.mxu0 }
 0x66e   :  { %v4020_v45 = vadd.f32 %v4019_v54, %v11823_v5 }
 0x66f   :  { %v4283_v46 = vpop.f32.mrf.mxu3  ;;  %v4108_v13 = vpop.f32.mrf.mxu1 }
 0x670   :  { %v12022_v62 = vadd.f32 %v4283_v46, %v4195_v43  ;;  %4334 = vmatmul.bf16.gmra.mxu0 %v13533_v48  ;;  %v4109_v40 = vadd.f32 %v4108_v13, %v11865_v26  ;;  %v4757_v34 = vmax.f32 %v4020_v45, 0.0  ;;  %v13539_v45 = vld [vmem:[#allocation97_spill] sm:$0xff] }
 0x671   :  { %4512 = vmatmul.bf16.gmra.mxu2 %v13535_v14  ;;  %v9589_v14 = vld [vmem:[#allocation8 + $0x280] sm:$0xf] }
 0x672   :  { %4423 = vmatmul.bf16.gmra.mxu1 %v13534_v29  ;;  %v13538_v29 = vld [vmem:[#allocation96_spill] sm:$0xff] }
 0x674   :  { %4601 = vmatmul.bf16.gmra.mxu3 %v13469_v8  ;;  %v4197_v55 = vpop.f32.mrf.mxu2 }
 0x675   :  { %v4198_v37 = vadd.f32 %v4197_v55, %v4109_v40  ;;  %v4021_v57 = vpop.f32.mrf.mxu0  ;;  %v13537_v40 = vld [vmem:[#allocation38_spill] sm:$0xff]  ;;  %v10325_v55 = vld [vmem:[#allocation8 + $0x28c] sm:$0xf0] }
 0x676   :  { %v4022_v58 = vadd.f32 %v4021_v57, %v11826_v60  ;;  %v10261_v57 = vld [vmem:[#allocation8 + $0x8c] sm:$0xf0] }
 0x677   :  { %v4286_v22 = vpop.f32.mrf.mxu3  ;;  %v4110_v5 = vpop.f32.mrf.mxu1 }
 0x678   :  { %v12030_v47 = vadd.f32 %v4286_v22, %v4198_v37  ;;  %v4761_v30 = vmax.f32 %v4022_v58, 0.0  ;;  %v4111_v35 = vadd.f32 %v4110_v5, %v11865_v26  ;;  %v9333_v37 = vld [vmem:[#allocation8 + $0x80] sm:$0xf]  ;;  %v9590_v22 = vor.u32 %v10325_v55, %v9589_v14 }
 0x679   :  { %v9717_v58 = vld [vmem:[#allocation8 + $0x380] sm:$0xf] }
 0x67a   :  { %v12032_v50 = vpack.c.bf16 %v4761_v30, %v4757_v34  ;;  %v9334_v34 = vor.u32 %v10261_v57, %v9333_v37  ;;  %5818 = vmatpush.bf16.msrb.mxu2 %v9590_v22 }
 0x67c   :  { %13536 = vst [vmem:[#allocation24_spill] sm:$0xff] %v12032_v50  ;;  %v4199_v4 = vpop.f32.mrf.mxu2  ;;  %5640 = vmatpush.bf16.msrb.mxu0 %v9334_v34  ;;  %v13541_v34 = vld [vmem:[#allocation42_spill] sm:$0xff] }
 0x67d   :  { %v4200_v43 = vadd.f32 %v4199_v4, %v4111_v35  ;;  %v4024_v54 = vpop.f32.mrf.mxu0 }
 0x67e   :  { %v4025_v8 = vadd.f32 %v4024_v54, %v11833_v1  ;;  %v10357_v1 = vld [vmem:[#allocation8 + $0x38c] sm:$0xf0] }
 0x67f   :  { %v4288_v46 = vpop.f32.mrf.mxu3  ;;  %v4113_v13 = vpop.f32.mrf.mxu1  ;;  %v9718_v30 = vor.u32 %v10357_v1, %v9717_v58 }
 0x680   :  { %v12036_v48 = vadd.f32 %v4288_v46, %v4200_v43  ;;  %4339 = vmatmul.bf16.gmra.mxu0 %v13537_v40  ;;  %v4114_v60 = vadd.f32 %v4113_v13, %v11865_v26  ;;  %v9461_v13 = vld [vmem:[#allocation8 + $0x180] sm:$0xf]  ;;  %v10293_v40 = vld [vmem:[#allocation8 + $0x18c] sm:$0xf0] }
 0x681   :  { %4517 = vmatmul.bf16.gmra.mxu2 %v13539_v45  ;;  %5907 = vmatpush.bf16.msrb.mxu3 %v9718_v30  ;;  %v9462_v14 = vor.u32 %v10293_v40, %v9461_v13  ;;  %v13542_v30 = vld [vmem:[#allocation100_spill] sm:$0xff]  ;;  %v13544_v13 = vld [vmem:[#allocation57_spill] sm:$0xff] }
 0x682   :  { %4428 = vmatmul.bf16.gmra.mxu1 %v13538_v29  ;;  %v4765_v29 = vmax.f32 %v4025_v8, 0.0 }
 0x683   :  { %5729 = vmatpush.bf16.msrb.mxu1 %v9462_v14 }
 0x684   :  { %4606 = vmatmul.bf16.gmra.mxu3 %v13472_v25  ;;  %v4202_v5 = vpop.f32.mrf.mxu2 }
 0x685   :  { %v4203_v35 = vadd.f32 %v4202_v5, %v4114_v60  ;;  %v4026_v43 = vpop.f32.mrf.mxu0 }
 0x686   :  { %v4027_v46 = vadd.f32 %v4026_v43, %v11836_v63 }
 0x687   :  { %v4291_v4 = vpop.f32.mrf.mxu3  ;;  %v4115_v54 = vpop.f32.mrf.mxu1 }
 0x688   :  { %v12044_v25 = vadd.f32 %v4291_v4, %v4203_v35  ;;  %v4769_v45 = vmax.f32 %v4027_v46, 0.0  ;;  %v4116_v60 = vadd.f32 %v4115_v54, %v11865_v26  ;;  %v13543_v35 = vld [vmem:[#allocation101_spill] sm:$0xff] }
 0x68a   :  { %v12046_v55 = vpack.c.bf16 %v4769_v45, %v4765_v29 }
 0x68c   :  { %13540 = vst [vmem:[#allocation91_spill] sm:$0xff] %v12046_v55  ;;  %v4204_v37 = vpop.f32.mrf.mxu2 }
 0x68d   :  { %v4205_v57 = vadd.f32 %v4204_v37, %v4116_v60  ;;  %v4029_v58 = vpop.f32.mrf.mxu0 }
 0x68e   :  { %v4030_v63 = vadd.f32 %v4029_v58, %v11843_v51 }
 0x68f   :  { %v4293_v22 = vpop.f32.mrf.mxu3  ;;  %v4118_v1 = vpop.f32.mrf.mxu1 }
 0x690   :  { %v12050_v5 = vadd.f32 %v4293_v22, %v4205_v57  ;;  %4344 = vmatmul.bf16.gmra.mxu0 %v13541_v34  ;;  %v4119_v8 = vadd.f32 %v4118_v1, %v11865_v26  ;;  %v4773_v45 = vmax.f32 %v4030_v63, 0.0  ;;  %v13548_v63 = vld [vmem:[#allocation105_spill] sm:$0xff] }
 0x691   :  { %4522 = vmatmul.bf16.gmra.mxu2 %v13543_v35 }
 0x692   :  { %4433 = vmatmul.bf16.gmra.mxu1 %v13542_v30  ;;  %v13546_v30 = vld [vmem:[#allocation46_spill] sm:$0xff] }
 0x694   :  { %4611 = vmatmul.bf16.gmra.mxu3 %v13475_v23  ;;  %v4207_v4 = vpop.f32.mrf.mxu2 }
 0x695   :  { %v4208_v43 = vadd.f32 %v4207_v4, %v4119_v8  ;;  %v4031_v54 = vpop.f32.mrf.mxu0  ;;  %v13547_v4 = vld [vmem:[#allocation104_spill] sm:$0xff] }
 0x696   :  { %v4032_v40 = vadd.f32 %v4031_v54, %v13544_v13  ;;  %v10321_v54 = vld [vmem:[#allocation8 + $0x26c] sm:$0xf0]  ;;  %v9317_v13 = vld [vmem:[#allocation8 + $0x60] sm:$0xf] }
 0x697   :  { %v4296_v46 = vpop.f32.mrf.mxu3  ;;  %v4120_v51 = vpop.f32.mrf.mxu1 }
 0x698   :  { %v12058_v29 = vadd.f32 %v4296_v46, %v4208_v43  ;;  %v4777_v14 = vmax.f32 %v4032_v40, 0.0  ;;  %v4121_v37 = vadd.f32 %v4120_v51, %v11865_v26  ;;  %v13549_v43 = vld [vmem:[#allocation106_spill] sm:$0xff]  ;;  %v10257_v51 = vld [vmem:[#allocation8 + $0x6c] sm:$0xf0] }
 0x699   :  { %v9573_v46 = vld [vmem:[#allocation8 + $0x260] sm:$0xf] }
 0x69a   :  { %v12060_v60 = vpack.c.bf16 %v4777_v14, %v4773_v45  ;;  %v9574_v40 = vor.u32 %v10321_v54, %v9573_v46  ;;  %v9701_v45 = vld [vmem:[#allocation8 + $0x360] sm:$0xf]  ;;  %v10289_v54 = vld [vmem:[#allocation8 + $0x16c] sm:$0xf0] }
 0x69b   :  { %v9445_v46 = vld [vmem:[#allocation8 + $0x160] sm:$0xf] }
 0x69c   :  { %13545 = vst [vmem:[#allocation27_spill] sm:$0xff] %v12060_v60  ;;  %v4209_v57 = vpop.f32.mrf.mxu2  ;;  %5819 = vmatpush.bf16.msrb.mxu2 %v9574_v40  ;;  %v9446_v55 = vor.u32 %v10289_v54, %v9445_v46 }
 0x69d   :  { %v4210_v22 = vadd.f32 %v4209_v57, %v4121_v37  ;;  %v4034_v1 = vpop.f32.mrf.mxu0  ;;  %v9318_v37 = vor.u32 %v10257_v51, %v9317_v13 }
 0x69e   :  { %v4035_v23 = vadd.f32 %v4034_v1, %v11853_v38  ;;  %v10353_v38 = vld [vmem:[#allocation8 + $0x36c] sm:$0xf0]  ;;  %5730 = vmatpush.bf16.msrb.mxu1 %v9446_v55 }
 0x69f   :  { %v4298_v58 = vpop.f32.mrf.mxu3  ;;  %v4123_v34 = vpop.f32.mrf.mxu1  ;;  %v9702_v57 = vor.u32 %v10353_v38, %v9701_v45  ;;  %5641 = vmatpush.bf16.msrb.mxu0 %v9318_v37 }
 0x6a0   :  { %v12064_v8 = vadd.f32 %v4298_v58, %v4210_v22  ;;  %4349 = vmatmul.bf16.gmra.mxu0 %v13546_v30  ;;  %v4124_v35 = vadd.f32 %v4123_v34, %v11865_v26 }
 0x6a1   :  { %4527 = vmatmul.bf16.gmra.mxu2 %v13548_v63  ;;  %5908 = vmatpush.bf16.msrb.mxu3 %v9702_v57  ;;  %v4781_v63 = vmax.f32 %v4035_v23, 0.0  ;;  %v13552_v57 = vld [vmem:[#allocation50_spill] sm:$0xff] }
 0x6a2   :  { %4438 = vmatmul.bf16.gmra.mxu1 %v13547_v4 }
 0x6a4   :  { %4616 = vmatmul.bf16.gmra.mxu3 %v13549_v43  ;;  %v4212_v14 = vpop.f32.mrf.mxu2 }
 0x6a5   :  { %v4213_v22 = vadd.f32 %v4212_v14, %v4124_v35  ;;  %v4036_v1 = vpop.f32.mrf.mxu0 }
 0x6a6   :  { %v4037_v34 = vadd.f32 %v4036_v1, %v11856_v61  ;;  %v13551_v61 = vld [vmem:[#allocation61_spill] sm:$0xff]  ;;  %v13555_v1 = vld [vmem:[#allocation110_spill] sm:$0xff] }
 0x6a7   :  { %v4301_v58 = vpop.f32.mrf.mxu3  ;;  %v4125_v30 = vpop.f32.mrf.mxu1 }
 0x6a8   :  { %v12072_v4 = vadd.f32 %v4301_v58, %v4213_v22  ;;  %v4785_v43 = vmax.f32 %v4037_v34, 0.0  ;;  %v4126_v13 = vadd.f32 %v4125_v30, %v11865_v26  ;;  %v13553_v22 = vld [vmem:[#allocation108_spill] sm:$0xff]  ;;  %v13554_v58 = vld [vmem:[#allocation109_spill] sm:$0xff] }
 0x6aa   :  { %v12074_v60 = vpack.c.bf16 %v4785_v43, %v4781_v63  ;;  %v13556_v43 = vld [vmem:[#allocation65_spill] sm:$0xff] }
 0x6ac   :  { %13550 = vst [vmem:[#allocation28_spill] sm:$0xff] %v12074_v60  ;;  %v4214_v35 = vpop.f32.mrf.mxu2 }
 0x6ad   :  { %v4215_v51 = vadd.f32 %v4214_v35, %v4126_v13  ;;  %v4039_v45 = vpop.f32.mrf.mxu0 }
 0x6ae   :  { %v4040_v38 = vadd.f32 %v4039_v45, %v13551_v61 }
 0x6af   :  { %v4303_v40 = vpop.f32.mrf.mxu3  ;;  %v4128_v14 = vpop.f32.mrf.mxu1 }
 0x6b0   :  { %v12078_v37 = vadd.f32 %v4303_v40, %v4215_v51  ;;  %4354 = vmatmul.bf16.gmra.mxu0 %v13552_v57  ;;  %v4129_v23 = vadd.f32 %v4128_v14, %v11865_v26  ;;  %v4789_v35 = vmax.f32 %v4040_v38, 0.0  ;;  %v13560_v38 = vld [vmem:[#allocation112_spill] sm:$0xff] }
 0x6b1   :  { %4532 = vmatmul.bf16.gmra.mxu2 %v13554_v58 }
 0x6b2   :  { %4443 = vmatmul.bf16.gmra.mxu1 %v13553_v22 }
 0x6b4   :  { %4621 = vmatmul.bf16.gmra.mxu3 %v13555_v1  ;;  %v4217_v34 = vpop.f32.mrf.mxu2 }
 0x6b5   :  { %v4218_v55 = vadd.f32 %v4217_v34, %v4129_v23  ;;  %v4041_v63 = vpop.f32.mrf.mxu0 }
 0x6b6   :  { %v4042_v46 = vadd.f32 %v4041_v63, %v13556_v43  ;;  %v13558_v63 = vld [vmem:[#allocation54_spill] sm:$0xff] }
 0x6b7   :  { %v4306_v30 = vpop.f32.mrf.mxu3  ;;  %v4130_v54 = vpop.f32.mrf.mxu1  ;;  %v9557_v43 = vld [vmem:[#allocation8 + $0x240] sm:$0xf] }
 0x6b8   :  { %v12086_v13 = vadd.f32 %v4306_v30, %v4218_v55  ;;  %v4793_v51 = vmax.f32 %v4042_v46, 0.0  ;;  %v4131_v45 = vadd.f32 %v4130_v54, %v11865_v26  ;;  %v13559_v55 = vld [vmem:[#allocation111_spill] sm:$0xff]  ;;  %v13561_v30 = vld [vmem:[#allocation113_spill] sm:$0xff]  ;;  %v10317_v26 = vld [vmem:[#allocation8 + $0x24c] sm:$0xf0] }
 0x6b9   :  { %v9301_v46 = vld [vmem:[#allocation8 + $0x40] sm:$0xf] }
 0x6ba   :  { %v12088_v40 = vpack.c.bf16 %v4793_v51, %v4789_v35  ;;  %v9558_v35 = vor.u32 %v10317_v26, %v9557_v43  ;;  %v10253_v51 = vld [vmem:[#allocation8 + $0x4c] sm:$0xf0] }
 0x6bc   :  { %13557 = vst [vmem:[#allocation94_spill] sm:$0xff] %v12088_v40  ;;  %v4219_v61 = vpop.f32.mrf.mxu2  ;;  %5820 = vmatpush.bf16.msrb.mxu2 %v9558_v35  ;;  %v10285_v40 = vld [vmem:[#allocation8 + $0x14c] sm:$0xf0] }
 0x6bd   :  { %v4220_v14 = vadd.f32 %v4219_v61, %v4131_v45  ;;  %v4320_v22 = vpop.f32.mrf.mxu0  ;;  %v9685_v45 = vld [vmem:[#allocation8 + $0x340] sm:$0xf] }
 0x6be   :  { %v4321_v58 = vadd.f32 %v4320_v22, %v11876_v12  ;;  %v10349_v12 = vld [vmem:[#allocation8 + $0x34c] sm:$0xf0]  ;;  %v9302_v22 = vor.u32 %v10253_v51, %v9301_v46 }
 0x6bf   :  { %v4308_v57 = vpop.f32.mrf.mxu3  ;;  %v4409_v23 = vpop.f32.mrf.mxu1 }
 0x6c0   :  { %v12092_v1 = vadd.f32 %v4308_v57, %v4220_v14  ;;  %v4410_v34 = vadd.f32 %v4409_v23, %v4321_v58  ;;  %4359 = vmatmul.bf16.gmra.mxu0 %v13558_v63  ;;  %v9686_v58 = vor.u32 %v10349_v12, %v9685_v45 }
 0x6c1   :  { %4537 = vmatmul.bf16.gmra.mxu2 %v13560_v38  ;;  %5642 = vmatpush.bf16.msrb.mxu0 %v9302_v22 }
 0x6c2   :  { %4448 = vmatmul.bf16.gmra.mxu1 %v13559_v55  ;;  %5909 = vmatpush.bf16.msrb.mxu3 %v9686_v58 }
 0x6c4   :  { %4626 = vmatmul.bf16.gmra.mxu3 %v13561_v30  ;;  %v4498_v54 = vpop.f32.mrf.mxu2  ;;  %v9429_v30 = vld [vmem:[#allocation8 + $0x140] sm:$0xf] }
 0x6c5   :  { %v4499_v61 = vadd.f32 %v4498_v54, %v4410_v34  ;;  %v4322_v57 = vpop.f32.mrf.mxu0  ;;  %v9430_v60 = vor.u32 %v10285_v40, %v9429_v30 }
 0x6c6   :  { %v4323_v23 = vadd.f32 %v4322_v57, %v11882_v59  ;;  %v13562_v59 = vld [vmem:[#allocation58_spill] sm:$0xff] }
 0x6c7   :  { %v4587_v14 = vpop.f32.mrf.mxu3  ;;  %v4411_v63 = vpop.f32.mrf.mxu1  ;;  %5731 = vmatpush.bf16.msrb.mxu1 %v9430_v60 }
 0x6c8   :  { %v4588_v55 = vadd.f32 %v4587_v14, %v4499_v61  ;;  %v4412_v38 = vadd.f32 %v4411_v63, %v4323_v23  ;;  %v13563_v61 = vld [vmem:[#allocation115_spill] sm:$0xff]  ;;  %v13564_v14 = vld [vmem:[#allocation116_spill] sm:$0xff] }
 0x6ca   :  { %v4670_v35 = vmax.f32 %v4588_v55, 0.0 }
 0x6cc   :  { %v4500_v43 = vpop.f32.mrf.mxu2 }
 0x6cd   :  { %v4501_v26 = vadd.f32 %v4500_v43, %v4412_v38  ;;  %v4325_v34 = vpop.f32.mrf.mxu0 }
 0x6ce   :  { %v4326_v54 = vadd.f32 %v4325_v34, %v11890_v9 }
 0x6cf   :  { %v4589_v50 = vpop.f32.mrf.mxu3  ;;  %v4414_v46 = vpop.f32.mrf.mxu1 }
 0x6d0   :  { %v4590_v51 = vadd.f32 %v4589_v50, %v4501_v26  ;;  %v4415_v45 = vadd.f32 %v4414_v46, %v4326_v54  ;;  %4364 = vmatmul.bf16.gmra.mxu0 %v13562_v59  ;;  %v13566_v46 = vld [vmem:[#allocation62_spill] sm:$0xff]  ;;  %v13567_v59 = vld [vmem:[#allocation119_spill] sm:$0xff] }
 0x6d1   :  { %4542 = vmatmul.bf16.gmra.mxu2 %v13564_v14  ;;  %v9285_v14 = vld [vmem:[#allocation8 + $0x20] sm:$0xf] }
 0x6d2   :  { %v4674_v12 = vmax.f32 %v4590_v51, 0.0  ;;  %4453 = vmatmul.bf16.gmra.mxu1 %v13563_v61  ;;  %v10313_v61 = vld [vmem:[#allocation8 + $0x22c] sm:$0xf0] }
 0x6d4   :  { %4631 = vmatmul.bf16.gmra.mxu3 %v13495_v18  ;;  %v12104_v40 = vpack.c.bf16 %v4674_v12, %v4670_v35  ;;  %v4503_v60 = vpop.f32.mrf.mxu2  ;;  %v13568_v35 = vld [vmem:[#allocation120_spill] sm:$0xff]  ;;  %v9541_v12 = vld [vmem:[#allocation8 + $0x220] sm:$0xf] }
 0x6d5   :  { %v4504_v57 = vadd.f32 %v4503_v60, %v4415_v45  ;;  %v4327_v58 = vpop.f32.mrf.mxu0 }
 0x6d6   :  { %13565 = vst [vmem:[#allocation31_spill] sm:$0xff] %v12104_v40  ;;  %v4328_v9 = vadd.f32 %v4327_v58, %v11896_v53  ;;  %v10345_v58 = vld [vmem:[#allocation8 + $0x32c] sm:$0xf0] }
 0x6d7   :  { %v4592_v22 = vpop.f32.mrf.mxu3  ;;  %v4416_v50 = vpop.f32.mrf.mxu1 }
 0x6d8   :  { %v4593_v23 = vadd.f32 %v4592_v22, %v4504_v57  ;;  %v4417_v63 = vadd.f32 %v4416_v50, %v4328_v9  ;;  %v10249_v57 = vld [vmem:[#allocation8 + $0x2c] sm:$0xf0]  ;;  %v9669_v22 = vld [vmem:[#allocation8 + $0x320] sm:$0xf] }
 0x6da   :  { %v4678_v51 = vmax.f32 %v4593_v23, 0.0 }
 0x6dc   :  { %v4505_v38 = vpop.f32.mrf.mxu2 }
 0x6dd   :  { %v4506_v55 = vadd.f32 %v4505_v38, %v4417_v63  ;;  %v4330_v43 = vpop.f32.mrf.mxu0  ;;  %v9286_v63 = vor.u32 %v10249_v57, %v9285_v14  ;;  %v9670_v38 = vor.u32 %v10345_v58, %v9669_v22  ;;  %v13571_v57 = vld [vmem:[#allocation124_spill] sm:$0xff] }
 0x6de   :  { %v4331_v26 = vadd.f32 %v4330_v43, %v11904_v10  ;;  %v9542_v10 = vor.u32 %v10313_v61, %v9541_v12 }
 0x6df   :  { %v4594_v30 = vpop.f32.mrf.mxu3  ;;  %v4419_v34 = vpop.f32.mrf.mxu1  ;;  %5643 = vmatpush.bf16.msrb.mxu0 %v9286_v63  ;;  %5910 = vmatpush.bf16.msrb.mxu3 %v9670_v38 }
 0x6e0   :  { %v4595_v54 = vadd.f32 %v4594_v30, %v4506_v55  ;;  %v4420_v18 = vadd.f32 %v4419_v34, %v4331_v26  ;;  %4369 = vmatmul.bf16.gmra.mxu0 %v13566_v46  ;;  %5821 = vmatpush.bf16.msrb.mxu2 %v9542_v10  ;;  %v9413_v26 = vld [vmem:[#allocation8 + $0x120] sm:$0xf]  ;;  %v10281_v34 = vld [vmem:[#allocation8 + $0x12c] sm:$0xf0]  ;;  %v13570_v10 = vld [vmem:[#allocation123_spill] sm:$0xff] }
 0x6e1   :  { %4547 = vmatmul.bf16.gmra.mxu2 %v13568_v35 }
 0x6e2   :  { %v4682_v45 = vmax.f32 %v4595_v54, 0.0  ;;  %4458 = vmatmul.bf16.gmra.mxu1 %v13567_v59  ;;  %v9414_v54 = vor.u32 %v10281_v34, %v9413_v26 }
 0x6e4   :  { %4636 = vmatmul.bf16.gmra.mxu3 %v13499_v3  ;;  %v12112_v53 = vpack.c.bf16 %v4682_v45, %v4678_v51  ;;  %v4508_v60 = vpop.f32.mrf.mxu2  ;;  %5732 = vmatpush.bf16.msrb.mxu1 %v9414_v54 }
 0x6e5   :  { %v4509_v9 = vadd.f32 %v4508_v60, %v4420_v18  ;;  %v4332_v23 = vpop.f32.mrf.mxu0 }
 0x6e6   :  { %v4333_v55 = vadd.f32 %v4332_v23, %v11910_v52  ;;  %v13569_v52 = vld [vmem:[#allocation66_spill] sm:$0xff] }
 0x6e7   :  { %v4597_v50 = vpop.f32.mrf.mxu3  ;;  %v4421_v30 = vpop.f32.mrf.mxu1 }
 0x6e8   :  { %v4598_v3 = vadd.f32 %v4597_v50, %v4509_v9  ;;  %v4422_v43 = vadd.f32 %v4421_v30, %v4333_v55 }
 0x6ea   :  { %v4686_v14 = vmax.f32 %v4598_v3, 0.0 }
 0x6ec   :  { %v4510_v46 = vpop.f32.mrf.mxu2 }
 0x6ed   :  { %v4511_v51 = vadd.f32 %v4510_v46, %v4422_v43  ;;  %v4335_v18 = vpop.f32.mrf.mxu0 }
 0x6ee   :  { %v4336_v59 = vadd.f32 %v4335_v18, %v11918_v17 }
 0x6ef   :  { %v4599_v45 = vpop.f32.mrf.mxu3  ;;  %v4424_v35 = vpop.f32.mrf.mxu1 }
 0x6f0   :  { %v4600_v12 = vadd.f32 %v4599_v45, %v4511_v51  ;;  %v4425_v61 = vadd.f32 %v4424_v35, %v4336_v59  ;;  %4374 = vmatmul.bf16.gmra.mxu0 %v13569_v52  ;;  %v13572_v51 = vld [vmem:[#allocation70_spill] sm:$0xff]  ;;  %v13573_v59 = vld [vmem:[#allocation127_spill] sm:$0xff]  ;;  %v13574_v35 = vld [vmem:[#allocation128_spill] sm:$0xff] }
 0x6f1   :  { %4552 = vmatmul.bf16.gmra.mxu2 %v13571_v57  ;;  %v9269_v52 = vld [vmem:[#allocation8] sm:$0xf]  ;;  %v10341_v57 = vld [vmem:[#allocation8 + $0x30c] sm:$0xf0] }
 0x6f2   :  { %v4690_v60 = vmax.f32 %v4600_v12, 0.0  ;;  %4463 = vmatmul.bf16.gmra.mxu1 %v13570_v10  ;;  %v9525_v12 = vld [vmem:[#allocation8 + $0x200] sm:$0xf] }
 0x6f3   :  { %v9653_v10 = vld [vmem:[#allocation8 + $0x300] sm:$0xf] }
 0x6f4   :  { %4641 = vmatmul.bf16.gmra.mxu3 %v13503_v56  ;;  %v12120_v22 = vpack.c.bf16 %v4690_v60, %v4686_v14  ;;  %v4513_v58 = vpop.f32.mrf.mxu2  ;;  %v10245_v60 = vld [vmem:[#allocation8 + $0xc] sm:$0xf0] }
 0x6f5   :  { %v4514_v9 = vadd.f32 %v4513_v58, %v4425_v61  ;;  %v4337_v23 = vpop.f32.mrf.mxu0  ;;  %v10309_v61 = vld [vmem:[#allocation8 + $0x20c] sm:$0xf0] }
 0x6f6   :  { %v4338_v17 = vadd.f32 %v4337_v23, %v11924_v36  ;;  %v9270_v23 = vor.u32 %v10245_v60, %v9269_v52 }
 0x6f7   :  { %v4602_v50 = vpop.f32.mrf.mxu3  ;;  %v4426_v63 = vpop.f32.mrf.mxu1 }
 0x6f8   :  { %v4603_v38 = vadd.f32 %v4602_v50, %v4514_v9  ;;  %v4427_v55 = vadd.f32 %v4426_v63, %v4338_v17  ;;  %v9654_v17 = vor.u32 %v10341_v57, %v9653_v10  ;;  %5644 = vmatpush.bf16.msrb.mxu0 %v9270_v23 }
 0x6fa   :  { %v4694_v45 = vmax.f32 %v4603_v38, 0.0  ;;  %5911 = vmatpush.bf16.msrb.mxu3 %v9654_v17 }
 0x6fc   :  { %v4515_v30 = vpop.f32.mrf.mxu2 }
 0x6fd   :  { %v4516_v3 = vadd.f32 %v4515_v30, %v4427_v55  ;;  %v4340_v26 = vpop.f32.mrf.mxu0  ;;  %v9397_v30 = vld [vmem:[#allocation8 + $0x100] sm:$0xf] }
 0x6fe   :  { %v4341_v34 = vadd.f32 %v4340_v26, %v11932_v32  ;;  %v9526_v32 = vor.u32 %v10309_v61, %v9525_v12  ;;  %v13576_v12 = vld [vmem:[#allocation131_spill] sm:$0xff]  ;;  %v13577_v61 = vld [vmem:[#allocation132_spill] sm:$0xff] }
 0x6ff   :  { %v4604_v43 = vpop.f32.mrf.mxu3  ;;  %v4429_v54 = vpop.f32.mrf.mxu1 }
 0x700   :  { %v4605_v46 = vadd.f32 %v4604_v43, %v4516_v3  ;;  %v4430_v56 = vadd.f32 %v4429_v54, %v4341_v34  ;;  %4379 = vmatmul.bf16.gmra.mxu0 %v13572_v51  ;;  %5822 = vmatpush.bf16.msrb.mxu2 %v9526_v32  ;;  %v10277_v3 = vld [vmem:[#allocation8 + $0x10c] sm:$0xf0] }
 0x701   :  { %4557 = vmatmul.bf16.gmra.mxu2 %v13574_v35  ;;  %v9398_v43 = vor.u32 %v10277_v3, %v9397_v30  ;;  %v13578_v30 = vld [vmem:[#allocation78_spill] sm:$0xff] }
 0x702   :  { %v4698_v18 = vmax.f32 %v4605_v46, 0.0  ;;  %4468 = vmatmul.bf16.gmra.mxu1 %v13573_v59 }
 0x703   :  { %5733 = vmatpush.bf16.msrb.mxu1 %v9398_v43 }
 0x704   :  { %4646 = vmatmul.bf16.gmra.mxu3 %v13507_v42  ;;  %v12128_v36 = vpack.c.bf16 %v4698_v18, %v4694_v45  ;;  %v4518_v14 = vpop.f32.mrf.mxu2 }
 0x705   :  { %v4519_v58 = vadd.f32 %v4518_v14, %v4430_v56  ;;  %v4342_v50 = vpop.f32.mrf.mxu0 }
 0x706   :  { %v4343_v63 = vadd.f32 %v4342_v50, %v11938_v27  ;;  %v13575_v27 = vld [vmem:[#allocation74_spill] sm:$0xff] }
 0x707   :  { %v4607_v9 = vpop.f32.mrf.mxu3  ;;  %v4431_v38 = vpop.f32.mrf.mxu1 }
 0x708   :  { %v4608_v42 = vadd.f32 %v4607_v9, %v4519_v58  ;;  %v4432_v55 = vadd.f32 %v4431_v38, %v4343_v63 }
 0x70a   :  { %v4702_v59 = vmax.f32 %v4608_v42, 0.0 }
 0x70c   :  { %v4520_v26 = vpop.f32.mrf.mxu2 }
 0x70d   :  { %v4521_v34 = vadd.f32 %v4520_v26, %v4432_v55  ;;  %v4345_v46 = vpop.f32.mrf.mxu0  ;;  %v13579_v26 = vld [vmem:[#allocation135_spill] sm:$0xff] }
 0x70e   :  { %v4346_v56 = vadd.f32 %v4345_v46, %v11946_v16  ;;  %v9639_v46 = vld [vmem:[#allocation8 + $0x2f0] sm:$0xf0] }
 0x70f   :  { %v4609_v54 = vpop.f32.mrf.mxu3  ;;  %v4434_v51 = vpop.f32.mrf.mxu1 }
 0x710   :  { %v4610_v45 = vadd.f32 %v4609_v54, %v4521_v34  ;;  %v4435_v18 = vadd.f32 %v4434_v51, %v4346_v56  ;;  %4384 = vmatmul.bf16.gmra.mxu0 %v13575_v27  ;;  %v13580_v34 = vld [vmem:[#allocation136_spill] sm:$0xff]  ;;  %v10335_v54 = vld [vmem:[#allocation8 + $0x2e4] sm:$0xf]  ;;  %v9767_v27 = vld [vmem:[#allocation8 + $0x3f0] sm:$0xf0] }
 0x711   :  { %4562 = vmatmul.bf16.gmra.mxu2 %v13577_v61  ;;  %v10271_v56 = vld [vmem:[#allocation8 + $0xe4] sm:$0xf] }
 0x712   :  { %v4706_v35 = vmax.f32 %v4610_v45, 0.0  ;;  %4473 = vmatmul.bf16.gmra.mxu1 %v13576_v12  ;;  %v9383_v45 = vld [vmem:[#allocation8 + $0xf0] sm:$0xf0] }
 0x713   :  { %v9386_v61 = vor.u32 %v10271_v56, %v9383_v45 }
 0x714   :  { %4651 = vmatmul.bf16.gmra.mxu3 %v13511_v39  ;;  %v12136_v52 = vpack.c.bf16 %v4706_v35, %v4702_v59  ;;  %v4523_v14 = vpop.f32.mrf.mxu2 }
 0x715   :  { %v4524_v32 = vadd.f32 %v4523_v14, %v4435_v18  ;;  %v4347_v10 = vpop.f32.mrf.mxu0  ;;  %v10367_v18 = vld [vmem:[#allocation8 + $0x3e4] sm:$0xf]  ;;  %5993 = vmatpush.bf16.msra.mxu0 %v9386_v61 }
 0x716   :  { %v4348_v16 = vadd.f32 %v4347_v10, %v11952_v6  ;;  %v9770_v14 = vor.u32 %v10367_v18, %v9767_v27 }
 0x717   :  { %v4612_v60 = vpop.f32.mrf.mxu3  ;;  %v4436_v57 = vpop.f32.mrf.mxu1 }
 0x718   :  { %v4613_v58 = vadd.f32 %v4612_v60, %v4524_v32  ;;  %v4437_v9 = vadd.f32 %v4436_v57, %v4348_v16  ;;  %6260 = vmatpush.bf16.msra.mxu3 %v9770_v14  ;;  %v10303_v16 = vld [vmem:[#allocation8 + $0x1e4] sm:$0xf]  ;;  %v9511_v57 = vld [vmem:[#allocation8 + $0x1f0] sm:$0xf0] }
 0x71a   :  { %v4710_v3 = vmax.f32 %v4613_v58, 0.0  ;;  %v9514_v58 = vor.u32 %v10303_v16, %v9511_v57  ;;  %v13586_v16 = vld [vmem:[#allocation69_spill] sm:$0xff]  ;;  %v10331_v57 = vld [vmem:[#allocation8 + $0x2c4] sm:$0xf] }
 0x71c   :  { %v4525_v50 = vpop.f32.mrf.mxu2  ;;  %6082 = vmatpush.bf16.msra.mxu1 %v9514_v58  ;;  %v9623_v58 = vld [vmem:[#allocation8 + $0x2d0] sm:$0xf0] }
 0x71d   :  { %v4526_v23 = vadd.f32 %v4525_v50, %v4437_v9  ;;  %v4350_v63 = vpop.f32.mrf.mxu0 }
 0x71e   :  { %v4351_v38 = vadd.f32 %v4350_v63, %v11960_v21  ;;  %v9642_v21 = vor.u32 %v10335_v54, %v9639_v46 }
 0x71f   :  { %v4614_v17 = vpop.f32.mrf.mxu3  ;;  %v4439_v42 = vpop.f32.mrf.mxu1 }
 0x720   :  { %v4615_v55 = vadd.f32 %v4614_v17, %v4526_v23  ;;  %v4440_v39 = vadd.f32 %v4439_v42, %v4351_v38  ;;  %4389 = vmatmul.bf16.gmra.mxu0 %v13578_v30  ;;  %6171 = vmatpush.bf16.msra.mxu2 %v9642_v21 }
 0x721   :  { %4567 = vmatmul.bf16.gmra.mxu2 %v13580_v34 }
 0x722   :  { %v4714_v43 = vmax.f32 %v4615_v55, 0.0  ;;  %4478 = vmatmul.bf16.gmra.mxu1 %v13579_v26 }
 0x724   :  { %4656 = vmatmul.bf16.gmra.mxu3 %v13515_v2  ;;  %v12144_v6 = vpack.c.bf16 %v4714_v43, %v4710_v3  ;;  %v4528_v51 = vpop.f32.mrf.mxu2  ;;  %v13582_v3 = vld [vmem:[#allocation139_spill] sm:$0xff]  ;;  %v13583_v43 = vld [vmem:[#allocation140_spill] sm:$0xff] }
 0x725   :  { %v4529_v59 = vadd.f32 %v4528_v51, %v4440_v39  ;;  %v4352_v12 = vpop.f32.mrf.mxu0 }
 0x726   :  { %v4353_v32 = vadd.f32 %v4352_v12, %v11966_v7  ;;  %v13581_v7 = vld [vmem:[#allocation82_spill] sm:$0xff] }
 0x727   :  { %v4617_v35 = vpop.f32.mrf.mxu3  ;;  %v4441_v60 = vpop.f32.mrf.mxu1 }
 0x728   :  { %v4618_v2 = vadd.f32 %v4617_v35, %v4529_v59  ;;  %v4442_v10 = vadd.f32 %v4441_v60, %v4353_v32  ;;  %v13584_v32 = vld [vmem:[#allocation118_spill] sm:$0xff] }
 0x72a   :  { %v4718_v39 = vmax.f32 %v4618_v2, 0.0 }
 0x72c   :  { %v4530_v9 = vpop.f32.mrf.mxu2 }
 0x72d   :  { %v4531_v50 = vadd.f32 %v4530_v9, %v4442_v10  ;;  %v4355_v17 = vpop.f32.mrf.mxu0  ;;  %v13585_v10 = vld [vmem:[#allocation114_spill] sm:$0xff]  ;;  %v10267_v9 = vld [vmem:[#allocation8 + $0xc4] sm:$0xf] }
 0x72e   :  { %v4356_v63 = vadd.f32 %v4355_v17, %v11974_v28  ;;  %v10363_v17 = vld [vmem:[#allocation8 + $0x3c4] sm:$0xf] }
 0x72f   :  { %v4619_v23 = vpop.f32.mrf.mxu3  ;;  %v4444_v38 = vpop.f32.mrf.mxu1 }
 0x730   :  { %v4620_v42 = vadd.f32 %v4619_v23, %v4531_v50  ;;  %v4445_v55 = vadd.f32 %v4444_v38, %v4356_v63  ;;  %4394 = vmatmul.bf16.gmra.mxu0 %v13581_v7  ;;  %v9367_v23 = vld [vmem:[#allocation8 + $0xd0] sm:$0xf0] }
 0x731   :  { %4572 = vmatmul.bf16.gmra.mxu2 %v13583_v43  ;;  %v9751_v63 = vld [vmem:[#allocation8 + $0x3d0] sm:$0xf0]  ;;  %v9370_v7 = vor.u32 %v10267_v9, %v9367_v23 }
 0x732   :  { %v4722_v30 = vmax.f32 %v4620_v42, 0.0  ;;  %4483 = vmatmul.bf16.gmra.mxu1 %v13582_v3 }
 0x733   :  { %5994 = vmatpush.bf16.msra.mxu0 %v9370_v7 }
 0x734   :  { %4661 = vmatmul.bf16.gmra.mxu3 %v13518_v15  ;;  %v12152_v26 = vpack.c.bf16 %v4722_v30, %v4718_v39  ;;  %v4533_v34 = vpop.f32.mrf.mxu2  ;;  %v9754_v39 = vor.u32 %v10363_v17, %v9751_v63 }
 0x735   :  { %v4534_v54 = vadd.f32 %v4533_v34, %v4445_v55  ;;  %v4357_v56 = vpop.f32.mrf.mxu0 }
 0x736   :  { %v4358_v28 = vadd.f32 %v4357_v56, %v11980_v41  ;;  %6261 = vmatpush.bf16.msra.mxu3 %v9754_v39 }
 0x737   :  { %v4622_v46 = vpop.f32.mrf.mxu3  ;;  %v4446_v51 = vpop.f32.mrf.mxu1 }
 0x738   :  { %v4623_v21 = vadd.f32 %v4622_v46, %v4534_v54  ;;  %v4447_v45 = vadd.f32 %v4446_v51, %v4358_v28  ;;  %v10299_v54 = vld [vmem:[#allocation8 + $0x1c4] sm:$0xf]  ;;  %v9495_v46 = vld [vmem:[#allocation8 + $0x1d0] sm:$0xf0] }
 0x739   :  { %v9498_v56 = vor.u32 %v10299_v54, %v9495_v46  ;;  %v13592_v54 = vld [vmem:[#allocation151_spill] sm:$0xff]  ;;  %v13593_v46 = vld [vmem:[#allocation77_spill] sm:$0xff] }
 0x73a   :  { %v4726_v60 = vmax.f32 %v4623_v21, 0.0 }
 0x73b   :  { %6083 = vmatpush.bf16.msra.mxu1 %v9498_v56  ;;  %v10327_v56 = vld [vmem:[#allocation8 + $0x2a4] sm:$0xf] }
 0x73c   :  { %v4535_v18 = vpop.f32.mrf.mxu2 }
 0x73d   :  { %v4536_v27 = vadd.f32 %v4535_v18, %v4447_v45  ;;  %v4360_v35 = vpop.f32.mrf.mxu0 }
 0x73e   :  { %v4361_v12 = vadd.f32 %v4360_v35, %v11988_v24  ;;  %v9626_v24 = vor.u32 %v10331_v57, %v9623_v58 }
 0x73f   :  { %v4624_v59 = vpop.f32.mrf.mxu3  ;;  %v4449_v61 = vpop.f32.mrf.mxu1 }
 0x740   :  { %v4625_v14 = vadd.f32 %v4624_v59, %v4536_v27  ;;  %v4450_v15 = vadd.f32 %v4449_v61, %v4361_v12  ;;  %5645 = vmatmul.bf16.vlgmr.msrb.gmra.mxu0 %v13584_v32  ;;  %6172 = vmatpush.bf16.msra.mxu2 %v9626_v24 }
 0x741   :  { %5823 = vmatmul.bf16.vlgmr.msrb.gmra.mxu2 %v13586_v16 }
 0x742   :  { %v4730_v2 = vmax.f32 %v4625_v14, 0.0  ;;  %5734 = vmatmul.bf16.vlgmr.msrb.gmra.mxu1 %v13585_v10  ;;  %v13588_v14 = vld [vmem:[#allocation150_spill] sm:$0xff] }
 0x744   :  { %5912 = vmatmul.bf16.vlgmr.msrb.gmra.mxu3 %v12104_v40  ;;  %v12160_v41 = vpack.c.bf16 %v4730_v2, %v4726_v60  ;;  %v4538_v50 = vpop.f32.mrf.mxu2 }
 0x745   :  { %v4539_v38 = vadd.f32 %v4538_v50, %v4450_v15  ;;  %v4362_v55 = vpop.f32.mrf.mxu0  ;;  %v13589_v15 = vld [vmem:[#allocation73_spill] sm:$0xff] }
 0x746   :  { %v4363_v30 = vadd.f32 %v4362_v55, %v11994_v49  ;;  %v13587_v49 = vld [vmem:[#allocation122_spill] sm:$0xff] }
 0x747   :  { %v4627_v42 = vpop.f32.mrf.mxu3  ;;  %v4451_v3 = vpop.f32.mrf.mxu1 }
 0x748   :  { %v4628_v43 = vadd.f32 %v4627_v42, %v4539_v38  ;;  %v4452_v34 = vadd.f32 %v4451_v3, %v4363_v30  ;;  %v13591_v3 = vld [vmem:[#allocation126_spill] sm:$0xff] }
 0x74a   :  { %v4734_v12 = vmax.f32 %v4628_v43, 0.0 }
 0x74c   :  { %v4540_v28 = vpop.f32.mrf.mxu2 }
 0x74d   :  { %v4541_v51 = vadd.f32 %v4540_v28, %v4452_v34  ;;  %v4365_v45 = vpop.f32.mrf.mxu0  ;;  %v9607_v28 = vld [vmem:[#allocation8 + $0x2b0] sm:$0xf0] }
 0x74e   :  { %v4366_v18 = vadd.f32 %v4365_v45, %v12002_v0  ;;  %v9351_v45 = vld [vmem:[#allocation8 + $0xb0] sm:$0xf0] }
 0x74f   :  { %v4629_v21 = vpop.f32.mrf.mxu3  ;;  %v4454_v27 = vpop.f32.mrf.mxu1 }
 0x750   :  { %v4630_v59 = vadd.f32 %v4629_v21, %v4541_v51  ;;  %v4455_v35 = vadd.f32 %v4454_v27, %v4366_v18  ;;  %5650 = vmatmul.bf16.gmra.mxu0 %v13587_v49  ;;  %v10263_v51 = vld [vmem:[#allocation8 + $0xa4] sm:$0xf]  ;;  %v9735_v27 = vld [vmem:[#allocation8 + $0x3b0] sm:$0xf0] }
 0x751   :  { %5828 = vmatmul.bf16.gmra.mxu2 %v13589_v15  ;;  %v10359_v18 = vld [vmem:[#allocation8 + $0x3a4] sm:$0xf] }
 0x752   :  { %v4738_v61 = vmax.f32 %v4630_v59, 0.0  ;;  %5739 = vmatmul.bf16.gmra.mxu1 %v13588_v14 }
 0x754   :  { %5917 = vmatmul.bf16.gmra.mxu3 %v12112_v53  ;;  %v12168_v60 = vpack.c.bf16 %v4738_v61, %v4734_v12  ;;  %v4543_v2 = vpop.f32.mrf.mxu2  ;;  %v9354_v61 = vor.u32 %v10263_v51, %v9351_v45 }
 0x755   :  { %v4544_v57 = vadd.f32 %v4543_v2, %v4455_v35  ;;  %v4367_v9 = vpop.f32.mrf.mxu0  ;;  %v9738_v2 = vor.u32 %v10359_v18, %v9735_v27 }
 0x756   :  { %13590 = vst [vmem:[#allocation32_spill] sm:$0xff] %v12168_v60  ;;  %v4368_v0 = vadd.f32 %v4367_v9, %v12008_v44  ;;  %5995 = vmatpush.bf16.msra.mxu0 %v9354_v61 }
 0x757   :  { %v4632_v58 = vpop.f32.mrf.mxu3  ;;  %v4456_v50 = vpop.f32.mrf.mxu1  ;;  %6262 = vmatpush.bf16.msra.mxu3 %v9738_v2 }
 0x758   :  { %v4633_v24 = vadd.f32 %v4632_v58, %v4544_v57  ;;  %v4457_v23 = vadd.f32 %v4456_v50, %v4368_v0  ;;  %v10295_v50 = vld [vmem:[#allocation8 + $0x1a4] sm:$0xf] }
 0x75a   :  { %v4742_v43 = vmax.f32 %v4633_v24, 0.0  ;;  %v9479_v24 = vld [vmem:[#allocation8 + $0x1b0] sm:$0xf0] }
 0x75c   :  { %v4545_v17 = vpop.f32.mrf.mxu2 }
 0x75d   :  { %v4546_v63 = vadd.f32 %v4545_v17, %v4457_v23  ;;  %v4370_v42 = vpop.f32.mrf.mxu0  ;;  %v9482_v23 = vor.u32 %v10295_v50, %v9479_v24  ;;  %v13599_v24 = vld [vmem:[#allocation134_spill] sm:$0xff] }
 0x75e   :  { %v4371_v55 = vadd.f32 %v4370_v42, %v12016_v33  ;;  %v9610_v33 = vor.u32 %v10327_v56, %v9607_v28  ;;  %v13596_v56 = vld [vmem:[#allocation152_spill] sm:$0xff]  ;;  %v13597_v28 = vld [vmem:[#allocation81_spill] sm:$0xff] }
 0x75f   :  { %v4634_v38 = vpop.f32.mrf.mxu3  ;;  %v4459_v7 = vpop.f32.mrf.mxu1  ;;  %6084 = vmatpush.bf16.msra.mxu1 %v9482_v23 }
 0x760   :  { %v4635_v39 = vadd.f32 %v4634_v38, %v4546_v63  ;;  %v4460_v30 = vadd.f32 %v4459_v7, %v4371_v55  ;;  %5655 = vmatmul.bf16.gmra.mxu0 %v13591_v3  ;;  %6173 = vmatpush.bf16.msra.mxu2 %v9610_v33 }
 0x761   :  { %5833 = vmatmul.bf16.gmra.mxu2 %v13593_v46 }
 0x762   :  { %v4746_v34 = vmax.f32 %v4635_v39, 0.0  ;;  %5744 = vmatmul.bf16.gmra.mxu1 %v13592_v54 }
 0x764   :  { %5922 = vmatmul.bf16.gmra.mxu3 %v12120_v22  ;;  %v12176_v44 = vpack.c.bf16 %v4746_v34, %v4742_v43  ;;  %v4548_v21 = vpop.f32.mrf.mxu2 }
 0x765   :  { %v4549_v59 = vadd.f32 %v4548_v21, %v4460_v30  ;;  %v4372_v12 = vpop.f32.mrf.mxu0 }
 0x766   :  { %13594 = vst [vmem:[#allocation98_spill] sm:$0xff] %v12176_v44  ;;  %v4373_v57 = vadd.f32 %v4372_v12, %v12022_v62  ;;  %v13595_v62 = vld [vmem:[#allocation130_spill] sm:$0xff] }
 0x767   :  { %v4637_v35 = vpop.f32.mrf.mxu3  ;;  %v4461_v58 = vpop.f32.mrf.mxu1 }
 0x768   :  { %v4638_v9 = vadd.f32 %v4637_v35, %v4549_v59  ;;  %v4462_v0 = vadd.f32 %v4461_v58, %v4373_v57 }
 0x76a   :  { %v4750_v43 = vmax.f32 %v4638_v9, 0.0 }
 0x76c   :  { %v4550_v17 = vpop.f32.mrf.mxu2 }
 0x76d   :  { %v4551_v63 = vadd.f32 %v4550_v17, %v4462_v0  ;;  %v4375_v42 = vpop.f32.mrf.mxu0 }
 0x76e   :  { %v4376_v55 = vadd.f32 %v4375_v42, %v12030_v47  ;;  %v10323_v42 = vld [vmem:[#allocation8 + $0x284] sm:$0xf] }
 0x76f   :  { %v4639_v38 = vpop.f32.mrf.mxu3  ;;  %v4464_v7 = vpop.f32.mrf.mxu1 }
 0x770   :  { %v4640_v39 = vadd.f32 %v4639_v38, %v4551_v63  ;;  %v4465_v30 = vadd.f32 %v4464_v7, %v4376_v55  ;;  %5660 = vmatmul.bf16.gmra.mxu0 %v13595_v62  ;;  %v13600_v63 = vld [vmem:[#allocation153_spill] sm:$0xff]  ;;  %v10259_v7 = vld [vmem:[#allocation8 + $0x84] sm:$0xf] }
 0x771   :  { %5838 = vmatmul.bf16.gmra.mxu2 %v13597_v28  ;;  %v13601_v38 = vld [vmem:[#allocation85_spill] sm:$0xff] }
 0x772   :  { %v4754_v34 = vmax.f32 %v4640_v39, 0.0  ;;  %5749 = vmatmul.bf16.gmra.mxu1 %v13596_v56  ;;  %v9591_v55 = vld [vmem:[#allocation8 + $0x290] sm:$0xf0] }
 0x774   :  { %5927 = vmatmul.bf16.gmra.mxu3 %v12128_v36  ;;  %v12184_v51 = vpack.c.bf16 %v4754_v34, %v4750_v43  ;;  %v4553_v21 = vpop.f32.mrf.mxu2  ;;  %v10355_v43 = vld [vmem:[#allocation8 + $0x384] sm:$0xf]  ;;  %v9719_v34 = vld [vmem:[#allocation8 + $0x390] sm:$0xf0] }
 0x775   :  { %v4554_v33 = vadd.f32 %v4553_v21, %v4465_v30  ;;  %v4377_v18 = vpop.f32.mrf.mxu0  ;;  %v9335_v30 = vld [vmem:[#allocation8 + $0x90] sm:$0xf0] }
 0x776   :  { %13598 = vst [vmem:[#allocation35_spill] sm:$0xff] %v12184_v51  ;;  %v4378_v47 = vadd.f32 %v4377_v18, %v12036_v48  ;;  %v9338_v18 = vor.u32 %v10259_v7, %v9335_v30  ;;  %v13605_v30 = vld [vmem:[#allocation19_spill] sm:$0xff] }
 0x777   :  { %v4642_v45 = vpop.f32.mrf.mxu3  ;;  %v4466_v27 = vpop.f32.mrf.mxu1 }
 0x778   :  { %v4643_v59 = vadd.f32 %v4642_v45, %v4554_v33  ;;  %v4467_v35 = vadd.f32 %v4466_v27, %v4378_v47  ;;  %v9722_v47 = vor.u32 %v10355_v43, %v9719_v34  ;;  %5996 = vmatpush.bf16.msra.mxu0 %v9338_v18 }
 0x77a   :  { %v4758_v23 = vmax.f32 %v4643_v59, 0.0  ;;  %6263 = vmatpush.bf16.msra.mxu3 %v9722_v47 }
 0x77c   :  { %v4555_v12 = vpop.f32.mrf.mxu2 }
 0x77d   :  { %v4556_v61 = vadd.f32 %v4555_v12, %v4467_v35  ;;  %v4380_v57 = vpop.f32.mrf.mxu0 }
 0x77e   :  { %v4381_v58 = vadd.f32 %v4380_v57, %v12044_v25  ;;  %v9594_v25 = vor.u32 %v10323_v42, %v9591_v55 }
 0x77f   :  { %v4644_v2 = vpop.f32.mrf.mxu3  ;;  %v4469_v9 = vpop.f32.mrf.mxu1 }
 0x780   :  { %v4645_v0 = vadd.f32 %v4644_v2, %v4556_v61  ;;  %v4470_v50 = vadd.f32 %v4469_v9, %v4381_v58  ;;  %5665 = vmatmul.bf16.gmra.mxu0 %v13599_v24  ;;  %6174 = vmatpush.bf16.msra.mxu2 %v9594_v25  ;;  %v10291_v61 = vld [vmem:[#allocation8 + $0x184] sm:$0xf]  ;;  %v9463_v2 = vld [vmem:[#allocation8 + $0x190] sm:$0xf0]  ;;  %v13604_v25 = vld [vmem:[#allocation154_spill] sm:$0xff] }
 0x781   :  { %5843 = vmatmul.bf16.gmra.mxu2 %v13601_v38  ;;  %v9466_v57 = vor.u32 %v10291_v61, %v9463_v2 }
 0x782   :  { %v4762_v17 = vmax.f32 %v4645_v0, 0.0  ;;  %5754 = vmatmul.bf16.gmra.mxu1 %v13600_v63 }
 0x783   :  { %6085 = vmatpush.bf16.msra.mxu1 %v9466_v57 }
 0x784   :  { %5932 = vmatmul.bf16.gmra.mxu3 %v12136_v52  ;;  %v12192_v48 = vpack.c.bf16 %v4762_v17, %v4758_v23  ;;  %v4558_v39 = vpop.f32.mrf.mxu2 }
 0x785   :  { %v4559_v21 = vadd.f32 %v4558_v39, %v4470_v50  ;;  %v4382_v45 = vpop.f32.mrf.mxu0 }
 0x786   :  { %13602 = vst [vmem:[#allocation36_spill] sm:$0xff] %v12192_v48  ;;  %v4383_v27 = vadd.f32 %v4382_v45, %v12050_v5  ;;  %v13603_v5 = vld [vmem:[#allocation138_spill] sm:$0xff] }
 0x787   :  { %v4647_v33 = vpop.f32.mrf.mxu3  ;;  %v4471_v59 = vpop.f32.mrf.mxu1 }
 0x788   :  { %v4648_v35 = vadd.f32 %v4647_v33, %v4559_v21  ;;  %v4472_v12 = vadd.f32 %v4471_v59, %v4383_v27 }
 0x78a   :  { %v4766_v7 = vmax.f32 %v4648_v35, 0.0 }
 0x78c   :  { %v4560_v58 = vpop.f32.mrf.mxu2 }
 0x78d   :  { %v4561_v9 = vadd.f32 %v4560_v58, %v4472_v12  ;;  %v4385_v50 = vpop.f32.mrf.mxu0 }
 0x78e   :  { %v4386_v23 = vadd.f32 %v4385_v50, %v12058_v29 }
 0x78f   :  { %v4649_v0 = vpop.f32.mrf.mxu3  ;;  %v4474_v17 = vpop.f32.mrf.mxu1 }
 0x790   :  { %v4650_v42 = vadd.f32 %v4649_v0, %v4561_v9  ;;  %v4475_v55 = vadd.f32 %v4474_v17, %v4386_v23  ;;  %5670 = vmatmul.bf16.gmra.mxu0 %v13603_v5  ;;  %v13607_v0 = vld [vmem:[#allocation142_spill] sm:$0xff]  ;;  %v13608_v17 = vld [vmem:[#allocation155_spill] sm:$0xff] }
 0x791   :  { %5848 = vmatmul.bf16.gmra.mxu2 %v13605_v30 }
 0x792   :  { %v4770_v39 = vmax.f32 %v4650_v42, 0.0  ;;  %5759 = vmatmul.bf16.gmra.mxu1 %v13604_v25  ;;  %v10319_v42 = vld [vmem:[#allocation8 + $0x264] sm:$0xf] }
 0x794   :  { %5937 = vmatmul.bf16.gmra.mxu3 %v12144_v6  ;;  %v12200_v43 = vpack.c.bf16 %v4770_v39, %v4766_v7  ;;  %v4563_v34 = vpop.f32.mrf.mxu2  ;;  %v10255_v7 = vld [vmem:[#allocation8 + $0x64] sm:$0xf] }
 0x795   :  { %v4564_v21 = vadd.f32 %v4563_v34, %v4475_v55  ;;  %v4387_v45 = vpop.f32.mrf.mxu0  ;;  %v9575_v55 = vld [vmem:[#allocation8 + $0x270] sm:$0xf0] }
 0x796   :  { %13606 = vst [vmem:[#allocation102_spill] sm:$0xff] %v12200_v43  ;;  %v4388_v29 = vadd.f32 %v4387_v45, %v12064_v8  ;;  %v9319_v34 = vld [vmem:[#allocation8 + $0x70] sm:$0xf0] }
 0x797   :  { %v4652_v33 = vpop.f32.mrf.mxu3  ;;  %v4476_v18 = vpop.f32.mrf.mxu1 }
 0x798   :  { %v4653_v47 = vadd.f32 %v4652_v33, %v4564_v21  ;;  %v4477_v27 = vadd.f32 %v4476_v18, %v4388_v29  ;;  %v10351_v21 = vld [vmem:[#allocation8 + $0x364] sm:$0xf]  ;;  %v9703_v33 = vld [vmem:[#allocation8 + $0x370] sm:$0xf0] }
 0x79a   :  { %v4774_v50 = vmax.f32 %v4653_v47, 0.0  ;;  %v9322_v47 = vor.u32 %v10255_v7, %v9319_v34 }
 0x79c   :  { %v4565_v59 = vpop.f32.mrf.mxu2  ;;  %5997 = vmatpush.bf16.msra.mxu0 %v9322_v47 }
 0x79d   :  { %v4566_v35 = vadd.f32 %v4565_v59, %v4477_v27  ;;  %v4390_v61 = vpop.f32.mrf.mxu0  ;;  %v9706_v27 = vor.u32 %v10351_v21, %v9703_v33  ;;  %v13611_v33 = vld [vmem:[#allocation156_spill] sm:$0xff] }
 0x79e   :  { %v4391_v2 = vadd.f32 %v4390_v61, %v12072_v4  ;;  %v9578_v4 = vor.u32 %v10319_v42, %v9575_v55 }
 0x79f   :  { %v4654_v12 = vpop.f32.mrf.mxu3  ;;  %v4479_v57 = vpop.f32.mrf.mxu1  ;;  %6264 = vmatpush.bf16.msra.mxu3 %v9706_v27 }
 0x7a0   :  { %v4655_v58 = vadd.f32 %v4654_v12, %v4566_v35  ;;  %v4480_v9 = vadd.f32 %v4479_v57, %v4391_v2  ;;  %5675 = vmatmul.bf16.gmra.mxu0 %v13607_v0  ;;  %6175 = vmatpush.bf16.msra.mxu2 %v9578_v4  ;;  %v10287_v2 = vld [vmem:[#allocation8 + $0x164] sm:$0xf]  ;;  %v9447_v57 = vld [vmem:[#allocation8 + $0x170] sm:$0xf0] }
 0x7a1   :  { %5853 = vmatmul.bf16.gmra.mxu2 %v11962_v20 }
 0x7a2   :  { %v4778_v23 = vmax.f32 %v4655_v58, 0.0  ;;  %5764 = vmatmul.bf16.gmra.mxu1 %v13608_v17  ;;  %v9450_v58 = vor.u32 %v10287_v2, %v9447_v57  ;;  %v12219_v2 = vld [vmem:[#allocation10] sm:$0xf] }
 0x7a3   :  { %13614 = vst [vmem:[#allocation107_spill] sm:$0xff] %v12219_v2  ;;  %v12222_v57 = vperm.slane %v12219_v2, 0 }
 0x7a4   :  { %5942 = vmatmul.bf16.gmra.mxu3 %v12152_v26  ;;  %v12208_v8 = vpack.c.bf16 %v4778_v23, %v4774_v50  ;;  %v4568_v39 = vpop.f32.mrf.mxu2  ;;  %6086 = vmatpush.bf16.msra.mxu1 %v9450_v58 }
 0x7a5   :  { %v4569_v45 = vadd.f32 %v4568_v39, %v4480_v9  ;;  %v4392_v18 = vpop.f32.mrf.mxu0 }
 0x7a6   :  { %13609 = vst [vmem:[#allocation39_spill] sm:$0xff] %v12208_v8  ;;  %v4393_v59 = vadd.f32 %v4392_v18, %v12078_v37  ;;  %v13610_v37 = vld [vmem:[#allocation143_spill] sm:$0xff] }
 0x7a7   :  { %v4657_v29 = vpop.f32.mrf.mxu3  ;;  %v4481_v35 = vpop.f32.mrf.mxu1 }
 0x7a8   :  { %v4658_v12 = vadd.f32 %v4657_v29, %v4569_v45  ;;  %v4482_v61 = vadd.f32 %v4481_v35, %v4393_v59  ;;  %v13612_v45 = vld [vmem:[#allocation20_spill] sm:$0xff] }
 0x7aa   :  { %v4782_v4 = vmax.f32 %v4658_v12, 0.0 }
 0x7ac   :  { %v4570_v50 = vpop.f32.mrf.mxu2 }
 0x7ad   :  { %v4571_v23 = vadd.f32 %v4570_v50, %v4482_v61  ;;  %v4395_v9 = vpop.f32.mrf.mxu0 }
 0x7ae   :  { %v4396_v55 = vadd.f32 %v4395_v9, %v12086_v13 }
 0x7af   :  { %v4659_v42 = vpop.f32.mrf.mxu3  ;;  %v4484_v7 = vpop.f32.mrf.mxu1 }
 0x7b0   :  { %v4660_v39 = vadd.f32 %v4659_v42, %v4571_v23  ;;  %v4485_v34 = vadd.f32 %v4484_v7, %v4396_v55  ;;  %5680 = vmatmul.bf16.gmra.mxu0 %v13610_v37 }
 0x7b1   :  { %5858 = vmatmul.bf16.gmra.mxu2 %v13612_v45 }
 0x7b2   :  { %v4786_v21 = vmax.f32 %v4660_v39, 0.0  ;;  %5769 = vmatmul.bf16.gmra.mxu1 %v13611_v33 }
 0x7b4   :  { %5947 = vmatmul.bf16.gmra.mxu3 %v12160_v41  ;;  %v12216_v29 = vpack.c.bf16 %v4786_v21, %v4782_v4  ;;  %v4573_v18 = vpop.f32.mrf.mxu2  ;;  %v13616_v21 = vld [vmem:[#allocation21_spill] sm:$0xff] }
 0x7b5   :  { %v4574_v47 = vadd.f32 %v4573_v18, %v4485_v34  ;;  %v4397_v59 = vpop.f32.mrf.mxu0  ;;  %v13615_v34 = vld [vmem:[#allocation144_spill] sm:$0xff]  ;;  %v10315_v18 = vld [vmem:[#allocation8 + $0x244] sm:$0xf] }
 0x7b6   :  { %13613 = vst [vmem:[#allocation40_spill] sm:$0xff] %v12216_v29  ;;  %v4398_v13 = vadd.f32 %v4397_v59, %v12092_v1 }
 0x7b7   :  { %v4662_v27 = vpop.f32.mrf.mxu3  ;;  %v4486_v35 = vpop.f32.mrf.mxu1 }
 0x7b8   :  { %v4663_v61 = vadd.f32 %v4662_v27, %v4574_v47  ;;  %v4487_v12 = vadd.f32 %v4486_v35, %v4398_v13  ;;  %v9559_v47 = vld [vmem:[#allocation8 + $0x250] sm:$0xf0]  ;;  %v10251_v27 = vld [vmem:[#allocation8 + $0x44] sm:$0xf] }
 0x7b9   :  { %v9562_v13 = vor.u32 %v10315_v18, %v9559_v47  ;;  %v9303_v35 = vld [vmem:[#allocation8 + $0x50] sm:$0xf0] }
 0x7ba   :  { %v4790_v1 = vmax.f32 %v4663_v61, 0.0 }
 0x7bb   :  { %6176 = vmatpush.bf16.msra.mxu2 %v9562_v13 }
 0x7bc   :  { %v4575_v58 = vpop.f32.mrf.mxu2 }
 0x7bd   :  { %v4576_v50 = vadd.f32 %v4575_v58, %v4487_v12  ;;  %v5646_v42 = vpop.f32.mrf.mxu0  ;;  %v10347_v12 = vld [vmem:[#allocation8 + $0x344] sm:$0xf]  ;;  %v9687_v58 = vld [vmem:[#allocation8 + $0x350] sm:$0xf0] }
 0x7be   :  { %v5647_v9 = vadd.f32 %v5646_v42, %v12222_v57  ;;  %v9690_v42 = vor.u32 %v10347_v12, %v9687_v58  ;;  %v13617_v58 = vld [vmem:[#allocation145_spill] sm:$0xff] }
 0x7bf   :  { %v4664_v23 = vpop.f32.mrf.mxu3  ;;  %v5735_v55 = vpop.f32.mrf.mxu1 }
 0x7c0   :  { %v4665_v7 = vadd.f32 %v4664_v23, %v4576_v50  ;;  %v5736_v39 = vadd.f32 %v5735_v55, %v5647_v9  ;;  %5685 = vmatmul.bf16.gmra.mxu0 %v13615_v34  ;;  %v9306_v23 = vor.u32 %v10251_v27, %v9303_v35  ;;  %6265 = vmatpush.bf16.msra.mxu3 %v9690_v42  ;;  %v13618_v42 = vld [vmem:[#allocation25_spill] sm:$0xff] }
 0x7c1   :  { %5863 = vmatmul.bf16.gmra.mxu2 %v11990_v31 }
 0x7c2   :  { %v4794_v4 = vmax.f32 %v4665_v7, 0.0  ;;  %5774 = vmatmul.bf16.gmra.mxu1 %v13616_v21  ;;  %5998 = vmatpush.bf16.msra.mxu0 %v9306_v23 }
 0x7c4   :  { %5952 = vmatmul.bf16.gmra.mxu3 %v12168_v60  ;;  %v12229_v59 = vpack.c.bf16 %v4794_v4, %v4790_v1  ;;  %v5824_v50 = vpop.f32.mrf.mxu2  ;;  %v10283_v1 = vld [vmem:[#allocation8 + $0x144] sm:$0xf]  ;;  %v9431_v4 = vld [vmem:[#allocation8 + $0x150] sm:$0xf0] }
 0x7c5   :  { %v5825_v61 = vadd.f32 %v5824_v50, %v5736_v39  ;;  %v5648_v55 = vpop.f32.mrf.mxu0  ;;  %v9434_v18 = vor.u32 %v10283_v1, %v9431_v4 }
 0x7c6   :  { %v5649_v7 = vadd.f32 %v5648_v55, %v12222_v57 }
 0x7c7   :  { %v5913_v9 = vpop.f32.mrf.mxu3  ;;  %v5737_v31 = vpop.f32.mrf.mxu1  ;;  %6087 = vmatpush.bf16.msra.mxu1 %v9434_v18 }
 0x7c8   :  { %v5914_v60 = vadd.f32 %v5913_v9, %v5825_v61  ;;  %v5738_v21 = vadd.f32 %v5737_v31, %v5649_v7 }
 0x7ca   :  { %v7061_v50 = vmax.f32 %v5914_v60, 0.0 }
 0x7cc   :  { %v5826_v47 = vpop.f32.mrf.mxu2 }
 0x7cd   :  { %v5827_v34 = vadd.f32 %v5826_v47, %v5738_v21  ;;  %v5651_v27 = vpop.f32.mrf.mxu0 }
 0x7ce   :  { %v5652_v39 = vadd.f32 %v5651_v27, %v12222_v57 }
 0x7cf   :  { %v5915_v2 = vpop.f32.mrf.mxu3  ;;  %v5740_v35 = vpop.f32.mrf.mxu1 }
 0x7d0   :  { %v5916_v12 = vadd.f32 %v5915_v2, %v5827_v34  ;;  %v5741_v13 = vadd.f32 %v5740_v35, %v5652_v39  ;;  %5690 = vmatmul.bf16.gmra.mxu0 %v13617_v58 }
 0x7d1   :  { %5868 = vmatmul.bf16.gmra.mxu2 %v12004_v19 }
 0x7d2   :  { %v7065_v23 = vmax.f32 %v5916_v12, 0.0  ;;  %5779 = vmatmul.bf16.gmra.mxu1 %v13618_v42 }
 0x7d4   :  { %5957 = vmatmul.bf16.gmra.mxu3 %v12176_v44  ;;  %v12237_v31 = vpack.c.bf16 %v7065_v23, %v7061_v50  ;;  %v5829_v21 = vpop.f32.mrf.mxu2  ;;  %v13620_v50 = vld [vmem:[#allocation95_spill] sm:$0xff] }
 0x7d5   :  { %v5830_v61 = vadd.f32 %v5829_v21, %v5741_v13  ;;  %v5653_v55 = vpop.f32.mrf.mxu0  ;;  %v13621_v21 = vld [vmem:[#allocation29_spill] sm:$0xff] }
 0x7d6   :  { %13619 = vst [vmem:[#allocation43_spill] sm:$0xff] %v12237_v31  ;;  %v5654_v7 = vadd.f32 %v5653_v55, %v12222_v57  ;;  %v10247_v55 = vld [vmem:[#allocation8 + $0x24] sm:$0xf] }
 0x7d7   :  { %v5918_v9 = vpop.f32.mrf.mxu3  ;;  %v5742_v2 = vpop.f32.mrf.mxu1 }
 0x7d8   :  { %v5919_v34 = vadd.f32 %v5918_v9, %v5830_v61  ;;  %v5743_v1 = vadd.f32 %v5742_v2, %v5654_v7  ;;  %v10311_v61 = vld [vmem:[#allocation8 + $0x224] sm:$0xf]  ;;  %v9543_v9 = vld [vmem:[#allocation8 + $0x230] sm:$0xf0] }
 0x7d9   :  { %v9546_v7 = vor.u32 %v10311_v61, %v9543_v9  ;;  %v9287_v2 = vld [vmem:[#allocation8 + $0x30] sm:$0xf0]  ;;  %v10279_v61 = vld [vmem:[#allocation8 + $0x124] sm:$0xf] }
 0x7da   :  { %v7069_v23 = vmax.f32 %v5919_v34, 0.0  ;;  %v9415_v9 = vld [vmem:[#allocation8 + $0x130] sm:$0xf0] }
 0x7db   :  { %6177 = vmatpush.bf16.msra.mxu2 %v9546_v7 }
 0x7dc   :  { %v5831_v4 = vpop.f32.mrf.mxu2 }
 0x7dd   :  { %v5832_v60 = vadd.f32 %v5831_v4, %v5743_v1  ;;  %v5656_v47 = vpop.f32.mrf.mxu0  ;;  %v10343_v1 = vld [vmem:[#allocation8 + $0x324] sm:$0xf]  ;;  %v9671_v4 = vld [vmem:[#allocation8 + $0x330] sm:$0xf0] }
 0x7de   :  { %v5657_v27 = vadd.f32 %v5656_v47, %v12222_v57 }
 0x7df   :  { %v5920_v18 = vpop.f32.mrf.mxu3  ;;  %v5745_v39 = vpop.f32.mrf.mxu1 }
 0x7e0   :  { %v5921_v35 = vadd.f32 %v5920_v18, %v5832_v60  ;;  %v5746_v12 = vadd.f32 %v5745_v39, %v5657_v27  ;;  %5695 = vmatmul.bf16.gmra.mxu0 %v13620_v50  ;;  %v9290_v18 = vor.u32 %v10247_v55, %v9287_v2  ;;  %v9674_v27 = vor.u32 %v10343_v1, %v9671_v4  ;;  %v13623_v4 = vld [vmem:[#allocation99_spill] sm:$0xff] }
 0x7e1   :  { %5873 = vmatmul.bf16.gmra.mxu2 %v12018_v11  ;;  %v9418_v50 = vor.u32 %v10279_v61, %v9415_v9 }
 0x7e2   :  { %v7073_v13 = vmax.f32 %v5921_v35, 0.0  ;;  %5784 = vmatmul.bf16.gmra.mxu1 %v13621_v21  ;;  %5999 = vmatpush.bf16.msra.mxu0 %v9290_v18 }
 0x7e3   :  { %6266 = vmatpush.bf16.msra.mxu3 %v9674_v27  ;;  %6088 = vmatpush.bf16.msra.mxu1 %v9418_v50  ;;  %v13624_v27 = vld [vmem:[#allocation33_spill] sm:$0xff] }
 0x7e4   :  { %5962 = vmatmul.bf16.gmra.mxu3 %v12184_v51  ;;  %v12245_v47 = vpack.c.bf16 %v7073_v13, %v7069_v23  ;;  %v5834_v60 = vpop.f32.mrf.mxu2 }
 0x7e5   :  { %v5835_v34 = vadd.f32 %v5834_v60, %v5746_v12  ;;  %v5658_v35 = vpop.f32.mrf.mxu0 }
 0x7e6   :  { %13622 = vst [vmem:[#allocation44_spill] sm:$0xff] %v12245_v47  ;;  %v5659_v31 = vadd.f32 %v5658_v35, %v12222_v57 }
 0x7e7   :  { %v5923_v39 = vpop.f32.mrf.mxu3  ;;  %v5747_v11 = vpop.f32.mrf.mxu1 }
 0x7e8   :  { %v5924_v51 = vadd.f32 %v5923_v39, %v5835_v34  ;;  %v5748_v21 = vadd.f32 %v5747_v11, %v5659_v31  ;;  %v13625_v11 = vld [vmem:[#allocation24_spill] sm:$0xff] }
 0x7ea   :  { %v7077_v60 = vmax.f32 %v5924_v51, 0.0 }
 0x7ec   :  { %v5836_v44 = vpop.f32.mrf.mxu2 }
 0x7ed   :  { %v5837_v23 = vadd.f32 %v5836_v44, %v5748_v21  ;;  %v5661_v55 = vpop.f32.mrf.mxu0 }
 0x7ee   :  { %v5662_v12 = vadd.f32 %v5661_v55, %v12222_v57 }
 0x7ef   :  { %v5925_v13 = vpop.f32.mrf.mxu3  ;;  %v5750_v2 = vpop.f32.mrf.mxu1 }
 0x7f0   :  { %v5926_v1 = vadd.f32 %v5925_v13, %v5837_v23  ;;  %v5751_v7 = vadd.f32 %v5750_v2, %v5662_v12  ;;  %5700 = vmatmul.bf16.gmra.mxu0 %v13623_v4 }
 0x7f1   :  { %5878 = vmatmul.bf16.gmra.mxu2 %v13625_v11 }
 0x7f2   :  { %v7081_v18 = vmax.f32 %v5926_v1, 0.0  ;;  %5789 = vmatmul.bf16.gmra.mxu1 %v13624_v27 }
 0x7f4   :  { %5967 = vmatmul.bf16.gmra.mxu3 %v12192_v48  ;;  %v12253_v31 = vpack.c.bf16 %v7081_v18, %v7077_v60  ;;  %v5839_v44 = vpop.f32.mrf.mxu2  ;;  %v13627_v60 = vld [vmem:[#allocation103_spill] sm:$0xff] }
 0x7f5   :  { %v5840_v50 = vadd.f32 %v5839_v44, %v5751_v7  ;;  %v5663_v34 = vpop.f32.mrf.mxu0  ;;  %v13628_v44 = vld [vmem:[#allocation37_spill] sm:$0xff] }
 0x7f6   :  { %13626 = vst [vmem:[#allocation45_spill] sm:$0xff] %v12253_v31  ;;  %v5664_v39 = vadd.f32 %v5663_v34, %v12222_v57  ;;  %v13629_v31 = vld [vmem:[#allocation91_spill] sm:$0xff] }
 0x7f7   :  { %v5928_v21 = vpop.f32.mrf.mxu3  ;;  %v5752_v35 = vpop.f32.mrf.mxu1  ;;  %v10243_v34 = vld [vmem:[#allocation8 + $0x4] sm:$0xf] }
 0x7f8   :  { %v5929_v61 = vadd.f32 %v5928_v21, %v5840_v50  ;;  %v5753_v9 = vadd.f32 %v5752_v35, %v5664_v39  ;;  %v10307_v50 = vld [vmem:[#allocation8 + $0x204] sm:$0xf]  ;;  %v9527_v21 = vld [vmem:[#allocation8 + $0x210] sm:$0xf0] }
 0x7f9   :  { %v9530_v39 = vor.u32 %v10307_v50, %v9527_v21  ;;  %v9271_v35 = vld [vmem:[#allocation8 + $0x10] sm:$0xf0]  ;;  %v10275_v50 = vld [vmem:[#allocation8 + $0x104] sm:$0xf] }
 0x7fa   :  { %v7085_v18 = vmax.f32 %v5929_v61, 0.0  ;;  %v9399_v21 = vld [vmem:[#allocation8 + $0x110] sm:$0xf0] }
 0x7fb   :  { %6178 = vmatpush.bf16.msra.mxu2 %v9530_v39  ;;  %v9402_v48 = vor.u32 %v10275_v50, %v9399_v21 }
 0x7fc   :  { %v5841_v23 = vpop.f32.mrf.mxu2 }
 0x7fd   :  { %v5842_v51 = vadd.f32 %v5841_v23, %v5753_v9  ;;  %v5666_v55 = vpop.f32.mrf.mxu0  ;;  %v10339_v9 = vld [vmem:[#allocation8 + $0x304] sm:$0xf]  ;;  %v9655_v23 = vld [vmem:[#allocation8 + $0x310] sm:$0xf0]  ;;  %6089 = vmatpush.bf16.msra.mxu1 %v9402_v48 }
 0x7fe   :  { %v5667_v12 = vadd.f32 %v5666_v55, %v12222_v57 }
 0x7ff   :  { %v5930_v13 = vpop.f32.mrf.mxu3  ;;  %v5755_v2 = vpop.f32.mrf.mxu1 }
 0x800   :  { %v5931_v1 = vadd.f32 %v5930_v13, %v5842_v51  ;;  %v5756_v47 = vadd.f32 %v5755_v2, %v5667_v12  ;;  %5705 = vmatmul.bf16.gmra.mxu0 %v13627_v60  ;;  %v9274_v13 = vor.u32 %v10243_v34, %v9271_v35  ;;  %v9658_v12 = vor.u32 %v10339_v9, %v9655_v23  ;;  %v13631_v23 = vld [vmem:[#allocation146_spill] sm:$0xff] }
 0x801   :  { %5883 = vmatmul.bf16.gmra.mxu2 %v13629_v31 }
 0x802   :  { %v7089_v7 = vmax.f32 %v5931_v1, 0.0  ;;  %5794 = vmatmul.bf16.gmra.mxu1 %v13628_v44  ;;  %6000 = vmatpush.bf16.msra.mxu0 %v9274_v13 }
 0x803   :  { %6267 = vmatpush.bf16.msra.mxu3 %v9658_v12  ;;  %v13632_v12 = vld [vmem:[#allocation41_spill] sm:$0xff] }
 0x804   :  { %5972 = vmatmul.bf16.gmra.mxu3 %v12200_v43  ;;  %v12261_v55 = vpack.c.bf16 %v7089_v7, %v7085_v18  ;;  %v5844_v51 = vpop.f32.mrf.mxu2 }
 0x805   :  { %v5845_v61 = vadd.f32 %v5844_v51, %v5756_v47  ;;  %v5668_v1 = vpop.f32.mrf.mxu0 }
 0x806   :  { %13630 = vst [vmem:[#allocation47_spill] sm:$0xff] %v12261_v55  ;;  %v5669_v31 = vadd.f32 %v5668_v1, %v12222_v57 }
 0x807   :  { %v5933_v2 = vpop.f32.mrf.mxu3  ;;  %v5757_v44 = vpop.f32.mrf.mxu1 }
 0x808   :  { %v5934_v43 = vadd.f32 %v5933_v2, %v5845_v61  ;;  %v5758_v60 = vadd.f32 %v5757_v44, %v5669_v31  ;;  %v13633_v31 = vld [vmem:[#allocation27_spill] sm:$0xff] }
 0x80a   :  { %v7093_v51 = vmax.f32 %v5934_v43, 0.0 }
 0x80c   :  { %v5846_v11 = vpop.f32.mrf.mxu2 }
 0x80d   :  { %v5847_v18 = vadd.f32 %v5846_v11, %v5758_v60  ;;  %v5671_v34 = vpop.f32.mrf.mxu0 }
 0x80e   :  { %v5672_v47 = vadd.f32 %v5671_v34, %v12222_v57 }
 0x80f   :  { %v5935_v7 = vpop.f32.mrf.mxu3  ;;  %v5760_v35 = vpop.f32.mrf.mxu1 }
 0x810   :  { %v5936_v9 = vadd.f32 %v5935_v7, %v5847_v18  ;;  %v5761_v39 = vadd.f32 %v5760_v35, %v5672_v47  ;;  %5710 = vmatmul.bf16.gmra.mxu0 %v13631_v23 }
 0x811   :  { %5888 = vmatmul.bf16.gmra.mxu2 %v13633_v31 }
 0x812   :  { %v7097_v13 = vmax.f32 %v5936_v9, 0.0  ;;  %5799 = vmatmul.bf16.gmra.mxu1 %v13632_v12 }
 0x814   :  { %5977 = vmatmul.bf16.gmra.mxu3 %v12208_v8  ;;  %v12269_v44 = vpack.c.bf16 %v7097_v13, %v7093_v51  ;;  %v5849_v48 = vpop.f32.mrf.mxu2  ;;  %v13635_v51 = vld [vmem:[#allocation147_spill] sm:$0xff] }
 0x815   :  { %v5850_v11 = vadd.f32 %v5849_v48, %v5761_v39  ;;  %v5673_v61 = vpop.f32.mrf.mxu0  ;;  %v13636_v48 = vld [vmem:[#allocation157_spill] sm:$0xff] }
 0x816   :  { %13634 = vst [vmem:[#allocation48_spill] sm:$0xff] %v12269_v44  ;;  %v5674_v2 = vadd.f32 %v5673_v61, %v12222_v57  ;;  %v13637_v44 = vld [vmem:[#allocation28_spill] sm:$0xff]  ;;  %v9389_v61 = vld [vmem:[#allocation8 + $0xe8] sm:$0xf] }
 0x817   :  { %v5938_v60 = vpop.f32.mrf.mxu3  ;;  %v5762_v1 = vpop.f32.mrf.mxu1 }
 0x818   :  { %v5939_v50 = vadd.f32 %v5938_v60, %v5850_v11  ;;  %v5763_v21 = vadd.f32 %v5762_v1, %v5674_v2  ;;  %v9645_v11 = vld [vmem:[#allocation8 + $0x2e8] sm:$0xf]  ;;  %v10338_v60 = vld [vmem:[#allocation8 + $0x2f4] sm:$0xf0] }
 0x819   :  { %v9646_v2 = vor.u32 %v10338_v60, %v9645_v11  ;;  %v10274_v1 = vld [vmem:[#allocation8 + $0xf4] sm:$0xf0]  ;;  %v9517_v11 = vld [vmem:[#allocation8 + $0x1e8] sm:$0xf] }
 0x81a   :  { %v7101_v13 = vmax.f32 %v5939_v50, 0.0  ;;  %v10306_v60 = vld [vmem:[#allocation8 + $0x1f4] sm:$0xf0] }
 0x81b   :  { %6527 = vmatpush.bf16.msrb.mxu2 %v9646_v2  ;;  %v9518_v8 = vor.u32 %v10306_v60, %v9517_v11 }
 0x81c   :  { %v5851_v18 = vpop.f32.mrf.mxu2 }
 0x81d   :  { %v5852_v43 = vadd.f32 %v5851_v18, %v5763_v21  ;;  %v5676_v34 = vpop.f32.mrf.mxu0  ;;  %v9773_v21 = vld [vmem:[#allocation8 + $0x3e8] sm:$0xf]  ;;  %v10370_v18 = vld [vmem:[#allocation8 + $0x3f4] sm:$0xf0]  ;;  %6438 = vmatpush.bf16.msrb.mxu1 %v9518_v8 }
 0x81e   :  { %v5677_v47 = vadd.f32 %v5676_v34, %v12222_v57 }
 0x81f   :  { %v5940_v7 = vpop.f32.mrf.mxu3  ;;  %v5765_v35 = vpop.f32.mrf.mxu1 }
 0x820   :  { %v5941_v9 = vadd.f32 %v5940_v7, %v5852_v43  ;;  %v5766_v55 = vadd.f32 %v5765_v35, %v5677_v47  ;;  %5715 = vmatmul.bf16.gmra.mxu0 %v13635_v51  ;;  %v9390_v7 = vor.u32 %v10274_v1, %v9389_v61  ;;  %v9774_v47 = vor.u32 %v10370_v18, %v9773_v21  ;;  %v13639_v18 = vld [vmem:[#allocation149_spill] sm:$0xff] }
 0x821   :  { %5893 = vmatmul.bf16.gmra.mxu2 %v13637_v44 }
 0x822   :  { %v7105_v39 = vmax.f32 %v5941_v9, 0.0  ;;  %5804 = vmatmul.bf16.gmra.mxu1 %v13636_v48  ;;  %6349 = vmatpush.bf16.msrb.mxu0 %v9390_v7 }
 0x823   :  { %6616 = vmatpush.bf16.msrb.mxu3 %v9774_v47  ;;  %v13640_v47 = vld [vmem:[#allocation49_spill] sm:$0xff] }
 0x824   :  { %5982 = vmatmul.bf16.gmra.mxu3 %v12216_v29  ;;  %v12277_v34 = vpack.c.bf16 %v7105_v39, %v7101_v13  ;;  %v5854_v43 = vpop.f32.mrf.mxu2 }
 0x825   :  { %v5855_v50 = vadd.f32 %v5854_v43, %v5766_v55  ;;  %v5678_v9 = vpop.f32.mrf.mxu0 }
 0x826   :  { %13638 = vst [vmem:[#allocation148_spill] sm:$0xff] %v12277_v34  ;;  %v5679_v44 = vadd.f32 %v5678_v9, %v12222_v57 }
 0x827   :  { %v5943_v35 = vpop.f32.mrf.mxu3  ;;  %v5767_v48 = vpop.f32.mrf.mxu1 }
 0x828   :  { %v5944_v29 = vadd.f32 %v5943_v35, %v5855_v50  ;;  %v5768_v51 = vadd.f32 %v5767_v48, %v5679_v44  ;;  %v13641_v44 = vld [vmem:[#allocation94_spill] sm:$0xff] }
 0x82a   :  { %v7109_v43 = vmax.f32 %v5944_v29, 0.0 }
 0x82c   :  { %v5856_v31 = vpop.f32.mrf.mxu2 }
 0x82d   :  { %v5857_v13 = vadd.f32 %v5856_v31, %v5768_v51  ;;  %v5681_v61 = vpop.f32.mrf.mxu0 }
 0x82e   :  { %v5682_v55 = vadd.f32 %v5681_v61, %v12222_v57 }
 0x82f   :  { %v5945_v39 = vpop.f32.mrf.mxu3  ;;  %v5770_v1 = vpop.f32.mrf.mxu1 }
 0x830   :  { %v5946_v21 = vadd.f32 %v5945_v39, %v5857_v13  ;;  %v5771_v2 = vadd.f32 %v5770_v1, %v5682_v55  ;;  %5720 = vmatmul.bf16.gmra.mxu0 %v13639_v18 }
 0x831   :  { %5898 = vmatmul.bf16.gmra.mxu2 %v13641_v44 }
 0x832   :  { %v7113_v7 = vmax.f32 %v5946_v21, 0.0  ;;  %5809 = vmatmul.bf16.gmra.mxu1 %v13640_v47 }
 0x834   :  { %5987 = vmatmul.bf16.gmra.mxu3 %v12229_v59  ;;  %v12285_v48 = vpack.c.bf16 %v7113_v7, %v7109_v43  ;;  %v5859_v8 = vpop.f32.mrf.mxu2  ;;  %v9629_v7 = vld [vmem:[#allocation8 + $0x2c8] sm:$0xf] }
 0x835   :  { %v5860_v31 = vadd.f32 %v5859_v8, %v5771_v2  ;;  %v5683_v50 = vpop.f32.mrf.mxu0  ;;  %v10334_v8 = vld [vmem:[#allocation8 + $0x2d4] sm:$0xf0] }
 0x836   :  { %13642 = vst [vmem:[#allocation51_spill] sm:$0xff] %v12285_v48  ;;  %v5684_v35 = vadd.f32 %v5683_v50, %v12222_v57  ;;  %v10270_v50 = vld [vmem:[#allocation8 + $0xd4] sm:$0xf0] }
 0x837   :  { %v5948_v51 = vpop.f32.mrf.mxu3  ;;  %v5772_v9 = vpop.f32.mrf.mxu1 }
 0x838   :  { %v5949_v11 = vadd.f32 %v5948_v51, %v5860_v31  ;;  %v5773_v60 = vadd.f32 %v5772_v9, %v5684_v35  ;;  %v9373_v31 = vld [vmem:[#allocation8 + $0xc8] sm:$0xf]  ;;  %v9630_v51 = vor.u32 %v10334_v8, %v9629_v7  ;;  %v10366_v9 = vld [vmem:[#allocation8 + $0x3d4] sm:$0xf0] }
 0x839   :  { %v9757_v35 = vld [vmem:[#allocation8 + $0x3c8] sm:$0xf]  ;;  %v10302_v8 = vld [vmem:[#allocation8 + $0x1d4] sm:$0xf0] }
 0x83a   :  { %v7117_v43 = vmax.f32 %v5949_v11, 0.0  ;;  %6528 = vmatpush.bf16.msrb.mxu2 %v9630_v51  ;;  %v9501_v7 = vld [vmem:[#allocation8 + $0x1c8] sm:$0xf] }
 0x83c   :  { %v5861_v13 = vpop.f32.mrf.mxu2 }
 0x83d   :  { %v5862_v29 = vadd.f32 %v5861_v13, %v5773_v60  ;;  %v5686_v61 = vpop.f32.mrf.mxu0 }
 0x83e   :  { %v5687_v55 = vadd.f32 %v5686_v61, %v12222_v57 }
 0x83f   :  { %v5950_v39 = vpop.f32.mrf.mxu3  ;;  %v5775_v1 = vpop.f32.mrf.mxu1 }
 0x840   :  { %v5951_v21 = vadd.f32 %v5950_v39, %v5862_v29  ;;  %v5776_v34 = vadd.f32 %v5775_v1, %v5687_v55  ;;  %6001 = vmatmul.bf16.vlgmr.msra.gmra.mxu0 %v13584_v32  ;;  %v9374_v29 = vor.u32 %v10270_v50, %v9373_v31  ;;  %v9758_v39 = vor.u32 %v10366_v9, %v9757_v35 }
 0x841   :  { %6179 = vmatmul.bf16.vlgmr.msra.gmra.mxu2 %v13586_v16  ;;  %v9502_v16 = vor.u32 %v10302_v8, %v9501_v7 }
 0x842   :  { %v7121_v2 = vmax.f32 %v5951_v21, 0.0  ;;  %6090 = vmatmul.bf16.vlgmr.msra.gmra.mxu1 %v13585_v10  ;;  %6350 = vmatpush.bf16.msrb.mxu0 %v9374_v29 }
 0x843   :  { %6617 = vmatpush.bf16.msrb.mxu3 %v9758_v39  ;;  %6439 = vmatpush.bf16.msrb.mxu1 %v9502_v16 }
 0x844   :  { %6268 = vmatmul.bf16.vlgmr.msra.gmra.mxu3 %v12104_v40  ;;  %v12293_v60 = vpack.c.bf16 %v7121_v2, %v7117_v43  ;;  %v5864_v13 = vpop.f32.mrf.mxu2 }
 0x845   :  { %v5865_v11 = vadd.f32 %v5864_v13, %v5776_v34  ;;  %v5688_v55 = vpop.f32.mrf.mxu0 }
 0x846   :  { %13643 = vst [vmem:[#allocation52_spill] sm:$0xff] %v12293_v60  ;;  %v5689_v1 = vadd.f32 %v5688_v55, %v12222_v57 }
 0x847   :  { %v5953_v61 = vpop.f32.mrf.mxu3  ;;  %v5777_v21 = vpop.f32.mrf.mxu1 }
 0x848   :  { %v5954_v48 = vadd.f32 %v5953_v61, %v5865_v11  ;;  %v5778_v40 = vadd.f32 %v5777_v21, %v5689_v1 }
 0x84a   :  { %v7125_v9 = vmax.f32 %v5954_v48, 0.0 }
 0x84c   :  { %v5866_v10 = vpop.f32.mrf.mxu2 }
 0x84d   :  { %v5867_v43 = vadd.f32 %v5866_v10, %v5778_v40  ;;  %v5691_v31 = vpop.f32.mrf.mxu0 }
 0x84e   :  { %v5692_v34 = vadd.f32 %v5691_v31, %v12222_v57 }
 0x84f   :  { %v5955_v2 = vpop.f32.mrf.mxu3  ;;  %v5780_v50 = vpop.f32.mrf.mxu1 }
 0x850   :  { %v5956_v35 = vadd.f32 %v5955_v2, %v5867_v43  ;;  %v5781_v51 = vadd.f32 %v5780_v50, %v5692_v34  ;;  %6006 = vmatmul.bf16.gmra.mxu0 %v13587_v49 }
 0x851   :  { %6184 = vmatmul.bf16.gmra.mxu2 %v13589_v15 }
 0x852   :  { %v7129_v13 = vmax.f32 %v5956_v35, 0.0  ;;  %6095 = vmatmul.bf16.gmra.mxu1 %v13588_v14 }
 0x854   :  { %6273 = vmatmul.bf16.gmra.mxu3 %v12112_v53  ;;  %v12301_v29 = vpack.c.bf16 %v7129_v13, %v7125_v9  ;;  %v5869_v40 = vpop.f32.mrf.mxu2  ;;  %v10330_v9 = vld [vmem:[#allocation8 + $0x2b4] sm:$0xf0]  ;;  %v9357_v13 = vld [vmem:[#allocation8 + $0xa8] sm:$0xf] }
 0x855   :  { %v5870_v10 = vadd.f32 %v5869_v40, %v5781_v51  ;;  %v5693_v39 = vpop.f32.mrf.mxu0  ;;  %v9613_v51 = vld [vmem:[#allocation8 + $0x2a8] sm:$0xf] }
 0x856   :  { %13644 = vst [vmem:[#allocation53_spill] sm:$0xff] %v12301_v29  ;;  %v5694_v11 = vadd.f32 %v5693_v39, %v12222_v57  ;;  %v9614_v40 = vor.u32 %v10330_v9, %v9613_v51  ;;  %v10362_v39 = vld [vmem:[#allocation8 + $0x3b4] sm:$0xf0]  ;;  %v9485_v51 = vld [vmem:[#allocation8 + $0x1a8] sm:$0xf] }
 0x857   :  { %v5958_v16 = vpop.f32.mrf.mxu3  ;;  %v5782_v61 = vpop.f32.mrf.mxu1  ;;  %v10298_v9 = vld [vmem:[#allocation8 + $0x1b4] sm:$0xf0] }
 0x858   :  { %v5959_v55 = vadd.f32 %v5958_v16, %v5870_v10  ;;  %v5783_v1 = vadd.f32 %v5782_v61, %v5694_v11  ;;  %v10266_v10 = vld [vmem:[#allocation8 + $0xb4] sm:$0xf0]  ;;  %v9741_v16 = vld [vmem:[#allocation8 + $0x3a8] sm:$0xf]  ;;  %6529 = vmatpush.bf16.msrb.mxu2 %v9614_v40  ;;  %v9486_v29 = vor.u32 %v10298_v9, %v9485_v51 }
 0x85a   :  { %v7133_v50 = vmax.f32 %v5959_v55, 0.0  ;;  %6440 = vmatpush.bf16.msrb.mxu1 %v9486_v29 }
 0x85c   :  { %v5871_v21 = vpop.f32.mrf.mxu2 }
 0x85d   :  { %v5872_v48 = vadd.f32 %v5871_v21, %v5783_v1  ;;  %v5696_v8 = vpop.f32.mrf.mxu0  ;;  %v9358_v1 = vor.u32 %v10266_v10, %v9357_v13  ;;  %v9742_v21 = vor.u32 %v10362_v39, %v9741_v16 }
 0x85e   :  { %v5697_v43 = vadd.f32 %v5696_v8, %v12222_v57 }
 0x85f   :  { %v5960_v7 = vpop.f32.mrf.mxu3  ;;  %v5785_v2 = vpop.f32.mrf.mxu1  ;;  %6351 = vmatpush.bf16.msrb.mxu0 %v9358_v1  ;;  %6618 = vmatpush.bf16.msrb.mxu3 %v9742_v21 }
 0x860   :  { %v5961_v31 = vadd.f32 %v5960_v7, %v5872_v48  ;;  %v5786_v34 = vadd.f32 %v5785_v2, %v5697_v43  ;;  %6011 = vmatmul.bf16.gmra.mxu0 %v13591_v3 }
 0x861   :  { %6189 = vmatmul.bf16.gmra.mxu2 %v13593_v46 }
 0x862   :  { %v7137_v35 = vmax.f32 %v5961_v31, 0.0  ;;  %6100 = vmatmul.bf16.gmra.mxu1 %v13592_v54 }
 0x864   :  { %6278 = vmatmul.bf16.gmra.mxu3 %v12120_v22  ;;  %v12309_v11 = vpack.c.bf16 %v7137_v35, %v7133_v50  ;;  %v5874_v61 = vpop.f32.mrf.mxu2 }
 0x865   :  { %v5875_v55 = vadd.f32 %v5874_v61, %v5786_v34  ;;  %v5698_v7 = vpop.f32.mrf.mxu0 }
 0x866   :  { %13645 = vst [vmem:[#allocation117_spill] sm:$0xff] %v12309_v11  ;;  %v5699_v8 = vadd.f32 %v5698_v7, %v12222_v57 }
 0x867   :  { %v5963_v48 = vpop.f32.mrf.mxu3  ;;  %v5787_v43 = vpop.f32.mrf.mxu1 }
 0x868   :  { %v5964_v2 = vadd.f32 %v5963_v48, %v5875_v55  ;;  %v5788_v31 = vadd.f32 %v5787_v43, %v5699_v8 }
 0x86a   :  { %v7141_v39 = vmax.f32 %v5964_v2, 0.0 }
 0x86c   :  { %v5876_v60 = vpop.f32.mrf.mxu2 }
 0x86d   :  { %v5877_v50 = vadd.f32 %v5876_v60, %v5788_v31  ;;  %v5701_v13 = vpop.f32.mrf.mxu0 }
 0x86e   :  { %v5702_v34 = vadd.f32 %v5701_v13, %v12222_v57 }
 0x86f   :  { %v5965_v35 = vpop.f32.mrf.mxu3  ;;  %v5790_v10 = vpop.f32.mrf.mxu1 }
 0x870   :  { %v5966_v16 = vadd.f32 %v5965_v35, %v5877_v50  ;;  %v5791_v40 = vadd.f32 %v5790_v10, %v5702_v34  ;;  %6016 = vmatmul.bf16.gmra.mxu0 %v13595_v62 }
 0x871   :  { %6194 = vmatmul.bf16.gmra.mxu2 %v13597_v28 }
 0x872   :  { %v7145_v61 = vmax.f32 %v5966_v16, 0.0  ;;  %6105 = vmatmul.bf16.gmra.mxu1 %v13596_v56 }
 0x874   :  { %6283 = vmatmul.bf16.gmra.mxu3 %v12128_v36  ;;  %v12317_v1 = vpack.c.bf16 %v7145_v61, %v7141_v39  ;;  %v5879_v60 = vpop.f32.mrf.mxu2  ;;  %v10326_v39 = vld [vmem:[#allocation8 + $0x294] sm:$0xf0]  ;;  %v9341_v61 = vld [vmem:[#allocation8 + $0x88] sm:$0xf] }
 0x875   :  { %v5880_v29 = vadd.f32 %v5879_v60, %v5791_v40  ;;  %v5703_v55 = vpop.f32.mrf.mxu0  ;;  %v9597_v40 = vld [vmem:[#allocation8 + $0x288] sm:$0xf] }
 0x876   :  { %13646 = vst [vmem:[#allocation55_spill] sm:$0xff] %v12317_v1  ;;  %v5704_v48 = vadd.f32 %v5703_v55, %v12222_v57  ;;  %v9598_v60 = vor.u32 %v10326_v39, %v9597_v40  ;;  %v10358_v55 = vld [vmem:[#allocation8 + $0x394] sm:$0xf0]  ;;  %v9469_v40 = vld [vmem:[#allocation8 + $0x188] sm:$0xf] }
 0x877   :  { %v5968_v21 = vpop.f32.mrf.mxu3  ;;  %v5792_v7 = vpop.f32.mrf.mxu1  ;;  %v10294_v39 = vld [vmem:[#allocation8 + $0x194] sm:$0xf0] }
 0x878   :  { %v5969_v8 = vadd.f32 %v5968_v21, %v5880_v29  ;;  %v5793_v43 = vadd.f32 %v5792_v7, %v5704_v48  ;;  %v10262_v29 = vld [vmem:[#allocation8 + $0x94] sm:$0xf0]  ;;  %v9725_v21 = vld [vmem:[#allocation8 + $0x388] sm:$0xf]  ;;  %6530 = vmatpush.bf16.msrb.mxu2 %v9598_v60  ;;  %v9470_v1 = vor.u32 %v10294_v39, %v9469_v40 }
 0x87a   :  { %v7149_v10 = vmax.f32 %v5969_v8, 0.0  ;;  %6441 = vmatpush.bf16.msrb.mxu1 %v9470_v1 }
 0x87c   :  { %v5881_v31 = vpop.f32.mrf.mxu2 }
 0x87d   :  { %v5882_v2 = vadd.f32 %v5881_v31, %v5793_v43  ;;  %v5706_v9 = vpop.f32.mrf.mxu0  ;;  %v9342_v43 = vor.u32 %v10262_v29, %v9341_v61  ;;  %v9726_v31 = vor.u32 %v10358_v55, %v9725_v21 }
 0x87e   :  { %v5707_v50 = vadd.f32 %v5706_v9, %v12222_v57 }
 0x87f   :  { %v5970_v51 = vpop.f32.mrf.mxu3  ;;  %v5795_v35 = vpop.f32.mrf.mxu1  ;;  %6352 = vmatpush.bf16.msrb.mxu0 %v9342_v43  ;;  %6619 = vmatpush.bf16.msrb.mxu3 %v9726_v31 }
 0x880   :  { %v5971_v13 = vadd.f32 %v5970_v51, %v5882_v2  ;;  %v5796_v34 = vadd.f32 %v5795_v35, %v5707_v50  ;;  %6021 = vmatmul.bf16.gmra.mxu0 %v13599_v24 }
 0x881   :  { %6199 = vmatmul.bf16.gmra.mxu2 %v13601_v38 }
 0x882   :  { %v7153_v16 = vmax.f32 %v5971_v13, 0.0  ;;  %6110 = vmatmul.bf16.gmra.mxu1 %v13600_v63 }
 0x884   :  { %6288 = vmatmul.bf16.gmra.mxu3 %v12136_v52  ;;  %v12325_v48 = vpack.c.bf16 %v7153_v16, %v7149_v10  ;;  %v5884_v7 = vpop.f32.mrf.mxu2 }
 0x885   :  { %v5885_v8 = vadd.f32 %v5884_v7, %v5796_v34  ;;  %v5708_v51 = vpop.f32.mrf.mxu0 }
 0x886   :  { %13647 = vst [vmem:[#allocation56_spill] sm:$0xff] %v12325_v48  ;;  %v5709_v9 = vadd.f32 %v5708_v51, %v12222_v57 }
 0x887   :  { %v5973_v2 = vpop.f32.mrf.mxu3  ;;  %v5797_v50 = vpop.f32.mrf.mxu1 }
 0x888   :  { %v5974_v35 = vadd.f32 %v5973_v2, %v5885_v8  ;;  %v5798_v13 = vadd.f32 %v5797_v50, %v5709_v9 }
 0x88a   :  { %v7157_v55 = vmax.f32 %v5974_v35, 0.0 }
 0x88c   :  { %v5886_v11 = vpop.f32.mrf.mxu2 }
 0x88d   :  { %v5887_v10 = vadd.f32 %v5886_v11, %v5798_v13  ;;  %v5711_v61 = vpop.f32.mrf.mxu0 }
 0x88e   :  { %v5712_v34 = vadd.f32 %v5711_v61, %v12222_v57 }
 0x88f   :  { %v5975_v16 = vpop.f32.mrf.mxu3  ;;  %v5800_v29 = vpop.f32.mrf.mxu1 }
 0x890   :  { %v5976_v21 = vadd.f32 %v5975_v16, %v5887_v10  ;;  %v5801_v60 = vadd.f32 %v5800_v29, %v5712_v34  ;;  %6026 = vmatmul.bf16.gmra.mxu0 %v13603_v5 }
 0x891   :  { %6204 = vmatmul.bf16.gmra.mxu2 %v13605_v30 }
 0x892   :  { %v7161_v7 = vmax.f32 %v5976_v21, 0.0  ;;  %6115 = vmatmul.bf16.gmra.mxu1 %v13604_v25 }
 0x894   :  { %6293 = vmatmul.bf16.gmra.mxu3 %v12144_v6  ;;  %v12333_v43 = vpack.c.bf16 %v7161_v7, %v7157_v55  ;;  %v5889_v11 = vpop.f32.mrf.mxu2  ;;  %v10322_v55 = vld [vmem:[#allocation8 + $0x274] sm:$0xf0]  ;;  %v9325_v7 = vld [vmem:[#allocation8 + $0x68] sm:$0xf] }
 0x895   :  { %v5890_v1 = vadd.f32 %v5889_v11, %v5801_v60  ;;  %v5713_v8 = vpop.f32.mrf.mxu0  ;;  %v9581_v60 = vld [vmem:[#allocation8 + $0x268] sm:$0xf] }
 0x896   :  { %13648 = vst [vmem:[#allocation121_spill] sm:$0xff] %v12333_v43  ;;  %v5714_v2 = vadd.f32 %v5713_v8, %v12222_v57  ;;  %v9582_v11 = vor.u32 %v10322_v55, %v9581_v60  ;;  %v10354_v8 = vld [vmem:[#allocation8 + $0x374] sm:$0xf0]  ;;  %v9453_v60 = vld [vmem:[#allocation8 + $0x168] sm:$0xf] }
 0x897   :  { %v5978_v31 = vpop.f32.mrf.mxu3  ;;  %v5802_v51 = vpop.f32.mrf.mxu1  ;;  %v10290_v55 = vld [vmem:[#allocation8 + $0x174] sm:$0xf0] }
 0x898   :  { %v5979_v9 = vadd.f32 %v5978_v31, %v5890_v1  ;;  %v5803_v50 = vadd.f32 %v5802_v51, %v5714_v2  ;;  %v10258_v1 = vld [vmem:[#allocation8 + $0x74] sm:$0xf0]  ;;  %v9709_v31 = vld [vmem:[#allocation8 + $0x368] sm:$0xf]  ;;  %6531 = vmatpush.bf16.msrb.mxu2 %v9582_v11  ;;  %v9454_v43 = vor.u32 %v10290_v55, %v9453_v60 }
 0x89a   :  { %v7165_v29 = vmax.f32 %v5979_v9, 0.0  ;;  %6442 = vmatpush.bf16.msrb.mxu1 %v9454_v43 }
 0x89c   :  { %v5891_v13 = vpop.f32.mrf.mxu2 }
 0x89d   :  { %v5892_v35 = vadd.f32 %v5891_v13, %v5803_v50  ;;  %v5716_v39 = vpop.f32.mrf.mxu0  ;;  %v9326_v50 = vor.u32 %v10258_v1, %v9325_v7  ;;  %v9710_v13 = vor.u32 %v10354_v8, %v9709_v31 }
 0x89e   :  { %v5717_v10 = vadd.f32 %v5716_v39, %v12222_v57 }
 0x89f   :  { %v5980_v40 = vpop.f32.mrf.mxu3  ;;  %v5805_v16 = vpop.f32.mrf.mxu1  ;;  %6353 = vmatpush.bf16.msrb.mxu0 %v9326_v50  ;;  %6620 = vmatpush.bf16.msrb.mxu3 %v9710_v13 }
 0x8a0   :  { %v5981_v61 = vadd.f32 %v5980_v40, %v5892_v35  ;;  %v5806_v34 = vadd.f32 %v5805_v16, %v5717_v10  ;;  %6031 = vmatmul.bf16.gmra.mxu0 %v13607_v0 }
 0x8a1   :  { %6209 = vmatmul.bf16.gmra.mxu2 %v11962_v20 }
 0x8a2   :  { %v7169_v21 = vmax.f32 %v5981_v61, 0.0  ;;  %6120 = vmatmul.bf16.gmra.mxu1 %v13608_v17 }
 0x8a4   :  { %6298 = vmatmul.bf16.gmra.mxu3 %v12152_v26  ;;  %v12341_v2 = vpack.c.bf16 %v7169_v21, %v7165_v29  ;;  %v5894_v51 = vpop.f32.mrf.mxu2 }
 0x8a5   :  { %v5895_v9 = vadd.f32 %v5894_v51, %v5806_v34  ;;  %v5718_v40 = vpop.f32.mrf.mxu0 }
 0x8a6   :  { %13649 = vst [vmem:[#allocation59_spill] sm:$0xff] %v12341_v2  ;;  %v5719_v39 = vadd.f32 %v5718_v40, %v12222_v57 }
 0x8a7   :  { %v5983_v35 = vpop.f32.mrf.mxu3  ;;  %v5807_v10 = vpop.f32.mrf.mxu1 }
 0x8a8   :  { %v5984_v16 = vadd.f32 %v5983_v35, %v5895_v9  ;;  %v5808_v61 = vadd.f32 %v5807_v10, %v5719_v39 }
 0x8aa   :  { %v7173_v8 = vmax.f32 %v5984_v16, 0.0 }
 0x8ac   :  { %v5896_v48 = vpop.f32.mrf.mxu2 }
 0x8ad   :  { %v5897_v29 = vadd.f32 %v5896_v48, %v5808_v61  ;;  %v5721_v7 = vpop.f32.mrf.mxu0  ;;  %v13651_v61 = vld [vmem:[#allocation107_spill] sm:$0xff] }
 0x8ae   :  { %v5722_v34 = vadd.f32 %v5721_v7, %v12222_v57  ;;  %v12353_v16 = vperm.slane %v13651_v61, 1  ;;  %v9693_v61 = vld [vmem:[#allocation8 + $0x348] sm:$0xf] }
 0x8af   :  { %v5985_v21 = vpop.f32.mrf.mxu3  ;;  %v5810_v1 = vpop.f32.mrf.mxu1 }
 0x8b0   :  { %v5986_v31 = vadd.f32 %v5985_v21, %v5897_v29  ;;  %v5811_v11 = vadd.f32 %v5810_v1, %v5722_v34  ;;  %6036 = vmatmul.bf16.gmra.mxu0 %v13610_v37 }
 0x8b1   :  { %6214 = vmatmul.bf16.gmra.mxu2 %v13612_v45 }
 0x8b2   :  { %v7177_v51 = vmax.f32 %v5986_v31, 0.0  ;;  %6125 = vmatmul.bf16.gmra.mxu1 %v13611_v33 }
 0x8b4   :  { %6303 = vmatmul.bf16.gmra.mxu3 %v12160_v41  ;;  %v12349_v50 = vpack.c.bf16 %v7177_v51, %v7173_v8  ;;  %v5899_v48 = vpop.f32.mrf.mxu2 }
 0x8b5   :  { %v5900_v43 = vadd.f32 %v5899_v48, %v5811_v11  ;;  %v5723_v9 = vpop.f32.mrf.mxu0  ;;  %v13652_v11 = vld [vmem:[#allocation144_spill] sm:$0xff] }
 0x8b6   :  { %13650 = vst [vmem:[#allocation60_spill] sm:$0xff] %v12349_v50  ;;  %v5724_v35 = vadd.f32 %v5723_v9, %v12222_v57  ;;  %v13653_v57 = vld [vmem:[#allocation21_spill] sm:$0xff]  ;;  %v13654_v48 = vld [vmem:[#allocation88_spill] sm:$0xff] }
 0x8b7   :  { %v5988_v13 = vpop.f32.mrf.mxu3  ;;  %v5812_v40 = vpop.f32.mrf.mxu1  ;;  %v10318_v9 = vld [vmem:[#allocation8 + $0x254] sm:$0xf0] }
 0x8b8   :  { %v5989_v39 = vadd.f32 %v5988_v13, %v5900_v43  ;;  %v5813_v10 = vadd.f32 %v5812_v40, %v5724_v35  ;;  %v13655_v43 = vld [vmem:[#allocation32_spill] sm:$0xff]  ;;  %v9565_v13 = vld [vmem:[#allocation8 + $0x248] sm:$0xf] }
 0x8b9   :  { %v9309_v35 = vld [vmem:[#allocation8 + $0x48] sm:$0xf]  ;;  %v9566_v40 = vor.u32 %v10318_v9, %v9565_v13  ;;  %v10286_v9 = vld [vmem:[#allocation8 + $0x154] sm:$0xf0] }
 0x8ba   :  { %v7181_v8 = vmax.f32 %v5989_v39, 0.0  ;;  %v9437_v13 = vld [vmem:[#allocation8 + $0x148] sm:$0xf] }
 0x8bb   :  { %6532 = vmatpush.bf16.msrb.mxu2 %v9566_v40 }
 0x8bc   :  { %v5901_v60 = vpop.f32.mrf.mxu2 }
 0x8bd   :  { %v5902_v55 = vadd.f32 %v5901_v60, %v5813_v10  ;;  %v6002_v21 = vpop.f32.mrf.mxu0  ;;  %v10254_v10 = vld [vmem:[#allocation8 + $0x54] sm:$0xf0] }
 0x8be   :  { %v6003_v7 = vadd.f32 %v6002_v21, %v12353_v16  ;;  %v10350_v60 = vld [vmem:[#allocation8 + $0x354] sm:$0xf0] }
 0x8bf   :  { %v5990_v29 = vpop.f32.mrf.mxu3  ;;  %v6091_v34 = vpop.f32.mrf.mxu1 }
 0x8c0   :  { %v5991_v1 = vadd.f32 %v5990_v29, %v5902_v55  ;;  %v6092_v31 = vadd.f32 %v6091_v34, %v6003_v7  ;;  %6041 = vmatmul.bf16.gmra.mxu0 %v13652_v11  ;;  %v9310_v29 = vor.u32 %v10254_v10, %v9309_v35  ;;  %v9694_v7 = vor.u32 %v10350_v60, %v9693_v61 }
 0x8c1   :  { %6219 = vmatmul.bf16.gmra.mxu2 %v13654_v48 }
 0x8c2   :  { %v7185_v51 = vmax.f32 %v5991_v1, 0.0  ;;  %6130 = vmatmul.bf16.gmra.mxu1 %v13653_v57  ;;  %6354 = vmatpush.bf16.msrb.mxu0 %v9310_v29  ;;  %v9438_v57 = vor.u32 %v10286_v9, %v9437_v13 }
 0x8c3   :  { %6621 = vmatpush.bf16.msrb.mxu3 %v9694_v7 }
 0x8c4   :  { %6308 = vmatmul.bf16.gmra.mxu3 %v13655_v43  ;;  %v12360_v21 = vpack.c.bf16 %v7185_v51, %v7181_v8  ;;  %v6180_v55 = vpop.f32.mrf.mxu2  ;;  %6443 = vmatpush.bf16.msrb.mxu1 %v9438_v57 }
 0x8c5   :  { %v6181_v39 = vadd.f32 %v6180_v55, %v6092_v31  ;;  %v6004_v1 = vpop.f32.mrf.mxu0 }
 0x8c6   :  { %13656 = vst [vmem:[#allocation125_spill] sm:$0xff] %v12360_v21  ;;  %v6005_v50 = vadd.f32 %v6004_v1, %v12353_v16 }
 0x8c7   :  { %v6269_v34 = vpop.f32.mrf.mxu3  ;;  %v6093_v2 = vpop.f32.mrf.mxu1 }
 0x8c8   :  { %v6270_v43 = vadd.f32 %v6269_v34, %v6181_v39  ;;  %v6094_v48 = vadd.f32 %v6093_v2, %v6005_v50  ;;  %v13657_v2 = vld [vmem:[#allocation98_spill] sm:$0xff] }
 0x8ca   :  { %v7062_v60 = vmax.f32 %v6270_v43, 0.0 }
 0x8cc   :  { %v6182_v11 = vpop.f32.mrf.mxu2 }
 0x8cd   :  { %v6183_v8 = vadd.f32 %v6182_v11, %v6094_v48  ;;  %v6007_v35 = vpop.f32.mrf.mxu0 }
 0x8ce   :  { %v6008_v31 = vadd.f32 %v6007_v35, %v12353_v16 }
 0x8cf   :  { %v6271_v51 = vpop.f32.mrf.mxu3  ;;  %v6096_v10 = vpop.f32.mrf.mxu1 }
 0x8d0   :  { %v6272_v61 = vadd.f32 %v6271_v51, %v6183_v8  ;;  %v6097_v40 = vadd.f32 %v6096_v10, %v6008_v31  ;;  %6046 = vmatmul.bf16.gmra.mxu0 %v13617_v58 }
 0x8d1   :  { %6224 = vmatmul.bf16.gmra.mxu2 %v12004_v19 }
 0x8d2   :  { %v7066_v55 = vmax.f32 %v6272_v61, 0.0  ;;  %6135 = vmatmul.bf16.gmra.mxu1 %v13618_v42  ;;  %v13659_v61 = vld [vmem:[#allocation95_spill] sm:$0xff] }
 0x8d4   :  { %6313 = vmatmul.bf16.gmra.mxu3 %v13657_v2  ;;  %v12368_v50 = vpack.c.bf16 %v7066_v55, %v7062_v60  ;;  %v6185_v11 = vpop.f32.mrf.mxu2  ;;  %v13660_v55 = vld [vmem:[#allocation29_spill] sm:$0xff] }
 0x8d5   :  { %v6186_v57 = vadd.f32 %v6185_v11, %v6097_v40  ;;  %v6009_v29 = vpop.f32.mrf.mxu0  ;;  %v13661_v11 = vld [vmem:[#allocation23_spill] sm:$0xff] }
 0x8d6   :  { %13658 = vst [vmem:[#allocation63_spill] sm:$0xff] %v12368_v50  ;;  %v6010_v7 = vadd.f32 %v6009_v29, %v12353_v16  ;;  %v13662_v29 = vld [vmem:[#allocation35_spill] sm:$0xff] }
 0x8d7   :  { %v6274_v48 = vpop.f32.mrf.mxu3  ;;  %v6098_v39 = vpop.f32.mrf.mxu1 }
 0x8d8   :  { %v6275_v34 = vadd.f32 %v6274_v48, %v6186_v57  ;;  %v6099_v1 = vadd.f32 %v6098_v39, %v6010_v7  ;;  %v9549_v57 = vld [vmem:[#allocation8 + $0x228] sm:$0xf]  ;;  %v10314_v48 = vld [vmem:[#allocation8 + $0x234] sm:$0xf0] }
 0x8d9   :  { %v9293_v7 = vld [vmem:[#allocation8 + $0x28] sm:$0xf]  ;;  %v9550_v39 = vor.u32 %v10314_v48, %v9549_v57  ;;  %v10282_v48 = vld [vmem:[#allocation8 + $0x134] sm:$0xf0] }
 0x8da   :  { %v7070_v60 = vmax.f32 %v6275_v34, 0.0  ;;  %v9421_v57 = vld [vmem:[#allocation8 + $0x128] sm:$0xf] }
 0x8db   :  { %6533 = vmatpush.bf16.msrb.mxu2 %v9550_v39 }
 0x8dc   :  { %v6187_v13 = vpop.f32.mrf.mxu2 }
 0x8dd   :  { %v6188_v43 = vadd.f32 %v6187_v13, %v6099_v1  ;;  %v6012_v8 = vpop.f32.mrf.mxu0  ;;  %v10250_v1 = vld [vmem:[#allocation8 + $0x34] sm:$0xf0]  ;;  %v9677_v13 = vld [vmem:[#allocation8 + $0x328] sm:$0xf] }
 0x8de   :  { %v6013_v51 = vadd.f32 %v6012_v8, %v12353_v16  ;;  %v10346_v8 = vld [vmem:[#allocation8 + $0x334] sm:$0xf0] }
 0x8df   :  { %v6276_v9 = vpop.f32.mrf.mxu3  ;;  %v6101_v35 = vpop.f32.mrf.mxu1 }
 0x8e0   :  { %v6277_v31 = vadd.f32 %v6276_v9, %v6188_v43  ;;  %v6102_v10 = vadd.f32 %v6101_v35, %v6013_v51  ;;  %6051 = vmatmul.bf16.gmra.mxu0 %v13659_v61  ;;  %v9294_v9 = vor.u32 %v10250_v1, %v9293_v7  ;;  %v9678_v51 = vor.u32 %v10346_v8, %v9677_v13 }
 0x8e1   :  { %6229 = vmatmul.bf16.gmra.mxu2 %v13661_v11  ;;  %v9422_v61 = vor.u32 %v10282_v48, %v9421_v57 }
 0x8e2   :  { %v7074_v40 = vmax.f32 %v6277_v31, 0.0  ;;  %6140 = vmatmul.bf16.gmra.mxu1 %v13660_v55  ;;  %6355 = vmatpush.bf16.msrb.mxu0 %v9294_v9 }
 0x8e3   :  { %6622 = vmatpush.bf16.msrb.mxu3 %v9678_v51  ;;  %6444 = vmatpush.bf16.msrb.mxu1 %v9422_v61 }
 0x8e4   :  { %6318 = vmatmul.bf16.gmra.mxu3 %v13662_v29  ;;  %v12376_v21 = vpack.c.bf16 %v7074_v40, %v7070_v60  ;;  %v6190_v43 = vpop.f32.mrf.mxu2 }
 0x8e5   :  { %v6191_v34 = vadd.f32 %v6190_v43, %v6102_v10  ;;  %v6014_v31 = vpop.f32.mrf.mxu0 }
 0x8e6   :  { %13663 = vst [vmem:[#allocation64_spill] sm:$0xff] %v12376_v21  ;;  %v6015_v50 = vadd.f32 %v6014_v31, %v12353_v16 }
 0x8e7   :  { %v6279_v35 = vpop.f32.mrf.mxu3  ;;  %v6103_v11 = vpop.f32.mrf.mxu1 }
 0x8e8   :  { %v6280_v29 = vadd.f32 %v6279_v35, %v6191_v34  ;;  %v6104_v55 = vadd.f32 %v6103_v11, %v6015_v50  ;;  %v13664_v50 = vld [vmem:[#allocation24_spill] sm:$0xff] }
 0x8e9   :  { %v13665_v11 = vld [vmem:[#allocation36_spill] sm:$0xff] }
 0x8ea   :  { %v7078_v8 = vmax.f32 %v6280_v29, 0.0 }
 0x8ec   :  { %v6192_v2 = vpop.f32.mrf.mxu2 }
 0x8ed   :  { %v6193_v60 = vadd.f32 %v6192_v2, %v6104_v55  ;;  %v6017_v7 = vpop.f32.mrf.mxu0 }
 0x8ee   :  { %v6018_v10 = vadd.f32 %v6017_v7, %v12353_v16 }
 0x8ef   :  { %v6281_v40 = vpop.f32.mrf.mxu3  ;;  %v6106_v1 = vpop.f32.mrf.mxu1 }
 0x8f0   :  { %v6282_v13 = vadd.f32 %v6281_v40, %v6193_v60  ;;  %v6107_v39 = vadd.f32 %v6106_v1, %v6018_v10  ;;  %6056 = vmatmul.bf16.gmra.mxu0 %v13623_v4 }
 0x8f1   :  { %6234 = vmatmul.bf16.gmra.mxu2 %v13664_v50 }
 0x8f2   :  { %v7082_v43 = vmax.f32 %v6282_v13, 0.0  ;;  %6145 = vmatmul.bf16.gmra.mxu1 %v13624_v27 }
 0x8f4   :  { %6323 = vmatmul.bf16.gmra.mxu3 %v13665_v11  ;;  %v12384_v9 = vpack.c.bf16 %v7082_v43, %v7078_v8  ;;  %v6195_v2 = vpop.f32.mrf.mxu2  ;;  %v13667_v8 = vld [vmem:[#allocation103_spill] sm:$0xff] }
 0x8f5   :  { %v6196_v61 = vadd.f32 %v6195_v2, %v6107_v39  ;;  %v6019_v51 = vpop.f32.mrf.mxu0  ;;  %v13668_v2 = vld [vmem:[#allocation37_spill] sm:$0xff] }
 0x8f6   :  { %13666 = vst [vmem:[#allocation129_spill] sm:$0xff] %v12384_v9  ;;  %v6020_v34 = vadd.f32 %v6019_v51, %v12353_v16  ;;  %v13669_v9 = vld [vmem:[#allocation91_spill] sm:$0xff]  ;;  %v13670_v51 = vld [vmem:[#allocation102_spill] sm:$0xff] }
 0x8f7   :  { %v6284_v55 = vpop.f32.mrf.mxu3  ;;  %v6108_v35 = vpop.f32.mrf.mxu1 }
 0x8f8   :  { %v6285_v31 = vadd.f32 %v6284_v55, %v6196_v61  ;;  %v6109_v57 = vadd.f32 %v6108_v35, %v6020_v34  ;;  %v9533_v61 = vld [vmem:[#allocation8 + $0x208] sm:$0xf]  ;;  %v10310_v55 = vld [vmem:[#allocation8 + $0x214] sm:$0xf0] }
 0x8f9   :  { %v9277_v34 = vld [vmem:[#allocation8 + $0x8] sm:$0xf]  ;;  %v9534_v35 = vor.u32 %v10310_v55, %v9533_v61  ;;  %v10278_v55 = vld [vmem:[#allocation8 + $0x114] sm:$0xf0] }
 0x8fa   :  { %v7086_v43 = vmax.f32 %v6285_v31, 0.0  ;;  %v9405_v61 = vld [vmem:[#allocation8 + $0x108] sm:$0xf] }
 0x8fb   :  { %6534 = vmatpush.bf16.msrb.mxu2 %v9534_v35  ;;  %v9406_v11 = vor.u32 %v10278_v55, %v9405_v61 }
 0x8fc   :  { %v6197_v48 = vpop.f32.mrf.mxu2 }
 0x8fd   :  { %v6198_v29 = vadd.f32 %v6197_v48, %v6109_v57  ;;  %v6022_v40 = vpop.f32.mrf.mxu0  ;;  %v10246_v57 = vld [vmem:[#allocation8 + $0x14] sm:$0xf0]  ;;  %v9661_v48 = vld [vmem:[#allocation8 + $0x308] sm:$0xf]  ;;  %6445 = vmatpush.bf16.msrb.mxu1 %v9406_v11 }
 0x8fe   :  { %v6023_v7 = vadd.f32 %v6022_v40, %v12353_v16  ;;  %v10342_v40 = vld [vmem:[#allocation8 + $0x314] sm:$0xf0] }
 0x8ff   :  { %v6286_v60 = vpop.f32.mrf.mxu3  ;;  %v6111_v10 = vpop.f32.mrf.mxu1 }
 0x900   :  { %v6287_v1 = vadd.f32 %v6286_v60, %v6198_v29  ;;  %v6112_v13 = vadd.f32 %v6111_v10, %v6023_v7  ;;  %6061 = vmatmul.bf16.gmra.mxu0 %v13667_v8  ;;  %v9278_v60 = vor.u32 %v10246_v57, %v9277_v34  ;;  %v9662_v7 = vor.u32 %v10342_v40, %v9661_v48 }
 0x901   :  { %6239 = vmatmul.bf16.gmra.mxu2 %v13669_v9 }
 0x902   :  { %v7090_v39 = vmax.f32 %v6287_v1, 0.0  ;;  %6150 = vmatmul.bf16.gmra.mxu1 %v13668_v2  ;;  %6356 = vmatpush.bf16.msrb.mxu0 %v9278_v60 }
 0x903   :  { %6623 = vmatpush.bf16.msrb.mxu3 %v9662_v7 }
 0x904   :  { %6328 = vmatmul.bf16.gmra.mxu3 %v13670_v51  ;;  %v12392_v21 = vpack.c.bf16 %v7090_v39, %v7086_v43  ;;  %v6200_v29 = vpop.f32.mrf.mxu2 }
 0x905   :  { %v6201_v31 = vadd.f32 %v6200_v29, %v6112_v13  ;;  %v6024_v1 = vpop.f32.mrf.mxu0 }
 0x906   :  { %13671 = vst [vmem:[#allocation67_spill] sm:$0xff] %v12392_v21  ;;  %v6025_v9 = vadd.f32 %v6024_v1, %v12353_v16 }
 0x907   :  { %v6289_v10 = vpop.f32.mrf.mxu3  ;;  %v6113_v2 = vpop.f32.mrf.mxu1 }
 0x908   :  { %v6290_v51 = vadd.f32 %v6289_v10, %v6201_v31  ;;  %v6114_v8 = vadd.f32 %v6113_v2, %v6025_v9  ;;  %v13672_v9 = vld [vmem:[#allocation27_spill] sm:$0xff] }
 0x909   :  { %v13673_v2 = vld [vmem:[#allocation39_spill] sm:$0xff] }
 0x90a   :  { %v7094_v40 = vmax.f32 %v6290_v51, 0.0 }
 0x90c   :  { %v6202_v50 = vpop.f32.mrf.mxu2 }
 0x90d   :  { %v6203_v43 = vadd.f32 %v6202_v50, %v6114_v8  ;;  %v6027_v34 = vpop.f32.mrf.mxu0 }
 0x90e   :  { %v6028_v13 = vadd.f32 %v6027_v34, %v12353_v16 }
 0x90f   :  { %v6291_v39 = vpop.f32.mrf.mxu3  ;;  %v6116_v57 = vpop.f32.mrf.mxu1 }
 0x910   :  { %v6292_v48 = vadd.f32 %v6291_v39, %v6203_v43  ;;  %v6117_v35 = vadd.f32 %v6116_v57, %v6028_v13  ;;  %6066 = vmatmul.bf16.gmra.mxu0 %v13631_v23 }
 0x911   :  { %6244 = vmatmul.bf16.gmra.mxu2 %v13672_v9 }
 0x912   :  { %v7098_v29 = vmax.f32 %v6292_v48, 0.0  ;;  %6155 = vmatmul.bf16.gmra.mxu1 %v13632_v12 }
 0x914   :  { %6333 = vmatmul.bf16.gmra.mxu3 %v13673_v2  ;;  %v12400_v60 = vpack.c.bf16 %v7098_v29, %v7094_v40  ;;  %v6205_v50 = vpop.f32.mrf.mxu2  ;;  %v13675_v40 = vld [vmem:[#allocation147_spill] sm:$0xff] }
 0x915   :  { %v6206_v11 = vadd.f32 %v6205_v50, %v6117_v35  ;;  %v6029_v7 = vpop.f32.mrf.mxu0  ;;  %v13676_v50 = vld [vmem:[#allocation157_spill] sm:$0xff] }
 0x916   :  { %13674 = vst [vmem:[#allocation68_spill] sm:$0xff] %v12400_v60  ;;  %v6030_v31 = vadd.f32 %v6029_v7, %v12353_v16  ;;  %v13677_v60 = vld [vmem:[#allocation28_spill] sm:$0xff] }
 0x917   :  { %v6294_v8 = vpop.f32.mrf.mxu3  ;;  %v6118_v10 = vpop.f32.mrf.mxu1  ;;  %v13678_v7 = vld [vmem:[#allocation40_spill] sm:$0xff] }
 0x918   :  { %v6295_v1 = vadd.f32 %v6294_v8, %v6206_v11  ;;  %v6119_v61 = vadd.f32 %v6118_v10, %v6030_v31  ;;  %v10336_v11 = vld [vmem:[#allocation8 + $0x2ec] sm:$0xf]  ;;  %v9647_v8 = vld [vmem:[#allocation8 + $0x2f8] sm:$0xf0] }
 0x919   :  { %v10272_v31 = vld [vmem:[#allocation8 + $0xec] sm:$0xf]  ;;  %v9650_v10 = vor.u32 %v10336_v11, %v9647_v8  ;;  %v9519_v8 = vld [vmem:[#allocation8 + $0x1f8] sm:$0xf0] }
 0x91a   :  { %v7102_v29 = vmax.f32 %v6295_v1, 0.0  ;;  %v10304_v11 = vld [vmem:[#allocation8 + $0x1ec] sm:$0xf] }
 0x91b   :  { %6883 = vmatpush.bf16.msra.mxu2 %v9650_v10  ;;  %v9522_v2 = vor.u32 %v10304_v11, %v9519_v8 }
 0x91c   :  { %v6207_v55 = vpop.f32.mrf.mxu2 }
 0x91d   :  { %v6208_v51 = vadd.f32 %v6207_v55, %v6119_v61  ;;  %v6032_v39 = vpop.f32.mrf.mxu0  ;;  %v9391_v61 = vld [vmem:[#allocation8 + $0xf8] sm:$0xf0]  ;;  %v10368_v55 = vld [vmem:[#allocation8 + $0x3ec] sm:$0xf]  ;;  %6794 = vmatpush.bf16.msra.mxu1 %v9522_v2 }
 0x91e   :  { %v6033_v34 = vadd.f32 %v6032_v39, %v12353_v16  ;;  %v9775_v39 = vld [vmem:[#allocation8 + $0x3f8] sm:$0xf0] }
 0x91f   :  { %v6296_v43 = vpop.f32.mrf.mxu3  ;;  %v6121_v13 = vpop.f32.mrf.mxu1 }
 0x920   :  { %v6297_v57 = vadd.f32 %v6296_v43, %v6208_v51  ;;  %v6122_v48 = vadd.f32 %v6121_v13, %v6033_v34  ;;  %6071 = vmatmul.bf16.gmra.mxu0 %v13675_v40  ;;  %v9394_v43 = vor.u32 %v10272_v31, %v9391_v61  ;;  %v9778_v34 = vor.u32 %v10368_v55, %v9775_v39 }
 0x921   :  { %6249 = vmatmul.bf16.gmra.mxu2 %v13677_v60 }
 0x922   :  { %v7106_v35 = vmax.f32 %v6297_v57, 0.0  ;;  %6160 = vmatmul.bf16.gmra.mxu1 %v13676_v50  ;;  %6705 = vmatpush.bf16.msra.mxu0 %v9394_v43 }
 0x923   :  { %6972 = vmatpush.bf16.msra.mxu3 %v9778_v34 }
 0x924   :  { %6338 = vmatmul.bf16.gmra.mxu3 %v13678_v7  ;;  %v12408_v21 = vpack.c.bf16 %v7106_v35, %v7102_v29  ;;  %v6210_v51 = vpop.f32.mrf.mxu2 }
 0x925   :  { %v6211_v1 = vadd.f32 %v6210_v51, %v6122_v48  ;;  %v6034_v57 = vpop.f32.mrf.mxu0 }
 0x926   :  { %13679 = vst [vmem:[#allocation133_spill] sm:$0xff] %v12408_v21  ;;  %v6035_v60 = vadd.f32 %v6034_v57, %v12353_v16 }
 0x927   :  { %v6299_v13 = vpop.f32.mrf.mxu3  ;;  %v6123_v50 = vpop.f32.mrf.mxu1 }
 0x928   :  { %v6300_v7 = vadd.f32 %v6299_v13, %v6211_v1  ;;  %v6124_v40 = vadd.f32 %v6123_v50, %v6035_v60 }
 0x92a   :  { %v7110_v39 = vmax.f32 %v6300_v7, 0.0 }
 0x92c   :  { %v6212_v9 = vpop.f32.mrf.mxu2 }
 0x92d   :  { %v6213_v29 = vadd.f32 %v6212_v9, %v6124_v40  ;;  %v6037_v31 = vpop.f32.mrf.mxu0 }
 0x92e   :  { %v6038_v48 = vadd.f32 %v6037_v31, %v12353_v16 }
 0x92f   :  { %v6301_v35 = vpop.f32.mrf.mxu3  ;;  %v6126_v61 = vpop.f32.mrf.mxu1 }
 0x930   :  { %v6302_v55 = vadd.f32 %v6301_v35, %v6213_v29  ;;  %v6127_v10 = vadd.f32 %v6126_v61, %v6038_v48  ;;  %6076 = vmatmul.bf16.gmra.mxu0 %v13639_v18 }
 0x931   :  { %6254 = vmatmul.bf16.gmra.mxu2 %v13641_v44 }
 0x932   :  { %v7114_v51 = vmax.f32 %v6302_v55, 0.0  ;;  %6165 = vmatmul.bf16.gmra.mxu1 %v13640_v47 }
 0x934   :  { %6343 = vmatmul.bf16.gmra.mxu3 %v12229_v59  ;;  %v12416_v60 = vpack.c.bf16 %v7114_v51, %v7110_v39  ;;  %v6215_v9 = vpop.f32.mrf.mxu2  ;;  %v13682_v39 = vld [vmem:[#allocation69_spill] sm:$0xff]  ;;  %v13683_v51 = vld [vmem:[#allocation31_spill] sm:$0xff] }
 0x935   :  { %v6216_v2 = vadd.f32 %v6215_v9, %v6127_v10  ;;  %v6039_v50 = vpop.f32.mrf.mxu0  ;;  %v13681_v10 = vld [vmem:[#allocation114_spill] sm:$0xff]  ;;  %v10332_v9 = vld [vmem:[#allocation8 + $0x2cc] sm:$0xf] }
 0x936   :  { %13680 = vst [vmem:[#allocation71_spill] sm:$0xff] %v12416_v60  ;;  %v6040_v43 = vadd.f32 %v6039_v50, %v12353_v16 }
 0x937   :  { %v6304_v40 = vpop.f32.mrf.mxu3  ;;  %v6128_v34 = vpop.f32.mrf.mxu1 }
 0x938   :  { %v6305_v1 = vadd.f32 %v6304_v40, %v6216_v2  ;;  %v6129_v13 = vadd.f32 %v6128_v34, %v6040_v43  ;;  %v9631_v2 = vld [vmem:[#allocation8 + $0x2d8] sm:$0xf0]  ;;  %v10268_v40 = vld [vmem:[#allocation8 + $0xcc] sm:$0xf] }
 0x939   :  { %v9634_v50 = vor.u32 %v10332_v9, %v9631_v2  ;;  %v9375_v43 = vld [vmem:[#allocation8 + $0xd8] sm:$0xf0]  ;;  %v10364_v34 = vld [vmem:[#allocation8 + $0x3cc] sm:$0xf] }
 0x93a   :  { %v7118_v61 = vmax.f32 %v6305_v1, 0.0  ;;  %v10300_v9 = vld [vmem:[#allocation8 + $0x1cc] sm:$0xf]  ;;  %v9503_v2 = vld [vmem:[#allocation8 + $0x1d8] sm:$0xf0] }
 0x93b   :  { %6884 = vmatpush.bf16.msra.mxu2 %v9634_v50 }
 0x93c   :  { %v6217_v57 = vpop.f32.mrf.mxu2 }
 0x93d   :  { %v6218_v7 = vadd.f32 %v6217_v57, %v6129_v13  ;;  %v6042_v8 = vpop.f32.mrf.mxu0  ;;  %v9759_v13 = vld [vmem:[#allocation8 + $0x3d8] sm:$0xf0] }
 0x93e   :  { %v6043_v29 = vadd.f32 %v6042_v8, %v12353_v16  ;;  %v9762_v8 = vor.u32 %v10364_v34, %v9759_v13 }
 0x93f   :  { %v6306_v11 = vpop.f32.mrf.mxu3  ;;  %v6131_v35 = vpop.f32.mrf.mxu1 }
 0x940   :  { %v6307_v31 = vadd.f32 %v6306_v11, %v6218_v7  ;;  %v6132_v48 = vadd.f32 %v6131_v35, %v6043_v29  ;;  %6357 = vmatmul.bf16.vlgmr.msrb.gmra.mxu0 %v13584_v32  ;;  %v9378_v11 = vor.u32 %v10268_v40, %v9375_v43  ;;  %6973 = vmatpush.bf16.msra.mxu3 %v9762_v8 }
 0x941   :  { %6535 = vmatmul.bf16.vlgmr.msrb.gmra.mxu2 %v13682_v39  ;;  %v9506_v39 = vor.u32 %v10300_v9, %v9503_v2 }
 0x942   :  { %v7122_v55 = vmax.f32 %v6307_v31, 0.0  ;;  %6446 = vmatmul.bf16.vlgmr.msrb.gmra.mxu1 %v13681_v10  ;;  %6706 = vmatpush.bf16.msra.mxu0 %v9378_v11 }
 0x943   :  { %6795 = vmatpush.bf16.msra.mxu1 %v9506_v39 }
 0x944   :  { %6624 = vmatmul.bf16.vlgmr.msrb.gmra.mxu3 %v13683_v51  ;;  %v12424_v57 = vpack.c.bf16 %v7122_v55, %v7118_v61  ;;  %v6220_v7 = vpop.f32.mrf.mxu2 }
 0x945   :  { %v6221_v1 = vadd.f32 %v6220_v7, %v6132_v48  ;;  %v6044_v35 = vpop.f32.mrf.mxu0 }
 0x946   :  { %13684 = vst [vmem:[#allocation72_spill] sm:$0xff] %v12424_v57  ;;  %v6045_v31 = vadd.f32 %v6044_v35, %v12353_v16 }
 0x947   :  { %v6309_v29 = vpop.f32.mrf.mxu3  ;;  %v6133_v60 = vpop.f32.mrf.mxu1 }
 0x948   :  { %v6310_v21 = vadd.f32 %v6309_v29, %v6221_v1  ;;  %v6134_v51 = vadd.f32 %v6133_v60, %v6045_v31 }
 0x94a   :  { %v7126_v13 = vmax.f32 %v6310_v21, 0.0 }
 0x94c   :  { %v6222_v10 = vpop.f32.mrf.mxu2 }
 0x94d   :  { %v6223_v61 = vadd.f32 %v6222_v10, %v6134_v51  ;;  %v6047_v40 = vpop.f32.mrf.mxu0 }
 0x94e   :  { %v6048_v48 = vadd.f32 %v6047_v40, %v12353_v16 }
 0x94f   :  { %v6311_v55 = vpop.f32.mrf.mxu3  ;;  %v6136_v43 = vpop.f32.mrf.mxu1 }
 0x950   :  { %v6312_v34 = vadd.f32 %v6311_v55, %v6223_v61  ;;  %v6137_v50 = vadd.f32 %v6136_v43, %v6048_v48  ;;  %6362 = vmatmul.bf16.gmra.mxu0 %v13587_v49 }
 0x951   :  { %6540 = vmatmul.bf16.gmra.mxu2 %v13589_v15 }
 0x952   :  { %v7130_v7 = vmax.f32 %v6312_v34, 0.0  ;;  %6451 = vmatmul.bf16.gmra.mxu1 %v13588_v14 }
 0x954   :  { %6629 = vmatmul.bf16.gmra.mxu3 %v12112_v53  ;;  %v12432_v60 = vpack.c.bf16 %v7130_v7, %v7126_v13  ;;  %v6225_v10 = vpop.f32.mrf.mxu2  ;;  %v9615_v13 = vld [vmem:[#allocation8 + $0x2b8] sm:$0xf0]  ;;  %v10264_v7 = vld [vmem:[#allocation8 + $0xac] sm:$0xf] }
 0x955   :  { %v6226_v39 = vadd.f32 %v6225_v10, %v6137_v50  ;;  %v6049_v11 = vpop.f32.mrf.mxu0  ;;  %v10328_v50 = vld [vmem:[#allocation8 + $0x2ac] sm:$0xf] }
 0x956   :  { %13685 = vst [vmem:[#allocation137_spill] sm:$0xff] %v12432_v60  ;;  %v6050_v8 = vadd.f32 %v6049_v11, %v12353_v16  ;;  %v9618_v10 = vor.u32 %v10328_v50, %v9615_v13  ;;  %v9743_v11 = vld [vmem:[#allocation8 + $0x3b8] sm:$0xf0]  ;;  %v10296_v50 = vld [vmem:[#allocation8 + $0x1ac] sm:$0xf] }
 0x957   :  { %v6314_v51 = vpop.f32.mrf.mxu3  ;;  %v6138_v1 = vpop.f32.mrf.mxu1  ;;  %v9487_v13 = vld [vmem:[#allocation8 + $0x1b8] sm:$0xf0] }
 0x958   :  { %v6315_v29 = vadd.f32 %v6314_v51, %v6226_v39  ;;  %v6139_v35 = vadd.f32 %v6138_v1, %v6050_v8  ;;  %v9359_v39 = vld [vmem:[#allocation8 + $0xb8] sm:$0xf0]  ;;  %v10360_v51 = vld [vmem:[#allocation8 + $0x3ac] sm:$0xf]  ;;  %6885 = vmatpush.bf16.msra.mxu2 %v9618_v10  ;;  %v9490_v60 = vor.u32 %v10296_v50, %v9487_v13 }
 0x95a   :  { %v7134_v43 = vmax.f32 %v6315_v29, 0.0  ;;  %6796 = vmatpush.bf16.msra.mxu1 %v9490_v60 }
 0x95c   :  { %v6227_v31 = vpop.f32.mrf.mxu2 }
 0x95d   :  { %v6228_v21 = vadd.f32 %v6227_v31, %v6139_v35  ;;  %v6052_v2 = vpop.f32.mrf.mxu0  ;;  %v9362_v35 = vor.u32 %v10264_v7, %v9359_v39  ;;  %v9746_v31 = vor.u32 %v10360_v51, %v9743_v11 }
 0x95e   :  { %v6053_v61 = vadd.f32 %v6052_v2, %v12353_v16 }
 0x95f   :  { %v6316_v9 = vpop.f32.mrf.mxu3  ;;  %v6141_v55 = vpop.f32.mrf.mxu1  ;;  %6707 = vmatpush.bf16.msra.mxu0 %v9362_v35  ;;  %6974 = vmatpush.bf16.msra.mxu3 %v9746_v31 }
 0x960   :  { %v6317_v40 = vadd.f32 %v6316_v9, %v6228_v21  ;;  %v6142_v48 = vadd.f32 %v6141_v55, %v6053_v61  ;;  %6367 = vmatmul.bf16.gmra.mxu0 %v13591_v3 }
 0x961   :  { %6545 = vmatmul.bf16.gmra.mxu2 %v13593_v46 }
 0x962   :  { %v7138_v34 = vmax.f32 %v6317_v40, 0.0  ;;  %6456 = vmatmul.bf16.gmra.mxu1 %v13592_v54 }
 0x964   :  { %6634 = vmatmul.bf16.gmra.mxu3 %v12120_v22  ;;  %v12440_v8 = vpack.c.bf16 %v7138_v34, %v7134_v43  ;;  %v6230_v1 = vpop.f32.mrf.mxu2 }
 0x965   :  { %v6231_v29 = vadd.f32 %v6230_v1, %v6142_v48  ;;  %v6054_v9 = vpop.f32.mrf.mxu0 }
 0x966   :  { %13686 = vst [vmem:[#allocation75_spill] sm:$0xff] %v12440_v8  ;;  %v6055_v2 = vadd.f32 %v6054_v9, %v12353_v16 }
 0x967   :  { %v6319_v21 = vpop.f32.mrf.mxu3  ;;  %v6143_v61 = vpop.f32.mrf.mxu1 }
 0x968   :  { %v6320_v55 = vadd.f32 %v6319_v21, %v6231_v29  ;;  %v6144_v40 = vadd.f32 %v6143_v61, %v6055_v2 }
 0x96a   :  { %v7142_v11 = vmax.f32 %v6320_v55, 0.0 }
 0x96c   :  { %v6232_v57 = vpop.f32.mrf.mxu2 }
 0x96d   :  { %v6233_v43 = vadd.f32 %v6232_v57, %v6144_v40  ;;  %v6057_v7 = vpop.f32.mrf.mxu0 }
 0x96e   :  { %v6058_v48 = vadd.f32 %v6057_v7, %v12353_v16 }
 0x96f   :  { %v6321_v34 = vpop.f32.mrf.mxu3  ;;  %v6146_v39 = vpop.f32.mrf.mxu1 }
 0x970   :  { %v6322_v51 = vadd.f32 %v6321_v34, %v6233_v43  ;;  %v6147_v10 = vadd.f32 %v6146_v39, %v6058_v48  ;;  %6372 = vmatmul.bf16.gmra.mxu0 %v13595_v62 }
 0x971   :  { %6550 = vmatmul.bf16.gmra.mxu2 %v13597_v28 }
 0x972   :  { %v7146_v1 = vmax.f32 %v6322_v51, 0.0  ;;  %6461 = vmatmul.bf16.gmra.mxu1 %v13596_v56 }
 0x974   :  { %6639 = vmatmul.bf16.gmra.mxu3 %v12128_v36  ;;  %v12448_v35 = vpack.c.bf16 %v7146_v1, %v7142_v11  ;;  %v6235_v57 = vpop.f32.mrf.mxu2  ;;  %v9599_v11 = vld [vmem:[#allocation8 + $0x298] sm:$0xf0]  ;;  %v10260_v1 = vld [vmem:[#allocation8 + $0x8c] sm:$0xf] }
 0x975   :  { %v6236_v60 = vadd.f32 %v6235_v57, %v6147_v10  ;;  %v6059_v29 = vpop.f32.mrf.mxu0  ;;  %v10324_v10 = vld [vmem:[#allocation8 + $0x28c] sm:$0xf] }
 0x976   :  { %13687 = vst [vmem:[#allocation76_spill] sm:$0xff] %v12448_v35  ;;  %v6060_v21 = vadd.f32 %v6059_v29, %v12353_v16  ;;  %v9602_v57 = vor.u32 %v10324_v10, %v9599_v11  ;;  %v9727_v29 = vld [vmem:[#allocation8 + $0x398] sm:$0xf0]  ;;  %v10292_v10 = vld [vmem:[#allocation8 + $0x18c] sm:$0xf] }
 0x977   :  { %v6324_v31 = vpop.f32.mrf.mxu3  ;;  %v6148_v9 = vpop.f32.mrf.mxu1  ;;  %v9471_v11 = vld [vmem:[#allocation8 + $0x198] sm:$0xf0] }
 0x978   :  { %v6325_v2 = vadd.f32 %v6324_v31, %v6236_v60  ;;  %v6149_v61 = vadd.f32 %v6148_v9, %v6060_v21  ;;  %v9343_v60 = vld [vmem:[#allocation8 + $0x98] sm:$0xf0]  ;;  %v10356_v31 = vld [vmem:[#allocation8 + $0x38c] sm:$0xf]  ;;  %6886 = vmatpush.bf16.msra.mxu2 %v9602_v57  ;;  %v9474_v35 = vor.u32 %v10292_v10, %v9471_v11 }
 0x97a   :  { %v7150_v39 = vmax.f32 %v6325_v2, 0.0  ;;  %6797 = vmatpush.bf16.msra.mxu1 %v9474_v35 }
 0x97c   :  { %v6237_v40 = vpop.f32.mrf.mxu2 }
 0x97d   :  { %v6238_v55 = vadd.f32 %v6237_v40, %v6149_v61  ;;  %v6062_v13 = vpop.f32.mrf.mxu0  ;;  %v9346_v61 = vor.u32 %v10260_v1, %v9343_v60  ;;  %v9730_v40 = vor.u32 %v10356_v31, %v9727_v29 }
 0x97e   :  { %v6063_v43 = vadd.f32 %v6062_v13, %v12353_v16 }
 0x97f   :  { %v6326_v50 = vpop.f32.mrf.mxu3  ;;  %v6151_v34 = vpop.f32.mrf.mxu1  ;;  %6708 = vmatpush.bf16.msra.mxu0 %v9346_v61  ;;  %6975 = vmatpush.bf16.msra.mxu3 %v9730_v40 }
 0x980   :  { %v6327_v7 = vadd.f32 %v6326_v50, %v6238_v55  ;;  %v6152_v48 = vadd.f32 %v6151_v34, %v6063_v43  ;;  %6377 = vmatmul.bf16.gmra.mxu0 %v13599_v24 }
 0x981   :  { %6555 = vmatmul.bf16.gmra.mxu2 %v13601_v38 }
 0x982   :  { %v7154_v51 = vmax.f32 %v6327_v7, 0.0  ;;  %6466 = vmatmul.bf16.gmra.mxu1 %v13600_v63 }
 0x984   :  { %6644 = vmatmul.bf16.gmra.mxu3 %v12136_v52  ;;  %v12456_v21 = vpack.c.bf16 %v7154_v51, %v7150_v39  ;;  %v6240_v9 = vpop.f32.mrf.mxu2 }
 0x985   :  { %v6241_v2 = vadd.f32 %v6240_v9, %v6152_v48  ;;  %v6064_v50 = vpop.f32.mrf.mxu0 }
 0x986   :  { %13688 = vst [vmem:[#allocation141_spill] sm:$0xff] %v12456_v21  ;;  %v6065_v13 = vadd.f32 %v6064_v50, %v12353_v16 }
 0x987   :  { %v6329_v55 = vpop.f32.mrf.mxu3  ;;  %v6153_v43 = vpop.f32.mrf.mxu1 }
 0x988   :  { %v6330_v34 = vadd.f32 %v6329_v55, %v6241_v2  ;;  %v6154_v7 = vadd.f32 %v6153_v43, %v6065_v13 }
 0x98a   :  { %v7158_v29 = vmax.f32 %v6330_v34, 0.0 }
 0x98c   :  { %v6242_v8 = vpop.f32.mrf.mxu2 }
 0x98d   :  { %v6243_v39 = vadd.f32 %v6242_v8, %v6154_v7  ;;  %v6067_v1 = vpop.f32.mrf.mxu0 }
 0x98e   :  { %v6068_v48 = vadd.f32 %v6067_v1, %v12353_v16 }
 0x98f   :  { %v6331_v51 = vpop.f32.mrf.mxu3  ;;  %v6156_v60 = vpop.f32.mrf.mxu1 }
 0x990   :  { %v6332_v31 = vadd.f32 %v6331_v51, %v6243_v39  ;;  %v6157_v57 = vadd.f32 %v6156_v60, %v6068_v48  ;;  %6382 = vmatmul.bf16.gmra.mxu0 %v13603_v5 }
 0x991   :  { %6560 = vmatmul.bf16.gmra.mxu2 %v13605_v30 }
 0x992   :  { %v7162_v9 = vmax.f32 %v6332_v31, 0.0  ;;  %6471 = vmatmul.bf16.gmra.mxu1 %v13604_v25 }
 0x994   :  { %6649 = vmatmul.bf16.gmra.mxu3 %v12144_v6  ;;  %v12464_v61 = vpack.c.bf16 %v7162_v9, %v7158_v29  ;;  %v6245_v8 = vpop.f32.mrf.mxu2  ;;  %v9583_v29 = vld [vmem:[#allocation8 + $0x278] sm:$0xf0]  ;;  %v10256_v9 = vld [vmem:[#allocation8 + $0x6c] sm:$0xf] }
 0x995   :  { %v6246_v35 = vadd.f32 %v6245_v8, %v6157_v57  ;;  %v6069_v2 = vpop.f32.mrf.mxu0  ;;  %v10320_v57 = vld [vmem:[#allocation8 + $0x26c] sm:$0xf] }
 0x996   :  { %13689 = vst [vmem:[#allocation79_spill] sm:$0xff] %v12464_v61  ;;  %v6070_v55 = vadd.f32 %v6069_v2, %v12353_v16  ;;  %v9586_v8 = vor.u32 %v10320_v57, %v9583_v29  ;;  %v9711_v2 = vld [vmem:[#allocation8 + $0x378] sm:$0xf0]  ;;  %v10288_v57 = vld [vmem:[#allocation8 + $0x16c] sm:$0xf] }
 0x997   :  { %v6334_v40 = vpop.f32.mrf.mxu3  ;;  %v6158_v50 = vpop.f32.mrf.mxu1  ;;  %v9455_v29 = vld [vmem:[#allocation8 + $0x178] sm:$0xf0] }
 0x998   :  { %v6335_v13 = vadd.f32 %v6334_v40, %v6246_v35  ;;  %v6159_v43 = vadd.f32 %v6158_v50, %v6070_v55  ;;  %v9327_v35 = vld [vmem:[#allocation8 + $0x78] sm:$0xf0]  ;;  %v10352_v40 = vld [vmem:[#allocation8 + $0x36c] sm:$0xf]  ;;  %6887 = vmatpush.bf16.msra.mxu2 %v9586_v8  ;;  %v9458_v61 = vor.u32 %v10288_v57, %v9455_v29 }
 0x99a   :  { %v7166_v60 = vmax.f32 %v6335_v13, 0.0  ;;  %6798 = vmatpush.bf16.msra.mxu1 %v9458_v61 }
 0x99c   :  { %v6247_v7 = vpop.f32.mrf.mxu2 }
 0x99d   :  { %v6248_v34 = vadd.f32 %v6247_v7, %v6159_v43  ;;  %v6072_v11 = vpop.f32.mrf.mxu0  ;;  %v9330_v43 = vor.u32 %v10256_v9, %v9327_v35  ;;  %v9714_v7 = vor.u32 %v10352_v40, %v9711_v2 }
 0x99e   :  { %v6073_v39 = vadd.f32 %v6072_v11, %v12353_v16 }
 0x99f   :  { %v6336_v10 = vpop.f32.mrf.mxu3  ;;  %v6161_v51 = vpop.f32.mrf.mxu1  ;;  %6709 = vmatpush.bf16.msra.mxu0 %v9330_v43  ;;  %6976 = vmatpush.bf16.msra.mxu3 %v9714_v7 }
 0x9a0   :  { %v6337_v1 = vadd.f32 %v6336_v10, %v6248_v34  ;;  %v6162_v48 = vadd.f32 %v6161_v51, %v6073_v39  ;;  %6387 = vmatmul.bf16.gmra.mxu0 %v13607_v0 }
 0x9a1   :  { %6565 = vmatmul.bf16.gmra.mxu2 %v11962_v20 }
 0x9a2   :  { %v7170_v31 = vmax.f32 %v6337_v1, 0.0  ;;  %6476 = vmatmul.bf16.gmra.mxu1 %v13608_v17 }
 0x9a4   :  { %6654 = vmatmul.bf16.gmra.mxu3 %v12152_v26  ;;  %v12472_v55 = vpack.c.bf16 %v7170_v31, %v7166_v60  ;;  %v6250_v50 = vpop.f32.mrf.mxu2 }
 0x9a5   :  { %v6251_v13 = vadd.f32 %v6250_v50, %v6162_v48  ;;  %v6074_v10 = vpop.f32.mrf.mxu0 }
 0x9a6   :  { %13690 = vst [vmem:[#allocation80_spill] sm:$0xff] %v12472_v55  ;;  %v6075_v11 = vadd.f32 %v6074_v10, %v12353_v16 }
 0x9a7   :  { %v6339_v34 = vpop.f32.mrf.mxu3  ;;  %v6163_v39 = vpop.f32.mrf.mxu1 }
 0x9a8   :  { %v6340_v51 = vadd.f32 %v6339_v34, %v6251_v13  ;;  %v6164_v1 = vadd.f32 %v6163_v39, %v6075_v11 }
 0x9aa   :  { %v7174_v2 = vmax.f32 %v6340_v51, 0.0 }
 0x9ac   :  { %v6252_v21 = vpop.f32.mrf.mxu2 }
 0x9ad   :  { %v6253_v60 = vadd.f32 %v6252_v21, %v6164_v1  ;;  %v6077_v9 = vpop.f32.mrf.mxu0  ;;  %v12483_v1 = vld [vmem:[#allocation10] sm:$0xf] }
 0x9ae   :  { %v6078_v48 = vadd.f32 %v6077_v9, %v12353_v16  ;;  %13692 = vst [vmem:[#allocation83_spill] sm:$0xff] %v12483_v1  ;;  %v12486_v51 = vperm.slane %v12483_v1, 2 }
 0x9af   :  { %v6341_v31 = vpop.f32.mrf.mxu3  ;;  %v6166_v35 = vpop.f32.mrf.mxu1 }
 0x9b0   :  { %v6342_v40 = vadd.f32 %v6341_v31, %v6253_v60  ;;  %v6167_v8 = vadd.f32 %v6166_v35, %v6078_v48  ;;  %6392 = vmatmul.bf16.gmra.mxu0 %v13610_v37 }
 0x9b1   :  { %6570 = vmatmul.bf16.gmra.mxu2 %v13612_v45 }
 0x9b2   :  { %v7178_v50 = vmax.f32 %v6342_v40, 0.0  ;;  %6481 = vmatmul.bf16.gmra.mxu1 %v13611_v33 }
 0x9b4   :  { %6659 = vmatmul.bf16.gmra.mxu3 %v12160_v41  ;;  %v12480_v43 = vpack.c.bf16 %v7178_v50, %v7174_v2  ;;  %v6255_v21 = vpop.f32.mrf.mxu2  ;;  %v13694_v50 = vld [vmem:[#allocation21_spill] sm:$0xff] }
 0x9b5   :  { %v6256_v61 = vadd.f32 %v6255_v21, %v6167_v8  ;;  %v6079_v13 = vpop.f32.mrf.mxu0  ;;  %v13693_v8 = vld [vmem:[#allocation144_spill] sm:$0xff] }
 0x9b6   :  { %13691 = vst [vmem:[#allocation22_spill] sm:$0xff] %v12480_v43  ;;  %v6080_v34 = vadd.f32 %v6079_v13, %v12353_v16  ;;  %v13695_v21 = vld [vmem:[#allocation88_spill] sm:$0xff]  ;;  %v9567_v13 = vld [vmem:[#allocation8 + $0x258] sm:$0xf0] }
 0x9b7   :  { %v6344_v7 = vpop.f32.mrf.mxu3  ;;  %v6168_v10 = vpop.f32.mrf.mxu1 }
 0x9b8   :  { %v6345_v11 = vadd.f32 %v6344_v7, %v6256_v61  ;;  %v6169_v39 = vadd.f32 %v6168_v10, %v6080_v34  ;;  %v13696_v61 = vld [vmem:[#allocation32_spill] sm:$0xff] }
 0x9b9   :  { %v10316_v7 = vld [vmem:[#allocation8 + $0x24c] sm:$0xf] }
 0x9ba   :  { %v7182_v16 = vmax.f32 %v6345_v11, 0.0  ;;  %v10252_v34 = vld [vmem:[#allocation8 + $0x4c] sm:$0xf]  ;;  %v9570_v10 = vor.u32 %v10316_v7, %v9567_v13  ;;  %v9439_v13 = vld [vmem:[#allocation8 + $0x158] sm:$0xf0] }
 0x9bb   :  { %v10284_v7 = vld [vmem:[#allocation8 + $0x14c] sm:$0xf] }
 0x9bc   :  { %v6257_v57 = vpop.f32.mrf.mxu2  ;;  %6888 = vmatpush.bf16.msra.mxu2 %v9570_v10 }
 0x9bd   :  { %v6258_v29 = vadd.f32 %v6257_v57, %v6169_v39  ;;  %v6358_v31 = vpop.f32.mrf.mxu0  ;;  %v9311_v39 = vld [vmem:[#allocation8 + $0x58] sm:$0xf0]  ;;  %v10348_v57 = vld [vmem:[#allocation8 + $0x34c] sm:$0xf] }
 0x9be   :  { %v6359_v9 = vadd.f32 %v6358_v31, %v12486_v51  ;;  %v9695_v31 = vld [vmem:[#allocation8 + $0x358] sm:$0xf0] }
 0x9bf   :  { %v6346_v60 = vpop.f32.mrf.mxu3  ;;  %v6447_v48 = vpop.f32.mrf.mxu1 }
 0x9c0   :  { %v6347_v35 = vadd.f32 %v6346_v60, %v6258_v29  ;;  %v6448_v40 = vadd.f32 %v6447_v48, %v6359_v9  ;;  %6397 = vmatmul.bf16.gmra.mxu0 %v13693_v8  ;;  %v9314_v60 = vor.u32 %v10252_v34, %v9311_v39  ;;  %v9698_v9 = vor.u32 %v10348_v57, %v9695_v31 }
 0x9c1   :  { %6575 = vmatmul.bf16.gmra.mxu2 %v13695_v21  ;;  %v9442_v8 = vor.u32 %v10284_v7, %v9439_v13 }
 0x9c2   :  { %v7186_v2 = vmax.f32 %v6347_v35, 0.0  ;;  %6486 = vmatmul.bf16.gmra.mxu1 %v13694_v50  ;;  %6710 = vmatpush.bf16.msra.mxu0 %v9314_v60 }
 0x9c3   :  { %6977 = vmatpush.bf16.msra.mxu3 %v9698_v9  ;;  %6799 = vmatpush.bf16.msra.mxu1 %v9442_v8 }
 0x9c4   :  { %6664 = vmatmul.bf16.gmra.mxu3 %v13696_v61  ;;  %v12493_v43 = vpack.c.bf16 %v7186_v2, %v7182_v16  ;;  %v6536_v29 = vpop.f32.mrf.mxu2 }
 0x9c5   :  { %v6537_v11 = vadd.f32 %v6536_v29, %v6448_v40  ;;  %v6360_v35 = vpop.f32.mrf.mxu0 }
 0x9c6   :  { %13697 = vst [vmem:[#allocation84_spill] sm:$0xff] %v12493_v43  ;;  %v6361_v55 = vadd.f32 %v6360_v35, %v12486_v51 }
 0x9c7   :  { %v6625_v48 = vpop.f32.mrf.mxu3  ;;  %v6449_v21 = vpop.f32.mrf.mxu1 }
 0x9c8   :  { %v6626_v61 = vadd.f32 %v6625_v48, %v6537_v11  ;;  %v6450_v50 = vadd.f32 %v6449_v21, %v6361_v55  ;;  %v13698_v55 = vld [vmem:[#allocation98_spill] sm:$0xff] }
 0x9ca   :  { %v7063_v31 = vmax.f32 %v6626_v61, 0.0 }
 0x9cc   :  { %v6538_v1 = vpop.f32.mrf.mxu2 }
 0x9cd   :  { %v6539_v16 = vadd.f32 %v6538_v1, %v6450_v50  ;;  %v6363_v34 = vpop.f32.mrf.mxu0 }
 0x9ce   :  { %v6364_v40 = vadd.f32 %v6363_v34, %v12486_v51 }
 0x9cf   :  { %v6627_v2 = vpop.f32.mrf.mxu3  ;;  %v6452_v39 = vpop.f32.mrf.mxu1 }
 0x9d0   :  { %v6628_v57 = vadd.f32 %v6627_v2, %v6539_v16  ;;  %v6453_v10 = vadd.f32 %v6452_v39, %v6364_v40  ;;  %6402 = vmatmul.bf16.gmra.mxu0 %v13617_v58 }
 0x9d1   :  { %6580 = vmatmul.bf16.gmra.mxu2 %v12004_v19 }
 0x9d2   :  { %v7067_v29 = vmax.f32 %v6628_v57, 0.0  ;;  %6491 = vmatmul.bf16.gmra.mxu1 %v13618_v42  ;;  %v13700_v57 = vld [vmem:[#allocation95_spill] sm:$0xff] }
 0x9d4   :  { %6669 = vmatmul.bf16.gmra.mxu3 %v13698_v55  ;;  %v12501_v21 = vpack.c.bf16 %v7067_v29, %v7063_v31  ;;  %v6541_v1 = vpop.f32.mrf.mxu2  ;;  %v13701_v29 = vld [vmem:[#allocation29_spill] sm:$0xff] }
 0x9d5   :  { %v6542_v8 = vadd.f32 %v6541_v1, %v6453_v10  ;;  %v6365_v60 = vpop.f32.mrf.mxu0  ;;  %v13702_v1 = vld [vmem:[#allocation23_spill] sm:$0xff] }
 0x9d6   :  { %13699 = vst [vmem:[#allocation26_spill] sm:$0xff] %v12501_v21  ;;  %v6366_v9 = vadd.f32 %v6365_v60, %v12486_v51  ;;  %v13703_v60 = vld [vmem:[#allocation35_spill] sm:$0xff] }
 0x9d7   :  { %v6630_v50 = vpop.f32.mrf.mxu3  ;;  %v6454_v11 = vpop.f32.mrf.mxu1 }
 0x9d8   :  { %v6631_v48 = vadd.f32 %v6630_v50, %v6542_v8  ;;  %v6455_v35 = vadd.f32 %v6454_v11, %v6366_v9  ;;  %v10312_v8 = vld [vmem:[#allocation8 + $0x22c] sm:$0xf]  ;;  %v9551_v50 = vld [vmem:[#allocation8 + $0x238] sm:$0xf0] }
 0x9d9   :  { %v10248_v9 = vld [vmem:[#allocation8 + $0x2c] sm:$0xf]  ;;  %v9554_v11 = vor.u32 %v10312_v8, %v9551_v50  ;;  %v9423_v50 = vld [vmem:[#allocation8 + $0x138] sm:$0xf0] }
 0x9da   :  { %v7071_v31 = vmax.f32 %v6631_v48, 0.0  ;;  %v10280_v8 = vld [vmem:[#allocation8 + $0x12c] sm:$0xf] }
 0x9db   :  { %6889 = vmatpush.bf16.msra.mxu2 %v9554_v11 }
 0x9dc   :  { %v6543_v7 = vpop.f32.mrf.mxu2 }
 0x9dd   :  { %v6544_v61 = vadd.f32 %v6543_v7, %v6455_v35  ;;  %v6368_v16 = vpop.f32.mrf.mxu0  ;;  %v9295_v35 = vld [vmem:[#allocation8 + $0x38] sm:$0xf0]  ;;  %v10344_v7 = vld [vmem:[#allocation8 + $0x32c] sm:$0xf] }
 0x9de   :  { %v6369_v2 = vadd.f32 %v6368_v16, %v12486_v51  ;;  %v9679_v16 = vld [vmem:[#allocation8 + $0x338] sm:$0xf0] }
 0x9df   :  { %v6632_v13 = vpop.f32.mrf.mxu3  ;;  %v6457_v34 = vpop.f32.mrf.mxu1 }
 0x9e0   :  { %v6633_v40 = vadd.f32 %v6632_v13, %v6544_v61  ;;  %v6458_v39 = vadd.f32 %v6457_v34, %v6369_v2  ;;  %6407 = vmatmul.bf16.gmra.mxu0 %v13700_v57  ;;  %v9298_v13 = vor.u32 %v10248_v9, %v9295_v35  ;;  %v9682_v2 = vor.u32 %v10344_v7, %v9679_v16 }
 0x9e1   :  { %6585 = vmatmul.bf16.gmra.mxu2 %v13702_v1  ;;  %v9426_v57 = vor.u32 %v10280_v8, %v9423_v50 }
 0x9e2   :  { %v7075_v10 = vmax.f32 %v6633_v40, 0.0  ;;  %6496 = vmatmul.bf16.gmra.mxu1 %v13701_v29  ;;  %6711 = vmatpush.bf16.msra.mxu0 %v9298_v13 }
 0x9e3   :  { %6978 = vmatpush.bf16.msra.mxu3 %v9682_v2  ;;  %6800 = vmatpush.bf16.msra.mxu1 %v9426_v57 }
 0x9e4   :  { %6674 = vmatmul.bf16.gmra.mxu3 %v13703_v60  ;;  %v12509_v43 = vpack.c.bf16 %v7075_v10, %v7071_v31  ;;  %v6546_v61 = vpop.f32.mrf.mxu2 }
 0x9e5   :  { %v6547_v48 = vadd.f32 %v6546_v61, %v6458_v39  ;;  %v6370_v40 = vpop.f32.mrf.mxu0 }
 0x9e6   :  { %13704 = vst [vmem:[#allocation86_spill] sm:$0xff] %v12509_v43  ;;  %v6371_v21 = vadd.f32 %v6370_v40, %v12486_v51 }
 0x9e7   :  { %v6635_v34 = vpop.f32.mrf.mxu3  ;;  %v6459_v1 = vpop.f32.mrf.mxu1 }
 0x9e8   :  { %v6636_v60 = vadd.f32 %v6635_v34, %v6547_v48  ;;  %v6460_v29 = vadd.f32 %v6459_v1, %v6371_v21  ;;  %v13705_v21 = vld [vmem:[#allocation24_spill] sm:$0xff] }
 0x9e9   :  { %v13706_v1 = vld [vmem:[#allocation36_spill] sm:$0xff] }
 0x9ea   :  { %v7079_v16 = vmax.f32 %v6636_v60, 0.0 }
 0x9ec   :  { %v6548_v55 = vpop.f32.mrf.mxu2 }
 0x9ed   :  { %v6549_v31 = vadd.f32 %v6548_v55, %v6460_v29  ;;  %v6373_v9 = vpop.f32.mrf.mxu0 }
 0x9ee   :  { %v6374_v39 = vadd.f32 %v6373_v9, %v12486_v51 }
 0x9ef   :  { %v6637_v10 = vpop.f32.mrf.mxu3  ;;  %v6462_v35 = vpop.f32.mrf.mxu1 }
 0x9f0   :  { %v6638_v7 = vadd.f32 %v6637_v10, %v6549_v31  ;;  %v6463_v11 = vadd.f32 %v6462_v35, %v6374_v39  ;;  %6412 = vmatmul.bf16.gmra.mxu0 %v13623_v4 }
 0x9f1   :  { %6590 = vmatmul.bf16.gmra.mxu2 %v13705_v21 }
 0x9f2   :  { %v7083_v61 = vmax.f32 %v6638_v7, 0.0  ;;  %6501 = vmatmul.bf16.gmra.mxu1 %v13624_v27 }
 0x9f4   :  { %6679 = vmatmul.bf16.gmra.mxu3 %v13706_v1  ;;  %v12517_v13 = vpack.c.bf16 %v7083_v61, %v7079_v16  ;;  %v6551_v55 = vpop.f32.mrf.mxu2  ;;  %v13708_v16 = vld [vmem:[#allocation103_spill] sm:$0xff] }
 0x9f5   :  { %v6552_v57 = vadd.f32 %v6551_v55, %v6463_v11  ;;  %v6375_v2 = vpop.f32.mrf.mxu0  ;;  %v13709_v55 = vld [vmem:[#allocation37_spill] sm:$0xff] }
 0x9f6   :  { %13707 = vst [vmem:[#allocation87_spill] sm:$0xff] %v12517_v13  ;;  %v6376_v48 = vadd.f32 %v6375_v2, %v12486_v51  ;;  %v13710_v13 = vld [vmem:[#allocation91_spill] sm:$0xff]  ;;  %v13711_v2 = vld [vmem:[#allocation102_spill] sm:$0xff] }
 0x9f7   :  { %v6640_v29 = vpop.f32.mrf.mxu3  ;;  %v6464_v34 = vpop.f32.mrf.mxu1 }
 0x9f8   :  { %v6641_v40 = vadd.f32 %v6640_v29, %v6552_v57  ;;  %v6465_v8 = vadd.f32 %v6464_v34, %v6376_v48  ;;  %v10308_v57 = vld [vmem:[#allocation8 + $0x20c] sm:$0xf]  ;;  %v9535_v29 = vld [vmem:[#allocation8 + $0x218] sm:$0xf0] }
 0x9f9   :  { %v10244_v48 = vld [vmem:[#allocation8 + $0xc] sm:$0xf]  ;;  %v9538_v34 = vor.u32 %v10308_v57, %v9535_v29  ;;  %v9407_v29 = vld [vmem:[#allocation8 + $0x118] sm:$0xf0] }
 0x9fa   :  { %v7087_v61 = vmax.f32 %v6641_v40, 0.0  ;;  %v10276_v57 = vld [vmem:[#allocation8 + $0x10c] sm:$0xf] }
 0x9fb   :  { %6890 = vmatpush.bf16.msra.mxu2 %v9538_v34  ;;  %v9410_v1 = vor.u32 %v10276_v57, %v9407_v29 }
 0x9fc   :  { %v6553_v50 = vpop.f32.mrf.mxu2 }
 0x9fd   :  { %v6554_v60 = vadd.f32 %v6553_v50, %v6465_v8  ;;  %v6378_v10 = vpop.f32.mrf.mxu0  ;;  %v9279_v8 = vld [vmem:[#allocation8 + $0x18] sm:$0xf0]  ;;  %v10340_v50 = vld [vmem:[#allocation8 + $0x30c] sm:$0xf]  ;;  %6801 = vmatpush.bf16.msra.mxu1 %v9410_v1 }
 0x9fe   :  { %v6379_v9 = vadd.f32 %v6378_v10, %v12486_v51  ;;  %v9663_v10 = vld [vmem:[#allocation8 + $0x318] sm:$0xf0] }
 0x9ff   :  { %v6642_v31 = vpop.f32.mrf.mxu3  ;;  %v6467_v39 = vpop.f32.mrf.mxu1 }
 0xa00   :  { %v6643_v35 = vadd.f32 %v6642_v31, %v6554_v60  ;;  %v6468_v7 = vadd.f32 %v6467_v39, %v6379_v9  ;;  %6417 = vmatmul.bf16.gmra.mxu0 %v13708_v16  ;;  %v9282_v31 = vor.u32 %v10244_v48, %v9279_v8  ;;  %v9666_v9 = vor.u32 %v10340_v50, %v9663_v10 }
 0xa01   :  { %6595 = vmatmul.bf16.gmra.mxu2 %v13710_v13 }
 0xa02   :  { %v7091_v11 = vmax.f32 %v6643_v35, 0.0  ;;  %6506 = vmatmul.bf16.gmra.mxu1 %v13709_v55  ;;  %6712 = vmatpush.bf16.msra.mxu0 %v9282_v31 }
 0xa03   :  { %6979 = vmatpush.bf16.msra.mxu3 %v9666_v9 }
 0xa04   :  { %6684 = vmatmul.bf16.gmra.mxu3 %v13711_v2  ;;  %v12525_v43 = vpack.c.bf16 %v7091_v11, %v7087_v61  ;;  %v6556_v60 = vpop.f32.mrf.mxu2 }
 0xa05   :  { %v6557_v40 = vadd.f32 %v6556_v60, %v6468_v7  ;;  %v6380_v35 = vpop.f32.mrf.mxu0 }
 0xa06   :  { %13712 = vst [vmem:[#allocation30_spill] sm:$0xff] %v12525_v43  ;;  %v6381_v13 = vadd.f32 %v6380_v35, %v12486_v51 }
 0xa07   :  { %v6645_v39 = vpop.f32.mrf.mxu3  ;;  %v6469_v55 = vpop.f32.mrf.mxu1 }
 0xa08   :  { %v6646_v2 = vadd.f32 %v6645_v39, %v6557_v40  ;;  %v6470_v16 = vadd.f32 %v6469_v55, %v6381_v13  ;;  %v13713_v13 = vld [vmem:[#allocation27_spill] sm:$0xff] }
 0xa09   :  { %v13714_v55 = vld [vmem:[#allocation39_spill] sm:$0xff] }
 0xa0a   :  { %v7095_v10 = vmax.f32 %v6646_v2, 0.0 }
 0xa0c   :  { %v6558_v21 = vpop.f32.mrf.mxu2 }
 0xa0d   :  { %v6559_v61 = vadd.f32 %v6558_v21, %v6470_v16  ;;  %v6383_v48 = vpop.f32.mrf.mxu0 }
 0xa0e   :  { %v6384_v7 = vadd.f32 %v6383_v48, %v12486_v51 }
 0xa0f   :  { %v6647_v11 = vpop.f32.mrf.mxu3  ;;  %v6472_v8 = vpop.f32.mrf.mxu1 }
 0xa10   :  { %v6648_v50 = vadd.f32 %v6647_v11, %v6559_v61  ;;  %v6473_v34 = vadd.f32 %v6472_v8, %v6384_v7  ;;  %6422 = vmatmul.bf16.gmra.mxu0 %v13631_v23 }
 0xa11   :  { %6600 = vmatmul.bf16.gmra.mxu2 %v13713_v13 }
 0xa12   :  { %v7099_v60 = vmax.f32 %v6648_v50, 0.0  ;;  %6511 = vmatmul.bf16.gmra.mxu1 %v13632_v12 }
 0xa14   :  { %6689 = vmatmul.bf16.gmra.mxu3 %v13714_v55  ;;  %v12533_v31 = vpack.c.bf16 %v7099_v60, %v7095_v10  ;;  %v6561_v21 = vpop.f32.mrf.mxu2  ;;  %v13716_v10 = vld [vmem:[#allocation147_spill] sm:$0xff] }
 0xa15   :  { %v6562_v1 = vadd.f32 %v6561_v21, %v6473_v34  ;;  %v6385_v9 = vpop.f32.mrf.mxu0  ;;  %v13717_v21 = vld [vmem:[#allocation157_spill] sm:$0xff] }
 0xa16   :  { %13715 = vst [vmem:[#allocation89_spill] sm:$0xff] %v12533_v31  ;;  %v6386_v40 = vadd.f32 %v6385_v9, %v12486_v51  ;;  %v13718_v31 = vld [vmem:[#allocation28_spill] sm:$0xff] }
 0xa17   :  { %v6650_v16 = vpop.f32.mrf.mxu3  ;;  %v6474_v39 = vpop.f32.mrf.mxu1  ;;  %v13719_v9 = vld [vmem:[#allocation40_spill] sm:$0xff] }
 0xa18   :  { %v6651_v35 = vadd.f32 %v6650_v16, %v6562_v1  ;;  %v6475_v57 = vadd.f32 %v6474_v39, %v6386_v40  ;;  %v10394_v1 = vld [vmem:[#allocation11 + $0xb8] sm:$0xff] }
 0xa19   :  { %v10378_v16 = vld [vmem:[#allocation11 + $0x38] sm:$0xff]  ;;  %7691 = vmatpush.bf16.msrb.mxu2 %v10394_v1 }
 0xa1a   :  { %v7103_v60 = vmax.f32 %v6651_v35, 0.0  ;;  %v10402_v40 = vld [vmem:[#allocation11 + $0xf8] sm:$0xff]  ;;  %7513 = vmatpush.bf16.msrb.mxu0 %v10378_v16 }
 0xa1b   :  { %7780 = vmatpush.bf16.msrb.mxu3 %v10402_v40 }
 0xa1c   :  { %v6563_v29 = vpop.f32.mrf.mxu2 }
 0xa1d   :  { %v6564_v2 = vadd.f32 %v6563_v29, %v6475_v57  ;;  %v6388_v11 = vpop.f32.mrf.mxu0 }
 0xa1e   :  { %v6389_v48 = vadd.f32 %v6388_v11, %v12486_v51 }
 0xa1f   :  { %v6652_v61 = vpop.f32.mrf.mxu3  ;;  %v6477_v7 = vpop.f32.mrf.mxu1 }
 0xa20   :  { %v6653_v8 = vadd.f32 %v6652_v61, %v6564_v2  ;;  %v6478_v50 = vadd.f32 %v6477_v7, %v6389_v48  ;;  %6427 = vmatmul.bf16.gmra.mxu0 %v13716_v10 }
 0xa21   :  { %6605 = vmatmul.bf16.gmra.mxu2 %v13718_v31 }
 0xa22   :  { %v7107_v34 = vmax.f32 %v6653_v8, 0.0  ;;  %6516 = vmatmul.bf16.gmra.mxu1 %v13717_v21  ;;  %v10386_v8 = vld [vmem:[#allocation11 + $0x78] sm:$0xff] }
 0xa23   :  { %7602 = vmatpush.bf16.msrb.mxu1 %v10386_v8 }
 0xa24   :  { %6694 = vmatmul.bf16.gmra.mxu3 %v13719_v9  ;;  %v12541_v39 = vpack.c.bf16 %v7107_v34, %v7103_v60  ;;  %v6566_v57 = vpop.f32.mrf.mxu2 }
 0xa25   :  { %v6567_v29 = vadd.f32 %v6566_v57, %v6478_v50  ;;  %v6390_v61 = vpop.f32.mrf.mxu0 }
 0xa26   :  { %13720 = vst [vmem:[#allocation90_spill] sm:$0xff] %v12541_v39  ;;  %v6391_v35 = vadd.f32 %v6390_v61, %v12486_v51 }
 0xa27   :  { %v6655_v2 = vpop.f32.mrf.mxu3  ;;  %v6479_v11 = vpop.f32.mrf.mxu1 }
 0xa28   :  { %v6656_v48 = vadd.f32 %v6655_v2, %v6567_v29  ;;  %v6480_v7 = vadd.f32 %v6479_v11, %v6391_v35 }
 0xa2a   :  { %v7111_v50 = vmax.f32 %v6656_v48, 0.0 }
 0xa2c   :  { %v6568_v43 = vpop.f32.mrf.mxu2 }
 0xa2d   :  { %v6569_v9 = vadd.f32 %v6568_v43, %v6480_v7  ;;  %v6393_v21 = vpop.f32.mrf.mxu0 }
 0xa2e   :  { %v6394_v60 = vadd.f32 %v6393_v21, %v12486_v51 }
 0xa2f   :  { %v6657_v31 = vpop.f32.mrf.mxu3  ;;  %v6482_v34 = vpop.f32.mrf.mxu1 }
 0xa30   :  { %v6658_v1 = vadd.f32 %v6657_v31, %v6569_v9  ;;  %v6483_v16 = vadd.f32 %v6482_v34, %v6394_v60  ;;  %6432 = vmatmul.bf16.gmra.mxu0 %v13639_v18 }
 0xa31   :  { %6610 = vmatmul.bf16.gmra.mxu2 %v13641_v44 }
 0xa32   :  { %v7115_v40 = vmax.f32 %v6658_v1, 0.0  ;;  %6521 = vmatmul.bf16.gmra.mxu1 %v13640_v47 }
 0xa34   :  { %6699 = vmatmul.bf16.gmra.mxu3 %v12229_v59  ;;  %v12549_v57 = vpack.c.bf16 %v7115_v40, %v7111_v50  ;;  %v6571_v43 = vpop.f32.mrf.mxu2  ;;  %v13721_v40 = vld [vmem:[#allocation114_spill] sm:$0xff] }
 0xa35   :  { %v6572_v29 = vadd.f32 %v6571_v43, %v6483_v16  ;;  %v6395_v61 = vpop.f32.mrf.mxu0  ;;  %v13722_v43 = vld [vmem:[#allocation69_spill] sm:$0xff] }
 0xa36   :  { %v6396_v21 = vadd.f32 %v6395_v61, %v12486_v51  ;;  %v13723_v61 = vld [vmem:[#allocation31_spill] sm:$0xff] }
 0xa37   :  { %v6660_v2 = vpop.f32.mrf.mxu3  ;;  %v6484_v31 = vpop.f32.mrf.mxu1 }
 0xa38   :  { %v6661_v9 = vadd.f32 %v6660_v2, %v6572_v29  ;;  %v6485_v35 = vadd.f32 %v6484_v31, %v6396_v21  ;;  %v10393_v29 = vld [vmem:[#allocation11 + $0xb0] sm:$0xff] }
 0xa39   :  { %v10377_v2 = vld [vmem:[#allocation11 + $0x30] sm:$0xff]  ;;  %7692 = vmatpush.bf16.msrb.mxu2 %v10393_v29 }
 0xa3a   :  { %v7119_v50 = vmax.f32 %v6661_v9, 0.0  ;;  %v10401_v21 = vld [vmem:[#allocation11 + $0xf0] sm:$0xff]  ;;  %7514 = vmatpush.bf16.msrb.mxu0 %v10377_v2 }
 0xa3b   :  { %7781 = vmatpush.bf16.msrb.mxu3 %v10401_v21 }
 0xa3c   :  { %v6573_v11 = vpop.f32.mrf.mxu2 }
 0xa3d   :  { %v6574_v48 = vadd.f32 %v6573_v11, %v6485_v35  ;;  %v6398_v8 = vpop.f32.mrf.mxu0 }
 0xa3e   :  { %v6399_v60 = vadd.f32 %v6398_v8, %v12486_v51 }
 0xa3f   :  { %v6662_v7 = vpop.f32.mrf.mxu3  ;;  %v6487_v34 = vpop.f32.mrf.mxu1 }
 0xa40   :  { %v6663_v1 = vadd.f32 %v6662_v7, %v6574_v48  ;;  %v6488_v39 = vadd.f32 %v6487_v34, %v6399_v60  ;;  %6713 = vmatmul.bf16.vlgmr.msra.gmra.mxu0 %v13584_v32  ;;  %v10385_v34 = vld [vmem:[#allocation11 + $0x70] sm:$0xff] }
 0xa41   :  { %6891 = vmatmul.bf16.vlgmr.msra.gmra.mxu2 %v13722_v43  ;;  %7603 = vmatpush.bf16.msrb.mxu1 %v10385_v34 }
 0xa42   :  { %v7123_v16 = vmax.f32 %v6663_v1, 0.0  ;;  %6802 = vmatmul.bf16.vlgmr.msra.gmra.mxu1 %v13721_v40 }
 0xa44   :  { %6980 = vmatmul.bf16.vlgmr.msra.gmra.mxu3 %v13723_v61  ;;  %v12557_v31 = vpack.c.bf16 %v7123_v16, %v7119_v50  ;;  %v6576_v35 = vpop.f32.mrf.mxu2 }
 0xa45   :  { %v6577_v11 = vadd.f32 %v6576_v35, %v6488_v39  ;;  %v6400_v7 = vpop.f32.mrf.mxu0 }
 0xa46   :  { %v6401_v32 = vadd.f32 %v6400_v7, %v12486_v51 }
 0xa47   :  { %v6665_v48 = vpop.f32.mrf.mxu3  ;;  %v6489_v9 = vpop.f32.mrf.mxu1 }
 0xa48   :  { %v6666_v8 = vadd.f32 %v6665_v48, %v6577_v11  ;;  %v6490_v60 = vadd.f32 %v6489_v9, %v6401_v32 }
 0xa4a   :  { %v7127_v39 = vmax.f32 %v6666_v8, 0.0 }
 0xa4c   :  { %v6578_v1 = vpop.f32.mrf.mxu2 }
 0xa4d   :  { %v6579_v40 = vadd.f32 %v6578_v1, %v6490_v60  ;;  %v6403_v61 = vpop.f32.mrf.mxu0 }
 0xa4e   :  { %v6404_v50 = vadd.f32 %v6403_v61, %v12486_v51 }
 0xa4f   :  { %v6667_v43 = vpop.f32.mrf.mxu3  ;;  %v6492_v16 = vpop.f32.mrf.mxu1 }
 0xa50   :  { %v6668_v29 = vadd.f32 %v6667_v43, %v6579_v40  ;;  %v6493_v2 = vadd.f32 %v6492_v16, %v6404_v50  ;;  %6718 = vmatmul.bf16.gmra.mxu0 %v13587_v49 }
 0xa51   :  { %6896 = vmatmul.bf16.gmra.mxu2 %v13589_v15 }
 0xa52   :  { %v7131_v21 = vmax.f32 %v6668_v29, 0.0  ;;  %6807 = vmatmul.bf16.gmra.mxu1 %v13588_v14  ;;  %v10392_v29 = vld [vmem:[#allocation11 + $0xa8] sm:$0xff] }
 0xa53   :  { %7693 = vmatpush.bf16.msrb.mxu2 %v10392_v29 }
 0xa54   :  { %6985 = vmatmul.bf16.gmra.mxu3 %v12112_v53  ;;  %v12565_v35 = vpack.c.bf16 %v7131_v21, %v7127_v39  ;;  %v6581_v11 = vpop.f32.mrf.mxu2  ;;  %v10400_v39 = vld [vmem:[#allocation11 + $0xe8] sm:$0xff] }
 0xa55   :  { %v6582_v48 = vadd.f32 %v6581_v11, %v6493_v2  ;;  %v6405_v32 = vpop.f32.mrf.mxu0  ;;  %v10376_v2 = vld [vmem:[#allocation11 + $0x28] sm:$0xff]  ;;  %7782 = vmatpush.bf16.msrb.mxu3 %v10400_v39 }
 0xa56   :  { %v6406_v9 = vadd.f32 %v6405_v32, %v12486_v51  ;;  %7515 = vmatpush.bf16.msrb.mxu0 %v10376_v2 }
 0xa57   :  { %v6670_v7 = vpop.f32.mrf.mxu3  ;;  %v6494_v60 = vpop.f32.mrf.mxu1 }
 0xa58   :  { %v6671_v34 = vadd.f32 %v6670_v7, %v6582_v48  ;;  %v6495_v1 = vadd.f32 %v6494_v60, %v6406_v9 }
 0xa5a   :  { %v7135_v50 = vmax.f32 %v6671_v34, 0.0 }
 0xa5c   :  { %v6583_v49 = vpop.f32.mrf.mxu2 }
 0xa5d   :  { %v6584_v8 = vadd.f32 %v6583_v49, %v6495_v1  ;;  %v6408_v43 = vpop.f32.mrf.mxu0 }
 0xa5e   :  { %v6409_v14 = vadd.f32 %v6408_v43, %v12486_v51 }
 0xa5f   :  { %v6672_v40 = vpop.f32.mrf.mxu3  ;;  %v6497_v15 = vpop.f32.mrf.mxu1 }
 0xa60   :  { %v6673_v61 = vadd.f32 %v6672_v40, %v6584_v8  ;;  %v6498_v53 = vadd.f32 %v6497_v15, %v6409_v14  ;;  %6723 = vmatmul.bf16.gmra.mxu0 %v13591_v3 }
 0xa61   :  { %6901 = vmatmul.bf16.gmra.mxu2 %v13593_v46  ;;  %v10384_v46 = vld [vmem:[#allocation11 + $0x68] sm:$0xff] }
 0xa62   :  { %v7139_v16 = vmax.f32 %v6673_v61, 0.0  ;;  %6812 = vmatmul.bf16.gmra.mxu1 %v13592_v54 }
 0xa63   :  { %7604 = vmatpush.bf16.msrb.mxu1 %v10384_v46 }
 0xa64   :  { %6990 = vmatmul.bf16.gmra.mxu3 %v12120_v22  ;;  %v12573_v21 = vpack.c.bf16 %v7139_v16, %v7135_v50  ;;  %v6586_v11 = vpop.f32.mrf.mxu2 }
 0xa65   :  { %v6587_v48 = vadd.f32 %v6586_v11, %v6498_v53  ;;  %v6410_v32 = vpop.f32.mrf.mxu0 }
 0xa66   :  { %v6411_v3 = vadd.f32 %v6410_v32, %v12486_v51 }
 0xa67   :  { %v6675_v7 = vpop.f32.mrf.mxu3  ;;  %v6499_v9 = vpop.f32.mrf.mxu1 }
 0xa68   :  { %v6676_v54 = vadd.f32 %v6675_v7, %v6587_v48  ;;  %v6500_v60 = vadd.f32 %v6499_v9, %v6411_v3 }
 0xa6a   :  { %v7143_v15 = vmax.f32 %v6676_v54, 0.0 }
 0xa6c   :  { %v6588_v22 = vpop.f32.mrf.mxu2 }
 0xa6d   :  { %v6589_v34 = vadd.f32 %v6588_v22, %v6500_v60  ;;  %v6413_v49 = vpop.f32.mrf.mxu0  ;;  %v10391_v22 = vld [vmem:[#allocation11 + $0xa0] sm:$0xff] }
 0xa6e   :  { %v6414_v8 = vadd.f32 %v6413_v49, %v12486_v51  ;;  %7694 = vmatpush.bf16.msrb.mxu2 %v10391_v22 }
 0xa6f   :  { %v6677_v1 = vpop.f32.mrf.mxu3  ;;  %v6502_v40 = vpop.f32.mrf.mxu1 }
 0xa70   :  { %v6678_v43 = vadd.f32 %v6677_v1, %v6589_v34  ;;  %v6503_v14 = vadd.f32 %v6502_v40, %v6414_v8  ;;  %6728 = vmatmul.bf16.gmra.mxu0 %v13595_v62  ;;  %v10375_v34 = vld [vmem:[#allocation11 + $0x20] sm:$0xff] }
 0xa71   :  { %6906 = vmatmul.bf16.gmra.mxu2 %v13597_v28  ;;  %v10399_v1 = vld [vmem:[#allocation11 + $0xe0] sm:$0xff]  ;;  %7516 = vmatpush.bf16.msrb.mxu0 %v10375_v34 }
 0xa72   :  { %v7147_v61 = vmax.f32 %v6678_v43, 0.0  ;;  %6817 = vmatmul.bf16.gmra.mxu1 %v13596_v56  ;;  %7783 = vmatpush.bf16.msrb.mxu3 %v10399_v1 }
 0xa74   :  { %6995 = vmatmul.bf16.gmra.mxu3 %v12128_v36  ;;  %v12581_v53 = vpack.c.bf16 %v7147_v61, %v7143_v15  ;;  %v6591_v50 = vpop.f32.mrf.mxu2 }
 0xa75   :  { %v6592_v16 = vadd.f32 %v6591_v50, %v6503_v14  ;;  %v6415_v2 = vpop.f32.mrf.mxu0 }
 0xa76   :  { %v6416_v39 = vadd.f32 %v6415_v2, %v12486_v51 }
 0xa77   :  { %v6680_v29 = vpop.f32.mrf.mxu3  ;;  %v6504_v11 = vpop.f32.mrf.mxu1 }
 0xa78   :  { %v6681_v48 = vadd.f32 %v6680_v29, %v6592_v16  ;;  %v6505_v7 = vadd.f32 %v6504_v11, %v6416_v39 }
 0xa7a   :  { %v7151_v60 = vmax.f32 %v6681_v48, 0.0 }
 0xa7c   :  { %v6593_v62 = vpop.f32.mrf.mxu2 }
 0xa7d   :  { %v6594_v32 = vadd.f32 %v6593_v62, %v6505_v7  ;;  %v6418_v9 = vpop.f32.mrf.mxu0 }
 0xa7e   :  { %v6419_v56 = vadd.f32 %v6418_v9, %v12486_v51 }
 0xa7f   :  { %v6682_v3 = vpop.f32.mrf.mxu3  ;;  %v6507_v28 = vpop.f32.mrf.mxu1 }
 0xa80   :  { %v6683_v54 = vadd.f32 %v6682_v3, %v6594_v32  ;;  %v6508_v36 = vadd.f32 %v6507_v28, %v6419_v56  ;;  %6733 = vmatmul.bf16.gmra.mxu0 %v13599_v24 }
 0xa81   :  { %6911 = vmatmul.bf16.gmra.mxu2 %v13601_v38  ;;  %v10383_v38 = vld [vmem:[#allocation11 + $0x60] sm:$0xff] }
 0xa82   :  { %v7155_v46 = vmax.f32 %v6683_v54, 0.0  ;;  %6822 = vmatmul.bf16.gmra.mxu1 %v13600_v63 }
 0xa83   :  { %7605 = vmatpush.bf16.msrb.mxu1 %v10383_v38 }
 0xa84   :  { %7000 = vmatmul.bf16.gmra.mxu3 %v12136_v52  ;;  %v12589_v49 = vpack.c.bf16 %v7155_v46, %v7151_v60  ;;  %v6596_v8 = vpop.f32.mrf.mxu2 }
 0xa85   :  { %v6597_v40 = vadd.f32 %v6596_v8, %v6508_v36  ;;  %v6420_v14 = vpop.f32.mrf.mxu0 }
 0xa86   :  { %v6421_v24 = vadd.f32 %v6420_v14, %v12486_v51  ;;  %v10390_v14 = vld [vmem:[#allocation11 + $0x98] sm:$0xff] }
 0xa87   :  { %v6685_v43 = vpop.f32.mrf.mxu3  ;;  %v6509_v15 = vpop.f32.mrf.mxu1  ;;  %7695 = vmatpush.bf16.msrb.mxu2 %v10390_v14  ;;  %v13725_v14 = vld [vmem:[#allocation144_spill] sm:$0xff] }
 0xa88   :  { %v6686_v63 = vadd.f32 %v6685_v43, %v6597_v40  ;;  %v6510_v61 = vadd.f32 %v6509_v15, %v6421_v24  ;;  %v10374_v24 = vld [vmem:[#allocation11 + $0x18] sm:$0xff] }
 0xa89   :  { %v10398_v15 = vld [vmem:[#allocation11 + $0xd8] sm:$0xff]  ;;  %7517 = vmatpush.bf16.msrb.mxu0 %v10374_v24 }
 0xa8a   :  { %v7159_v7 = vmax.f32 %v6686_v63, 0.0  ;;  %7784 = vmatpush.bf16.msrb.mxu3 %v10398_v15 }
 0xa8c   :  { %v6598_v52 = vpop.f32.mrf.mxu2 }
 0xa8d   :  { %v6599_v50 = vadd.f32 %v6598_v52, %v6510_v61  ;;  %v6423_v29 = vpop.f32.mrf.mxu0 }
 0xa8e   :  { %v6424_v2 = vadd.f32 %v6423_v29, %v12486_v51 }
 0xa8f   :  { %v6687_v16 = vpop.f32.mrf.mxu3  ;;  %v6512_v39 = vpop.f32.mrf.mxu1 }
 0xa90   :  { %v6688_v11 = vadd.f32 %v6687_v16, %v6599_v50  ;;  %v6513_v48 = vadd.f32 %v6512_v39, %v6424_v2  ;;  %6738 = vmatmul.bf16.gmra.mxu0 %v13603_v5 }
 0xa91   :  { %6916 = vmatmul.bf16.gmra.mxu2 %v13605_v30 }
 0xa92   :  { %v7163_v62 = vmax.f32 %v6688_v11, 0.0  ;;  %6827 = vmatmul.bf16.gmra.mxu1 %v13604_v25 }
 0xa94   :  { %7005 = vmatmul.bf16.gmra.mxu3 %v12144_v6  ;;  %v12597_v32 = vpack.c.bf16 %v7163_v62, %v7159_v7  ;;  %v6601_v3 = vpop.f32.mrf.mxu2 }
 0xa95   :  { %v6602_v9 = vadd.f32 %v6601_v3, %v6513_v48  ;;  %v6425_v28 = vpop.f32.mrf.mxu0 }
 0xa96   :  { %v6426_v54 = vadd.f32 %v6425_v28, %v12486_v51 }
 0xa97   :  { %v6690_v56 = vpop.f32.mrf.mxu3  ;;  %v6514_v36 = vpop.f32.mrf.mxu1 }
 0xa98   :  { %v6691_v60 = vadd.f32 %v6690_v56, %v6602_v9  ;;  %v6515_v46 = vadd.f32 %v6514_v36, %v6426_v54 }
 0xa9a   :  { %v7167_v40 = vmax.f32 %v6691_v60, 0.0 }
 0xa9c   :  { %v6603_v5 = vpop.f32.mrf.mxu2 }
 0xa9d   :  { %v6604_v22 = vadd.f32 %v6603_v5, %v6515_v46  ;;  %v6428_v1 = vpop.f32.mrf.mxu0 }
 0xa9e   :  { %v6429_v25 = vadd.f32 %v6428_v1, %v12486_v51 }
 0xa9f   :  { %v6692_v34 = vpop.f32.mrf.mxu3  ;;  %v6517_v30 = vpop.f32.mrf.mxu1 }
 0xaa0   :  { %v6693_v8 = vadd.f32 %v6692_v34, %v6604_v22  ;;  %v6518_v6 = vadd.f32 %v6517_v30, %v6429_v25  ;;  %6743 = vmatmul.bf16.gmra.mxu0 %v13607_v0 }
 0xaa1   :  { %6921 = vmatmul.bf16.gmra.mxu2 %v11962_v20  ;;  %v10382_v20 = vld [vmem:[#allocation11 + $0x58] sm:$0xff] }
 0xaa2   :  { %v7171_v43 = vmax.f32 %v6693_v8, 0.0  ;;  %6832 = vmatmul.bf16.gmra.mxu1 %v13608_v17 }
 0xaa3   :  { %7606 = vmatpush.bf16.msrb.mxu1 %v10382_v20 }
 0xaa4   :  { %7010 = vmatmul.bf16.gmra.mxu3 %v12152_v26  ;;  %v12605_v63 = vpack.c.bf16 %v7171_v43, %v7167_v40  ;;  %v6606_v61 = vpop.f32.mrf.mxu2 }
 0xaa5   :  { %v6607_v38 = vadd.f32 %v6606_v61, %v6518_v6  ;;  %v6430_v50 = vpop.f32.mrf.mxu0  ;;  %v13727_v61 = vld [vmem:[#allocation88_spill] sm:$0xff] }
 0xaa6   :  { %v6431_v0 = vadd.f32 %v6430_v50, %v12486_v51  ;;  %v10373_v50 = vld [vmem:[#allocation11 + $0x10] sm:$0xff] }
 0xaa7   :  { %v6695_v52 = vpop.f32.mrf.mxu3  ;;  %v6519_v16 = vpop.f32.mrf.mxu1  ;;  %7518 = vmatpush.bf16.msrb.mxu0 %v10373_v50  ;;  %v13731_v50 = vld [vmem:[#allocation29_spill] sm:$0xff] }
 0xaa8   :  { %v6696_v17 = vadd.f32 %v6695_v52, %v6607_v38  ;;  %v6520_v29 = vadd.f32 %v6519_v16, %v6431_v0  ;;  %v13728_v38 = vld [vmem:[#allocation32_spill] sm:$0xff]  ;;  %v10389_v52 = vld [vmem:[#allocation11 + $0x90] sm:$0xff] }
 0xaa9   :  { %v10397_v0 = vld [vmem:[#allocation11 + $0xd0] sm:$0xff]  ;;  %7696 = vmatpush.bf16.msrb.mxu2 %v10389_v52 }
 0xaaa   :  { %v7175_v9 = vmax.f32 %v6696_v17, 0.0  ;;  %7785 = vmatpush.bf16.msrb.mxu3 %v10397_v0  ;;  %v13732_v0 = vld [vmem:[#allocation23_spill] sm:$0xff] }
 0xaac   :  { %v6608_v26 = vpop.f32.mrf.mxu2 }
 0xaad   :  { %v6609_v2 = vadd.f32 %v6608_v26, %v6520_v29  ;;  %v6433_v11 = vpop.f32.mrf.mxu0 }
 0xaae   :  { %v6434_v48 = vadd.f32 %v6433_v11, %v12486_v51 }
 0xaaf   :  { %v6697_v39 = vpop.f32.mrf.mxu3  ;;  %v6522_v7 = vpop.f32.mrf.mxu1 }
 0xab0   :  { %v6698_v62 = vadd.f32 %v6697_v39, %v6609_v2  ;;  %v6523_v3 = vadd.f32 %v6522_v7, %v6434_v48  ;;  %6748 = vmatmul.bf16.gmra.mxu0 %v13610_v37  ;;  %v13724_v37 = vld [vmem:[#allocation83_spill] sm:$0xff]  ;;  %v10381_v7 = vld [vmem:[#allocation11 + $0x50] sm:$0xff] }
 0xab1   :  { %6926 = vmatmul.bf16.gmra.mxu2 %v13612_v45  ;;  %v12617_v25 = vperm.slane %v13724_v37, 3  ;;  %7607 = vmatpush.bf16.msrb.mxu1 %v10381_v7 }
 0xab2   :  { %v7179_v56 = vmax.f32 %v6698_v62, 0.0  ;;  %6837 = vmatmul.bf16.gmra.mxu1 %v13611_v33 }
 0xab4   :  { %7015 = vmatmul.bf16.gmra.mxu3 %v12160_v41  ;;  %v12613_v28 = vpack.c.bf16 %v7179_v56, %v7175_v9  ;;  %v6611_v54 = vpop.f32.mrf.mxu2 }
 0xab5   :  { %v6612_v36 = vadd.f32 %v6611_v54, %v6523_v3  ;;  %v6435_v46 = vpop.f32.mrf.mxu0 }
 0xab6   :  { %v6436_v5 = vadd.f32 %v6435_v46, %v12486_v51  ;;  %v13726_v51 = vld [vmem:[#allocation21_spill] sm:$0xff] }
 0xab7   :  { %v6700_v60 = vpop.f32.mrf.mxu3  ;;  %v6524_v22 = vpop.f32.mrf.mxu1 }
 0xab8   :  { %v6701_v34 = vadd.f32 %v6700_v60, %v6612_v36  ;;  %v6525_v1 = vadd.f32 %v6524_v22, %v6436_v5 }
 0xaba   :  { %v7183_v24 = vmax.f32 %v6701_v34, 0.0  ;;  %v13729_v34 = vld [vmem:[#allocation98_spill] sm:$0xff] }
 0xabc   :  { %v6613_v30 = vpop.f32.mrf.mxu2 }
 0xabd   :  { %v6614_v33 = vadd.f32 %v6613_v30, %v6525_v1  ;;  %v6714_v45 = vpop.f32.mrf.mxu0 }
 0xabe   :  { %v6715_v41 = vadd.f32 %v6714_v45, %v12617_v25 }
 0xabf   :  { %v6702_v8 = vpop.f32.mrf.mxu3  ;;  %v6803_v6 = vpop.f32.mrf.mxu1 }
 0xac0   :  { %v6703_v40 = vadd.f32 %v6702_v8, %v6614_v33  ;;  %v6804_v43 = vadd.f32 %v6803_v6, %v6715_v41  ;;  %6753 = vmatmul.bf16.gmra.mxu0 %v13725_v14 }
 0xac1   :  { %6931 = vmatmul.bf16.gmra.mxu2 %v13727_v61  ;;  %v13730_v61 = vld [vmem:[#allocation95_spill] sm:$0xff] }
 0xac2   :  { %v7187_v15 = vmax.f32 %v6703_v40, 0.0  ;;  %6842 = vmatmul.bf16.gmra.mxu1 %v13726_v51 }
 0xac4   :  { %7020 = vmatmul.bf16.gmra.mxu3 %v13728_v38  ;;  %v12624_v16 = vpack.c.bf16 %v7187_v15, %v7183_v24  ;;  %v6892_v17 = vpop.f32.mrf.mxu2 }
 0xac5   :  { %v6893_v29 = vadd.f32 %v6892_v17, %v6804_v43  ;;  %v6716_v26 = vpop.f32.mrf.mxu0  ;;  %v13733_v17 = vld [vmem:[#allocation35_spill] sm:$0xff] }
 0xac6   :  { %v6717_v2 = vadd.f32 %v6716_v26, %v12617_v25  ;;  %v10396_v26 = vld [vmem:[#allocation11 + $0xc8] sm:$0xff] }
 0xac7   :  { %v6981_v20 = vpop.f32.mrf.mxu3  ;;  %v6805_v39 = vpop.f32.mrf.mxu1  ;;  %7786 = vmatpush.bf16.msrb.mxu3 %v10396_v26  ;;  %v13737_v26 = vld [vmem:[#allocation37_spill] sm:$0xff] }
 0xac8   :  { %v6982_v11 = vadd.f32 %v6981_v20, %v6893_v29  ;;  %v6806_v48 = vadd.f32 %v6805_v39, %v6717_v2  ;;  %v10388_v29 = vld [vmem:[#allocation11 + $0x88] sm:$0xff] }
 0xac9   :  { %v10372_v20 = vld [vmem:[#allocation11 + $0x8] sm:$0xff]  ;;  %7697 = vmatpush.bf16.msrb.mxu2 %v10388_v29 }
 0xaca   :  { %v7064_v5 = vmax.f32 %v6982_v11, 0.0  ;;  %7519 = vmatpush.bf16.msrb.mxu0 %v10372_v20 }
 0xacc   :  { %v6894_v62 = vpop.f32.mrf.mxu2 }
 0xacd   :  { %v6895_v3 = vadd.f32 %v6894_v62, %v6806_v48  ;;  %v6719_v56 = vpop.f32.mrf.mxu0 }
 0xace   :  { %v6720_v54 = vadd.f32 %v6719_v56, %v12617_v25 }
 0xacf   :  { %v6983_v9 = vpop.f32.mrf.mxu3  ;;  %v6808_v36 = vpop.f32.mrf.mxu1 }
 0xad0   :  { %v6984_v60 = vadd.f32 %v6983_v9, %v6895_v3  ;;  %v6809_v46 = vadd.f32 %v6808_v36, %v6720_v54  ;;  %6758 = vmatmul.bf16.gmra.mxu0 %v13617_v58  ;;  %v10380_v54 = vld [vmem:[#allocation11 + $0x48] sm:$0xff] }
 0xad1   :  { %6936 = vmatmul.bf16.gmra.mxu2 %v12004_v19  ;;  %7608 = vmatpush.bf16.msrb.mxu1 %v10380_v54 }
 0xad2   :  { %v7068_v22 = vmax.f32 %v6984_v60, 0.0  ;;  %6847 = vmatmul.bf16.gmra.mxu1 %v13618_v42 }
 0xad4   :  { %7025 = vmatmul.bf16.gmra.mxu3 %v13729_v34  ;;  %v12632_v1 = vpack.c.bf16 %v7068_v22, %v7064_v5  ;;  %v6897_v37 = vpop.f32.mrf.mxu2 }
 0xad5   :  { %v6898_v30 = vadd.f32 %v6897_v37, %v6809_v46  ;;  %v6721_v8 = vpop.f32.mrf.mxu0 }
 0xad6   :  { %v6722_v45 = vadd.f32 %v6721_v8, %v12617_v25 }
 0xad7   :  { %v6986_v33 = vpop.f32.mrf.mxu3  ;;  %v6810_v41 = vpop.f32.mrf.mxu1 }
 0xad8   :  { %v6987_v6 = vadd.f32 %v6986_v33, %v6898_v30  ;;  %v6811_v40 = vadd.f32 %v6810_v41, %v6722_v45  ;;  %v13734_v45 = vld [vmem:[#allocation24_spill] sm:$0xff] }
 0xad9   :  { %v13735_v41 = vld [vmem:[#allocation36_spill] sm:$0xff] }
 0xada   :  { %v7072_v38 = vmax.f32 %v6987_v6, 0.0 }
 0xadc   :  { %v6899_v58 = vpop.f32.mrf.mxu2 }
 0xadd   :  { %v6900_v43 = vadd.f32 %v6899_v58, %v6811_v40  ;;  %v6724_v24 = vpop.f32.mrf.mxu0 }
 0xade   :  { %v6725_v42 = vadd.f32 %v6724_v24, %v12617_v25 }
 0xadf   :  { %v6988_v14 = vpop.f32.mrf.mxu3  ;;  %v6813_v19 = vpop.f32.mrf.mxu1 }
 0xae0   :  { %v6989_v15 = vadd.f32 %v6988_v14, %v6900_v43  ;;  %v6814_v51 = vadd.f32 %v6813_v19, %v6725_v42  ;;  %6763 = vmatmul.bf16.gmra.mxu0 %v13730_v61 }
 0xae1   :  { %6941 = vmatmul.bf16.gmra.mxu2 %v13732_v0 }
 0xae2   :  { %v7076_v52 = vmax.f32 %v6989_v15, 0.0  ;;  %6852 = vmatmul.bf16.gmra.mxu1 %v13731_v50 }
 0xae4   :  { %7030 = vmatmul.bf16.gmra.mxu3 %v13733_v17  ;;  %v12640_v2 = vpack.c.bf16 %v7076_v52, %v7072_v38  ;;  %v6902_v39 = vpop.f32.mrf.mxu2  ;;  %v13736_v17 = vld [vmem:[#allocation103_spill] sm:$0xff] }
 0xae5   :  { %v6903_v11 = vadd.f32 %v6902_v39, %v6814_v51  ;;  %v6726_v7 = vpop.f32.mrf.mxu0  ;;  %v13738_v39 = vld [vmem:[#allocation91_spill] sm:$0xff] }
 0xae6   :  { %v6727_v62 = vadd.f32 %v6726_v7, %v12617_v25  ;;  %v10371_v7 = vld [vmem:[#allocation11] sm:$0xff] }
 0xae7   :  { %v6991_v48 = vpop.f32.mrf.mxu3  ;;  %v6815_v3 = vpop.f32.mrf.mxu1  ;;  %7520 = vmatpush.bf16.msrb.mxu0 %v10371_v7 }
 0xae8   :  { %v6992_v9 = vadd.f32 %v6991_v48, %v6903_v11  ;;  %v6816_v56 = vadd.f32 %v6815_v3, %v6727_v62  ;;  %v13739_v11 = vld [vmem:[#allocation102_spill] sm:$0xff]  ;;  %v10387_v48 = vld [vmem:[#allocation11 + $0x80] sm:$0xff] }
 0xae9   :  { %v10395_v62 = vld [vmem:[#allocation11 + $0xc0] sm:$0xff]  ;;  %7698 = vmatpush.bf16.msrb.mxu2 %v10387_v48 }
 0xaea   :  { %v7080_v33 = vmax.f32 %v6992_v9, 0.0  ;;  %7787 = vmatpush.bf16.msrb.mxu3 %v10395_v62 }
 0xaec   :  { %v6904_v36 = vpop.f32.mrf.mxu2 }
 0xaed   :  { %v6905_v60 = vadd.f32 %v6904_v36, %v6816_v56  ;;  %v6729_v5 = vpop.f32.mrf.mxu0 }
 0xaee   :  { %v6730_v22 = vadd.f32 %v6729_v5, %v12617_v25 }
 0xaef   :  { %v6993_v46 = vpop.f32.mrf.mxu3  ;;  %v6818_v34 = vpop.f32.mrf.mxu1 }
 0xaf0   :  { %v6994_v37 = vadd.f32 %v6993_v46, %v6905_v60  ;;  %v6819_v30 = vadd.f32 %v6818_v34, %v6730_v22  ;;  %6768 = vmatmul.bf16.gmra.mxu0 %v13623_v4  ;;  %v10379_v34 = vld [vmem:[#allocation11 + $0x40] sm:$0xff] }
 0xaf1   :  { %6946 = vmatmul.bf16.gmra.mxu2 %v13734_v45  ;;  %7609 = vmatpush.bf16.msrb.mxu1 %v10379_v34 }
 0xaf2   :  { %v7084_v8 = vmax.f32 %v6994_v37, 0.0  ;;  %6857 = vmatmul.bf16.gmra.mxu1 %v13624_v27 }
 0xaf4   :  { %7035 = vmatmul.bf16.gmra.mxu3 %v13735_v41  ;;  %v12648_v6 = vpack.c.bf16 %v7084_v8, %v7080_v33  ;;  %v6907_v40 = vpop.f32.mrf.mxu2 }
 0xaf5   :  { %v6908_v58 = vadd.f32 %v6907_v40, %v6819_v30  ;;  %v6731_v14 = vpop.f32.mrf.mxu0 }
 0xaf6   :  { %v6732_v24 = vadd.f32 %v6731_v14, %v12617_v25 }
 0xaf7   :  { %v6996_v43 = vpop.f32.mrf.mxu3  ;;  %v6820_v42 = vpop.f32.mrf.mxu1 }
 0xaf8   :  { %v6997_v19 = vadd.f32 %v6996_v43, %v6908_v58  ;;  %v6821_v15 = vadd.f32 %v6820_v42, %v6732_v24 }
 0xafa   :  { %v7088_v29 = vmax.f32 %v6997_v19, 0.0 }
 0xafc   :  { %v6909_v4 = vpop.f32.mrf.mxu2 }
 0xafd   :  { %v6910_v51 = vadd.f32 %v6909_v4, %v6821_v15  ;;  %v6734_v38 = vpop.f32.mrf.mxu0 }
 0xafe   :  { %v6735_v27 = vadd.f32 %v6734_v38, %v12617_v25 }
 0xaff   :  { %v6998_v61 = vpop.f32.mrf.mxu3  ;;  %v6823_v52 = vpop.f32.mrf.mxu1 }
 0xb00   :  { %v6999_v50 = vadd.f32 %v6998_v61, %v6910_v51  ;;  %v6824_v0 = vadd.f32 %v6823_v52, %v6735_v27  ;;  %6773 = vmatmul.bf16.gmra.mxu0 %v13736_v17 }
 0xb01   :  { %6951 = vmatmul.bf16.gmra.mxu2 %v13738_v39  ;;  %v13741_v39 = vld [vmem:[#allocation28_spill] sm:$0xff] }
 0xb02   :  { %v7092_v20 = vmax.f32 %v6999_v50, 0.0  ;;  %6862 = vmatmul.bf16.gmra.mxu1 %v13737_v26  ;;  %v13740_v26 = vld [vmem:[#allocation157_spill] sm:$0xff] }
 0xb04   :  { %7040 = vmatmul.bf16.gmra.mxu3 %v13739_v11  ;;  %v12656_v3 = vpack.c.bf16 %v7092_v20, %v7088_v29  ;;  %v6912_v9 = vpop.f32.mrf.mxu2  ;;  %v13742_v11 = vld [vmem:[#allocation40_spill] sm:$0xff] }
 0xb05   :  { %v6913_v56 = vadd.f32 %v6912_v9, %v6824_v0  ;;  %v6736_v36 = vpop.f32.mrf.mxu0 }
 0xb06   :  { %v6737_v60 = vadd.f32 %v6736_v36, %v12617_v25 }
 0xb07   :  { %v7001_v54 = vpop.f32.mrf.mxu3  ;;  %v6825_v46 = vpop.f32.mrf.mxu1 }
 0xb08   :  { %v7002_v5 = vadd.f32 %v7001_v54, %v6913_v56  ;;  %v6826_v22 = vadd.f32 %v6825_v46, %v6737_v60 }
 0xb0a   :  { %v7096_v43 = vmax.f32 %v7002_v5, 0.0 }
 0xb0c   :  { %v6914_v37 = vpop.f32.mrf.mxu2 }
 0xb0d   :  { %v6915_v30 = vadd.f32 %v6914_v37, %v6826_v22  ;;  %v6739_v8 = vpop.f32.mrf.mxu0 }
 0xb0e   :  { %v6740_v45 = vadd.f32 %v6739_v8, %v12617_v25 }
 0xb0f   :  { %v7003_v33 = vpop.f32.mrf.mxu3  ;;  %v6828_v41 = vpop.f32.mrf.mxu1 }
 0xb10   :  { %v7004_v40 = vadd.f32 %v7003_v33, %v6915_v30  ;;  %v6829_v58 = vadd.f32 %v6828_v41, %v6740_v45  ;;  %6778 = vmatmul.bf16.gmra.mxu0 %v13631_v23 }
 0xb11   :  { %6956 = vmatmul.bf16.gmra.mxu2 %v13713_v13 }
 0xb12   :  { %v7100_v14 = vmax.f32 %v7004_v40, 0.0  ;;  %6867 = vmatmul.bf16.gmra.mxu1 %v13632_v12 }
 0xb14   :  { %7045 = vmatmul.bf16.gmra.mxu3 %v13714_v55  ;;  %v12664_v24 = vpack.c.bf16 %v7100_v14, %v7096_v43  ;;  %v6917_v42 = vpop.f32.mrf.mxu2 }
 0xb15   :  { %v6918_v19 = vadd.f32 %v6917_v42, %v6829_v58  ;;  %v6741_v4 = vpop.f32.mrf.mxu0 }
 0xb16   :  { %v6742_v51 = vadd.f32 %v6741_v4, %v12617_v25 }
 0xb17   :  { %v7006_v15 = vpop.f32.mrf.mxu3  ;;  %v6830_v61 = vpop.f32.mrf.mxu1 }
 0xb18   :  { %v7007_v38 = vadd.f32 %v7006_v15, %v6918_v19  ;;  %v6831_v27 = vadd.f32 %v6830_v61, %v6742_v51 }
 0xb1a   :  { %v7104_v29 = vmax.f32 %v7007_v38, 0.0 }
 0xb1c   :  { %v6919_v23 = vpop.f32.mrf.mxu2 }
 0xb1d   :  { %v6920_v52 = vadd.f32 %v6919_v23, %v6831_v27  ;;  %v6744_v0 = vpop.f32.mrf.mxu0 }
 0xb1e   :  { %v6745_v12 = vadd.f32 %v6744_v0, %v12617_v25 }
 0xb1f   :  { %v7008_v50 = vpop.f32.mrf.mxu3  ;;  %v6833_v13 = vpop.f32.mrf.mxu1 }
 0xb20   :  { %v7009_v17 = vadd.f32 %v7008_v50, %v6920_v52  ;;  %v6834_v55 = vadd.f32 %v6833_v13, %v6745_v12  ;;  %6783 = vmatmul.bf16.gmra.mxu0 %v13716_v10  ;;  %v13743_v52 = vld [vmem:[#allocation43_spill] sm:$0xff]  ;;  %v13745_v13 = vld [vmem:[#allocation26_spill] sm:$0xff] }
 0xb21   :  { %6961 = vmatmul.bf16.gmra.mxu2 %v13741_v39  ;;  %v13744_v12 = vld [vmem:[#allocation63_spill] sm:$0xff] }
 0xb22   :  { %v7108_v20 = vmax.f32 %v7009_v17, 0.0  ;;  %6872 = vmatmul.bf16.gmra.mxu1 %v13740_v26 }
 0xb24   :  { %7050 = vmatmul.bf16.gmra.mxu3 %v13742_v11  ;;  %v12672_v48 = vpack.c.bf16 %v7108_v20, %v7104_v29  ;;  %v6922_v7 = vpop.f32.mrf.mxu2 }
 0xb25   :  { %v6923_v62 = vadd.f32 %v6922_v7, %v6834_v55  ;;  %v6746_v56 = vpop.f32.mrf.mxu0 }
 0xb26   :  { %v6747_v54 = vadd.f32 %v6746_v56, %v12617_v25 }
 0xb27   :  { %v7011_v9 = vpop.f32.mrf.mxu3  ;;  %v6835_v36 = vpop.f32.mrf.mxu1 }
 0xb28   :  { %v7012_v60 = vadd.f32 %v7011_v9, %v6923_v62  ;;  %v6836_v46 = vadd.f32 %v6835_v36, %v6747_v54 }
 0xb2a   :  { %v7112_v45 = vmax.f32 %v7012_v60, 0.0 }
 0xb2c   :  { %v6924_v10 = vpop.f32.mrf.mxu2 }
 0xb2d   :  { %v6925_v5 = vadd.f32 %v6924_v10, %v6836_v46  ;;  %v6749_v34 = vpop.f32.mrf.mxu0 }
 0xb2e   :  { %v6750_v37 = vadd.f32 %v6749_v34, %v12617_v25 }
 0xb2f   :  { %v7013_v22 = vpop.f32.mrf.mxu3  ;;  %v6838_v30 = vpop.f32.mrf.mxu1 }
 0xb30   :  { %v7014_v33 = vadd.f32 %v7013_v22, %v6925_v5  ;;  %v6839_v8 = vadd.f32 %v6838_v30, %v6750_v37  ;;  %6788 = vmatmul.bf16.gmra.mxu0 %v13639_v18  ;;  %v13746_v5 = vld [vmem:[#allocation44_spill] sm:$0xff]  ;;  %v13748_v30 = vld [vmem:[#allocation86_spill] sm:$0xff] }
 0xb31   :  { %6966 = vmatmul.bf16.gmra.mxu2 %v13641_v44  ;;  %v13747_v37 = vld [vmem:[#allocation64_spill] sm:$0xff] }
 0xb32   :  { %v7116_v41 = vmax.f32 %v7014_v33, 0.0  ;;  %6877 = vmatmul.bf16.gmra.mxu1 %v13640_v47 }
 0xb34   :  { %7055 = vmatmul.bf16.gmra.mxu3 %v12229_v59  ;;  %v12680_v40 = vpack.c.bf16 %v7116_v41, %v7112_v45  ;;  %v6927_v58 = vpop.f32.mrf.mxu2 }
 0xb35   :  { %v6928_v43 = vadd.f32 %v6927_v58, %v6839_v8  ;;  %v6751_v42 = vpop.f32.mrf.mxu0 }
 0xb36   :  { %v6752_v19 = vadd.f32 %v6751_v42, %v12617_v25 }
 0xb37   :  { %v7016_v14 = vpop.f32.mrf.mxu3  ;;  %v6840_v15 = vpop.f32.mrf.mxu1 }
 0xb38   :  { %v7017_v4 = vadd.f32 %v7016_v14, %v6928_v43  ;;  %v6841_v51 = vadd.f32 %v6840_v15, %v6752_v19 }
 0xb3a   :  { %v7120_v50 = vmax.f32 %v7017_v4, 0.0 }
 0xb3c   :  { %v6929_v18 = vpop.f32.mrf.mxu2 }
 0xb3d   :  { %v6930_v61 = vadd.f32 %v6929_v18, %v6841_v51  ;;  %v6754_v27 = vpop.f32.mrf.mxu0 }
 0xb3e   :  { %v6755_v47 = vadd.f32 %v6754_v27, %v12617_v25 }
 0xb3f   :  { %v7018_v38 = vpop.f32.mrf.mxu3  ;;  %v6843_v44 = vpop.f32.mrf.mxu1 }
 0xb40   :  { %v7019_v23 = vadd.f32 %v7018_v38, %v6930_v61  ;;  %v6844_v59 = vadd.f32 %v6843_v44, %v6755_v47  ;;  %7521 = vmatmul.bf16.vlgmr.msrb.gmra.mxu0 %v13743_v52  ;;  %v13749_v47 = vld [vmem:[#allocation45_spill] sm:$0xff]  ;;  %v13751_v52 = vld [vmem:[#allocation87_spill] sm:$0xff] }
 0xb41   :  { %7699 = vmatmul.bf16.vlgmr.msrb.gmra.mxu2 %v13745_v13 }
 0xb42   :  { %v7124_v0 = vmax.f32 %v7019_v23, 0.0  ;;  %7610 = vmatmul.bf16.vlgmr.msrb.gmra.mxu1 %v13744_v12 }
 0xb44   :  { %7788 = vmatmul.bf16.vlgmr.msrb.gmra.mxu3 %v12632_v1  ;;  %v12688_v17 = vpack.c.bf16 %v7124_v0, %v7120_v50  ;;  %v6932_v55 = vpop.f32.mrf.mxu2 }
 0xb45   :  { %v6933_v29 = vadd.f32 %v6932_v55, %v6844_v59  ;;  %v6756_v26 = vpop.f32.mrf.mxu0  ;;  %v13750_v59 = vld [vmem:[#allocation129_spill] sm:$0xff] }
 0xb46   :  { %v6757_v39 = vadd.f32 %v6756_v26, %v12617_v25 }
 0xb47   :  { %v7021_v20 = vpop.f32.mrf.mxu3  ;;  %v6845_v11 = vpop.f32.mrf.mxu1 }
 0xb48   :  { %v7022_v7 = vadd.f32 %v7021_v20, %v6933_v29  ;;  %v6846_v62 = vadd.f32 %v6845_v11, %v6757_v39 }
 0xb4a   :  { %v7128_v22 = vmax.f32 %v7022_v7, 0.0 }
 0xb4c   :  { %v6934_v9 = vpop.f32.mrf.mxu2 }
 0xb4d   :  { %v6935_v56 = vadd.f32 %v6934_v9, %v6846_v62  ;;  %v6759_v36 = vpop.f32.mrf.mxu0 }
 0xb4e   :  { %v6760_v60 = vadd.f32 %v6759_v36, %v12617_v25 }
 0xb4f   :  { %v7023_v54 = vpop.f32.mrf.mxu3  ;;  %v6848_v46 = vpop.f32.mrf.mxu1 }
 0xb50   :  { %v7024_v10 = vadd.f32 %v7023_v54, %v6935_v56  ;;  %v6849_v1 = vadd.f32 %v6848_v46, %v6760_v60  ;;  %7526 = vmatmul.bf16.gmra.mxu0 %v13746_v5  ;;  %v13752_v60 = vld [vmem:[#allocation47_spill] sm:$0xff]  ;;  %v13754_v5 = vld [vmem:[#allocation30_spill] sm:$0xff] }
 0xb51   :  { %7704 = vmatmul.bf16.gmra.mxu2 %v13748_v30 }
 0xb52   :  { %v7132_v34 = vmax.f32 %v7024_v10, 0.0  ;;  %7615 = vmatmul.bf16.gmra.mxu1 %v13747_v37 }
 0xb54   :  { %7793 = vmatmul.bf16.gmra.mxu3 %v12640_v2  ;;  %v12696_v33 = vpack.c.bf16 %v7132_v34, %v7128_v22  ;;  %v6937_v8 = vpop.f32.mrf.mxu2 }
 0xb55   :  { %v6938_v45 = vadd.f32 %v6937_v8, %v6849_v1  ;;  %v6761_v58 = vpop.f32.mrf.mxu0  ;;  %v13753_v1 = vld [vmem:[#allocation67_spill] sm:$0xff] }
 0xb56   :  { %v6762_v43 = vadd.f32 %v6761_v58, %v12617_v25 }
 0xb57   :  { %v7026_v41 = vpop.f32.mrf.mxu3  ;;  %v6850_v14 = vpop.f32.mrf.mxu1 }
 0xb58   :  { %v7027_v42 = vadd.f32 %v7026_v41, %v6938_v45  ;;  %v6851_v19 = vadd.f32 %v6850_v14, %v6762_v43 }
 0xb5a   :  { %v7136_v44 = vmax.f32 %v7027_v42, 0.0 }
 0xb5c   :  { %v6939_v15 = vpop.f32.mrf.mxu2 }
 0xb5d   :  { %v6940_v4 = vadd.f32 %v6939_v15, %v6851_v19  ;;  %v6764_v18 = vpop.f32.mrf.mxu0 }
 0xb5e   :  { %v6765_v61 = vadd.f32 %v6764_v18, %v12617_v25 }
 0xb5f   :  { %v7028_v51 = vpop.f32.mrf.mxu3  ;;  %v6853_v38 = vpop.f32.mrf.mxu1 }
 0xb60   :  { %v7029_v27 = vadd.f32 %v7028_v51, %v6940_v4  ;;  %v6854_v2 = vadd.f32 %v6853_v38, %v6765_v61  ;;  %7531 = vmatmul.bf16.gmra.mxu0 %v13749_v47  ;;  %v13755_v61 = vld [vmem:[#allocation48_spill] sm:$0xff]  ;;  %v13757_v47 = vld [vmem:[#allocation89_spill] sm:$0xff] }
 0xb61   :  { %7709 = vmatmul.bf16.gmra.mxu2 %v13751_v52 }
 0xb62   :  { %v7140_v23 = vmax.f32 %v7029_v27, 0.0  ;;  %7620 = vmatmul.bf16.gmra.mxu1 %v13750_v59 }
 0xb64   :  { %7798 = vmatmul.bf16.gmra.mxu3 %v12648_v6  ;;  %v12704_v50 = vpack.c.bf16 %v7140_v23, %v7136_v44  ;;  %v6942_v0 = vpop.f32.mrf.mxu2 }
 0xb65   :  { %v6943_v12 = vadd.f32 %v6942_v0, %v6854_v2  ;;  %v6766_v55 = vpop.f32.mrf.mxu0  ;;  %v13756_v2 = vld [vmem:[#allocation68_spill] sm:$0xff] }
 0xb66   :  { %v6767_v29 = vadd.f32 %v6766_v55, %v12617_v25 }
 0xb67   :  { %v7031_v13 = vpop.f32.mrf.mxu3  ;;  %v6855_v20 = vpop.f32.mrf.mxu1 }
 0xb68   :  { %v7032_v26 = vadd.f32 %v7031_v13, %v6943_v12  ;;  %v6856_v39 = vadd.f32 %v6855_v20, %v6767_v29 }
 0xb6a   :  { %v7144_v46 = vmax.f32 %v7032_v26, 0.0 }
 0xb6c   :  { %v6944_v11 = vpop.f32.mrf.mxu2 }
 0xb6d   :  { %v6945_v7 = vadd.f32 %v6944_v11, %v6856_v39  ;;  %v6769_v9 = vpop.f32.mrf.mxu0 }
 0xb6e   :  { %v6770_v56 = vadd.f32 %v6769_v9, %v12617_v25 }
 0xb6f   :  { %v7033_v62 = vpop.f32.mrf.mxu3  ;;  %v6858_v54 = vpop.f32.mrf.mxu1 }
 0xb70   :  { %v7034_v36 = vadd.f32 %v7033_v62, %v6945_v7  ;;  %v6859_v6 = vadd.f32 %v6858_v54, %v6770_v56  ;;  %7536 = vmatmul.bf16.gmra.mxu0 %v13752_v60  ;;  %v13758_v56 = vld [vmem:[#allocation148_spill] sm:$0xff]  ;;  %v13760_v60 = vld [vmem:[#allocation90_spill] sm:$0xff] }
 0xb71   :  { %7714 = vmatmul.bf16.gmra.mxu2 %v13754_v5 }
 0xb72   :  { %v7148_v10 = vmax.f32 %v7034_v36, 0.0  ;;  %7625 = vmatmul.bf16.gmra.mxu1 %v13753_v1 }
 0xb74   :  { %7803 = vmatmul.bf16.gmra.mxu3 %v12656_v3  ;;  %v12712_v22 = vpack.c.bf16 %v7148_v10, %v7144_v46  ;;  %v6947_v34 = vpop.f32.mrf.mxu2 }
 0xb75   :  { %v6948_v37 = vadd.f32 %v6947_v34, %v6859_v6  ;;  %v6771_v8 = vpop.f32.mrf.mxu0  ;;  %v13759_v6 = vld [vmem:[#allocation133_spill] sm:$0xff] }
 0xb76   :  { %v6772_v45 = vadd.f32 %v6771_v8, %v12617_v25 }
 0xb77   :  { %v7036_v30 = vpop.f32.mrf.mxu3  ;;  %v6860_v41 = vpop.f32.mrf.mxu1 }
 0xb78   :  { %v7037_v58 = vadd.f32 %v7036_v30, %v6948_v37  ;;  %v6861_v43 = vadd.f32 %v6860_v41, %v6772_v45 }
 0xb7a   :  { %v7152_v38 = vmax.f32 %v7037_v58, 0.0 }
 0xb7c   :  { %v6949_v14 = vpop.f32.mrf.mxu2 }
 0xb7d   :  { %v6950_v42 = vadd.f32 %v6949_v14, %v6861_v43  ;;  %v6774_v15 = vpop.f32.mrf.mxu0 }
 0xb7e   :  { %v6775_v4 = vadd.f32 %v6774_v15, %v12617_v25 }
 0xb7f   :  { %v7038_v19 = vpop.f32.mrf.mxu3  ;;  %v6863_v51 = vpop.f32.mrf.mxu1 }
 0xb80   :  { %v7039_v18 = vadd.f32 %v7038_v19, %v6950_v42  ;;  %v6864_v3 = vadd.f32 %v6863_v51, %v6775_v4  ;;  %7541 = vmatmul.bf16.gmra.mxu0 %v13755_v61  ;;  %v13761_v4 = vld [vmem:[#allocation51_spill] sm:$0xff] }
 0xb81   :  { %7719 = vmatmul.bf16.gmra.mxu2 %v13757_v47 }
 0xb82   :  { %v7156_v27 = vmax.f32 %v7039_v18, 0.0  ;;  %7630 = vmatmul.bf16.gmra.mxu1 %v13756_v2 }
 0xb84   :  { %7808 = vmatmul.bf16.gmra.mxu3 %v12664_v24  ;;  %v12720_v44 = vpack.c.bf16 %v7156_v27, %v7152_v38  ;;  %v6952_v23 = vpop.f32.mrf.mxu2 }
 0xb85   :  { %v6953_v59 = vadd.f32 %v6952_v23, %v6864_v3  ;;  %v6776_v0 = vpop.f32.mrf.mxu0  ;;  %v13762_v3 = vld [vmem:[#allocation71_spill] sm:$0xff] }
 0xb86   :  { %v6777_v12 = vadd.f32 %v6776_v0, %v12617_v25 }
 0xb87   :  { %v7041_v52 = vpop.f32.mrf.mxu3  ;;  %v6865_v13 = vpop.f32.mrf.mxu1 }
 0xb88   :  { %v7042_v55 = vadd.f32 %v7041_v52, %v6953_v59  ;;  %v6866_v29 = vadd.f32 %v6865_v13, %v6777_v12 }
 0xb8a   :  { %v7160_v54 = vmax.f32 %v7042_v55, 0.0 }
 0xb8c   :  { %v6954_v20 = vpop.f32.mrf.mxu2 }
 0xb8d   :  { %v6955_v26 = vadd.f32 %v6954_v20, %v6866_v29  ;;  %v6779_v11 = vpop.f32.mrf.mxu0 }
 0xb8e   :  { %v6780_v7 = vadd.f32 %v6779_v11, %v12617_v25 }
 0xb8f   :  { %v7043_v39 = vpop.f32.mrf.mxu3  ;;  %v6868_v62 = vpop.f32.mrf.mxu1 }
 0xb90   :  { %v7044_v9 = vadd.f32 %v7043_v39, %v6955_v26  ;;  %v6869_v24 = vadd.f32 %v6868_v62, %v6780_v7  ;;  %7546 = vmatmul.bf16.gmra.mxu0 %v13758_v56  ;;  %v13763_v39 = vld [vmem:[#allocation52_spill] sm:$0xff] }
 0xb91   :  { %7724 = vmatmul.bf16.gmra.mxu2 %v13760_v60  ;;  %v13764_v62 = vld [vmem:[#allocation72_spill] sm:$0xff] }
 0xb92   :  { %v7164_v36 = vmax.f32 %v7044_v9, 0.0  ;;  %7635 = vmatmul.bf16.gmra.mxu1 %v13759_v6 }
 0xb94   :  { %7813 = vmatmul.bf16.gmra.mxu3 %v12672_v48  ;;  %v12728_v46 = vpack.c.bf16 %v7164_v36, %v7160_v54  ;;  %v6957_v10 = vpop.f32.mrf.mxu2 }
 0xb95   :  { %v6958_v1 = vadd.f32 %v6957_v10, %v6869_v24  ;;  %v6781_v34 = vpop.f32.mrf.mxu0 }
 0xb96   :  { %v6782_v37 = vadd.f32 %v6781_v34, %v12617_v25 }
 0xb97   :  { %v7046_v5 = vpop.f32.mrf.mxu3  ;;  %v6870_v30 = vpop.f32.mrf.mxu1 }
 0xb98   :  { %v7047_v8 = vadd.f32 %v7046_v5, %v6958_v1  ;;  %v6871_v45 = vadd.f32 %v6870_v30, %v6782_v37  ;;  %v12750_v5 = vld [vmem:[%s12827_s6] ss:$0 sm:$0xff]  ;;  %s10612_s6 = smov [#allocation13]  }
 0xb99   :  { %s7905_s10 = sshll.u32 %s10612_s6, 4  ;;  %s7906_s10 = int_to_ptr.vmem [resolvable:$true] %s7905_s10 }
 0xb9a   :  { %v7168_v51 = vmax.f32 %v7047_v8, 0.0 }
 0xb9c   :  { %v6959_v41 = vpop.f32.mrf.mxu2 }
 0xb9d   :  { %v6960_v58 = vadd.f32 %v6959_v41, %v6871_v45  ;;  %v6784_v14 = vpop.f32.mrf.mxu0  ;;  %v13765_v41 = vld [vmem:[#allocation53_spill] sm:$0xff] }
 0xb9e   :  { %v6785_v42 = vadd.f32 %v6784_v14, %v12617_v25 }
 0xb9f   :  { %v7048_v43 = vpop.f32.mrf.mxu3  ;;  %v6873_v19 = vpop.f32.mrf.mxu1 }
 0xba0   :  { %v7049_v15 = vadd.f32 %v7048_v43, %v6960_v58  ;;  %v6874_v48 = vadd.f32 %v6873_v19, %v6785_v42  ;;  %7551 = vmatmul.bf16.gmra.mxu0 %v13761_v4  ;;  %v13766_v43 = vld [vmem:[#allocation137_spill] sm:$0xff] }
 0xba1   :  { %7729 = vmatmul.bf16.gmra.mxu2 %v12549_v57 }
 0xba2   :  { %v7172_v18 = vmax.f32 %v7049_v15, 0.0  ;;  %7640 = vmatmul.bf16.gmra.mxu1 %v13762_v3 }
 0xba4   :  { %7818 = vmatmul.bf16.gmra.mxu3 %v12680_v40  ;;  %v12736_v61 = vpack.c.bf16 %v7172_v18, %v7168_v51  ;;  %v6962_v38 = vpop.f32.mrf.mxu2 }
 0xba5   :  { %v6963_v27 = vadd.f32 %v6962_v38, %v6874_v48  ;;  %v6786_v47 = vpop.f32.mrf.mxu0 }
 0xba6   :  { %v6787_v23 = vadd.f32 %v6786_v47, %v12617_v25 }
 0xba7   :  { %v7051_v2 = vpop.f32.mrf.mxu3  ;;  %v6875_v59 = vpop.f32.mrf.mxu1 }
 0xba8   :  { %v7052_v52 = vadd.f32 %v7051_v2, %v6963_v27  ;;  %v6876_v0 = vadd.f32 %v6875_v59, %v6787_v23 }
 0xbaa   :  { %v7176_v11 = vmax.f32 %v7052_v52, 0.0  ;;  %v13767_v52 = vld [vmem:[#allocation117_spill] sm:$0xff] }
 0xbac   :  { %v6964_v12 = vpop.f32.mrf.mxu2 }
 0xbad   :  { %v6965_v13 = vadd.f32 %v6964_v12, %v6876_v0  ;;  %v6789_v29 = vpop.f32.mrf.mxu0  ;;  %v13768_v0 = vld [vmem:[#allocation75_spill] sm:$0xff] }
 0xbae   :  { %v6790_v20 = vadd.f32 %v6789_v29, %v12617_v25 }
 0xbaf   :  { %v7053_v55 = vpop.f32.mrf.mxu3  ;;  %v6878_v57 = vpop.f32.mrf.mxu1 }
 0xbb0   :  { %v7054_v26 = vadd.f32 %v7053_v55, %v6965_v13  ;;  %v6879_v40 = vadd.f32 %v6878_v57, %v6790_v20  ;;  %7556 = vmatmul.bf16.gmra.mxu0 %v13763_v39 }
 0xbb1   :  { %7734 = vmatmul.bf16.gmra.mxu2 %v12557_v31 }
 0xbb2   :  { %v7180_v7 = vmax.f32 %v7054_v26, 0.0  ;;  %7645 = vmatmul.bf16.gmra.mxu1 %v13764_v62 }
 0xbb4   :  { %7823 = vmatmul.bf16.gmra.mxu3 %v12688_v17  ;;  %v12744_v9 = vpack.c.bf16 %v7180_v7, %v7176_v11  ;;  %v6967_v24 = vpop.f32.mrf.mxu2 }
 0xbb5   :  { %v6968_v56 = vadd.f32 %v6967_v24, %v6879_v40  ;;  %v6791_v36 = vpop.f32.mrf.mxu0 }
 0xbb6   :  { %v6792_v6 = vadd.f32 %v6791_v36, %v12617_v25  ;;  %v13770_v36 = vld [vmem:[#allocation76_spill] sm:$0xff] }
 0xbb7   :  { %v7056_v54 = vpop.f32.mrf.mxu3  ;;  %v6880_v60 = vpop.f32.mrf.mxu1 }
 0xbb8   :  { %v7057_v10 = vadd.f32 %v7056_v54, %v6968_v56  ;;  %v6881_v1 = vadd.f32 %v6880_v60, %v6792_v6 }
 0xbba   :  { %v7184_v58 = vmax.f32 %v7057_v10, 0.0 }
 0xbbc   :  { %v6969_v34 = vpop.f32.mrf.mxu2 }
 0xbbd   :  { %v6970_v31 = vadd.f32 %v6969_v34, %v6881_v1  ;;  %v7522_v17 = vpop.f32.mrf.mxu0 }
 0xbbe   :  { %v7523_v45 = vadd.f32 %v12750_v5, %v7522_v17 }
 0xbbf   :  { %v7058_v37 = vpop.f32.mrf.mxu3  ;;  %v7611_v30 = vpop.f32.mrf.mxu1 }
 0xbc0   :  { %v7059_v8 = vadd.f32 %v7058_v37, %v6970_v31  ;;  %7561 = vmatmul.bf16.gmra.mxu0 %v13765_v41  ;;  %v7612_v14 = vadd.f32 %v7611_v30, %v7523_v45 }
 0xbc1   :  { %7739 = vmatmul.bf16.gmra.mxu2 %v12565_v35 }
 0xbc2   :  { %v7188_v25 = vmax.f32 %v7059_v8, 0.0  ;;  %7650 = vmatmul.bf16.gmra.mxu1 %v13766_v43 }
 0xbc4   :  { %7828 = vmatmul.bf16.gmra.mxu3 %v12696_v33  ;;  %v12757_v42 = vpack.c.bf16 %v7188_v25, %v7184_v58  ;;  %v7700_v19 = vpop.f32.mrf.mxu2 }
 0xbc5   :  { %v7701_v15 = vadd.f32 %v7700_v19, %v7612_v14  ;;  %v7524_v4 = vpop.f32.mrf.mxu0  ;;  %v13772_v14 = vld [vmem:[#allocation141_spill] sm:$0xff] }
 0xbc6   :  { %v7525_v3 = vadd.f32 %v12750_v5, %v7524_v4 }
 0xbc7   :  { %v7789_v48 = vpop.f32.mrf.mxu3  ;;  %v7613_v51 = vpop.f32.mrf.mxu1 }
 0xbc8   :  { %v7790_v18 = vadd.f32 %v7789_v48, %v7701_v15  ;;  %v7614_v38 = vadd.f32 %v7613_v51, %v7525_v3 }
 0xbca   :  { %7869 = vst [vmem:[#allocation13] sm:$0xff] %v7790_v18 }
 0xbcc   :  { %v7702_v27 = vpop.f32.mrf.mxu2 }
 0xbcd   :  { %v7703_v2 = vadd.f32 %v7702_v27, %v7614_v38  ;;  %v7527_v23 = vpop.f32.mrf.mxu0 }
 0xbce   :  { %v7528_v33 = vadd.f32 %v12750_v5, %v7527_v23 }
 0xbcf   :  { %v7791_v47 = vpop.f32.mrf.mxu3  ;;  %v7616_v35 = vpop.f32.mrf.mxu1 }
 0xbd0   :  { %v7792_v59 = vadd.f32 %v7791_v47, %v7703_v2  ;;  %7566 = vmatmul.bf16.gmra.mxu0 %v13767_v52  ;;  %v7617_v12 = vadd.f32 %v7616_v35, %v7528_v33  ;;  %v13774_v52 = vld [vmem:[#allocation79_spill] sm:$0xff] }
 0xbd1   :  { %7744 = vmatmul.bf16.gmra.mxu2 %v12573_v21 }
 0xbd2   :  { %7870 = vst [vmem:[#allocation13 + $0x8] sm:$0xff] %v7792_v59  ;;  %7655 = vmatmul.bf16.gmra.mxu1 %v13768_v0 }
 0xbd4   :  { %7833 = vmatmul.bf16.gmra.mxu3 %v12704_v50  ;;  %v7705_v13 = vpop.f32.mrf.mxu2  ;;  %v13769_v50 = vld [vmem:[#allocation55_spill] sm:$0xff] }
 0xbd5   :  { %v7706_v55 = vadd.f32 %v7705_v13, %v7617_v12  ;;  %v7529_v20 = vpop.f32.mrf.mxu0 }
 0xbd6   :  { %v7530_v40 = vadd.f32 %v12750_v5, %v7529_v20 }
 0xbd7   :  { %v7794_v29 = vpop.f32.mrf.mxu3  ;;  %v7618_v57 = vpop.f32.mrf.mxu1 }
 0xbd8   :  { %v7795_v26 = vadd.f32 %v7794_v29, %v7706_v55  ;;  %v7619_v39 = vadd.f32 %v7618_v57, %v7530_v40 }
 0xbda   :  { %7871 = vst [vmem:[#allocation13 + $0x10] sm:$0xff] %v7795_v26 }
 0xbdc   :  { %v7707_v11 = vpop.f32.mrf.mxu2 }
 0xbdd   :  { %v7708_v7 = vadd.f32 %v7707_v11, %v7619_v39  ;;  %v7532_v24 = vpop.f32.mrf.mxu0 }
 0xbde   :  { %v7533_v21 = vadd.f32 %v12750_v5, %v7532_v24 }
 0xbdf   :  { %v7796_v62 = vpop.f32.mrf.mxu3  ;;  %v7621_v56 = vpop.f32.mrf.mxu1 }
 0xbe0   :  { %v7797_v54 = vadd.f32 %v7796_v62, %v7708_v7  ;;  %7571 = vmatmul.bf16.gmra.mxu0 %v13769_v50  ;;  %v7622_v6 = vadd.f32 %v7621_v56, %v7533_v21 }
 0xbe1   :  { %7749 = vmatmul.bf16.gmra.mxu2 %v12581_v53 }
 0xbe2   :  { %7872 = vst [vmem:[#allocation13 + $0x18] sm:$0xff] %v7797_v54  ;;  %7660 = vmatmul.bf16.gmra.mxu1 %v13770_v36  ;;  %v13776_v54 = vld [vmem:[#allocation80_spill] sm:$0xff] }
 0xbe4   :  { %7838 = vmatmul.bf16.gmra.mxu3 %v12712_v22  ;;  %v7710_v60 = vpop.f32.mrf.mxu2  ;;  %v13771_v22 = vld [vmem:[#allocation56_spill] sm:$0xff] }
 0xbe5   :  { %v7711_v10 = vadd.f32 %v7710_v60, %v7622_v6  ;;  %v7534_v34 = vpop.f32.mrf.mxu0 }
 0xbe6   :  { %v7535_v17 = vadd.f32 %v12750_v5, %v7534_v34 }
 0xbe7   :  { %v7799_v1 = vpop.f32.mrf.mxu3  ;;  %v7623_v31 = vpop.f32.mrf.mxu1 }
 0xbe8   :  { %v7800_v37 = vadd.f32 %v7799_v1, %v7711_v10  ;;  %v7624_v30 = vadd.f32 %v7623_v31, %v7535_v17 }
 0xbea   :  { %7873 = vst [vmem:[#allocation13 + $0x20] sm:$0xff] %v7800_v37 }
 0xbec   :  { %v7712_v8 = vpop.f32.mrf.mxu2 }
 0xbed   :  { %v7713_v45 = vadd.f32 %v7712_v8, %v7624_v30  ;;  %v7537_v58 = vpop.f32.mrf.mxu0 }
 0xbee   :  { %v7538_v53 = vadd.f32 %v12750_v5, %v7537_v58  ;;  %v13778_v58 = vld [vmem:[#allocation22_spill] sm:$0xff] }
 0xbef   :  { %v7801_v41 = vpop.f32.mrf.mxu3  ;;  %v7626_v25 = vpop.f32.mrf.mxu1 }
 0xbf0   :  { %v7802_v43 = vadd.f32 %v7801_v41, %v7713_v45  ;;  %7576 = vmatmul.bf16.gmra.mxu0 %v13771_v22  ;;  %v7627_v19 = vadd.f32 %v7626_v25, %v7538_v53 }
 0xbf1   :  { %7754 = vmatmul.bf16.gmra.mxu2 %v12589_v49 }
 0xbf2   :  { %7874 = vst [vmem:[#allocation13 + $0x28] sm:$0xff] %v7802_v43  ;;  %7665 = vmatmul.bf16.gmra.mxu1 %v13772_v14 }
 0xbf4   :  { %7843 = vmatmul.bf16.gmra.mxu3 %v12720_v44  ;;  %v7715_v15 = vpop.f32.mrf.mxu2  ;;  %v13773_v44 = vld [vmem:[#allocation121_spill] sm:$0xff] }
 0xbf5   :  { %v7716_v48 = vadd.f32 %v7715_v15, %v7627_v19  ;;  %v7539_v51 = vpop.f32.mrf.mxu0 }
 0xbf6   :  { %v7540_v38 = vadd.f32 %v12750_v5, %v7539_v51 }
 0xbf7   :  { %v7804_v4 = vpop.f32.mrf.mxu3  ;;  %v7628_v18 = vpop.f32.mrf.mxu1 }
 0xbf8   :  { %v7805_v3 = vadd.f32 %v7804_v4, %v7716_v48  ;;  %v7629_v27 = vadd.f32 %v7628_v18, %v7540_v38 }
 0xbfa   :  { %7875 = vst [vmem:[#allocation13 + $0x30] sm:$0xff] %v7805_v3 }
 0xbfc   :  { %v7717_v2 = vpop.f32.mrf.mxu2 }
 0xbfd   :  { %v7718_v47 = vadd.f32 %v7717_v2, %v7629_v27  ;;  %v7542_v35 = vpop.f32.mrf.mxu0 }
 0xbfe   :  { %v7543_v49 = vadd.f32 %v12750_v5, %v7542_v35 }
 0xbff   :  { %v7806_v23 = vpop.f32.mrf.mxu3  ;;  %v7631_v59 = vpop.f32.mrf.mxu1 }
 0xc00   :  { %v7807_v33 = vadd.f32 %v7806_v23, %v7718_v47  ;;  %7581 = vmatmul.bf16.gmra.mxu0 %v13773_v44  ;;  %v7632_v0 = vadd.f32 %v7631_v59, %v7543_v49  ;;  %v13780_v47 = vld [vmem:[#allocation84_spill] sm:$0xff] }
 0xc01   :  { %7759 = vmatmul.bf16.gmra.mxu2 %v12597_v32 }
 0xc02   :  { %7876 = vst [vmem:[#allocation13 + $0x38] sm:$0xff] %v7807_v33  ;;  %7670 = vmatmul.bf16.gmra.mxu1 %v13774_v52 }
 0xc04   :  { %7848 = vmatmul.bf16.gmra.mxu3 %v12728_v46  ;;  %v7720_v12 = vpop.f32.mrf.mxu2  ;;  %v13775_v46 = vld [vmem:[#allocation59_spill] sm:$0xff] }
 0xc05   :  { %v7721_v13 = vadd.f32 %v7720_v12, %v7632_v0  ;;  %v7544_v29 = vpop.f32.mrf.mxu0 }
 0xc06   :  { %v7545_v26 = vadd.f32 %v12750_v5, %v7544_v29 }
 0xc07   :  { %v7809_v55 = vpop.f32.mrf.mxu3  ;;  %v7633_v20 = vpop.f32.mrf.mxu1 }
 0xc08   :  { %v7810_v57 = vadd.f32 %v7809_v55, %v7721_v13  ;;  %v7634_v40 = vadd.f32 %v7633_v20, %v7545_v26 }
 0xc0a   :  { %7877 = vst [vmem:[#allocation13 + $0x40] sm:$0xff] %v7810_v57 }
 0xc0c   :  { %v7722_v39 = vpop.f32.mrf.mxu2 }
 0xc0d   :  { %v7723_v11 = vadd.f32 %v7722_v39, %v7634_v40  ;;  %v7547_v62 = vpop.f32.mrf.mxu0 }
 0xc0e   :  { %v7548_v32 = vadd.f32 %v12750_v5, %v7547_v62 }
 0xc0f   :  { %v7811_v7 = vpop.f32.mrf.mxu3  ;;  %v7636_v24 = vpop.f32.mrf.mxu1 }
 0xc10   :  { %v7812_v56 = vadd.f32 %v7811_v7, %v7723_v11  ;;  %7586 = vmatmul.bf16.gmra.mxu0 %v13775_v46  ;;  %v7637_v21 = vadd.f32 %v7636_v24, %v7548_v32 }
 0xc11   :  { %7764 = vmatmul.bf16.gmra.mxu2 %v12605_v63 }
 0xc12   :  { %7878 = vst [vmem:[#allocation13 + $0x48] sm:$0xff] %v7812_v56  ;;  %7675 = vmatmul.bf16.gmra.mxu1 %v13776_v54 }
 0xc14   :  { %7853 = vmatmul.bf16.gmra.mxu3 %v12736_v61  ;;  %v7725_v50 = vpop.f32.mrf.mxu2  ;;  %v13777_v61 = vld [vmem:[#allocation60_spill] sm:$0xff] }
 0xc15   :  { %v7726_v36 = vadd.f32 %v7725_v50, %v7637_v21  ;;  %v7549_v60 = vpop.f32.mrf.mxu0 }
 0xc16   :  { %v7550_v34 = vadd.f32 %v12750_v5, %v7549_v60 }
 0xc17   :  { %v7814_v6 = vpop.f32.mrf.mxu3  ;;  %v7638_v10 = vpop.f32.mrf.mxu1 }
 0xc18   :  { %v7815_v1 = vadd.f32 %v7814_v6, %v7726_v36  ;;  %v7639_v31 = vadd.f32 %v7638_v10, %v7550_v34 }
 0xc1a   :  { %7879 = vst [vmem:[#allocation13 + $0x50] sm:$0xff] %v7815_v1 }
 0xc1c   :  { %v7727_v37 = vpop.f32.mrf.mxu2 }
 0xc1d   :  { %v7728_v17 = vadd.f32 %v7727_v37, %v7639_v31  ;;  %v7552_v8 = vpop.f32.mrf.mxu0 }
 0xc1e   :  { %v7553_v63 = vadd.f32 %v12750_v5, %v7552_v8 }
 0xc1f   :  { %v7816_v30 = vpop.f32.mrf.mxu3  ;;  %v7641_v45 = vpop.f32.mrf.mxu1 }
 0xc20   :  { %v7817_v41 = vadd.f32 %v7816_v30, %v7728_v17  ;;  %7591 = vmatmul.bf16.gmra.mxu0 %v13777_v61  ;;  %v7642_v25 = vadd.f32 %v7641_v45, %v7553_v63 }
 0xc21   :  { %7769 = vmatmul.bf16.gmra.mxu2 %v12613_v28 }
 0xc22   :  { %7880 = vst [vmem:[#allocation13 + $0x58] sm:$0xff] %v7817_v41  ;;  %7680 = vmatmul.bf16.gmra.mxu1 %v13778_v58 }
 0xc24   :  { %7858 = vmatmul.bf16.gmra.mxu3 %v12744_v9  ;;  %v7730_v43 = vpop.f32.mrf.mxu2  ;;  %v13779_v9 = vld [vmem:[#allocation125_spill] sm:$0xff] }
 0xc25   :  { %v7731_v53 = vadd.f32 %v7730_v43, %v7642_v25  ;;  %v7554_v14 = vpop.f32.mrf.mxu0 }
 0xc26   :  { %v7555_v48 = vadd.f32 %v12750_v5, %v7554_v14 }
 0xc27   :  { %v7819_v22 = vpop.f32.mrf.mxu3  ;;  %v7643_v19 = vpop.f32.mrf.mxu1 }
 0xc28   :  { %v7820_v15 = vadd.f32 %v7819_v22, %v7731_v53  ;;  %v7644_v4 = vadd.f32 %v7643_v19, %v7555_v48 }
 0xc2a   :  { %7881 = vst [vmem:[#allocation13 + $0x60] sm:$0xff] %v7820_v15 }
 0xc2c   :  { %v7732_v51 = vpop.f32.mrf.mxu2 }
 0xc2d   :  { %v7733_v18 = vadd.f32 %v7732_v51, %v7644_v4  ;;  %v7557_v38 = vpop.f32.mrf.mxu0 }
 0xc2e   :  { %v7558_v28 = vadd.f32 %v12750_v5, %v7557_v38 }
 0xc2f   :  { %v7821_v3 = vpop.f32.mrf.mxu3  ;;  %v7646_v27 = vpop.f32.mrf.mxu1 }
 0xc30   :  { %v7822_v2 = vadd.f32 %v7821_v3, %v7733_v18  ;;  %7596 = vmatmul.bf16.gmra.mxu0 %v13779_v9  ;;  %v7647_v23 = vadd.f32 %v7646_v27, %v7558_v28 }
 0xc31   :  { %7774 = vmatmul.bf16.gmra.mxu2 %v12624_v16 }
 0xc32   :  { %7882 = vst [vmem:[#allocation13 + $0x68] sm:$0xff] %v7822_v2  ;;  %7685 = vmatmul.bf16.gmra.mxu1 %v13780_v47 }
 0xc34   :  { %7863 = vmatmul.bf16.gmra.mxu3 %v12757_v42  ;;  %v7735_v35 = vpop.f32.mrf.mxu2 }
 0xc35   :  { %v7736_v59 = vadd.f32 %v7735_v35, %v7647_v23  ;;  %v7559_v49 = vpop.f32.mrf.mxu0 }
 0xc36   :  { %v7560_v0 = vadd.f32 %v12750_v5, %v7559_v49 }
 0xc37   :  { %v7824_v33 = vpop.f32.mrf.mxu3  ;;  %v7648_v44 = vpop.f32.mrf.mxu1 }
 0xc38   :  { %v7825_v52 = vadd.f32 %v7824_v33, %v7736_v59  ;;  %v7649_v12 = vadd.f32 %v7648_v44, %v7560_v0 }
 0xc3a   :  { %7883 = vst [vmem:[#allocation13 + $0x70] sm:$0xff] %v7825_v52 }
 0xc3c   :  { %v7737_v13 = vpop.f32.mrf.mxu2 }
 0xc3d   :  { %v7738_v55 = vadd.f32 %v7737_v13, %v7649_v12  ;;  %v7562_v20 = vpop.f32.mrf.mxu0 }
 0xc3e   :  { %v7563_v16 = vadd.f32 %v12750_v5, %v7562_v20 }
 0xc3f   :  { %v7826_v29 = vpop.f32.mrf.mxu3  ;;  %v7651_v57 = vpop.f32.mrf.mxu1 }
 0xc40   :  { %v7827_v26 = vadd.f32 %v7826_v29, %v7738_v55  ;;  %v7652_v42 = vadd.f32 %v7651_v57, %v7563_v16 }
 0xc42   :  { %7884 = vst [vmem:[#allocation13 + $0x78] sm:$0xff] %v7827_v26 }
 0xc44   :  { %v7740_v40 = vpop.f32.mrf.mxu2 }
 0xc45   :  { %v7741_v39 = vadd.f32 %v7740_v40, %v7652_v42  ;;  %v7564_v7 = vpop.f32.mrf.mxu0 }
 0xc46   :  { %v7565_v56 = vadd.f32 %v12750_v5, %v7564_v7 }
 0xc47   :  { %v7829_v11 = vpop.f32.mrf.mxu3  ;;  %v7653_v62 = vpop.f32.mrf.mxu1 }
 0xc48   :  { %v7830_v24 = vadd.f32 %v7829_v11, %v7741_v39  ;;  %v7654_v32 = vadd.f32 %v7653_v62, %v7565_v56 }
 0xc4a   :  { %7885 = vst [vmem:[#allocation13 + $0x80] sm:$0xff] %v7830_v24 }
 0xc4c   :  { %v7742_v46 = vpop.f32.mrf.mxu2 }
 0xc4d   :  { %v7743_v54 = vadd.f32 %v7742_v46, %v7654_v32  ;;  %v7567_v50 = vpop.f32.mrf.mxu0 }
 0xc4e   :  { %v7568_v60 = vadd.f32 %v12750_v5, %v7567_v50 }
 0xc4f   :  { %v7831_v21 = vpop.f32.mrf.mxu3  ;;  %v7656_v36 = vpop.f32.mrf.mxu1 }
 0xc50   :  { %v7832_v6 = vadd.f32 %v7831_v21, %v7743_v54  ;;  %v7657_v10 = vadd.f32 %v7656_v36, %v7568_v60 }
 0xc52   :  { %7886 = vst [vmem:[#allocation13 + $0x88] sm:$0xff] %v7832_v6 }
 0xc54   :  { %v7745_v1 = vpop.f32.mrf.mxu2 }
 0xc55   :  { %v7746_v34 = vadd.f32 %v7745_v1, %v7657_v10  ;;  %v7569_v37 = vpop.f32.mrf.mxu0 }
 0xc56   :  { %v7570_v8 = vadd.f32 %v12750_v5, %v7569_v37 }
 0xc57   :  { %v7834_v31 = vpop.f32.mrf.mxu3  ;;  %v7658_v17 = vpop.f32.mrf.mxu1 }
 0xc58   :  { %v7835_v30 = vadd.f32 %v7834_v31, %v7746_v34  ;;  %v7659_v45 = vadd.f32 %v7658_v17, %v7570_v8 }
 0xc5a   :  { %7887 = vst [vmem:[#allocation13 + $0x90] sm:$0xff] %v7835_v30 }
 0xc5c   :  { %v7747_v41 = vpop.f32.mrf.mxu2 }
 0xc5d   :  { %v7748_v63 = vadd.f32 %v7747_v41, %v7659_v45  ;;  %v7572_v58 = vpop.f32.mrf.mxu0 }
 0xc5e   :  { %v7573_v53 = vadd.f32 %v12750_v5, %v7572_v58 }
 0xc5f   :  { %v7836_v61 = vpop.f32.mrf.mxu3  ;;  %v7661_v25 = vpop.f32.mrf.mxu1 }
 0xc60   :  { %v7837_v43 = vadd.f32 %v7836_v61, %v7748_v63  ;;  %v7662_v22 = vadd.f32 %v7661_v25, %v7573_v53 }
 0xc62   :  { %7888 = vst [vmem:[#allocation13 + $0x98] sm:$0xff] %v7837_v43 }
 0xc64   :  { %v7750_v14 = vpop.f32.mrf.mxu2 }
 0xc65   :  { %v7751_v19 = vadd.f32 %v7750_v14, %v7662_v22  ;;  %v7574_v48 = vpop.f32.mrf.mxu0 }
 0xc66   :  { %v7575_v18 = vadd.f32 %v12750_v5, %v7574_v48 }
 0xc67   :  { %v7839_v15 = vpop.f32.mrf.mxu3  ;;  %v7663_v4 = vpop.f32.mrf.mxu1 }
 0xc68   :  { %v7840_v51 = vadd.f32 %v7839_v15, %v7751_v19  ;;  %v7664_v3 = vadd.f32 %v7663_v4, %v7575_v18 }
 0xc6a   :  { %7889 = vst [vmem:[#allocation13 + $0xa0] sm:$0xff] %v7840_v51 }
 0xc6c   :  { %v7752_v38 = vpop.f32.mrf.mxu2 }
 0xc6d   :  { %v7753_v27 = vadd.f32 %v7752_v38, %v7664_v3  ;;  %v7577_v28 = vpop.f32.mrf.mxu0 }
 0xc6e   :  { %v7578_v23 = vadd.f32 %v12750_v5, %v7577_v28 }
 0xc6f   :  { %v7841_v2 = vpop.f32.mrf.mxu3  ;;  %v7666_v9 = vpop.f32.mrf.mxu1 }
 0xc70   :  { %v7842_v47 = vadd.f32 %v7841_v2, %v7753_v27  ;;  %v7667_v35 = vadd.f32 %v7666_v9, %v7578_v23 }
 0xc72   :  { %7890 = vst [vmem:[#allocation13 + $0xa8] sm:$0xff] %v7842_v47 }
 0xc74   :  { %v7755_v59 = vpop.f32.mrf.mxu2 }
 0xc75   :  { %v7756_v33 = vadd.f32 %v7755_v59, %v7667_v35  ;;  %v7579_v44 = vpop.f32.mrf.mxu0 }
 0xc76   :  { %v7580_v12 = vadd.f32 %v12750_v5, %v7579_v44 }
 0xc77   :  { %v7844_v49 = vpop.f32.mrf.mxu3  ;;  %v7668_v52 = vpop.f32.mrf.mxu1 }
 0xc78   :  { %v7845_v0 = vadd.f32 %v7844_v49, %v7756_v33  ;;  %v7669_v13 = vadd.f32 %v7668_v52, %v7580_v12 }
 0xc7a   :  { %7891 = vst [vmem:[#allocation13 + $0xb0] sm:$0xff] %v7845_v0 }
 0xc7c   :  { %v7757_v55 = vpop.f32.mrf.mxu2 }
 0xc7d   :  { %v7758_v29 = vadd.f32 %v7757_v55, %v7669_v13  ;;  %v7582_v57 = vpop.f32.mrf.mxu0 }
 0xc7e   :  { %v7583_v42 = vadd.f32 %v12750_v5, %v7582_v57 }
 0xc7f   :  { %v7846_v20 = vpop.f32.mrf.mxu3  ;;  %v7671_v26 = vpop.f32.mrf.mxu1 }
 0xc80   :  { %v7847_v16 = vadd.f32 %v7846_v20, %v7758_v29  ;;  %v7672_v40 = vadd.f32 %v7671_v26, %v7583_v42 }
 0xc82   :  { %7892 = vst [vmem:[#allocation13 + $0xb8] sm:$0xff] %v7847_v16 }
 0xc84   :  { %v7760_v39 = vpop.f32.mrf.mxu2 }
 0xc85   :  { %v7761_v11 = vadd.f32 %v7760_v39, %v7672_v40  ;;  %v7584_v62 = vpop.f32.mrf.mxu0 }
 0xc86   :  { %v7585_v32 = vadd.f32 %v12750_v5, %v7584_v62 }
 0xc87   :  { %v7849_v7 = vpop.f32.mrf.mxu3  ;;  %v7673_v24 = vpop.f32.mrf.mxu1 }
 0xc88   :  { %v7850_v56 = vadd.f32 %v7849_v7, %v7761_v11  ;;  %v7674_v46 = vadd.f32 %v7673_v24, %v7585_v32 }
 0xc8a   :  { %7893 = vst [vmem:[#allocation13 + $0xc0] sm:$0xff] %v7850_v56 }
 0xc8c   :  { %v7762_v54 = vpop.f32.mrf.mxu2 }
 0xc8d   :  { %v7763_v21 = vadd.f32 %v7762_v54, %v7674_v46  ;;  %v7587_v36 = vpop.f32.mrf.mxu0 }
 0xc8e   :  { %v7588_v10 = vadd.f32 %v12750_v5, %v7587_v36 }
 0xc8f   :  { %v7851_v50 = vpop.f32.mrf.mxu3  ;;  %v7676_v6 = vpop.f32.mrf.mxu1 }
 0xc90   :  { %v7852_v60 = vadd.f32 %v7851_v50, %v7763_v21  ;;  %v7677_v1 = vadd.f32 %v7676_v6, %v7588_v10 }
 0xc92   :  { %7894 = vst [vmem:[#allocation13 + $0xc8] sm:$0xff] %v7852_v60 }
 0xc94   :  { %v7765_v34 = vpop.f32.mrf.mxu2 }
 0xc95   :  { %v7766_v31 = vadd.f32 %v7765_v34, %v7677_v1  ;;  %v7589_v17 = vpop.f32.mrf.mxu0 }
 0xc96   :  { %v7590_v45 = vadd.f32 %v12750_v5, %v7589_v17 }
 0xc97   :  { %v7854_v37 = vpop.f32.mrf.mxu3  ;;  %v7678_v30 = vpop.f32.mrf.mxu1 }
 0xc98   :  { %v7855_v8 = vadd.f32 %v7854_v37, %v7766_v31  ;;  %v7679_v41 = vadd.f32 %v7678_v30, %v7590_v45 }
 0xc9a   :  { %7895 = vst [vmem:[#allocation13 + $0xd0] sm:$0xff] %v7855_v8 }
 0xc9c   :  { %v7767_v63 = vpop.f32.mrf.mxu2 }
 0xc9d   :  { %v7768_v61 = vadd.f32 %v7767_v63, %v7679_v41  ;;  %v7592_v25 = vpop.f32.mrf.mxu0 }
 0xc9e   :  { %v7593_v22 = vadd.f32 %v12750_v5, %v7592_v25 }
 0xc9f   :  { %v7856_v58 = vpop.f32.mrf.mxu3  ;;  %v7681_v43 = vpop.f32.mrf.mxu1 }
 0xca0   :  { %v7857_v53 = vadd.f32 %v7856_v58, %v7768_v61  ;;  %v7682_v14 = vadd.f32 %v7681_v43, %v7593_v22 }
 0xca2   :  { %7896 = vst [vmem:[#allocation13 + $0xd8] sm:$0xff] %v7857_v53 }
 0xca4   :  { %v7770_v19 = vpop.f32.mrf.mxu2 }
 0xca5   :  { %v7771_v15 = vadd.f32 %v7770_v19, %v7682_v14  ;;  %v7594_v4 = vpop.f32.mrf.mxu0 }
 0xca6   :  { %v7595_v3 = vadd.f32 %v12750_v5, %v7594_v4 }
 0xca7   :  { %v7859_v48 = vpop.f32.mrf.mxu3  ;;  %v7683_v51 = vpop.f32.mrf.mxu1 }
 0xca8   :  { %v7860_v18 = vadd.f32 %v7859_v48, %v7771_v15  ;;  %v7684_v38 = vadd.f32 %v7683_v51, %v7595_v3 }
 0xcaa   :  { %7897 = vst [vmem:[#allocation13 + $0xe0] sm:$0xff] %v7860_v18 }
 0xcac   :  { %v7772_v27 = vpop.f32.mrf.mxu2 }
 0xcad   :  { %v7773_v2 = vadd.f32 %v7772_v27, %v7684_v38  ;;  %v7597_v9 = vpop.f32.mrf.mxu0 }
 0xcae   :  { %v7598_v23 = vadd.f32 %v12750_v5, %v7597_v9 }
 0xcaf   :  { %v7861_v28 = vpop.f32.mrf.mxu3  ;;  %v7686_v35 = vpop.f32.mrf.mxu1 }
 0xcb0   :  { %v7862_v47 = vadd.f32 %v7861_v28, %v7773_v2  ;;  %v7687_v59 = vadd.f32 %v7686_v35, %v7598_v23 }
 0xcb2   :  { %7898 = vst [vmem:[#allocation13 + $0xe8] sm:$0xff] %v7862_v47 }
 0xcb4   :  { %v7775_v33 = vpop.f32.mrf.mxu2 }
 0xcb5   :  { %v7776_v49 = vadd.f32 %v7775_v33, %v7687_v59  ;;  %v7599_v52 = vpop.f32.mrf.mxu0 }
 0xcb6   :  { %v7600_v12 = vadd.f32 %v12750_v5, %v7599_v52 }
 0xcb7   :  { %v7864_v44 = vpop.f32.mrf.mxu3  ;;  %v7688_v13 = vpop.f32.mrf.mxu1 }
 0xcb8   :  { %v7865_v0 = vadd.f32 %v7864_v44, %v7776_v49  ;;  %v7689_v55 = vadd.f32 %v7688_v13, %v7600_v12 }
 0xcba   :  { %7899 = vst [vmem:[#allocation13 + $0xf0] sm:$0xff] %v7865_v0 }
 0xcbc   :  { %v7777_v29 = vpop.f32.mrf.mxu2 }
 0xcbd   :  { %v7778_v20 = vadd.f32 %v7777_v29, %v7689_v55 }
 0xcbf   :  { %v7866_v57 = vpop.f32.mrf.mxu3 }
 0xcc0   :  { %v7867_v26 = vadd.f32 %v7866_v57, %v7778_v20 }
 0xcc2   :  { %7900 = vst [vmem:[#allocation13 + $0xf8] sm:$0xff] %v7867_v26 }
 0xcc3   :  { %7913 = dma.vmem_to_hbm [thread:$0]  %s7906_s10, 4096, %s7908_s13, [#allocation4], %s10613_s14, %s10613_s14, %s10614_s15  }
 0xcc4   :  { %10598 = dma.done.wait [#allocation4], 4096  }
 0xcc5   :  { %10599 = vsyncadd [#allocation4], 4294963200 }
 0xcc6   :  { %7918 = vsyncpa [#allocation3], 1 }
 0xcc7   :  { %7919 = vsyncpa [#allocation6], 1 }
 0xcc8   :  { %7920 = vsyncpa [#allocation9], 1 }
 0xcc9   :  { %7921 = vsyncpa [#allocation12], 1 }
 0xcca   :  { %7922 = vsyncpa [#allocation4], 1 }

</bundles_post_ra>
